<compile_context>
chip_gen: v7x
topology: tpu7x:2x2x1
jax: 0.10.0
libtpu: 0.0.40
codegen_flags: <defaults>
</compile_context>

<pallas_src>
import jax
import jax.numpy as jnp
from jax import lax
from jax.experimental import pallas as pl
from jax.experimental.pallas import tpu as pltpu

EPS = 1e-5     # PyTorch nn.LayerNorm default
P = 4          # P1 = P2 = 4
P16 = P * P    # 16


def _expand_norm_shuffle_kernel(x_ref, w_ref, gdiv_ref, emean_ref, egamma_ref,
                                beta_ref, o_ref):
    # x_ref:      (m, W, C)       bf16 input pixels (m image rows of W pixels)
    # w_ref:      (C, 16C)        bf16 expansion weight, columns ordered (p1, p2, c)
    # gdiv_ref:   (16C, 16)       f32, 1/C on the group block-diagonal (group sums)
    # emean_ref:  (16, 16C)       f32 one-hot group -> full-width expansion
    # egamma_ref: (16, 16C)       f32 one-hot expansion pre-scaled by gamma[c]
    # beta_ref:   (1, 16C)        f32 beta tiled over the 16 groups
    # o_ref:      (m, 4, W, 4C)   output slab: [r, p1, w, p2*C + c]
    m, W, C = x_ref.shape
    rows = m * W
    C16 = w_ref.shape[1]
    C4 = C16 // P

    x2 = x_ref[...].reshape(rows, C)                              # bf16
    # MXU: channel expansion (bf16 x bf16 -> f32 accumulate).
    y = jnp.dot(x2, w_ref[...], preferred_element_type=jnp.float32)   # (rows, 16C)

    # LayerNorm over each C-sized group of the 16C vector (== per output pixel).
    # Group stats are computed on the MXU (block-diagonal / one-hot matrices)
    # instead of 16 masked sub-lane XLU reductions; variance stays centered.
    mean_g = jnp.dot(y, gdiv_ref[...], preferred_element_type=jnp.float32)        # (rows, 16)
    mean_f = jnp.dot(mean_g, emean_ref[...], preferred_element_type=jnp.float32)  # (rows, 16C)
    cen = y - mean_f
    var_g = jnp.dot(cen * cen, gdiv_ref[...], preferred_element_type=jnp.float32) # (rows, 16)
    inv_std_g = lax.rsqrt(var_g + EPS)                                            # (rows, 16)
    scale_f = jnp.dot(inv_std_g, egamma_ref[...],
                      preferred_element_type=jnp.float32)                         # (rows, 16C)
    out = cen * scale_f + beta_ref[...]                                           # (rows, 16C)

    # Pixel shuffle: column p1*4C + p2*C + c  ->  o[r, p1, w, p2*C + c].
    # Each p1 slab is a lane-contiguous 4C-wide slice, stored straight into o_ref.
    out3 = out.reshape(m, W, C16).astype(o_ref.dtype)
    for p1 in range(P):
        o_ref[:, p1, :, :] = out3[:, :, p1 * C4:(p1 + 1) * C4]


def final_patch_expanding(x, weight, gamma, beta, *, max_tile_pixels=4096):
    """
    x:      [B, H, W, C]   channels-last
    weight: [C, 16*C]      y = x @ weight (== torch weight.T), columns ordered (P1, P2, C)
    gamma:  [C]            LayerNorm scale
    beta:   [C]            LayerNorm shift
    returns [B, 4H, 4W, C]
    """
    B, H, W, C = x.shape
    C16 = P16 * C
    assert weight.shape == (C, C16), weight.shape
    BH = B * H

    # --- operands -----------------------------------------------------------
    x3 = x.reshape(BH, W, C).astype(jnp.bfloat16)        # bf16 input (halves DMA)
    wb = weight.astype(jnp.bfloat16)                     # MXU-native weight

    groups = jnp.arange(C16, dtype=jnp.int32) // C                          # (16C,)
    e_mean = (jnp.arange(P16, dtype=jnp.int32)[:, None]
              == groups[None, :]).astype(jnp.float32)                       # (16, 16C)
    gdiv = e_mean.T * jnp.float32(1.0 / C)                                  # (16C, 16)
    gamma_full = jnp.tile(gamma.astype(jnp.float32), P16)                   # (16C,)
    e_gamma = e_mean * gamma_full[None, :]                                  # (16, 16C)
    beta_full = jnp.tile(beta.astype(jnp.float32), P16).reshape(1, C16)     # (1, 16C)

    out_dtype = x.dtype
    out_isz = jnp.dtype(out_dtype).itemsize

    # --- VMEM budget & tile choice -----------------------------------------
    try:
        vmem_cap = int(pltpu.get_tpu_info().vmem_capacity_bytes)
    except Exception:
        vmem_cap = 128 * 1024 * 1024
    budget = int(vmem_cap * 0.75)            # headroom (v7x: ~48 MiB of 64 MiB)

    def vmem_estimate(m):
        px = m * W
        in_b = 2 * px * C * 2                               # bf16 input, 2 buffers
        out_b = 2 * px * C16 * out_isz                      # output block, 2 buffers
        w_b = 2 * (C * C16 * 2)                             # weight (assume 2 buffers)
        small = 2 * (C16 * 16 * 4 + 2 * 16 * C16 * 4 + C16 * 4)
        mid = 4 * px * C16 * 4                              # f32 intermediates (y/cen/..)
        return int(1.25 * (in_b + out_b + w_b + small + mid)) + (2 << 20)

    m = 1
    pixel_cap = max(max_tile_pixels, W)
    for cand in range(1, BH + 1):
        if BH % cand:
            continue
        if cand * W > pixel_cap:
            continue
        if vmem_estimate(cand) <= budget:
            m = max(m, cand)
    n_steps = BH // m
    vmem_limit = int(min(budget, max(32 * 1024 * 1024, vmem_estimate(m) + (8 << 20))))

    const_in = [wb, gdiv, e_mean, e_gamma, beta_full]

    def build(single_buffer_consts):
        def cspec(arr):
            shape = arr.shape
            imap = lambda i: (0,) * len(shape)
            if single_buffer_consts:
                # Constant-index operands only need one VMEM buffer.
                return pl.BlockSpec(shape, imap, pipeline_mode=pl.Buffered(1))
            return pl.BlockSpec(shape, imap)

        return pl.pallas_call(
            _expand_norm_shuffle_kernel,
            out_shape=jax.ShapeDtypeStruct((BH, P, W, P * C), out_dtype),
            grid=(n_steps,),
            in_specs=[pl.BlockSpec((m, W, C), lambda i: (i, 0, 0))]
                     + [cspec(a) for a in const_in],
            out_specs=pl.BlockSpec((m, P, W, P * C), lambda i: (i, 0, 0, 0)),
            compiler_params=pltpu.CompilerParams(
                dimension_semantics=("parallel",),
                vmem_limit_bytes=vmem_limit,
            ),
        )

    try:
        out4 = build(True)(x3, *const_in)
    except Exception:
        # Fallback: plain double-buffered specs (older Pallas / unsupported Buffered(1)).
        out4 = build(False)(x3, *const_in)

    # Free row-major view: (B*H, 4, W, 4C) -> (B, 4H, 4W, C).  No transpose pass.
    return out4.reshape(B, P * H, P * W, C)


def _reference(x, weight, gamma, beta):
    """Pure-JAX reference (matmul done on the same bf16-rounded operands)."""
    B, H, W, C = x.shape
    xb = x.astype(jnp.bfloat16).astype(jnp.float32)
    wb = weight.astype(jnp.bfloat16).astype(jnp.float32)
    y = jnp.einsum("nc,cd->nd", xb.reshape(-1, C), wb,
                   precision=lax.Precision.HIGHEST).reshape(B, H, W, P16 * C)
    y = y.reshape(B, H, W, P, P, C).transpose(0, 1, 3, 2, 4, 5).reshape(B, P * H, P * W, C)
    mean = jnp.mean(y, axis=-1, keepdims=True)
    var = jnp.mean((y - mean) ** 2, axis=-1, keepdims=True)
    out = (y - mean) * lax.rsqrt(var + EPS) * gamma + beta
    return out.astype(x.dtype)


if __name__ == "__main__":
    key = jax.random.PRNGKey(0)
    k_x, k_w, k_g, k_b = jax.random.split(key, 4)

    B, H, W, C = 2, 16, 16, 32   # small but representative; dim = 32

    x = jax.random.normal(k_x, (B, H, W, C), dtype=jnp.float32)
    # nn.Linear(dim, 16*dim, bias=False): torch weight is [16C, C]; we keep W^T.
    weight = (jax.random.normal(k_w, (C, P16 * C), dtype=jnp.float32)
              * (1.0 / jnp.sqrt(jnp.float32(C))))
    # nn.LayerNorm(dim) default init (gamma=1, beta=0), perturbed so the affine
    # path is exercised.
    gamma = jnp.ones((C,), jnp.float32) + 0.01 * jax.random.normal(k_g, (C,), jnp.float32)
    beta = 0.01 * jax.random.normal(k_b, (C,), jnp.float32)

    # max_tile_pixels=256 forces a 2-step grid so the pipelined path is exercised.
    out = final_patch_expanding(x, weight, gamma, beta, max_tile_pixels=256)
    out = jax.block_until_ready(out)

    ref = _reference(x, weight, gamma, beta)
    assert out.shape == (B, 4 * H, 4 * W, C), out.shape
    # Tolerance covers the MXU-computed group statistics (worst case ~bf16-level
    # rounding of the stats); with faithful f32 stats matmuls the error is ~1e-6.
    assert jnp.allclose(out, ref, atol=5e-3, rtol=5e-3), float(
        jnp.max(jnp.abs(out.astype(jnp.float32) - ref.astype(jnp.float32))))

    print("KERNEL_OK")
</pallas_src>

<mosaic_0001>
module attributes {stable_mosaic.version = 11 : i64} {
  func.func @_expand_norm_shuffle_kernel(%arg0: i32, %arg1: memref<16x16x32xbf16, #tpu.memory_space<vmem>>, %arg2: memref<32x512xbf16, #tpu.memory_space<vmem>>, %arg3: memref<512x16xf32, #tpu.memory_space<vmem>>, %arg4: memref<16x512xf32, #tpu.memory_space<vmem>>, %arg5: memref<16x512xf32, #tpu.memory_space<vmem>>, %arg6: memref<1x512xf32, #tpu.memory_space<vmem>>, %arg7: memref<16x4x16x128xf32, #tpu.memory_space<vmem>>) attributes {dimension_semantics = [#tpu.dimension_semantics<parallel>], iteration_bounds = array<i64: 2>, scalar_prefetch = 0 : i64, scratch_operands = 0 : i64, tpu.core_type = #tpu.core_type<tc>, window_params = [{transform_indices = @transform_0, window_bounds = array<i64: 16, 16, 32>}, {pipeline_mode = #tpu.pipeline_mode<synchronous>, transform_indices = @transform_1, window_bounds = array<i64: 32, 512>}, {pipeline_mode = #tpu.pipeline_mode<synchronous>, transform_indices = @transform_2, window_bounds = array<i64: 512, 16>}, {pipeline_mode = #tpu.pipeline_mode<synchronous>, transform_indices = @transform_3, window_bounds = array<i64: 16, 512>}, {pipeline_mode = #tpu.pipeline_mode<synchronous>, transform_indices = @transform_4, window_bounds = array<i64: 16, 512>}, {pipeline_mode = #tpu.pipeline_mode<synchronous>, transform_indices = @transform_5, window_bounds = array<i64: 1, 512>}, {transform_indices = @transform_6, window_bounds = array<i64: 16, 4, 16, 128>}]} {
    %c0 = arith.constant 0 : index
    %c0_0 = arith.constant 0 : index
    %c0_1 = arith.constant 0 : index
    %0 = vector.load %arg1[%c0, %c0_0, %c0_1] : memref<16x16x32xbf16, #tpu.memory_space<vmem>>, vector<16x16x32xbf16>
    %1 = vector.shape_cast %0 : vector<16x16x32xbf16> to vector<256x32xbf16>
    %c0_2 = arith.constant 0 : index
    %c0_3 = arith.constant 0 : index
    %2 = vector.load %arg2[%c0_2, %c0_3] : memref<32x512xbf16, #tpu.memory_space<vmem>>, vector<32x512xbf16>
    %cst = arith.constant dense<0.000000e+00> : vector<256x512xf32>
    %3 = tpu.matmul %1, %2, %cst {dimension_numbers = #tpu.dot_dimension_numbers<[1], [0], [0], [1], [0, 0, 1, 1], [], []>} : vector<256x32xbf16>, vector<32x512xbf16>, vector<256x512xf32> -> vector<256x512xf32>
    %c0_4 = arith.constant 0 : index
    %c0_5 = arith.constant 0 : index
    %4 = vector.load %arg3[%c0_4, %c0_5] : memref<512x16xf32, #tpu.memory_space<vmem>>, vector<512x16xf32>
    %cst_6 = arith.constant dense<0.000000e+00> : vector<256x16xf32>
    %5 = tpu.matmul %3, %4, %cst_6 {dimension_numbers = #tpu.dot_dimension_numbers<[1], [0], [0], [1], [0, 0, 1, 1], [], []>} : vector<256x512xf32>, vector<512x16xf32>, vector<256x16xf32> -> vector<256x16xf32>
    %c0_7 = arith.constant 0 : index
    %c0_8 = arith.constant 0 : index
    %6 = vector.load %arg4[%c0_7, %c0_8] : memref<16x512xf32, #tpu.memory_space<vmem>>, vector<16x512xf32>
    %cst_9 = arith.constant dense<0.000000e+00> : vector<256x512xf32>
    %7 = tpu.matmul %5, %6, %cst_9 {dimension_numbers = #tpu.dot_dimension_numbers<[1], [0], [0], [1], [0, 0, 1, 1], [], []>} : vector<256x16xf32>, vector<16x512xf32>, vector<256x512xf32> -> vector<256x512xf32>
    %8 = arith.subf %3, %7 : vector<256x512xf32>
    %9 = arith.mulf %8, %8 : vector<256x512xf32>
    %c0_10 = arith.constant 0 : index
    %c0_11 = arith.constant 0 : index
    %10 = vector.load %arg3[%c0_10, %c0_11] : memref<512x16xf32, #tpu.memory_space<vmem>>, vector<512x16xf32>
    %cst_12 = arith.constant dense<0.000000e+00> : vector<256x16xf32>
    %11 = tpu.matmul %9, %10, %cst_12 {dimension_numbers = #tpu.dot_dimension_numbers<[1], [0], [0], [1], [0, 0, 1, 1], [], []>} : vector<256x512xf32>, vector<512x16xf32>, vector<256x16xf32> -> vector<256x16xf32>
    %cst_13 = arith.constant 9.99999974E-6 : f32
    %12 = vector.broadcast %cst_13 : f32 to vector<256x16xf32>
    %13 = arith.addf %11, %12 : vector<256x16xf32>
    %14 = math.rsqrt %13 : vector<256x16xf32>
    %c0_14 = arith.constant 0 : index
    %c0_15 = arith.constant 0 : index
    %15 = vector.load %arg5[%c0_14, %c0_15] : memref<16x512xf32, #tpu.memory_space<vmem>>, vector<16x512xf32>
    %cst_16 = arith.constant dense<0.000000e+00> : vector<256x512xf32>
    %16 = tpu.matmul %14, %15, %cst_16 {dimension_numbers = #tpu.dot_dimension_numbers<[1], [0], [0], [1], [0, 0, 1, 1], [], []>} : vector<256x16xf32>, vector<16x512xf32>, vector<256x512xf32> -> vector<256x512xf32>
    %17 = arith.mulf %8, %16 : vector<256x512xf32>
    %c0_17 = arith.constant 0 : index
    %c0_18 = arith.constant 0 : index
    %18 = vector.load %arg6[%c0_17, %c0_18] : memref<1x512xf32, #tpu.memory_space<vmem>>, vector<1x512xf32>
    %19 = vector.broadcast %18 : vector<1x512xf32> to vector<256x512xf32>
    %20 = arith.addf %17, %19 : vector<256x512xf32>
    %21 = vector.shape_cast %20 : vector<256x512xf32> to vector<16x16x512xf32>
    %22 = vector.extract_strided_slice %21 {offsets = [0, 0, 0], sizes = [16, 16, 128], strides = [1, 1, 1]} : vector<16x16x512xf32> to vector<16x16x128xf32>
    %c0_19 = arith.constant 0 : index
    %c0_20 = arith.constant 0 : index
    %c0_21 = arith.constant 0 : index
    %c0_22 = arith.constant 0 : index
    %23 = vector.load %arg7[%c0_19, %c0_20, %c0_21, %c0_22] : memref<16x4x16x128xf32, #tpu.memory_space<vmem>>, vector<16x1x16x128xf32>
    %24 = vector.shape_cast %23 : vector<16x1x16x128xf32> to vector<16x16x128xf32>
    %25 = vector.shape_cast %22 : vector<16x16x128xf32> to vector<16x1x16x128xf32>
    tpu.vector_store %arg7[%c0_19, %c0_20, %c0_21, %c0_22], %25 {strides = array<i32>} : memref<16x4x16x128xf32, #tpu.memory_space<vmem>>, vector<16x1x16x128xf32>,
    %26 = vector.extract_strided_slice %21 {offsets = [0, 0, 128], sizes = [16, 16, 128], strides = [1, 1, 1]} : vector<16x16x512xf32> to vector<16x16x128xf32>
    %c0_23 = arith.constant 0 : index
    %c1 = arith.constant 1 : index
    %c0_24 = arith.constant 0 : index
    %c0_25 = arith.constant 0 : index
    %27 = vector.load %arg7[%c0_23, %c1, %c0_24, %c0_25] : memref<16x4x16x128xf32, #tpu.memory_space<vmem>>, vector<16x1x16x128xf32>
    %28 = vector.shape_cast %27 : vector<16x1x16x128xf32> to vector<16x16x128xf32>
    %29 = vector.shape_cast %26 : vector<16x16x128xf32> to vector<16x1x16x128xf32>
    tpu.vector_store %arg7[%c0_23, %c1, %c0_24, %c0_25], %29 {strides = array<i32>} : memref<16x4x16x128xf32, #tpu.memory_space<vmem>>, vector<16x1x16x128xf32>,
    %30 = vector.extract_strided_slice %21 {offsets = [0, 0, 256], sizes = [16, 16, 128], strides = [1, 1, 1]} : vector<16x16x512xf32> to vector<16x16x128xf32>
    %c0_26 = arith.constant 0 : index
    %c2 = arith.constant 2 : index
    %c0_27 = arith.constant 0 : index
    %c0_28 = arith.constant 0 : index
    %31 = vector.load %arg7[%c0_26, %c2, %c0_27, %c0_28] : memref<16x4x16x128xf32, #tpu.memory_space<vmem>>, vector<16x1x16x128xf32>
    %32 = vector.shape_cast %31 : vector<16x1x16x128xf32> to vector<16x16x128xf32>
    %33 = vector.shape_cast %30 : vector<16x16x128xf32> to vector<16x1x16x128xf32>
    tpu.vector_store %arg7[%c0_26, %c2, %c0_27, %c0_28], %33 {strides = array<i32>} : memref<16x4x16x128xf32, #tpu.memory_space<vmem>>, vector<16x1x16x128xf32>,
    %34 = vector.extract_strided_slice %21 {offsets = [0, 0, 384], sizes = [16, 16, 128], strides = [1, 1, 1]} : vector<16x16x512xf32> to vector<16x16x128xf32>
    %c0_29 = arith.constant 0 : index
    %c3 = arith.constant 3 : index
    %c0_30 = arith.constant 0 : index
    %c0_31 = arith.constant 0 : index
    %35 = vector.load %arg7[%c0_29, %c3, %c0_30, %c0_31] : memref<16x4x16x128xf32, #tpu.memory_space<vmem>>, vector<16x1x16x128xf32>
    %36 = vector.shape_cast %35 : vector<16x1x16x128xf32> to vector<16x16x128xf32>
    %37 = vector.shape_cast %34 : vector<16x16x128xf32> to vector<16x1x16x128xf32>
    tpu.vector_store %arg7[%c0_29, %c3, %c0_30, %c0_31], %37 {strides = array<i32>} : memref<16x4x16x128xf32, #tpu.memory_space<vmem>>, vector<16x1x16x128xf32>,
    return
  }
  func.func @transform_0(%arg0: i32) -> (i32, i32, i32) {
    %c0_i32 = arith.constant 0 : i32
    %c0_i32_0 = arith.constant 0 : i32
    %c0_i32_1 = arith.constant 0 : i32
    return %arg0, %c0_i32, %c0_i32_0 : i32, i32, i32
  }
  func.func @transform_1(%arg0: i32) -> (i32, i32) {
    %c0_i32 = arith.constant 0 : i32
    %c0_i32_0 = arith.constant 0 : i32
    %c0_i32_1 = arith.constant 0 : i32
    return %c0_i32, %c0_i32_0 : i32, i32
  }
  func.func @transform_2(%arg0: i32) -> (i32, i32) {
    %c0_i32 = arith.constant 0 : i32
    %c0_i32_0 = arith.constant 0 : i32
    %c0_i32_1 = arith.constant 0 : i32
    return %c0_i32, %c0_i32_0 : i32, i32
  }
  func.func @transform_3(%arg0: i32) -> (i32, i32) {
    %c0_i32 = arith.constant 0 : i32
    %c0_i32_0 = arith.constant 0 : i32
    %c0_i32_1 = arith.constant 0 : i32
    return %c0_i32, %c0_i32_0 : i32, i32
  }
  func.func @transform_4(%arg0: i32) -> (i32, i32) {
    %c0_i32 = arith.constant 0 : i32
    %c0_i32_0 = arith.constant 0 : i32
    %c0_i32_1 = arith.constant 0 : i32
    return %c0_i32, %c0_i32_0 : i32, i32
  }
  func.func @transform_5(%arg0: i32) -> (i32, i32) {
    %c0_i32 = arith.constant 0 : i32
    %c0_i32_0 = arith.constant 0 : i32
    %c0_i32_1 = arith.constant 0 : i32
    return %c0_i32, %c0_i32_0 : i32, i32
  }
  func.func @transform_6(%arg0: i32) -> (i32, i32, i32, i32) {
    %c0_i32 = arith.constant 0 : i32
    %c0_i32_0 = arith.constant 0 : i32
    %c0_i32_1 = arith.constant 0 : i32
    %c0_i32_2 = arith.constant 0 : i32
    return %arg0, %c0_i32, %c0_i32_0, %c0_i32_1 : i32, i32, i32, i32
  }
}

module attributes {stable_mosaic.version = 11 : i64} {
  func.func @_expand_norm_shuffle_kernel(%arg0: i32, %arg1: memref<16x16x32xbf16, #tpu.memory_space<vmem>>, %arg2: memref<32x512xbf16, #tpu.memory_space<vmem>>, %arg3: memref<512x16xf32, #tpu.memory_space<vmem>>, %arg4: memref<16x512xf32, #tpu.memory_space<vmem>>, %arg5: memref<16x512xf32, #tpu.memory_space<vmem>>, %arg6: memref<1x512xf32, #tpu.memory_space<vmem>>, %arg7: memref<16x4x16x128xf32, #tpu.memory_space<vmem>>) attributes {dimension_semantics = [#tpu.dimension_semantics<parallel>], iteration_bounds = array<i64: 2>, scalar_prefetch = 0 : i64, scratch_operands = 0 : i64, tpu.core_type = #tpu.core_type<tc>, window_params = [{transform_indices = @transform_0, window_bounds = array<i64: 16, 16, 32>}, {pipeline_mode = #tpu.pipeline_mode<synchronous>, transform_indices = @transform_1, window_bounds = array<i64: 32, 512>}, {pipeline_mode = #tpu.pipeline_mode<synchronous>, transform_indices = @transform_2, window_bounds = array<i64: 512, 16>}, {pipeline_mode = #tpu.pipeline_mode<synchronous>, transform_indices = @transform_3, window_bounds = array<i64: 16, 512>}, {pipeline_mode = #tpu.pipeline_mode<synchronous>, transform_indices = @transform_4, window_bounds = array<i64: 16, 512>}, {pipeline_mode = #tpu.pipeline_mode<synchronous>, transform_indices = @transform_5, window_bounds = array<i64: 1, 512>}, {transform_indices = @transform_6, window_bounds = array<i64: 16, 4, 16, 128>}]} {
    %c0 = arith.constant 0 : index
    %c0_0 = arith.constant 0 : index
    %c0_1 = arith.constant 0 : index
    %0 = vector.load %arg1[%c0, %c0_0, %c0_1] : memref<16x16x32xbf16, #tpu.memory_space<vmem>>, vector<16x16x32xbf16>
    %1 = vector.shape_cast %0 : vector<16x16x32xbf16> to vector<256x32xbf16>
    %c0_2 = arith.constant 0 : index
    %c0_3 = arith.constant 0 : index
    %2 = vector.load %arg2[%c0_2, %c0_3] : memref<32x512xbf16, #tpu.memory_space<vmem>>, vector<32x512xbf16>
    %cst = arith.constant dense<0.000000e+00> : vector<256x512xf32>
    %3 = tpu.matmul %1, %2, %cst {dimension_numbers = #tpu.dot_dimension_numbers<[1], [0], [0], [1], [0, 0, 1, 1], [], []>} : vector<256x32xbf16>, vector<32x512xbf16>, vector<256x512xf32> -> vector<256x512xf32>
    %c0_4 = arith.constant 0 : index
    %c0_5 = arith.constant 0 : index
    %4 = vector.load %arg3[%c0_4, %c0_5] : memref<512x16xf32, #tpu.memory_space<vmem>>, vector<512x16xf32>
    %cst_6 = arith.constant dense<0.000000e+00> : vector<256x16xf32>
    %5 = tpu.matmul %3, %4, %cst_6 {dimension_numbers = #tpu.dot_dimension_numbers<[1], [0], [0], [1], [0, 0, 1, 1], [], []>} : vector<256x512xf32>, vector<512x16xf32>, vector<256x16xf32> -> vector<256x16xf32>
    %c0_7 = arith.constant 0 : index
    %c0_8 = arith.constant 0 : index
    %6 = vector.load %arg4[%c0_7, %c0_8] : memref<16x512xf32, #tpu.memory_space<vmem>>, vector<16x512xf32>
    %cst_9 = arith.constant dense<0.000000e+00> : vector<256x512xf32>
    %7 = tpu.matmul %5, %6, %cst_9 {dimension_numbers = #tpu.dot_dimension_numbers<[1], [0], [0], [1], [0, 0, 1, 1], [], []>} : vector<256x16xf32>, vector<16x512xf32>, vector<256x512xf32> -> vector<256x512xf32>
    %8 = arith.subf %3, %7 : vector<256x512xf32>
    %9 = arith.mulf %8, %8 : vector<256x512xf32>
    %c0_10 = arith.constant 0 : index
    %c0_11 = arith.constant 0 : index
    %10 = vector.load %arg3[%c0_10, %c0_11] : memref<512x16xf32, #tpu.memory_space<vmem>>, vector<512x16xf32>
    %cst_12 = arith.constant dense<0.000000e+00> : vector<256x16xf32>
    %11 = tpu.matmul %9, %10, %cst_12 {dimension_numbers = #tpu.dot_dimension_numbers<[1], [0], [0], [1], [0, 0, 1, 1], [], []>} : vector<256x512xf32>, vector<512x16xf32>, vector<256x16xf32> -> vector<256x16xf32>
    %cst_13 = arith.constant 9.99999974E-6 : f32
    %12 = vector.broadcast %cst_13 : f32 to vector<256x16xf32>
    %13 = arith.addf %11, %12 : vector<256x16xf32>
    %14 = math.rsqrt %13 : vector<256x16xf32>
    %c0_14 = arith.constant 0 : index
    %c0_15 = arith.constant 0 : index
    %15 = vector.load %arg5[%c0_14, %c0_15] : memref<16x512xf32, #tpu.memory_space<vmem>>, vector<16x512xf32>
    %cst_16 = arith.constant dense<0.000000e+00> : vector<256x512xf32>
    %16 = tpu.matmul %14, %15, %cst_16 {dimension_numbers = #tpu.dot_dimension_numbers<[1], [0], [0], [1], [0, 0, 1, 1], [], []>} : vector<256x16xf32>, vector<16x512xf32>, vector<256x512xf32> -> vector<256x512xf32>
    %17 = arith.mulf %8, %16 : vector<256x512xf32>
    %c0_17 = arith.constant 0 : index
    %c0_18 = arith.constant 0 : index
    %18 = vector.load %arg6[%c0_17, %c0_18] : memref<1x512xf32, #tpu.memory_space<vmem>>, vector<1x512xf32>
    %19 = vector.broadcast %18 : vector<1x512xf32> to vector<256x512xf32>
    %20 = arith.addf %17, %19 : vector<256x512xf32>
    %21 = vector.shape_cast %20 : vector<256x512xf32> to vector<16x16x512xf32>
    %22 = vector.extract_strided_slice %21 {offsets = [0, 0, 0], sizes = [16, 16, 128], strides = [1, 1, 1]} : vector<16x16x512xf32> to vector<16x16x128xf32>
    %c0_19 = arith.constant 0 : index
    %c0_20 = arith.constant 0 : index
    %c0_21 = arith.constant 0 : index
    %c0_22 = arith.constant 0 : index
    %23 = vector.load %arg7[%c0_19, %c0_20, %c0_21, %c0_22] : memref<16x4x16x128xf32, #tpu.memory_space<vmem>>, vector<16x1x16x128xf32>
    %24 = vector.shape_cast %23 : vector<16x1x16x128xf32> to vector<16x16x128xf32>
    %25 = vector.shape_cast %22 : vector<16x16x128xf32> to vector<16x1x16x128xf32>
    tpu.vector_store %arg7[%c0_19, %c0_20, %c0_21, %c0_22], %25 {strides = array<i32>} : memref<16x4x16x128xf32, #tpu.memory_space<vmem>>, vector<16x1x16x128xf32>,
    %26 = vector.extract_strided_slice %21 {offsets = [0, 0, 128], sizes = [16, 16, 128], strides = [1, 1, 1]} : vector<16x16x512xf32> to vector<16x16x128xf32>
    %c0_23 = arith.constant 0 : index
    %c1 = arith.constant 1 : index
    %c0_24 = arith.constant 0 : index
    %c0_25 = arith.constant 0 : index
    %27 = vector.load %arg7[%c0_23, %c1, %c0_24, %c0_25] : memref<16x4x16x128xf32, #tpu.memory_space<vmem>>, vector<16x1x16x128xf32>
    %28 = vector.shape_cast %27 : vector<16x1x16x128xf32> to vector<16x16x128xf32>
    %29 = vector.shape_cast %26 : vector<16x16x128xf32> to vector<16x1x16x128xf32>
    tpu.vector_store %arg7[%c0_23, %c1, %c0_24, %c0_25], %29 {strides = array<i32>} : memref<16x4x16x128xf32, #tpu.memory_space<vmem>>, vector<16x1x16x128xf32>,
    %30 = vector.extract_strided_slice %21 {offsets = [0, 0, 256], sizes = [16, 16, 128], strides = [1, 1, 1]} : vector<16x16x512xf32> to vector<16x16x128xf32>
    %c0_26 = arith.constant 0 : index
    %c2 = arith.constant 2 : index
    %c0_27 = arith.constant 0 : index
    %c0_28 = arith.constant 0 : index
    %31 = vector.load %arg7[%c0_26, %c2, %c0_27, %c0_28] : memref<16x4x16x128xf32, #tpu.memory_space<vmem>>, vector<16x1x16x128xf32>
    %32 = vector.shape_cast %31 : vector<16x1x16x128xf32> to vector<16x16x128xf32>
    %33 = vector.shape_cast %30 : vector<16x16x128xf32> to vector<16x1x16x128xf32>
    tpu.vector_store %arg7[%c0_26, %c2, %c0_27, %c0_28], %33 {strides = array<i32>} : memref<16x4x16x128xf32, #tpu.memory_space<vmem>>, vector<16x1x16x128xf32>,
    %34 = vector.extract_strided_slice %21 {offsets = [0, 0, 384], sizes = [16, 16, 128], strides = [1, 1, 1]} : vector<16x16x512xf32> to vector<16x16x128xf32>
    %c0_29 = arith.constant 0 : index
    %c3 = arith.constant 3 : index
    %c0_30 = arith.constant 0 : index
    %c0_31 = arith.constant 0 : index
    %35 = vector.load %arg7[%c0_29, %c3, %c0_30, %c0_31] : memref<16x4x16x128xf32, #tpu.memory_space<vmem>>, vector<16x1x16x128xf32>
    %36 = vector.shape_cast %35 : vector<16x1x16x128xf32> to vector<16x16x128xf32>
    %37 = vector.shape_cast %34 : vector<16x16x128xf32> to vector<16x1x16x128xf32>
    tpu.vector_store %arg7[%c0_29, %c3, %c0_30, %c0_31], %37 {strides = array<i32>} : memref<16x4x16x128xf32, #tpu.memory_space<vmem>>, vector<16x1x16x128xf32>,
    return
  }
  func.func @transform_0(%arg0: i32) -> (i32, i32, i32) {
    %c0_i32 = arith.constant 0 : i32
    %c0_i32_0 = arith.constant 0 : i32
    %c0_i32_1 = arith.constant 0 : i32
    return %arg0, %c0_i32, %c0_i32_0 : i32, i32, i32
  }
  func.func @transform_1(%arg0: i32) -> (i32, i32) {
    %c0_i32 = arith.constant 0 : i32
    %c0_i32_0 = arith.constant 0 : i32
    %c0_i32_1 = arith.constant 0 : i32
    return %c0_i32, %c0_i32_0 : i32, i32
  }
  func.func @transform_2(%arg0: i32) -> (i32, i32) {
    %c0_i32 = arith.constant 0 : i32
    %c0_i32_0 = arith.constant 0 : i32
    %c0_i32_1 = arith.constant 0 : i32
    return %c0_i32, %c0_i32_0 : i32, i32
  }
  func.func @transform_3(%arg0: i32) -> (i32, i32) {
    %c0_i32 = arith.constant 0 : i32
    %c0_i32_0 = arith.constant 0 : i32
    %c0_i32_1 = arith.constant 0 : i32
    return %c0_i32, %c0_i32_0 : i32, i32
  }
  func.func @transform_4(%arg0: i32) -> (i32, i32) {
    %c0_i32 = arith.constant 0 : i32
    %c0_i32_0 = arith.constant 0 : i32
    %c0_i32_1 = arith.constant 0 : i32
    return %c0_i32, %c0_i32_0 : i32, i32
  }
  func.func @transform_5(%arg0: i32) -> (i32, i32) {
    %c0_i32 = arith.constant 0 : i32
    %c0_i32_0 = arith.constant 0 : i32
    %c0_i32_1 = arith.constant 0 : i32
    return %c0_i32, %c0_i32_0 : i32, i32
  }
  func.func @transform_6(%arg0: i32) -> (i32, i32, i32, i32) {
    %c0_i32 = arith.constant 0 : i32
    %c0_i32_0 = arith.constant 0 : i32
    %c0_i32_1 = arith.constant 0 : i32
    %c0_i32_2 = arith.constant 0 : i32
    return %arg0, %c0_i32, %c0_i32_0, %c0_i32_1 : i32, i32, i32, i32
  }
}

</mosaic_0001>

<bundles_post_ra>
// kernel: tpu_custom_call.1
= control target key start
LH: loop header
LB: loop body
LE: loop exit
PB: predicated region body
PF: predicated region fallthrough
CT: control target
= control target key end

     0   :  { %11 = vsyncpa [#allocation3], 0  ;;  %s7323_s0 = inlined_call_operand.vmem [shape: bf16[32,16,32], index: 0, kind: input, shape index: {}]   ;;  %s7324_s1 = inlined_call_operand.vmem [shape: bf16[32,512], index: 1, kind: input, shape index: {}]   ;;  %s7325_s2 = inlined_call_operand.vmem [shape: f32[512,16], index: 2, kind: input, shape index: {}]   ;;  %s7326_s3 = inlined_call_operand.vmem [shape: f32[16,512], index: 3, kind: input, shape index: {}]   ;;  %s7327_s4 = inlined_call_operand.vmem [shape: f32[16,512], index: 4, kind: input, shape index: {}]   ;;  %s7328_s5 = inlined_call_operand.vmem [shape: f32[1,512], index: 5, kind: input, shape index: {}]   ;;  %s7329_s6 = inlined_call_operand.hbm [shape: f32[32,4,16,128], index: 6, kind: output, shape index: {}]  }
   0x1   :  { %13 = vsyncpa [#allocation3 + $0x1], 0  ;;  %s4733_s21 = smov 0   ;;  %s4735_s22 = smov 0  }
   0x2   :  { %s4737_s23 = smov 0   ;;  %s4739_s24 = smov 0  }
   0x3 LB: > { %s4754_s25 = sadd.s32 4294967295, %s4690_s24   ;;  %s3827_s26 = sadd.s32 4294967294, %s4690_s24   ;;  %s4690_s24 = sphi %s4739_s24, %s8008_s24   ;;  %s4686_s23 = sphi %s4737_s23, %s8007_s23   ;;  %s4682_s22 = sphi %s4735_s22, %s8006_s22   ;;  %s4678_s21 = sphi %s4733_s21, %s8005_s21  }
   0x4   : > { %s4758_s27 = sadd.s32 1, %s4690_s24   ;;  %s157_s28 = sadd.s32 1, %s4686_s23 }
   0x5   : > { %s154_s29 = ssub.s32 %s4690_s24, %s4758_s27  ;;  %p167_p0 = scmp.ne.s32.totalorder %s4686_s23, %s4682_s22 }
   0x6   : > { %p155_p1 = scmp.eq.s32.totalorder %s154_s29, 0  ;;  %p168_p2 = scmp.eq.s32.totalorder %s4754_s25, 1 }
   0x7   : > { %p173_p3 = scmp.ne.s32.totalorder %s4682_s22, %s4678_s21  ;;  %p174_p4 = scmp.eq.s32.totalorder %s3827_s26, 1 }
   0x8   : > { %s4769_s30 = scalar_select %p155_p1, %s4686_s23, %s157_s28  }
   0x9   : > { %p4771_p5 = por %p168_p2, %p167_p0  ;;  %p4775_p6 = por %p174_p4, %p173_p3 }
   0xa   : > { %p3830_p7 = scmp.ge.s32.totalorder %s4690_s24, 1  ;;  %p217_p8 = scmp.lt.s32.totalorder %s4690_s24, 3 }
   0xc   : > { %p218_p9 = pnand %p3830_p7, %p217_p8 }
   0xe   : > { %221 = sbr.rel (%p218_p9) target bundleno = 1640 (0x668), region = 44 }
  0x15   : > { %v4536_v0 = vld [vmem:[%s7324_s1 + $0x4] ss:$16 sps:$4 sm:$0xff]   ;;  %s3832_s11 = sshll.u32 %s4754_s25, 4  ;;  %v4538_v1 = vld [vmem:[%s7324_s1] ss:$16 sps:$4 sm:$0xff]   ;;  %v4692_v2 = vmov 0  }
  0x16   : > { %498 = vmatprep.mubr.bf16.mxu0 %v4692_v2  ;;  %p249_p10 = scmp.lt.s32.totalorder %s3832_s11, 31  ;;  %691 = vmatprep.mubr.bf16.mxu1 %v4692_v2  ;;  %v4539_v3 = vld [vmem:[%s7324_s1 + $0x24] ss:$16 sps:$4 sm:$0xff]   ;;  %v4541_v4 = vld [vmem:[%s7324_s1 + $0x20] ss:$16 sps:$4 sm:$0xff]   ;;  %v853_v6 = vld [vmem:[%s7325_s2 + $0x8] sm:$0xff] }
  0x17   : > { %466 = vmatprep.subr.bf16.mxu0 %v4536_v0  ;;  %v852_v5 = vld [vmem:[%s7325_s2] sm:$0xff]  ;;  %v854_v7 = vld [vmem:[%s7325_s2 + $0x10] sm:$0xff]  ;;  %v4557_v8 = vld [vmem:[%s7324_s1 + $0xc] ss:$16 sps:$4 sm:$0xff]   ;;  %vm417_vm0 = vcmask 261120   ;;  %v7338_v12 = vmov 0.0|0.0  }
  0x18   : > { %467 = vmatpush1.bf16.msra.mxu0 %v4538_v1  ;;  %s8010_s11 = smov (!%p249_p10, %s3832_s11), 31  ;;  %v4559_v9 = vld [vmem:[%s7324_s1 + $0x8] ss:$16 sps:$4 sm:$0xff]   ;;  %v4817_v11 = vpack.c.bf16 %v853_v6, %v852_v5  ;;  %659 = vmatprep.subr.bf16.mxu1 %v4557_v8  ;;  %v856_v15 = vld [vmem:[%s7325_s2 + $0x20] sm:$0xff]  ;;  %v858_v19 = vld [vmem:[%s7325_s2 + $0x30] sm:$0xff]  ;;  %vm1374_vm1 = vcmask 130048  }
  0x19   : > { %468 = vmatprep.subr.bf16.mxu0 %v4539_v3  ;;  %s4121_s28 = sshll.u32 %s8010_s11, 3  ;;  %v855_v13 = vld [vmem:[%s7325_s2 + $0x18] sm:$0xff]  ;;  %660 = vmatpush1.bf16.msra.mxu1 %v4559_v9  ;;  %v857_v16 = vld [vmem:[%s7325_s2 + $0x28] sm:$0xff]  ;;  %v860_v22 = vld [vmem:[%s7325_s2 + $0x40] sm:$0xff]  ;;  %s245_s15 = sand.u32 1, %s4682_s22  }
  0x1a   : > { %s4805_s10 = scalar_lea.vmem %s7323_s0, %s4121_s28  ;;  %v4826_v14 = vpack.c.bf16 %v855_v13, %v854_v7  ;;  %v4837_v18 = vpack.c.bf16 %v857_v16, %v856_v15  ;;  %v859_v20 = vld [vmem:[%s7325_s2 + $0x38] sm:$0xff]  ;;  %v861_v24 = vld [vmem:[%s7325_s2 + $0x48] sm:$0xff]  ;;  %v862_v28 = vld [vmem:[%s7325_s2 + $0x50] sm:$0xff]  ;;  %s3831_s11 = sshll.u32 %s245_s15, 10 }
  0x1b   : > { %v4542_v10 = vld [vmem:[%s4805_s10] sm:$0xff]   ;;  %v4543_v17 = vld [vmem:[%s4805_s10 + $0x8] sm:$0xff]   ;;  %v4849_v21 = vpack.c.bf16 %v859_v20, %v858_v19  ;;  %v4544_v23 = vld [vmem:[%s4805_s10 + $0x10] sm:$0xff]   ;;  %v4860_v25 = vpack.c.bf16 %v861_v24, %v860_v22  ;;  %s6852_s18 = scalar_lea.vmem [#allocation2], %s3831_s11  ;;  %s4123_s19 = sshll.u32 %s4754_s25, 14 }
  0x1c   : > { %469 = vmatpush1.bf16.msra.mxu0 %v4541_v4  ;;  %v4561_v26 = vld [vmem:[%s7324_s1 + $0x2c] ss:$16 sps:$4 sm:$0xff]   ;;  %v4563_v27 = vld [vmem:[%s7324_s1 + $0x28] ss:$16 sps:$4 sm:$0xff]   ;;  %v864_v31 = vld [vmem:[%s7325_s2 + $0x60] sm:$0xff]  ;;  %s3765_s20 = sshll.u32 %s6852_s18, 4  ;;  %s7273_s29 = scalar_lea.hbm %s7329_s6, %s4123_s19  ;;  %s7275_s20 = int_to_ptr.vmem [resolvable:$true] %s3765_s20 }
  0x1d   : > { %4124 = vmatprep.subr.bf16.mxu0 %v7338_v12  ;;  %v863_v29 = vld [vmem:[%s7325_s2 + $0x58] sm:$0xff]  ;;  %661 = vmatprep.subr.bf16.mxu1 %v4561_v26  ;;  %v865_v32 = vld [vmem:[%s7325_s2 + $0x68] sm:$0xff]  ;;  %v866_v35 = vld [vmem:[%s7325_s2 + $0x70] sm:$0xff]  ;;  %s7282_s25 = scalar_lea.sflag [#allocation3], %s245_s15  ;;  %s4628_s9 = scalar_lea.vmem %s7275_s20, 16384 }
  0x1e   : > { %v4878_v30 = vpack.c.bf16 %v863_v29, %v862_v28  ;;  %662 = vmatpush1.bf16.msra.mxu1 %v4563_v27  ;;  %v4545_v33 = vld [vmem:[%s4805_s10 + $0x18] sm:$0xff]   ;;  %v4890_v34 = vpack.c.bf16 %v865_v32, %v864_v31  ;;  %v868_v38 = vld [vmem:[%s7325_s2 + $0x80] sm:$0xff]  ;;  %v869_v39 = vld [vmem:[%s7325_s2 + $0x88] sm:$0xff]  ;;  %p4629_p11 = scmp.ne.s32.totalorder %s7275_s20, %s4628_s9 }
  0x1f   : > { %3859 = vmatmul.mubr.msk.bf16.vlgmr.msra.gmra.mrb[0].mxu0 %vm417_vm0, %v4542_v10  ;;  %v867_v36 = vld [vmem:[%s7325_s2 + $0x78] sm:$0xff]  ;;  %v4546_v40 = vld [vmem:[%s4805_s10 + $0x20] sm:$0xff]   ;;  %v4915_v41 = vpack.c.bf16 %v869_v39, %v868_v38  ;;  %v870_v42 = vld [vmem:[%s7325_s2 + $0x90] sm:$0xff] }
  0x20   : > { %508 = vmatprep.mubr.bf16.mxu0 %v4692_v2  ;;  %4126 = vmatpush1.bf16.msra.mxu0 %v4817_v11  ;;  %v4903_v37 = vpack.c.bf16 %v867_v36, %v866_v35  ;;  %v871_v43 = vld [vmem:[%s7325_s2 + $0x98] sm:$0xff]  ;;  %v872_v45 = vld [vmem:[%s7325_s2 + $0xa0] sm:$0xff]  ;;  %v873_v46 = vld [vmem:[%s7325_s2 + $0xa8] sm:$0xff]  ;;  %p4630_p12 = pnand %p4629_p11, %p4771_p5 }
  0x21   : > { %4127 = vmatprep.subr.bf16.mxu0 %v7338_v12  ;;  %3875 = vmatmul.mubr.msk.bf16.vlgmr.msra.gmra.mrb[0].mxu1 %vm417_vm0, %v4542_v10  ;;  %v4928_v44 = vpack.c.bf16 %v871_v43, %v870_v42  ;;  %v4547_v47 = vld [vmem:[%s4805_s10 + $0x28] sm:$0xff]   ;;  %v4940_v48 = vpack.c.bf16 %v873_v46, %v872_v45  ;;  %v874_v49 = vld [vmem:[%s7325_s2 + $0xb0] sm:$0xff]  ;;  %v875_v50 = vld [vmem:[%s7325_s2 + $0xb8] sm:$0xff] }
  0x22   : > { %701 = vmatprep.mubr.bf16.mxu1 %v4692_v2  ;;  %v4953_v51 = vpack.c.bf16 %v875_v50, %v874_v49  ;;  %v876_v52 = vld [vmem:[%s7325_s2 + $0xc0] sm:$0xff]  ;;  %v877_v53 = vld [vmem:[%s7325_s2 + $0xc8] sm:$0xff]  ;;  %v4548_v54 = vld [vmem:[%s4805_s10 + $0x30] sm:$0xff]   ;;  %p4631_p13 = pneg %p4630_p12 }
  0x23   : > { %v4965_v55 = vpack.c.bf16 %v877_v53, %v876_v52  ;;  %v878_v56 = vld [vmem:[%s7325_s2 + $0xd0] sm:$0xff]  ;;  %v879_v57 = vld [vmem:[%s7325_s2 + $0xd8] sm:$0xff]  ;;  %v880_v59 = vld [vmem:[%s7325_s2 + $0xe0] sm:$0xff] }
  0x24   : > { %4129 = vmatpush1.bf16.msra.mxu0 %v4826_v14  ;;  %v4978_v58 = vpack.c.bf16 %v879_v57, %v878_v56  ;;  %v881_v60 = vld [vmem:[%s7325_s2 + $0xe8] sm:$0xff]  ;;  %v4549_v61 = vld [vmem:[%s4805_s10 + $0x38] sm:$0xff]   ;;  %v882_v63 = vld [vmem:[%s7325_s2 + $0xf0] sm:$0xff] }
  0x25   : > { %4130 = vmatprep.subr.bf16.mxu0 %v7338_v12  ;;  %v4990_v62 = vpack.c.bf16 %v881_v60, %v880_v59  ;;  %v883_v0 = vld [vmem:[%s7325_s2 + $0xf8] sm:$0xff]  ;;  %v4550_v3 = vld [vmem:[%s4805_s10 + $0x40] sm:$0xff]   ;;  %v4551_v4 = vld [vmem:[%s4805_s10 + $0x48] sm:$0xff]  }
  0x26   : > { %v5003_v1 = vpack.c.bf16 %v883_v0, %v882_v63  ;;  %v4552_v5 = vld [vmem:[%s4805_s10 + $0x50] sm:$0xff]   ;;  %v4553_v6 = vld [vmem:[%s4805_s10 + $0x58] sm:$0xff]   ;;  %v4554_v7 = vld [vmem:[%s4805_s10 + $0x60] sm:$0xff]  }
  0x27   : > { %3860 = vmatmul.mubr.msk.bf16.gmra.mrb[4].mxu0 %vm417_vm0, %v4543_v17  ;;  %v4555_v8 = vld [vmem:[%s4805_s10 + $0x68] sm:$0xff]   ;;  %v4556_v9 = vld [vmem:[%s4805_s10 + $0x70] sm:$0xff]   ;;  %v4560_v10 = vld [vmem:[%s4805_s10 + $0x78] sm:$0xff]   ;;  %s4695_s10 = smov [#allocation2]  }
  0x28   : > { %518 = vmatprep.mubr.bf16.mxu0 %v4692_v2  ;;  %4132 = vmatpush1.bf16.msra.mxu0 %v4837_v18  ;;  %v884_v13 = vld [vmem:[%s7325_s2 + $0x100] sm:$0xff]  ;;  %v885_v15 = vld [vmem:[%s7325_s2 + $0x108] sm:$0xff]  ;;  %v887_v20 = vld [vmem:[%s7325_s2 + $0x118] sm:$0xff]  ;;  %s4632_s12 = sshll.u32 %s4695_s10, 4  ;;  %s4633_s12 = int_to_ptr.vmem [resolvable:$false] %s4632_s12 }
  0x29   : > { %4133 = vmatprep.subr.bf16.mxu0 %v7338_v12  ;;  %3876 = vmatmul.mubr.msk.bf16.gmra.mrb[4].mxu1 %vm417_vm0, %v4543_v17  ;;  %v5060_v17 = vpack.c.bf16 %v885_v15, %v884_v13  ;;  %v888_v26 = vld [vmem:[%s7325_s2 + $0x120] sm:$0xff]  ;;  %v889_v27 = vld [vmem:[%s7325_s2 + $0x128] sm:$0xff]  ;;  %v890_v32 = vld [vmem:[%s7325_s2 + $0x130] sm:$0xff]  ;;  %s4634_s13 = scalar_lea.vmem %s4633_s12, 32768  ;;  %p4635_p0 = scmp.lt.s32.totalorder %s7275_s20, %s4633_s12 }
  0x2a   : > { %711 = vmatprep.mubr.bf16.mxu1 %v4692_v2  ;;  %v5091_v29 = vpack.c.bf16 %v889_v27, %v888_v26  ;;  %v892_v39 = vld [vmem:[%s7325_s2 + $0x140] sm:$0xff]  ;;  %v894_v46 = vld [vmem:[%s7325_s2 + $0x150] sm:$0xff]  ;;  %p4636_p1 = scmp.lt.s32.totalorder %s4634_s13, %s4628_s9 }
  0x2b   : > { %7555 = vst [vmem:[#allocation6_spill] sm:$0xff] %v5060_v17  ;;  %v896_v53 = vld [vmem:[%s7325_s2 + $0x160] sm:$0xff] }
  0x2c   : > { %4135 = vmatpush1.bf16.msra.mxu0 %v4849_v21  ;;  %7561 = vst [vmem:[#allocation12_spill] sm:$0xff] %v5091_v29  ;;  %p4637_p2 = por %p4636_p1, %p4635_p0 }
  0x2d   : > { %4136 = vmatprep.subr.bf16.mxu0 %v7338_v12 }
  0x2e   : > { %p4638_p3 = pnand %p4637_p2, %p4631_p13 }
  0x2f   : > { %3861 = vmatmul.mubr.msk.bf16.gmra.mrb[8].mxu0 %vm417_vm0, %v4544_v23 }
  0x30   : > { %528 = vmatprep.mubr.bf16.mxu0 %v4692_v2  ;;  %4138 = vmatpush1.bf16.msra.mxu0 %v4860_v25 }
  0x31   : > { %4139 = vmatprep.subr.bf16.mxu0 %v7338_v12  ;;  %3877 = vmatmul.mubr.msk.bf16.gmra.mrb[8].mxu1 %vm417_vm0, %v4544_v23 }
  0x32   : > { %721 = vmatprep.mubr.bf16.mxu1 %v4692_v2 }
  0x34   : > { %4141 = vmatpush1.bf16.msra.mxu0 %v4878_v30 }
  0x35   : > { %4142 = vmatprep.subr.bf16.mxu0 %v7338_v12 }
  0x37   : > { %3862 = vmatmul.mubr.msk.bf16.gmra.mrb[12].mxu0 %vm417_vm0, %v4545_v33 }
  0x38   : > { %538 = vmatprep.mubr.bf16.mxu0 %v4692_v2  ;;  %4144 = vmatpush1.bf16.msra.mxu0 %v4890_v34 }
  0x39   : > { %4145 = vmatprep.subr.bf16.mxu0 %v7338_v12  ;;  %3878 = vmatmul.mubr.msk.bf16.gmra.mrb[12].mxu1 %vm417_vm0, %v4545_v33  ;;  %v891_v33 = vld [vmem:[%s7325_s2 + $0x138] sm:$0xff] }
  0x3a   : > { %731 = vmatprep.mubr.bf16.mxu1 %v4692_v2  ;;  %v5110_v38 = vpack.c.bf16 %v891_v33, %v890_v32  ;;  %v902_v32 = vld [vmem:[%s7325_s2 + $0x190] sm:$0xff]  ;;  %v903_v33 = vld [vmem:[%s7325_s2 + $0x198] sm:$0xff] }
  0x3c   : > { %4147 = vmatpush1.bf16.msra.mxu0 %v4903_v37  ;;  %7565 = vst [vmem:[#allocation16_spill] sm:$0xff] %v5110_v38 }
  0x3d   : > { %4148 = vmatprep.subr.bf16.mxu0 %v7338_v12 }
  0x3f   : > { %3863 = vmatmul.mubr.msk.bf16.gmra.mrb[16].mxu0 %vm417_vm0, %v4546_v40 }
  0x40   : > { %548 = vmatprep.mubr.bf16.mxu0 %v4692_v2  ;;  %4150 = vmatpush1.bf16.msra.mxu0 %v4915_v41 }
  0x41   : > { %4151 = vmatprep.subr.bf16.mxu0 %v7338_v12  ;;  %3879 = vmatmul.mubr.msk.bf16.gmra.mrb[16].mxu1 %vm417_vm0, %v4546_v40  ;;  %v893_v40 = vld [vmem:[%s7325_s2 + $0x148] sm:$0xff] }
  0x42   : > { %741 = vmatprep.mubr.bf16.mxu1 %v4692_v2  ;;  %v5123_v43 = vpack.c.bf16 %v893_v40, %v892_v39 }
  0x44   : > { %4153 = vmatpush1.bf16.msra.mxu0 %v4928_v44  ;;  %7567 = vst [vmem:[#allocation18_spill] sm:$0xff] %v5123_v43 }
  0x45   : > { %4154 = vmatprep.subr.bf16.mxu0 %v7338_v12 }
  0x47   : > { %3864 = vmatmul.mubr.msk.bf16.gmra.mrb[20].mxu0 %vm417_vm0, %v4547_v47 }
  0x48   : > { %558 = vmatprep.mubr.bf16.mxu0 %v4692_v2  ;;  %4156 = vmatpush1.bf16.msra.mxu0 %v4940_v48 }
  0x49   : > { %4157 = vmatprep.subr.bf16.mxu0 %v7338_v12  ;;  %3880 = vmatmul.mubr.msk.bf16.gmra.mrb[20].mxu1 %vm417_vm0, %v4547_v47  ;;  %v895_v47 = vld [vmem:[%s7325_s2 + $0x158] sm:$0xff] }
  0x4a   : > { %751 = vmatprep.mubr.bf16.mxu1 %v4692_v2  ;;  %v5142_v52 = vpack.c.bf16 %v895_v47, %v894_v46  ;;  %v5222_v46 = vpack.c.bf16 %v903_v33, %v902_v32  ;;  %v904_v47 = vld [vmem:[%s7325_s2 + $0x1a0] sm:$0xff] }
  0x4c   : > { %4159 = vmatpush1.bf16.msra.mxu0 %v4953_v51  ;;  %7571 = vst [vmem:[#allocation22_spill] sm:$0xff] %v5142_v52  ;;  %7586 = vst [vmem:[#allocation37_spill] sm:$0xff] %v5222_v46 }
  0x4d   : > { %4160 = vmatprep.subr.bf16.mxu0 %v7338_v12 }
  0x4f   : > { %3865 = vmatmul.mubr.msk.bf16.gmra.mrb[24].mxu0 %vm417_vm0, %v4548_v54 }
  0x50   : > { %568 = vmatprep.mubr.bf16.mxu0 %v4692_v2  ;;  %4162 = vmatpush1.bf16.msra.mxu0 %v4965_v55 }
  0x51   : > { %4163 = vmatprep.subr.bf16.mxu0 %v7338_v12  ;;  %3881 = vmatmul.mubr.msk.bf16.gmra.mrb[24].mxu1 %vm417_vm0, %v4548_v54  ;;  %v897_v54 = vld [vmem:[%s7325_s2 + $0x168] sm:$0xff] }
  0x52   : > { %761 = vmatprep.mubr.bf16.mxu1 %v4692_v2 }
  0x54   : > { %4165 = vmatpush1.bf16.msra.mxu0 %v4978_v58 }
  0x55   : > { %4166 = vmatprep.subr.bf16.mxu0 %v7338_v12 }
  0x57   : > { %3866 = vmatmul.mubr.msk.bf16.gmra.mrb[28].mxu0 %vm417_vm0, %v4549_v61 }
  0x58   : > { %578 = vmatprep.mubr.bf16.mxu0 %v4692_v2  ;;  %4168 = vmatpush1.bf16.msra.mxu0 %v4990_v62 }
  0x59   : > { %4169 = vmatprep.subr.bf16.mxu0 %v7338_v12  ;;  %3882 = vmatmul.mubr.msk.bf16.gmra.mrb[28].mxu1 %vm417_vm0, %v4549_v61  ;;  %v5161_v61 = vpack.c.bf16 %v897_v54, %v896_v53  ;;  %v905_v53 = vld [vmem:[%s7325_s2 + $0x1a8] sm:$0xff] }
  0x5a   : > { %771 = vmatprep.mubr.bf16.mxu1 %v4692_v2 }
  0x5b   : > { %7574 = vst [vmem:[#allocation25_spill] sm:$0xff] %v5161_v61 }
  0x5c   : > { %4171 = vmatpush1.bf16.msra.mxu0 %v5003_v1 }
  0x5d   : > { %4172 = vmatprep.subr.bf16.mxu0 %v7338_v12 }
  0x5f   : > { %3867 = vmatmul.mubr.msk.bf16.gmra.mrb[32].mxu0 %vm417_vm0, %v4550_v3 }
  0x60   : > { %588 = vmatprep.mubr.bf16.mxu0 %v4692_v2 }
  0x61   : > { %3883 = vmatmul.mubr.msk.bf16.gmra.mrb[32].mxu1 %vm417_vm0, %v4550_v3  ;;  %v898_v3 = vld [vmem:[%s7325_s2 + $0x170] sm:$0xff] }
  0x62   : > { %781 = vmatprep.mubr.bf16.mxu1 %v4692_v2 }
  0x67   : > { %3868 = vmatmul.mubr.msk.bf16.gmra.mrb[36].mxu0 %vm417_vm0, %v4551_v4 }
  0x68   : > { %598 = vmatprep.mubr.bf16.mxu0 %v4692_v2 }
  0x69   : > { %3884 = vmatmul.mubr.msk.bf16.gmra.mrb[36].mxu1 %vm417_vm0, %v4551_v4  ;;  %v899_v4 = vld [vmem:[%s7325_s2 + $0x178] sm:$0xff] }
  0x6a   : > { %791 = vmatprep.mubr.bf16.mxu1 %v4692_v2 }
  0x6f   : > { %3869 = vmatmul.mubr.msk.bf16.gmra.mrb[40].mxu0 %vm417_vm0, %v4552_v5 }
  0x70   : > { %608 = vmatprep.mubr.bf16.mxu0 %v4692_v2 }
  0x71   : > { %3885 = vmatmul.mubr.msk.bf16.gmra.mrb[40].mxu1 %vm417_vm0, %v4552_v5 }
  0x72   : > { %801 = vmatprep.mubr.bf16.mxu1 %v4692_v2 }
  0x77   : > { %3870 = vmatmul.mubr.msk.bf16.gmra.mrb[44].mxu0 %vm417_vm0, %v4553_v6 }
  0x78   : > { %618 = vmatprep.mubr.bf16.mxu0 %v4692_v2 }
  0x79   : > { %3886 = vmatmul.mubr.msk.bf16.gmra.mrb[44].mxu1 %vm417_vm0, %v4553_v6 }
  0x7a   : > { %811 = vmatprep.mubr.bf16.mxu1 %v4692_v2 }
  0x7f   : > { %3871 = vmatmul.mubr.msk.bf16.gmra.mrb[48].mxu0 %vm417_vm0, %v4554_v7 }
  0x80   : > { %628 = vmatprep.mubr.bf16.mxu0 %v4692_v2 }
  0x81   : > { %3887 = vmatmul.mubr.msk.bf16.gmra.mrb[48].mxu1 %vm417_vm0, %v4554_v7  ;;  %v5182_v7 = vpack.c.bf16 %v899_v4, %v898_v3 }
  0x82   : > { %821 = vmatprep.mubr.bf16.mxu1 %v4692_v2 }
  0x83   : > { %7579 = vst [vmem:[#allocation30_spill] sm:$0xff] %v5182_v7 }
  0x87   : > { %3872 = vmatmul.mubr.msk.bf16.gmra.mrb[52].mxu0 %vm417_vm0, %v4555_v8 }
  0x88   : > { %638 = vmatprep.mubr.bf16.mxu0 %v4692_v2 }
  0x89   : > { %3888 = vmatmul.mubr.msk.bf16.gmra.mrb[52].mxu1 %vm417_vm0, %v4555_v8  ;;  %v900_v8 = vld [vmem:[%s7325_s2 + $0x180] sm:$0xff] }
  0x8a   : > { %831 = vmatprep.mubr.bf16.mxu1 %v4692_v2 }
  0x8f   : > { %3873 = vmatmul.mubr.msk.bf16.gmra.mrb[56].mxu0 %vm417_vm0, %v4556_v9 }
  0x90   : > { %648 = vmatprep.mubr.bf16.mxu0 %v4692_v2 }
  0x91   : > { %3889 = vmatmul.mubr.msk.bf16.gmra.mrb[56].mxu1 %vm417_vm0, %v4556_v9  ;;  %v901_v9 = vld [vmem:[%s7325_s2 + $0x188] sm:$0xff] }
  0x92   : > { %841 = vmatprep.mubr.bf16.mxu1 %v4692_v2  ;;  %v886_v2 = vld [vmem:[%s7325_s2 + $0x110] sm:$0xff] }
  0x93   : > { %v5078_v24 = vpack.c.bf16 %v887_v20, %v886_v2  ;;  %v5201_v20 = vpack.c.bf16 %v901_v9, %v900_v8  ;;  %v5241_v9 = vpack.c.bf16 %v905_v53, %v904_v47 }
  0x95   : > { %7559 = vst [vmem:[#allocation10_spill] sm:$0xff] %v5078_v24  ;;  %7582 = vst [vmem:[#allocation33_spill] sm:$0xff] %v5201_v20 }
  0x96   : > { %7588 = vst [vmem:[#allocation39_spill] sm:$0xff] %v5241_v9 }
  0x97   : > { %3874 = vmatmul.mubr.msk.bf16.gmra.mrb[60].mxu0 %vm417_vm0, %v4560_v10 }
  0x99   : > { %3890 = vmatmul.mubr.msk.bf16.gmra.mrb[60].mxu1 %vm417_vm0, %v4560_v10 }
  0xf2   : > { %v5058_v16 = vpop.f32.mrb[0].mxu0 }
  0xf3   : > { %7554 = vst [vmem:[#allocation5_spill] sm:$0xff] %v5058_v16  ;;  %v5062_v19 = vpop.f32.mrb[1].mxu0 }
  0xf4   : > { %7556 = vst [vmem:[#allocation7_spill] sm:$0xff] %v5062_v19  ;;  %v5070_v22 = vpop.f32.mrb[2].mxu0  ;;  %980 = vmatprep.mubr.f32.mxu0 %v5062_v19  ;;  %v5151_v56 = vpop.f32.mrb[0].mxu1 }
  0xf5   : > { %7557 = vst [vmem:[#allocation8_spill] sm:$0xff] %v5070_v22  ;;  %v5073_v23 = vpop.f32.mrb[3].mxu0  ;;  %981 = vmatmul.mubr.f32.vlgmr.msra.gmra.mrb[64].mxu0 %v5058_v16  ;;  %v5153_v57 = vpop.f32.mrb[1].mxu1 }
  0xf6   : > { %7558 = vst [vmem:[#allocation9_spill] sm:$0xff] %v5073_v23  ;;  %4174 = vmatpush1.bf16.msra.mxu0 %v5060_v17  ;;  %985 = vmatprep.mubr.f32.mxu0 %v5073_v23  ;;  %7572 = vst [vmem:[#allocation23_spill] sm:$0xff] %v5153_v57  ;;  %v5156_v59 = vpop.f32.mrb[2].mxu1 }
  0xf7   : > { %4175 = vmatprep.subr.bf16.mxu0 %v7338_v12  ;;  %v5163_v63 = vpop.f32.mrb[3].mxu1 }
  0xf8   : > { %7575 = vst [vmem:[#allocation26_spill] sm:$0xff] %v5163_v63 }
  0xf9   : > { %986 = vmatmul.mubr.f32.gmra.mrb[66].mxu0 %v5070_v22 }
  0xfa   : > { %v5088_v28 = vpop.f32.mrb[4].mxu0  ;;  %4177 = vmatpush1.bf16.msra.mxu0 %v5078_v24 }
  0xfb   : > { %7560 = vst [vmem:[#allocation11_spill] sm:$0xff] %v5088_v28  ;;  %v5093_v31 = vpop.f32.mrb[5].mxu0  ;;  %4178 = vmatprep.subr.bf16.mxu0 %v7338_v12 }
  0xfc   : > { %7562 = vst [vmem:[#allocation13_spill] sm:$0xff] %v5093_v31  ;;  %v5102_v35 = vpop.f32.mrb[6].mxu0  ;;  %990 = vmatprep.mubr.f32.mxu0 %v5093_v31  ;;  %v5191_v10 = vpop.f32.mrb[4].mxu1 }
  0xfd   : > { %7563 = vst [vmem:[#allocation14_spill] sm:$0xff] %v5102_v35  ;;  %v5105_v36 = vpop.f32.mrb[7].mxu0  ;;  %991 = vmatmul.mubr.f32.gmra.mrb[68].mxu0 %v5088_v28  ;;  %v5193_v13 = vpop.f32.mrb[5].mxu1 }
  0xfe   : > { %7564 = vst [vmem:[#allocation15_spill] sm:$0xff] %v5105_v36  ;;  %995 = vmatprep.mubr.f32.mxu0 %v5105_v36  ;;  %4180 = vmatpush1.bf16.msra.mxu0 %v5091_v29  ;;  %7580 = vst [vmem:[#allocation31_spill] sm:$0xff] %v5193_v13  ;;  %v5196_v15 = vpop.f32.mrb[6].mxu1 }
  0xff   : > { %4181 = vmatprep.subr.bf16.mxu0 %v7338_v12  ;;  %v5203_v26 = vpop.f32.mrb[7].mxu1 }
 0x101   : > { %996 = vmatmul.mubr.f32.gmra.mrb[70].mxu0 %v5102_v35 }
 0x102   : > { %v5120_v42 = vpop.f32.mrb[8].mxu0  ;;  %4183 = vmatpush1.bf16.msra.mxu0 %v5110_v38 }
 0x103   : > { %7566 = vst [vmem:[#allocation17_spill] sm:$0xff] %v5120_v42  ;;  %v5125_v45 = vpop.f32.mrb[9].mxu0  ;;  %4184 = vmatprep.subr.bf16.mxu0 %v7338_v12 }
 0x104   : > { %7568 = vst [vmem:[#allocation19_spill] sm:$0xff] %v5125_v45  ;;  %v5134_v49 = vpop.f32.mrb[10].mxu0  ;;  %1000 = vmatprep.mubr.f32.mxu0 %v5125_v45  ;;  %v5231_v54 = vpop.f32.mrb[8].mxu1 }
 0x105   : > { %7569 = vst [vmem:[#allocation20_spill] sm:$0xff] %v5134_v49  ;;  %v5137_v50 = vpop.f32.mrb[11].mxu0  ;;  %1001 = vmatmul.mubr.f32.gmra.mrb[72].mxu0 %v5120_v42  ;;  %v5233_v3 = vpop.f32.mrb[9].mxu1 }
 0x106   : > { %7570 = vst [vmem:[#allocation21_spill] sm:$0xff] %v5137_v50  ;;  %1005 = vmatprep.mubr.f32.mxu0 %v5137_v50  ;;  %4186 = vmatpush1.bf16.msra.mxu0 %v5123_v43  ;;  %v5236_v4 = vpop.f32.mrb[10].mxu1 }
 0x107   : > { %4187 = vmatprep.subr.bf16.mxu0 %v7338_v12  ;;  %v5243_v32 = vpop.f32.mrb[11].mxu1 }
 0x109   : > { %1006 = vmatmul.mubr.f32.gmra.mrb[74].mxu0 %v5134_v49 }
 0x10a   : > { %v5158_v60 = vpop.f32.mrb[12].mxu0  ;;  %4189 = vmatpush1.bf16.msra.mxu0 %v5142_v52  ;;  %v914_v52 = vld [vmem:[%s7325_s2 + $0x1f0] sm:$0xff] }
 0x10b   : > { %7573 = vst [vmem:[#allocation24_spill] sm:$0xff] %v5158_v60  ;;  %v5165_v0 = vpop.f32.mrb[13].mxu0  ;;  %4190 = vmatprep.subr.bf16.mxu0 %v7338_v12 }
 0x10c   : > { %7576 = vst [vmem:[#allocation27_spill] sm:$0xff] %v5165_v0  ;;  %v5174_v5 = vpop.f32.mrb[14].mxu0  ;;  %1010 = vmatprep.mubr.f32.mxu0 %v5165_v0 }
 0x10d   : > { %7577 = vst [vmem:[#allocation28_spill] sm:$0xff] %v5174_v5  ;;  %v5177_v6 = vpop.f32.mrb[15].mxu0  ;;  %1011 = vmatmul.mubr.f32.gmra.mrb[76].mxu0 %v5158_v60 }
 0x10e   : > { %7578 = vst [vmem:[#allocation29_spill] sm:$0xff] %v5177_v6  ;;  %1015 = vmatprep.mubr.f32.mxu0 %v5177_v6  ;;  %4192 = vmatpush1.bf16.msra.mxu0 %v5161_v61 }
 0x10f   : > { %4193 = vmatprep.subr.bf16.mxu0 %v7338_v12 }
 0x111   : > { %1016 = vmatmul.mubr.f32.gmra.mrb[78].mxu0 %v5174_v5 }
 0x112   : > { %v5198_v2 = vpop.f32.mrb[16].mxu0  ;;  %4195 = vmatpush1.bf16.msra.mxu0 %v5182_v7  ;;  %v5271_v7 = vpop.f32.mrb[12].mxu1 }
 0x113   : > { %7581 = vst [vmem:[#allocation32_spill] sm:$0xff] %v5198_v2  ;;  %v5205_v27 = vpop.f32.mrb[17].mxu0  ;;  %4196 = vmatprep.subr.bf16.mxu0 %v7338_v12 }
 0x114   : > { %7583 = vst [vmem:[#allocation34_spill] sm:$0xff] %v5205_v27  ;;  %v5214_v39 = vpop.f32.mrb[18].mxu0  ;;  %1020 = vmatprep.mubr.f32.mxu0 %v5205_v27  ;;  %v5273_v27 = vpop.f32.mrb[13].mxu1 }
 0x115   : > { %7584 = vst [vmem:[#allocation35_spill] sm:$0xff] %v5214_v39  ;;  %v5217_v40 = vpop.f32.mrb[19].mxu0  ;;  %1021 = vmatmul.mubr.f32.gmra.mrb[80].mxu0 %v5198_v2  ;;  %v910_v2 = vld [vmem:[%s7325_s2 + $0x1d0] sm:$0xff] }
 0x116   : > { %7585 = vst [vmem:[#allocation36_spill] sm:$0xff] %v5217_v40  ;;  %1025 = vmatprep.mubr.f32.mxu0 %v5217_v40  ;;  %4198 = vmatpush1.bf16.msra.mxu0 %v5201_v20  ;;  %v906_v20 = vld [vmem:[%s7325_s2 + $0x1b0] sm:$0xff]  ;;  %v907_v40 = vld [vmem:[%s7325_s2 + $0x1b8] sm:$0xff] }
 0x117   : > { %4199 = vmatprep.subr.bf16.mxu0 %v7338_v12  ;;  %v5262_v53 = vpack.c.bf16 %v907_v40, %v906_v20 }
 0x119   : > { %1026 = vmatmul.mubr.f32.gmra.mrb[82].mxu0 %v5214_v39  ;;  %7592 = vst [vmem:[#allocation43_spill] sm:$0xff] %v5262_v53 }
 0x11a   : > { %v5238_v8 = vpop.f32.mrb[20].mxu0  ;;  %4201 = vmatpush1.bf16.msra.mxu0 %v5222_v46  ;;  %v908_v46 = vld [vmem:[%s7325_s2 + $0x1c0] sm:$0xff] }
 0x11b   : > { %7587 = vst [vmem:[#allocation38_spill] sm:$0xff] %v5238_v8  ;;  %v5245_v33 = vpop.f32.mrb[21].mxu0  ;;  %4202 = vmatprep.subr.bf16.mxu0 %v7338_v12 }
 0x11c   : > { %7589 = vst [vmem:[#allocation40_spill] sm:$0xff] %v5245_v33  ;;  %v5254_v39 = vpop.f32.mrb[22].mxu0  ;;  %1030 = vmatprep.mubr.f32.mxu0 %v5245_v33  ;;  %v909_v33 = vld [vmem:[%s7325_s2 + $0x1c8] sm:$0xff] }
 0x11d   : > { %7590 = vst [vmem:[#allocation41_spill] sm:$0xff] %v5254_v39  ;;  %v5257_v47 = vpop.f32.mrb[23].mxu0  ;;  %1031 = vmatmul.mubr.f32.gmra.mrb[84].mxu0 %v5238_v8  ;;  %v5281_v40 = vpack.c.bf16 %v909_v33, %v908_v46  ;;  %v7596_v8 = vmov 0.0|0.0  }
 0x11e   : > { %7591 = vst [vmem:[#allocation42_spill] sm:$0xff] %v5257_v47  ;;  %1035 = vmatprep.mubr.f32.mxu0 %v5257_v47  ;;  %4204 = vmatpush1.bf16.msra.mxu0 %v5241_v9  ;;  %v5276_v47 = vpop.f32.mrb[14].mxu1 }
 0x11f   : > { %4205 = vmatprep.subr.bf16.mxu0 %v7338_v12  ;;  %7594 = vst [vmem:[#allocation45_spill] sm:$0xff] %v5281_v40  ;;  %v5283_v12 = vpop.f32.mrb[15].mxu1 }
 0x120   : > { %v5311_v6 = vpop.f32.mrb[16].mxu1 }
 0x121   : > { %1036 = vmatmul.mubr.f32.gmra.mrb[86].mxu0 %v5254_v39  ;;  %v911_v39 = vld [vmem:[%s7325_s2 + $0x1d8] sm:$0xff]  ;;  %v5313_v5 = vpop.f32.mrb[17].mxu1 }
 0x122   : > { %v5278_v20 = vpop.f32.mrb[24].mxu0  ;;  %4207 = vmatpush1.bf16.msra.mxu0 %v5262_v53  ;;  %v5302_v33 = vpack.c.bf16 %v911_v39, %v910_v2  ;;  %v912_v53 = vld [vmem:[%s7325_s2 + $0x1e0] sm:$0xff] }
 0x123   : > { %7593 = vst [vmem:[#allocation44_spill] sm:$0xff] %v5278_v20  ;;  %v5285_v9 = vpop.f32.mrb[25].mxu0  ;;  %4208 = vmatprep.subr.bf16.mxu0 %v7596_v8 }
 0x124   : > { %7595 = vst [vmem:[#allocation46_spill] sm:$0xff] %v5285_v9  ;;  %v5294_v61 = vpop.f32.mrb[26].mxu0  ;;  %1040 = vmatprep.mubr.f32.mxu0 %v5285_v9  ;;  %7599 = vst [vmem:[#allocation49_spill] sm:$0xff] %v5302_v33  ;;  %v913_v9 = vld [vmem:[%s7325_s2 + $0x1e8] sm:$0xff] }
 0x125   : > { %7597 = vst [vmem:[#allocation47_spill] sm:$0xff] %v5294_v61  ;;  %v5297_v46 = vpop.f32.mrb[27].mxu0  ;;  %1041 = vmatmul.mubr.f32.gmra.mrb[88].mxu0 %v5278_v20  ;;  %v5321_v39 = vpack.c.bf16 %v913_v9, %v912_v53 }
 0x126   : > { %7598 = vst [vmem:[#allocation48_spill] sm:$0xff] %v5297_v46  ;;  %1045 = vmatprep.mubr.f32.mxu0 %v5297_v46  ;;  %4210 = vmatpush1.bf16.msra.mxu0 %v5281_v40  ;;  %v5316_v46 = vpop.f32.mrb[18].mxu1 }
 0x127   : > { %4211 = vmatprep.subr.bf16.mxu0 %v7596_v8  ;;  %7601 = vst [vmem:[#allocation51_spill] sm:$0xff] %v5321_v39  ;;  %v5323_v40 = vpop.f32.mrb[19].mxu1 }
 0x129   : > { %1046 = vmatmul.mubr.f32.gmra.mrb[90].mxu0 %v5294_v61  ;;  %v915_v61 = vld [vmem:[%s7325_s2 + $0x1f8] sm:$0xff] }
 0x12a   : > { %v5318_v2 = vpop.f32.mrb[28].mxu0  ;;  %4213 = vmatpush1.bf16.msra.mxu0 %v5302_v33  ;;  %v5342_v53 = vpack.c.bf16 %v915_v61, %v914_v52  ;;  %v5345_v33 = vpop.f32.mrb[20].mxu1 }
 0x12b   : > { %7600 = vst [vmem:[#allocation50_spill] sm:$0xff] %v5318_v2  ;;  %v5325_v20 = vpop.f32.mrb[29].mxu0  ;;  %4214 = vmatprep.subr.bf16.mxu0 %v7596_v8  ;;  %v5347_v60 = vpop.f32.mrb[21].mxu1 }
 0x12c   : > { %7602 = vst [vmem:[#allocation52_spill] sm:$0xff] %v5325_v20  ;;  %v5334_v0 = vpop.f32.mrb[30].mxu0  ;;  %1050 = vmatprep.mubr.f32.mxu0 %v5325_v20  ;;  %7605 = vst [vmem:[#allocation55_spill] sm:$0xff] %v5342_v53  ;;  %v5350_v43 = vpop.f32.mrb[22].mxu1 }
 0x12d   : > { %7603 = vst [vmem:[#allocation53_spill] sm:$0xff] %v5334_v0  ;;  %v5337_v9 = vpop.f32.mrb[31].mxu0  ;;  %1051 = vmatmul.mubr.f32.gmra.mrb[92].mxu0 %v5318_v2  ;;  %v5355_v2 = vpop.f32.mrb[23].mxu1 }
 0x12e   : > { %7604 = vst [vmem:[#allocation54_spill] sm:$0xff] %v5337_v9  ;;  %1055 = vmatprep.mubr.f32.mxu0 %v5337_v9  ;;  %4216 = vmatpush1.bf16.msra.mxu0 %v5321_v39  ;;  %v5367_v39 = vpop.f32.mrb[24].mxu1 }
 0x12f   : > { %4217 = vmatprep.subr.bf16.mxu0 %v7596_v8 }
 0x131   : > { %1056 = vmatmul.mubr.f32.gmra.mrb[94].mxu0 %v5334_v0  ;;  %v5369_v0 = vpop.f32.mrb[25].mxu1 }
 0x132   : > { %v5352_v20 = vpop.f32.mrb[32].mxu0  ;;  %4219 = vmatpush1.bf16.msra.mxu0 %v5342_v53  ;;  %v5372_v53 = vpop.f32.mrb[26].mxu1 }
 0x133   : > { %7606 = vst [vmem:[#allocation56_spill] sm:$0xff] %v5352_v20  ;;  %v5357_v9 = vpop.f32.mrb[33].mxu0  ;;  %4228 = vmatprep.subr.bf16.mxu0 %v7596_v8  ;;  %v5376_v49 = vpop.f32.mrb[27].mxu1 }
 0x134   : > { %7607 = vst [vmem:[#allocation57_spill] sm:$0xff] %v5357_v9  ;;  %v5360_v52 = vpop.f32.mrb[34].mxu0  ;;  %1060 = vmatprep.mubr.f32.mxu0 %v5357_v9 }
 0x135   : > { %7608 = vst [vmem:[#allocation58_spill] sm:$0xff] %v5360_v52  ;;  %v5363_v61 = vpop.f32.mrb[35].mxu0  ;;  %1061 = vmatmul.mubr.f32.gmra.mrb[96].mxu0 %v5352_v20 }
 0x136   : > { %7609 = vst [vmem:[#allocation59_spill] sm:$0xff] %v5363_v61  ;;  %1065 = vmatprep.mubr.f32.mxu0 %v5363_v61  ;;  %v5387_v61 = vpop.f32.mrb[28].mxu1 }
 0x139   : > { %1066 = vmatmul.mubr.f32.gmra.mrb[98].mxu0 %v5360_v52  ;;  %v5389_v52 = vpop.f32.mrb[29].mxu1 }
 0x13a   : > { %v5374_v50 = vpop.f32.mrb[36].mxu0  ;;  %7614 = vst [vmem:[#allocation64_spill] sm:$0xff] %v5389_v52  ;;  %v5392_v45 = vpop.f32.mrb[30].mxu1 }
 0x13b   : > { %7610 = vst [vmem:[#allocation60_spill] sm:$0xff] %v5374_v50  ;;  %v5378_v38 = vpop.f32.mrb[37].mxu0  ;;  %7615 = vst [vmem:[#allocation65_spill] sm:$0xff] %v5392_v45  ;;  %v5396_v29 = vpop.f32.mrb[31].mxu1 }
 0x13c   : > { %7611 = vst [vmem:[#allocation61_spill] sm:$0xff] %v5378_v38  ;;  %v5380_v9 = vpop.f32.mrb[38].mxu0  ;;  %1070 = vmatprep.mubr.f32.mxu0 %v5378_v38  ;;  %7617 = vst [vmem:[#allocation67_spill] sm:$0xff] %v5396_v29  ;;  %v5413_v35 = vpop.f32.mrb[32].mxu1 }
 0x13d   : > { %7612 = vst [vmem:[#allocation62_spill] sm:$0xff] %v5380_v9  ;;  %v5383_v20 = vpop.f32.mrb[39].mxu0  ;;  %1071 = vmatmul.mubr.f32.gmra.mrb[100].mxu0 %v5374_v50  ;;  %7621 = vst [vmem:[#allocation71_spill] sm:$0xff] %v5413_v35  ;;  %v5415_v31 = vpop.f32.mrb[33].mxu1 }
 0x13e   : > { %7613 = vst [vmem:[#allocation63_spill] sm:$0xff] %v5383_v20  ;;  %1075 = vmatprep.mubr.f32.mxu0 %v5383_v20  ;;  %v1367_v20 = vld [vmem:[%s7326_s3 + $0x8] sm:$0xff]  ;;  %7622 = vst [vmem:[#allocation72_spill] sm:$0xff] %v5415_v31 }
 0x141   : > { %1076 = vmatmul.mubr.f32.gmra.mrb[102].mxu0 %v5380_v9  ;;  %v1371_v9 = vld [vmem:[%s7326_s3 + $0x28] sm:$0xff] }
 0x142   : > { %v5394_v42 = vpop.f32.mrb[40].mxu0  ;;  %v4220_v24 = vpack.c.bf16 %v1371_v9, %v1367_v20 }
 0x143   : > { %7616 = vst [vmem:[#allocation66_spill] sm:$0xff] %v5394_v42  ;;  %v5398_v36 = vpop.f32.mrb[41].mxu0 }
 0x144   : > { %7618 = vst [vmem:[#allocation68_spill] sm:$0xff] %v5398_v36  ;;  %v5400_v38 = vpop.f32.mrb[42].mxu0  ;;  %1080 = vmatprep.mubr.f32.mxu0 %v5398_v36  ;;  %v5418_v36 = vpop.f32.mrb[34].mxu1  ;;  %4221 = vmatprep.subr.bf16.mxu1 %v4220_v24 }
 0x145   : > { %7619 = vst [vmem:[#allocation69_spill] sm:$0xff] %v5400_v38  ;;  %v5403_v50 = vpop.f32.mrb[43].mxu0  ;;  %1081 = vmatmul.mubr.f32.gmra.mrb[104].mxu0 %v5394_v42  ;;  %7623 = vst [vmem:[#allocation73_spill] sm:$0xff] %v5418_v36  ;;  %v1370_v42 = vld [vmem:[%s7326_s3 + $0x20] sm:$0xff]  ;;  %v5428_v17 = vpop.f32.mrb[35].mxu1 }
 0x146   : > { %7620 = vst [vmem:[#allocation70_spill] sm:$0xff] %v5403_v50  ;;  %1085 = vmatprep.mubr.f32.mxu0 %v5403_v50  ;;  %v1366_v50 = vld [vmem:[%s7326_s3] sm:$0xff]  ;;  %7625 = vst [vmem:[#allocation75_spill] sm:$0xff] %v5428_v17 }
 0x147   : > { %v4222_v20 = vpack.c.bf16 %v1370_v42, %v1366_v50 }
 0x149   : > { %1086 = vmatmul.mubr.f32.gmra.mrb[106].mxu0 %v5400_v38  ;;  %4223 = vmatpush1.bf16.msra.mxu1 %v4222_v20  ;;  %v5439_v38 = vpop.f32.mrb[36].mxu1 }
 0x14a   : > { %v5426_v28 = vpop.f32.mrb[44].mxu0  ;;  %7629 = vst [vmem:[#allocation79_spill] sm:$0xff] %v5439_v38  ;;  %v5441_v22 = vpop.f32.mrb[37].mxu1 }
 0x14b   : > { %7624 = vst [vmem:[#allocation74_spill] sm:$0xff] %v5426_v28  ;;  %v5430_v9 = vpop.f32.mrb[45].mxu0  ;;  %7630 = vst [vmem:[#allocation80_spill] sm:$0xff] %v5441_v22  ;;  %v5444_v42 = vpop.f32.mrb[38].mxu1 }
 0x14c   : > { %7626 = vst [vmem:[#allocation76_spill] sm:$0xff] %v5430_v9  ;;  %v5432_v23 = vpop.f32.mrb[46].mxu0  ;;  %1090 = vmatprep.mubr.f32.mxu0 %v5430_v9  ;;  %7631 = vst [vmem:[#allocation81_spill] sm:$0xff] %v5444_v42  ;;  %v5448_v19 = vpop.f32.mrb[39].mxu1 }
 0x14d   : > { %7627 = vst [vmem:[#allocation77_spill] sm:$0xff] %v5432_v23  ;;  %v5435_v24 = vpop.f32.mrb[47].mxu0  ;;  %1091 = vmatmul.mubr.f32.gmra.mrb[108].mxu0 %v5426_v28  ;;  %7633 = vst [vmem:[#allocation83_spill] sm:$0xff] %v5448_v19 }
 0x14e   : > { %7628 = vst [vmem:[#allocation78_spill] sm:$0xff] %v5435_v24  ;;  %1095 = vmatprep.mubr.f32.mxu0 %v5435_v24  ;;  %v5459_v24 = vpop.f32.mrb[40].mxu1 }
 0x14f   : > { %7637 = vst [vmem:[#allocation87_spill] sm:$0xff] %v5459_v24 }
 0x151   : > { %1096 = vmatmul.mubr.f32.gmra.mrb[110].mxu0 %v5432_v23  ;;  %v5461_v23 = vpop.f32.mrb[41].mxu1 }
 0x152   : > { %v5446_v50 = vpop.f32.mrb[48].mxu0  ;;  %7638 = vst [vmem:[#allocation88_spill] sm:$0xff] %v5461_v23  ;;  %v5464_v16 = vpop.f32.mrb[42].mxu1 }
 0x153   : > { %7632 = vst [vmem:[#allocation82_spill] sm:$0xff] %v5446_v50  ;;  %v5450_v9 = vpop.f32.mrb[49].mxu0  ;;  %7639 = vst [vmem:[#allocation89_spill] sm:$0xff] %v5464_v16  ;;  %v5468_v19 = vpop.f32.mrb[43].mxu1 }
 0x154   : > { %7634 = vst [vmem:[#allocation84_spill] sm:$0xff] %v5450_v9  ;;  %v5452_v20 = vpop.f32.mrb[50].mxu0  ;;  %1100 = vmatprep.mubr.f32.mxu0 %v5450_v9  ;;  %7641 = vst [vmem:[#allocation91_spill] sm:$0xff] %v5468_v19 }
 0x155   : > { %7635 = vst [vmem:[#allocation85_spill] sm:$0xff] %v5452_v20  ;;  %v5455_v28 = vpop.f32.mrb[51].mxu0  ;;  %1101 = vmatmul.mubr.f32.gmra.mrb[112].mxu0 %v5446_v50 }
 0x156   : > { %7636 = vst [vmem:[#allocation86_spill] sm:$0xff] %v5455_v28  ;;  %1105 = vmatprep.mubr.f32.mxu0 %v5455_v28  ;;  %v5479_v28 = vpop.f32.mrb[44].mxu1 }
 0x157   : > { %7645 = vst [vmem:[#allocation95_spill] sm:$0xff] %v5479_v28 }
 0x159   : > { %1106 = vmatmul.mubr.f32.gmra.mrb[114].mxu0 %v5452_v20  ;;  %v5481_v20 = vpop.f32.mrb[45].mxu1 }
 0x15a   : > { %v5466_v42 = vpop.f32.mrb[52].mxu0  ;;  %7646 = vst [vmem:[#allocation96_spill] sm:$0xff] %v5481_v20  ;;  %v5484_v16 = vpop.f32.mrb[46].mxu1 }
 0x15b   : > { %7640 = vst [vmem:[#allocation90_spill] sm:$0xff] %v5466_v42  ;;  %v5470_v38 = vpop.f32.mrb[53].mxu0  ;;  %7647 = vst [vmem:[#allocation97_spill] sm:$0xff] %v5484_v16  ;;  %v5488_v24 = vpop.f32.mrb[47].mxu1 }
 0x15c   : > { %7642 = vst [vmem:[#allocation92_spill] sm:$0xff] %v5470_v38  ;;  %v5472_v9 = vpop.f32.mrb[54].mxu0  ;;  %1110 = vmatprep.mubr.f32.mxu0 %v5470_v38  ;;  %7649 = vst [vmem:[#allocation99_spill] sm:$0xff] %v5488_v24 }
 0x15d   : > { %7643 = vst [vmem:[#allocation93_spill] sm:$0xff] %v5472_v9  ;;  %v5475_v50 = vpop.f32.mrb[55].mxu0  ;;  %1111 = vmatmul.mubr.f32.gmra.mrb[116].mxu0 %v5466_v42 }
 0x15e   : > { %7644 = vst [vmem:[#allocation94_spill] sm:$0xff] %v5475_v50  ;;  %1115 = vmatprep.mubr.f32.mxu0 %v5475_v50  ;;  %v5499_v50 = vpop.f32.mrb[48].mxu1 }
 0x15f   : > { %7653 = vst [vmem:[#allocation103_spill] sm:$0xff] %v5499_v50 }
 0x161   : > { %1116 = vmatmul.mubr.f32.gmra.mrb[118].mxu0 %v5472_v9  ;;  %v5501_v9 = vpop.f32.mrb[49].mxu1 }
 0x162   : > { %v5486_v19 = vpop.f32.mrb[56].mxu0  ;;  %7654 = vst [vmem:[#allocation104_spill] sm:$0xff] %v5501_v9  ;;  %v5504_v16 = vpop.f32.mrb[50].mxu1 }
 0x163   : > { %7648 = vst [vmem:[#allocation98_spill] sm:$0xff] %v5486_v19  ;;  %v5490_v23 = vpop.f32.mrb[57].mxu0  ;;  %7655 = vst [vmem:[#allocation105_spill] sm:$0xff] %v5504_v16  ;;  %v5508_v28 = vpop.f32.mrb[51].mxu1 }
 0x164   : > { %7650 = vst [vmem:[#allocation100_spill] sm:$0xff] %v5490_v23  ;;  %v5492_v38 = vpop.f32.mrb[58].mxu0  ;;  %1120 = vmatprep.mubr.f32.mxu0 %v5490_v23  ;;  %7656 = vst [vmem:[#allocation106_spill] sm:$0xff] %v5508_v28 }
 0x165   : > { %7651 = vst [vmem:[#allocation101_spill] sm:$0xff] %v5492_v38  ;;  %v5495_v42 = vpop.f32.mrb[59].mxu0  ;;  %1121 = vmatmul.mubr.f32.gmra.mrb[120].mxu0 %v5486_v19 }
 0x166   : > { %7652 = vst [vmem:[#allocation102_spill] sm:$0xff] %v5495_v42  ;;  %1125 = vmatprep.mubr.f32.mxu0 %v5495_v42  ;;  %v5519_v42 = vpop.f32.mrb[52].mxu1 }
 0x167   : > { %7660 = vst [vmem:[#allocation110_spill] sm:$0xff] %v5519_v42 }
 0x169   : > { %1126 = vmatmul.mubr.f32.gmra.mrb[122].mxu0 %v5492_v38  ;;  %v5521_v38 = vpop.f32.mrb[53].mxu1 }
 0x16a   : > { %v5506_v24 = vpop.f32.mrb[60].mxu0  ;;  %7661 = vst [vmem:[#allocation111_spill] sm:$0xff] %v5521_v38  ;;  %v5524_v16 = vpop.f32.mrb[54].mxu1 }
 0x16b   : > { %v5510_v20 = vpop.f32.mrb[61].mxu0  ;;  %7662 = vst [vmem:[#allocation112_spill] sm:$0xff] %v5524_v16  ;;  %v5527_v28 = vpop.f32.mrb[55].mxu1 }
 0x16c   : > { %7657 = vst [vmem:[#allocation107_spill] sm:$0xff] %v5510_v20  ;;  %v5512_v23 = vpop.f32.mrb[62].mxu0  ;;  %1130 = vmatprep.mubr.f32.mxu0 %v5510_v20  ;;  %7663 = vst [vmem:[#allocation113_spill] sm:$0xff] %v5527_v28  ;;  %v5532_v20 = vpop.f32.mrb[56].mxu1 }
 0x16d   : > { %7658 = vst [vmem:[#allocation108_spill] sm:$0xff] %v5512_v23  ;;  %v5515_v19 = vpop.f32.mrb[63].mxu0  ;;  %1131 = vmatmul.mubr.f32.gmra.mrb[124].mxu0 %v5506_v24  ;;  %7664 = vst [vmem:[#allocation114_spill] sm:$0xff] %v5532_v20 }
 0x16e   : > { %7659 = vst [vmem:[#allocation109_spill] sm:$0xff] %v5515_v19  ;;  %1135 = vmatprep.mubr.f32.mxu0 %v5515_v19  ;;  %v5535_v19 = vpop.f32.mrb[57].mxu1 }
 0x16f   : > { %7665 = vst [vmem:[#allocation115_spill] sm:$0xff] %v5535_v19 }
 0x171   : > { %1136 = vmatmul.mubr.f32.gmra.mrb[126].mxu0 %v5512_v23  ;;  %v5538_v23 = vpop.f32.mrb[58].mxu1 }
 0x172   : > { %1205 = vmatprep.mubr.f32.mxu0 %v5153_v57  ;;  %7666 = vst [vmem:[#allocation116_spill] sm:$0xff] %v5538_v23  ;;  %v5541_v57 = vpop.f32.mrb[59].mxu1 }
 0x173   : > { %7667 = vst [vmem:[#allocation117_spill] sm:$0xff] %v5541_v57 }
 0x175   : > { %1206 = vmatmul.mubr.f32.vlgmr.msra.gmra.mrb[64].mxu0 %v5151_v56 }
 0x176   : > { %1210 = vmatprep.mubr.f32.mxu0 %v5163_v63  ;;  %4230 = vmatpush1.bf16.msra.mxu0 %v4817_v11  ;;  %v5548_v11 = vpop.f32.mrb[60].mxu1 }
 0x177   : > { %4231 = vmatprep.subr.bf16.mxu0 %v7596_v8  ;;  %7668 = vst [vmem:[#allocation118_spill] sm:$0xff] %v5548_v11  ;;  %v5551_v63 = vpop.f32.mrb[61].mxu1 }
 0x178   : > { %7669 = vst [vmem:[#allocation119_spill] sm:$0xff] %v5551_v63 }
 0x179   : > { %1211 = vmatmul.mubr.f32.gmra.mrb[66].mxu0 %v5156_v59 }
 0x17a   : > { %1215 = vmatprep.mubr.f32.mxu0 %v5193_v13  ;;  %4233 = vmatpush1.bf16.msra.mxu0 %v4826_v14  ;;  %v5554_v13 = vpop.f32.mrb[62].mxu1 }
 0x17b   : > { %4234 = vmatprep.subr.bf16.mxu0 %v7596_v8  ;;  %7670 = vst [vmem:[#allocation120_spill] sm:$0xff] %v5554_v13  ;;  %v5557_v14 = vpop.f32.mrb[63].mxu1 }
 0x17c   : > { %7671 = vst [vmem:[#allocation121_spill] sm:$0xff] %v5557_v14 }
 0x17d   : > { %1216 = vmatmul.mubr.f32.gmra.mrb[68].mxu0 %v5191_v10 }
 0x17e   : > { %1220 = vmatprep.mubr.f32.mxu0 %v5203_v26  ;;  %4236 = vmatpush1.bf16.msra.mxu0 %v4837_v18  ;;  %v7672_v18 = vld [vmem:[#allocation79_spill] sm:$0xff] }
 0x17f   : > { %4237 = vmatprep.subr.bf16.mxu0 %v7596_v8 }
 0x181   : > { %1221 = vmatmul.mubr.f32.gmra.mrb[70].mxu0 %v5196_v15 }
 0x182   : > { %1225 = vmatprep.mubr.f32.mxu0 %v5233_v3  ;;  %4239 = vmatpush1.bf16.msra.mxu0 %v4849_v21  ;;  %v7673_v21 = vld [vmem:[#allocation83_spill] sm:$0xff] }
 0x183   : > { %4240 = vmatprep.subr.bf16.mxu0 %v7596_v8 }
 0x185   : > { %1226 = vmatmul.mubr.f32.gmra.mrb[72].mxu0 %v5231_v54 }
 0x186   : > { %1230 = vmatprep.mubr.f32.mxu0 %v5243_v32  ;;  %4242 = vmatpush1.bf16.msra.mxu0 %v4860_v25  ;;  %v7674_v25 = vld [vmem:[#allocation81_spill] sm:$0xff] }
 0x187   : > { %4243 = vmatprep.subr.bf16.mxu0 %v7596_v8 }
 0x189   : > { %1231 = vmatmul.mubr.f32.gmra.mrb[74].mxu0 %v5236_v4 }
 0x18a   : > { %1235 = vmatprep.mubr.f32.mxu0 %v5273_v27  ;;  %4245 = vmatpush1.bf16.msra.mxu0 %v4878_v30  ;;  %v7675_v30 = vld [vmem:[#allocation88_spill] sm:$0xff] }
 0x18b   : > { %4246 = vmatprep.subr.bf16.mxu0 %v7596_v8 }
 0x18d   : > { %1236 = vmatmul.mubr.f32.gmra.mrb[76].mxu0 %v5271_v7 }
 0x18e   : > { %1240 = vmatprep.mubr.f32.mxu0 %v5283_v12  ;;  %4248 = vmatpush1.bf16.msra.mxu0 %v4890_v34  ;;  %v7676_v34 = vld [vmem:[#allocation87_spill] sm:$0xff] }
 0x18f   : > { %4249 = vmatprep.subr.bf16.mxu0 %v7596_v8 }
 0x191   : > { %1241 = vmatmul.mubr.f32.gmra.mrb[78].mxu0 %v5276_v47 }
 0x192   : > { %1245 = vmatprep.mubr.f32.mxu0 %v5313_v5  ;;  %4251 = vmatpush1.bf16.msra.mxu0 %v4903_v37  ;;  %v7677_v37 = vld [vmem:[#allocation91_spill] sm:$0xff] }
 0x193   : > { %4252 = vmatprep.subr.bf16.mxu0 %v7596_v8 }
 0x195   : > { %1246 = vmatmul.mubr.f32.gmra.mrb[80].mxu0 %v5311_v6 }
 0x196   : > { %1250 = vmatprep.mubr.f32.mxu0 %v5323_v40  ;;  %4254 = vmatpush1.bf16.msra.mxu0 %v4915_v41  ;;  %v7427_v41 = vmov 0.0  }
 0x197   : > { %4255 = vmatprep.subr.bf16.mxu0 %v7596_v8  ;;  %1535 = vmatprep.mubr.f32.mxu1 %v7427_v41  ;;  %v7683_v41 = vld [vmem:[#allocation106_spill] sm:$0xff] }
 0x199   : > { %1251 = vmatmul.mubr.f32.gmra.mrb[82].mxu0 %v5316_v46 }
 0x19a   : > { %1255 = vmatprep.mubr.f32.mxu0 %v5347_v60  ;;  %4257 = vmatpush1.bf16.msra.mxu0 %v4928_v44  ;;  %v1369_v44 = vld [vmem:[%s7326_s3 + $0x18] sm:$0xff] }
 0x19b   : > { %4258 = vmatprep.subr.bf16.mxu0 %v7596_v8 }
 0x19d   : > { %1256 = vmatmul.mubr.f32.gmra.mrb[84].mxu0 %v5345_v33 }
 0x19e   : > { %1260 = vmatprep.mubr.f32.mxu0 %v5355_v2  ;;  %4260 = vmatpush1.bf16.msra.mxu0 %v4940_v48  ;;  %v1373_v48 = vld [vmem:[%s7326_s3 + $0x38] sm:$0xff] }
 0x19f   : > { %4261 = vmatprep.subr.bf16.mxu0 %v7596_v8 }
 0x1a1   : > { %1261 = vmatmul.mubr.f32.gmra.mrb[86].mxu0 %v5350_v43 }
 0x1a2   : > { %1265 = vmatprep.mubr.f32.mxu0 %v5369_v0  ;;  %4263 = vmatpush1.bf16.msra.mxu0 %v4953_v51  ;;  %v7678_v51 = vld [vmem:[#allocation89_spill] sm:$0xff] }
 0x1a3   : > { %4264 = vmatprep.subr.bf16.mxu0 %v7596_v8 }
 0x1a5   : > { %1266 = vmatmul.mubr.f32.gmra.mrb[88].mxu0 %v5367_v39 }
 0x1a6   : > { %1270 = vmatprep.mubr.f32.mxu0 %v5376_v49  ;;  %4266 = vmatpush1.bf16.msra.mxu0 %v4965_v55  ;;  %v4224_v55 = vpack.c.bf16 %v1373_v48, %v1369_v44  ;;  %v1368_v44 = vld [vmem:[%s7326_s3 + $0x10] sm:$0xff] }
 0x1a7   : > { %4267 = vmatprep.subr.bf16.mxu0 %v7596_v8  ;;  %v1372_v48 = vld [vmem:[%s7326_s3 + $0x30] sm:$0xff] }
 0x1a8   : > { %4225 = vmatprep.subr.bf16.mxu1 %v4224_v55  ;;  %v4226_v55 = vpack.c.bf16 %v1372_v48, %v1368_v44 }
 0x1a9   : > { %1271 = vmatmul.mubr.f32.gmra.mrb[90].mxu0 %v5372_v53 }
 0x1aa   : > { %1275 = vmatprep.mubr.f32.mxu0 %v5389_v52  ;;  %4269 = vmatpush1.bf16.msra.mxu0 %v4978_v58  ;;  %v7679_v58 = vld [vmem:[#allocation96_spill] sm:$0xff] }
 0x1ab   : > { %4270 = vmatprep.subr.bf16.mxu0 %v7596_v8 }
 0x1ad   : > { %1276 = vmatmul.mubr.f32.gmra.mrb[92].mxu0 %v5387_v61 }
 0x1ae   : > { %1280 = vmatprep.mubr.f32.mxu0 %v5396_v29  ;;  %4272 = vmatpush1.bf16.msra.mxu0 %v4990_v62  ;;  %v7680_v62 = vld [vmem:[#allocation95_spill] sm:$0xff] }
 0x1af   : > { %4273 = vmatprep.subr.bf16.mxu0 %v7596_v8 }
 0x1b1   : > { %1281 = vmatmul.mubr.f32.gmra.mrb[94].mxu0 %v5392_v45 }
 0x1b2   : > { %1285 = vmatprep.mubr.f32.mxu0 %v5415_v31  ;;  %4275 = vmatpush1.bf16.msra.mxu0 %v5003_v1  ;;  %v7681_v1 = vld [vmem:[#allocation99_spill] sm:$0xff] }
 0x1b3   : > { %4276 = vmatprep.subr.bf16.mxu0 %v7596_v8 }
 0x1b5   : > { %1286 = vmatmul.mubr.f32.gmra.mrb[96].mxu0 %v5413_v35 }
 0x1b6   : > { %1290 = vmatprep.mubr.f32.mxu0 %v5428_v17 }
 0x1b9   : > { %1291 = vmatmul.mubr.f32.gmra.mrb[98].mxu0 %v5418_v36 }
 0x1ba   : > { %1295 = vmatprep.mubr.f32.mxu0 %v5441_v22 }
 0x1bd   : > { %1296 = vmatmul.mubr.f32.gmra.mrb[100].mxu0 %v7672_v18 }
 0x1be   : > { %1300 = vmatprep.mubr.f32.mxu0 %v7673_v21 }
 0x1c1   : > { %1301 = vmatmul.mubr.f32.gmra.mrb[102].mxu0 %v7674_v25 }
 0x1c2   : > { %1305 = vmatprep.mubr.f32.mxu0 %v7675_v30  ;;  %v7684_v30 = vld [vmem:[#allocation105_spill] sm:$0xff] }
 0x1c5   : > { %1306 = vmatmul.mubr.f32.gmra.mrb[104].mxu0 %v7676_v34 }
 0x1c6   : > { %1310 = vmatprep.mubr.f32.mxu0 %v7677_v37  ;;  %v7682_v37 = vld [vmem:[#allocation97_spill] sm:$0xff] }
 0x1c9   : > { %1311 = vmatmul.mubr.f32.gmra.mrb[106].mxu0 %v7678_v51 }
 0x1ca   : > { %1315 = vmatprep.mubr.f32.mxu0 %v7679_v58 }
 0x1cd   : > { %1316 = vmatmul.mubr.f32.gmra.mrb[108].mxu0 %v7680_v62 }
 0x1ce   : > { %1320 = vmatprep.mubr.f32.mxu0 %v7681_v1 }
 0x1d1   : > { %1321 = vmatmul.mubr.f32.gmra.mrb[110].mxu0 %v7682_v37 }
 0x1d2   : > { %1325 = vmatprep.mubr.f32.mxu0 %v5501_v9 }
 0x1d5   : > { %1326 = vmatmul.mubr.f32.gmra.mrb[112].mxu0 %v5499_v50 }
 0x1d6   : > { %1330 = vmatprep.mubr.f32.mxu0 %v7683_v41 }
 0x1d9   : > { %1331 = vmatmul.mubr.f32.gmra.mrb[114].mxu0 %v7684_v30 }
 0x1da   : > { %1335 = vmatprep.mubr.f32.mxu0 %v5521_v38 }
 0x1dd   : > { %1336 = vmatmul.mubr.f32.gmra.mrb[116].mxu0 %v5519_v42 }
 0x1de   : > { %1340 = vmatprep.mubr.f32.mxu0 %v5527_v28 }
 0x1e1   : > { %1341 = vmatmul.mubr.f32.gmra.mrb[118].mxu0 %v5524_v16 }
 0x1e2   : > { %1345 = vmatprep.mubr.f32.mxu0 %v5535_v19 }
 0x1e5   : > { %1346 = vmatmul.mubr.f32.gmra.mrb[120].mxu0 %v5532_v20 }
 0x1e6   : > { %1350 = vmatprep.mubr.f32.mxu0 %v5541_v57 }
 0x1e9   : > { %1351 = vmatmul.mubr.f32.gmra.mrb[122].mxu0 %v5538_v23 }
 0x1ea   : > { %1355 = vmatprep.mubr.f32.mxu0 %v5551_v63 }
 0x1ed   : > { %1356 = vmatmul.mubr.f32.gmra.mrb[124].mxu0 %v5548_v11 }
 0x1ee   : > { %1360 = vmatprep.mubr.f32.mxu0 %v5557_v14  ;;  %v7685_v14 = vmov 0.0  }
 0x1f1   : > { %1361 = vmatmul.mubr.f32.gmra.mrb[126].mxu0 %v5554_v13 }
 0x248   : > { %v5653_v57 = vpop.f32.mrb[64].mxu0 }
 0x249   : > { %v1209_v23 = vpop.f32.mrb[65].mxu0  ;;  %3891 = vmatmul.mubr.msk.f32.vlgmr.msra.gmra.mrb[64].mxu1 %vm1374_vm1, %v5653_v57 }
 0x24a   : > { %4227 = vmatpush1.bf16.msra.mxu1 %v4226_v55  ;;  %1541 = vmatprep.mubr.f32.mxu1 %v7685_v14 }
 0x24c   : > { %v5658_v13 = vpop.f32.mrb[66].mxu0 }
 0x24d   : > { %v1214_v63 = vpop.f32.mrb[67].mxu0  ;;  %3892 = vmatmul.mubr.msk.f32.gmra.mrb[66].mxu1 %vm1374_vm1, %v5658_v13 }
 0x24e   : > { %1547 = vmatprep.mubr.f32.mxu1 %v7685_v14 }
 0x250   : > { %v5663_v11 = vpop.f32.mrb[68].mxu0 }
 0x251   : > { %v1219_v44 = vpop.f32.mrb[69].mxu0  ;;  %3893 = vmatmul.mubr.msk.f32.gmra.mrb[68].mxu1 %vm1374_vm1, %v5663_v11 }
 0x252   : > { %1553 = vmatprep.mubr.f32.mxu1 %v7685_v14 }
 0x254   : > { %v5668_v23 = vpop.f32.mrb[70].mxu0 }
 0x255   : > { %v1224_v48 = vpop.f32.mrb[71].mxu0  ;;  %3894 = vmatmul.mubr.msk.f32.gmra.mrb[70].mxu1 %vm1374_vm1, %v5668_v23 }
 0x256   : > { %1559 = vmatprep.mubr.f32.mxu1 %v7685_v14 }
 0x258   : > { %v5673_v63 = vpop.f32.mrb[72].mxu0 }
 0x259   : > { %v1229_v55 = vpop.f32.mrb[73].mxu0  ;;  %3895 = vmatmul.mubr.msk.f32.gmra.mrb[72].mxu1 %vm1374_vm1, %v5673_v63 }
 0x25a   : > { %1565 = vmatprep.mubr.f32.mxu1 %v7685_v14 }
 0x25c   : > { %v5678_v44 = vpop.f32.mrb[74].mxu0 }
 0x25d   : > { %v1234_v19 = vpop.f32.mrb[75].mxu0  ;;  %3896 = vmatmul.mubr.msk.f32.gmra.mrb[74].mxu1 %vm1374_vm1, %v5678_v44 }
 0x25e   : > { %1571 = vmatprep.mubr.f32.mxu1 %v7685_v14 }
 0x260   : > { %v5683_v48 = vpop.f32.mrb[76].mxu0 }
 0x261   : > { %v1239_v20 = vpop.f32.mrb[77].mxu0  ;;  %3897 = vmatmul.mubr.msk.f32.gmra.mrb[76].mxu1 %vm1374_vm1, %v5683_v48 }
 0x262   : > { %1577 = vmatprep.mubr.f32.mxu1 %v7685_v14 }
 0x264   : > { %v5688_v55 = vpop.f32.mrb[78].mxu0 }
 0x265   : > { %v1244_v28 = vpop.f32.mrb[79].mxu0  ;;  %3898 = vmatmul.mubr.msk.f32.gmra.mrb[78].mxu1 %vm1374_vm1, %v5688_v55 }
 0x266   : > { %1583 = vmatprep.mubr.f32.mxu1 %v7685_v14 }
 0x268   : > { %v5693_v19 = vpop.f32.mrb[80].mxu0 }
 0x269   : > { %v1249_v16 = vpop.f32.mrb[81].mxu0  ;;  %3899 = vmatmul.mubr.msk.f32.gmra.mrb[80].mxu1 %vm1374_vm1, %v5693_v19 }
 0x26a   : > { %1589 = vmatprep.mubr.f32.mxu1 %v7685_v14 }
 0x26c   : > { %v5698_v20 = vpop.f32.mrb[82].mxu0 }
 0x26d   : > { %v1254_v38 = vpop.f32.mrb[83].mxu0  ;;  %3900 = vmatmul.mubr.msk.f32.gmra.mrb[82].mxu1 %vm1374_vm1, %v5698_v20 }
 0x26e   : > { %1595 = vmatprep.mubr.f32.mxu1 %v7685_v14 }
 0x270   : > { %v5703_v28 = vpop.f32.mrb[84].mxu0 }
 0x271   : > { %v1259_v42 = vpop.f32.mrb[85].mxu0  ;;  %3901 = vmatmul.mubr.msk.f32.gmra.mrb[84].mxu1 %vm1374_vm1, %v5703_v28 }
 0x272   : > { %1601 = vmatprep.mubr.f32.mxu1 %v7685_v14 }
 0x274   : > { %v5708_v16 = vpop.f32.mrb[86].mxu0 }
 0x275   : > { %v1264_v41 = vpop.f32.mrb[87].mxu0  ;;  %3902 = vmatmul.mubr.msk.f32.gmra.mrb[86].mxu1 %vm1374_vm1, %v5708_v16 }
 0x276   : > { %1607 = vmatprep.mubr.f32.mxu1 %v7685_v14 }
 0x278   : > { %v5713_v38 = vpop.f32.mrb[88].mxu0 }
 0x279   : > { %v1269_v30 = vpop.f32.mrb[89].mxu0  ;;  %3903 = vmatmul.mubr.msk.f32.gmra.mrb[88].mxu1 %vm1374_vm1, %v5713_v38 }
 0x27a   : > { %1613 = vmatprep.mubr.f32.mxu1 %v7685_v14 }
 0x27c   : > { %v5718_v42 = vpop.f32.mrb[90].mxu0 }
 0x27d   : > { %v1274_v9 = vpop.f32.mrb[91].mxu0  ;;  %3904 = vmatmul.mubr.msk.f32.gmra.mrb[90].mxu1 %vm1374_vm1, %v5718_v42 }
 0x27e   : > { %1619 = vmatprep.mubr.f32.mxu1 %v7685_v14 }
 0x280   : > { %v5723_v41 = vpop.f32.mrb[92].mxu0 }
 0x281   : > { %v1279_v50 = vpop.f32.mrb[93].mxu0  ;;  %3905 = vmatmul.mubr.msk.f32.gmra.mrb[92].mxu1 %vm1374_vm1, %v5723_v41 }
 0x282   : > { %1625 = vmatprep.mubr.f32.mxu1 %v7685_v14 }
 0x284   : > { %v5728_v30 = vpop.f32.mrb[94].mxu0 }
 0x285   : > { %v1284_v1 = vpop.f32.mrb[95].mxu0  ;;  %3906 = vmatmul.mubr.msk.f32.gmra.mrb[94].mxu1 %vm1374_vm1, %v5728_v30 }
 0x286   : > { %1631 = vmatprep.mubr.f32.mxu1 %v7685_v14 }
 0x288   : > { %v5733_v9 = vpop.f32.mrb[96].mxu0 }
 0x289   : > { %v1289_v37 = vpop.f32.mrb[97].mxu0  ;;  %3907 = vmatmul.mubr.msk.f32.gmra.mrb[96].mxu1 %vm1374_vm1, %v5733_v9 }
 0x28a   : > { %1637 = vmatprep.mubr.f32.mxu1 %v7685_v14 }
 0x28c   : > { %v5738_v50 = vpop.f32.mrb[98].mxu0 }
 0x28d   : > { %v1294_v58 = vpop.f32.mrb[99].mxu0  ;;  %3908 = vmatmul.mubr.msk.f32.gmra.mrb[98].mxu1 %vm1374_vm1, %v5738_v50 }
 0x28e   : > { %1643 = vmatprep.mubr.f32.mxu1 %v7685_v14 }
 0x290   : > { %v5743_v1 = vpop.f32.mrb[100].mxu0 }
 0x291   : > { %v1299_v62 = vpop.f32.mrb[101].mxu0  ;;  %3909 = vmatmul.mubr.msk.f32.gmra.mrb[100].mxu1 %vm1374_vm1, %v5743_v1 }
 0x292   : > { %1649 = vmatprep.mubr.f32.mxu1 %v7685_v14 }
 0x294   : > { %v5748_v37 = vpop.f32.mrb[102].mxu0 }
 0x295   : > { %v1304_v51 = vpop.f32.mrb[103].mxu0  ;;  %3910 = vmatmul.mubr.msk.f32.gmra.mrb[102].mxu1 %vm1374_vm1, %v5748_v37 }
 0x296   : > { %1655 = vmatprep.mubr.f32.mxu1 %v7685_v14 }
 0x298   : > { %v5753_v58 = vpop.f32.mrb[104].mxu0 }
 0x299   : > { %v1309_v34 = vpop.f32.mrb[105].mxu0  ;;  %3911 = vmatmul.mubr.msk.f32.gmra.mrb[104].mxu1 %vm1374_vm1, %v5753_v58 }
 0x29a   : > { %1661 = vmatprep.mubr.f32.mxu1 %v7685_v14 }
 0x29c   : > { %v5758_v62 = vpop.f32.mrb[106].mxu0 }
 0x29d   : > { %v1314_v21 = vpop.f32.mrb[107].mxu0  ;;  %3912 = vmatmul.mubr.msk.f32.gmra.mrb[106].mxu1 %vm1374_vm1, %v5758_v62 }
 0x29e   : > { %1667 = vmatprep.mubr.f32.mxu1 %v7685_v14 }
 0x2a0   : > { %v5763_v51 = vpop.f32.mrb[108].mxu0 }
 0x2a1   : > { %v1319_v25 = vpop.f32.mrb[109].mxu0  ;;  %3913 = vmatmul.mubr.msk.f32.gmra.mrb[108].mxu1 %vm1374_vm1, %v5763_v51 }
 0x2a2   : > { %1673 = vmatprep.mubr.f32.mxu1 %v7685_v14 }
 0x2a4   : > { %v5768_v34 = vpop.f32.mrb[110].mxu0 }
 0x2a5   : > { %v1324_v22 = vpop.f32.mrb[111].mxu0  ;;  %3914 = vmatmul.mubr.msk.f32.gmra.mrb[110].mxu1 %vm1374_vm1, %v5768_v34 }
 0x2a6   : > { %1679 = vmatprep.mubr.f32.mxu1 %v7685_v14 }
 0x2a8   : > { %v5773_v21 = vpop.f32.mrb[112].mxu0 }
 0x2a9   : > { %v1329_v18 = vpop.f32.mrb[113].mxu0  ;;  %3915 = vmatmul.mubr.msk.f32.gmra.mrb[112].mxu1 %vm1374_vm1, %v5773_v21 }
 0x2aa   : > { %1685 = vmatprep.mubr.f32.mxu1 %v7685_v14 }
 0x2ac   : > { %v5778_v25 = vpop.f32.mrb[114].mxu0 }
 0x2ad   : > { %v1334_v17 = vpop.f32.mrb[115].mxu0  ;;  %3916 = vmatmul.mubr.msk.f32.gmra.mrb[114].mxu1 %vm1374_vm1, %v5778_v25 }
 0x2ae   : > { %1691 = vmatprep.mubr.f32.mxu1 %v7685_v14 }
 0x2b0   : > { %v5783_v22 = vpop.f32.mrb[116].mxu0 }
 0x2b1   : > { %v1339_v36 = vpop.f32.mrb[117].mxu0  ;;  %3917 = vmatmul.mubr.msk.f32.gmra.mrb[116].mxu1 %vm1374_vm1, %v5783_v22 }
 0x2b2   : > { %1697 = vmatprep.mubr.f32.mxu1 %v7685_v14 }
 0x2b4   : > { %v5788_v18 = vpop.f32.mrb[118].mxu0 }
 0x2b5   : > { %v1344_v31 = vpop.f32.mrb[119].mxu0  ;;  %3918 = vmatmul.mubr.msk.f32.gmra.mrb[118].mxu1 %vm1374_vm1, %v5788_v18 }
 0x2b6   : > { %1703 = vmatprep.mubr.f32.mxu1 %v7685_v14 }
 0x2b8   : > { %v5793_v17 = vpop.f32.mrb[120].mxu0 }
 0x2b9   : > { %v1349_v35 = vpop.f32.mrb[121].mxu0  ;;  %3919 = vmatmul.mubr.msk.f32.gmra.mrb[120].mxu1 %vm1374_vm1, %v5793_v17 }
 0x2ba   : > { %1709 = vmatprep.mubr.f32.mxu1 %v7685_v14 }
 0x2bc   : > { %v5798_v36 = vpop.f32.mrb[122].mxu0 }
 0x2bd   : > { %v1354_v29 = vpop.f32.mrb[123].mxu0  ;;  %3920 = vmatmul.mubr.msk.f32.gmra.mrb[122].mxu1 %vm1374_vm1, %v5798_v36 }
 0x2be   : > { %1715 = vmatprep.mubr.f32.mxu1 %v7685_v14 }
 0x2c0   : > { %v5803_v31 = vpop.f32.mrb[124].mxu0 }
 0x2c1   : > { %v1359_v45 = vpop.f32.mrb[125].mxu0  ;;  %3921 = vmatmul.mubr.msk.f32.gmra.mrb[124].mxu1 %vm1374_vm1, %v5803_v31 }
 0x2c2   : > { %1721 = vmatprep.mubr.f32.mxu1 %v7685_v14  ;;  %v7686_v45 = vld [vmem:[#allocation5_spill] sm:$0xff] }
 0x2c4   : > { %v5808_v35 = vpop.f32.mrb[126].mxu0 }
 0x2c5   : > { %v1364_v52 = vpop.f32.mrb[127].mxu0  ;;  %3922 = vmatmul.mubr.msk.f32.gmra.mrb[126].mxu1 %vm1374_vm1, %v5808_v35 }
 0x2c6   : > { %1792 = vmatprep.mubr.f32.mxu1 %v7685_v14  ;;  %v7687_v52 = vld [vmem:[#allocation7_spill] sm:$0xff] }
 0x2c9   : > { %3923 = vmatmul.mubr.msk.f32.vlgmr.msra.gmra.mrb[128].mxu1 %vm1374_vm1, %v5653_v57 }
 0x2ca   : > { %1798 = vmatprep.mubr.f32.mxu1 %v7685_v14 }
 0x2cd   : > { %3924 = vmatmul.mubr.msk.f32.gmra.mrb[130].mxu1 %vm1374_vm1, %v5658_v13 }
 0x2ce   : > { %1804 = vmatprep.mubr.f32.mxu1 %v7685_v14 }
 0x2d1   : > { %3925 = vmatmul.mubr.msk.f32.gmra.mrb[132].mxu1 %vm1374_vm1, %v5663_v11 }
 0x2d2   : > { %1810 = vmatprep.mubr.f32.mxu1 %v7685_v14 }
 0x2d5   : > { %3926 = vmatmul.mubr.msk.f32.gmra.mrb[134].mxu1 %vm1374_vm1, %v5668_v23 }
 0x2d6   : > { %1816 = vmatprep.mubr.f32.mxu1 %v7685_v14 }
 0x2d9   : > { %3927 = vmatmul.mubr.msk.f32.gmra.mrb[136].mxu1 %vm1374_vm1, %v5673_v63 }
 0x2da   : > { %1822 = vmatprep.mubr.f32.mxu1 %v7685_v14 }
 0x2dd   : > { %3928 = vmatmul.mubr.msk.f32.gmra.mrb[138].mxu1 %vm1374_vm1, %v5678_v44 }
 0x2de   : > { %1828 = vmatprep.mubr.f32.mxu1 %v7685_v14 }
 0x2e1   : > { %3929 = vmatmul.mubr.msk.f32.gmra.mrb[140].mxu1 %vm1374_vm1, %v5683_v48  ;;  %v7688_v48 = vld [vmem:[#allocation8_spill] sm:$0xff] }
 0x2e2   : > { %1834 = vmatprep.mubr.f32.mxu1 %v7685_v14 }
 0x2e5   : > { %3930 = vmatmul.mubr.msk.f32.gmra.mrb[142].mxu1 %vm1374_vm1, %v5688_v55 }
 0x2e6   : > { %1840 = vmatprep.mubr.f32.mxu1 %v7685_v14 }
 0x2e9   : > { %3931 = vmatmul.mubr.msk.f32.gmra.mrb[144].mxu1 %vm1374_vm1, %v5693_v19 }
 0x2ea   : > { %1846 = vmatprep.mubr.f32.mxu1 %v7685_v14 }
 0x2ed   : > { %3932 = vmatmul.mubr.msk.f32.gmra.mrb[146].mxu1 %vm1374_vm1, %v5698_v20  ;;  %v7689_v20 = vld [vmem:[#allocation9_spill] sm:$0xff] }
 0x2ee   : > { %1852 = vmatprep.mubr.f32.mxu1 %v7685_v14 }
 0x2f1   : > { %3933 = vmatmul.mubr.msk.f32.gmra.mrb[148].mxu1 %vm1374_vm1, %v5703_v28 }
 0x2f2   : > { %1858 = vmatprep.mubr.f32.mxu1 %v7685_v14 }
 0x2f5   : > { %3934 = vmatmul.mubr.msk.f32.gmra.mrb[150].mxu1 %vm1374_vm1, %v5708_v16 }
 0x2f6   : > { %1864 = vmatprep.mubr.f32.mxu1 %v7685_v14 }
 0x2f9   : > { %3935 = vmatmul.mubr.msk.f32.gmra.mrb[152].mxu1 %vm1374_vm1, %v5713_v38  ;;  %v7690_v38 = vld [vmem:[#allocation6_spill] sm:$0xff] }
 0x2fa   : > { %1870 = vmatprep.mubr.f32.mxu1 %v7685_v14 }
 0x2fd   : > { %3936 = vmatmul.mubr.msk.f32.gmra.mrb[154].mxu1 %vm1374_vm1, %v5718_v42 }
 0x2fe   : > { %1876 = vmatprep.mubr.f32.mxu1 %v7685_v14 }
 0x301   : > { %3937 = vmatmul.mubr.msk.f32.gmra.mrb[156].mxu1 %vm1374_vm1, %v5723_v41 }
 0x302   : > { %1882 = vmatprep.mubr.f32.mxu1 %v7685_v14 }
 0x305   : > { %3938 = vmatmul.mubr.msk.f32.gmra.mrb[158].mxu1 %vm1374_vm1, %v5728_v30  ;;  %v7691_v30 = vld [vmem:[#allocation11_spill] sm:$0xff] }
 0x306   : > { %1888 = vmatprep.mubr.f32.mxu1 %v7685_v14 }
 0x309   : > { %3939 = vmatmul.mubr.msk.f32.gmra.mrb[160].mxu1 %vm1374_vm1, %v5733_v9 }
 0x30a   : > { %1894 = vmatprep.mubr.f32.mxu1 %v7685_v14 }
 0x30d   : > { %3940 = vmatmul.mubr.msk.f32.gmra.mrb[162].mxu1 %vm1374_vm1, %v5738_v50 }
 0x30e   : > { %1900 = vmatprep.mubr.f32.mxu1 %v7685_v14 }
 0x311   : > { %3941 = vmatmul.mubr.msk.f32.gmra.mrb[164].mxu1 %vm1374_vm1, %v5743_v1  ;;  %v7692_v1 = vld [vmem:[#allocation13_spill] sm:$0xff] }
 0x312   : > { %1906 = vmatprep.mubr.f32.mxu1 %v7685_v14 }
 0x315   : > { %3942 = vmatmul.mubr.msk.f32.gmra.mrb[166].mxu1 %vm1374_vm1, %v5748_v37 }
 0x316   : > { %1912 = vmatprep.mubr.f32.mxu1 %v7685_v14 }
 0x319   : > { %3943 = vmatmul.mubr.msk.f32.gmra.mrb[168].mxu1 %vm1374_vm1, %v5753_v58 }
 0x31a   : > { %1918 = vmatprep.mubr.f32.mxu1 %v7685_v14 }
 0x31c   : > { %v1537_v29 = vpop.f32.mrb[64].mxu1 }
 0x31d   : > { %v5877_v57 = vsub.f32 %v7686_v45, %v1537_v29  ;;  %v1539_v13 = vpop.f32.mrb[65].mxu1  ;;  %3944 = vmatmul.mubr.msk.f32.gmra.mrb[170].mxu1 %vm1374_vm1, %v5758_v62  ;;  %v7694_v45 = vld [vmem:[#allocation14_spill] sm:$0xff] }
 0x31e   : > { %v5882_v11 = vsub.f32 %v7687_v52, %v1539_v13  ;;  %1924 = vmatprep.mubr.f32.mxu1 %v7685_v14  ;;  %v7695_v52 = vld [vmem:[#allocation15_spill] sm:$0xff] }
 0x31f   : > { %v2113_v44 = vmul.f32 %v5877_v57, %v5877_v57 }
 0x320   : > { %v2114_v23 = vmul.f32 %v5882_v11, %v5882_v11  ;;  %v1543_v63 = vpop.f32.mrb[66].mxu1 }
 0x321   : > { %v5890_v55 = vsub.f32 %v7688_v48, %v1543_v63  ;;  %v1545_v19 = vpop.f32.mrb[67].mxu1  ;;  %3945 = vmatmul.mubr.msk.f32.gmra.mrb[172].mxu1 %vm1374_vm1, %v5763_v51  ;;  %v7693_v51 = vld [vmem:[#allocation10_spill] sm:$0xff]  ;;  %v7696_v48 = vld [vmem:[#allocation12_spill] sm:$0xff] }
 0x322   : > { %v5895_v28 = vsub.f32 %v7689_v20, %v1545_v19  ;;  %2305 = vmatprep.mubr.f32.mxu0 %v2114_v23  ;;  %1930 = vmatprep.mubr.f32.mxu1 %v7685_v14  ;;  %v7697_v20 = vld [vmem:[#allocation17_spill] sm:$0xff] }
 0x323   : > { %2306 = vmatmul.mubr.f32.vlgmr.msra.gmra.mrb[128].mxu0 %v2113_v44  ;;  %v2117_v41 = vmul.f32 %v5890_v55, %v5890_v55 }
 0x324   : > { %v2118_v16 = vmul.f32 %v5895_v28, %v5895_v28  ;;  %4278 = vmatpush1.bf16.msra.mxu0 %v7690_v38  ;;  %v1549_v42 = vpop.f32.mrb[68].mxu1  ;;  %v7698_v38 = vld [vmem:[#allocation19_spill] sm:$0xff] }
 0x325   : > { %v5904_v9 = vsub.f32 %v7691_v30, %v1549_v42  ;;  %v1551_v50 = vpop.f32.mrb[69].mxu1  ;;  %3946 = vmatmul.mubr.msk.f32.gmra.mrb[174].mxu1 %vm1374_vm1, %v5768_v34  ;;  %4279 = vmatprep.subr.bf16.mxu0 %v7596_v8 }
 0x326   : > { %v5910_v37 = vsub.f32 %v7692_v1, %v1551_v50  ;;  %2310 = vmatprep.mubr.f32.mxu0 %v2118_v16  ;;  %1936 = vmatprep.mubr.f32.mxu1 %v7685_v14  ;;  %v7699_v50 = vld [vmem:[#allocation16_spill] sm:$0xff] }
 0x327   : > { %2311 = vmatmul.mubr.f32.gmra.mrb[130].mxu0 %v2117_v41  ;;  %v2121_v29 = vmul.f32 %v5904_v9, %v5904_v9 }
 0x328   : > { %v2122_v58 = vmul.f32 %v5910_v37, %v5910_v37  ;;  %v1555_v62 = vpop.f32.mrb[70].mxu1  ;;  %4281 = vmatpush1.bf16.msra.mxu0 %v7693_v51  ;;  %v7701_v51 = vld [vmem:[#allocation21_spill] sm:$0xff] }
 0x329   : > { %v5919_v34 = vsub.f32 %v7694_v45, %v1555_v62  ;;  %v1557_v13 = vpop.f32.mrb[71].mxu1  ;;  %3947 = vmatmul.mubr.msk.f32.gmra.mrb[176].mxu1 %vm1374_vm1, %v5773_v21  ;;  %4282 = vmatprep.subr.bf16.mxu0 %v7596_v8 }
 0x32a   : > { %v5925_v23 = vsub.f32 %v7695_v52, %v1557_v13  ;;  %2315 = vmatprep.mubr.f32.mxu0 %v2122_v58  ;;  %1942 = vmatprep.mubr.f32.mxu1 %v7685_v14  ;;  %v7700_v58 = vld [vmem:[#allocation20_spill] sm:$0xff]  ;;  %v7702_v52 = vld [vmem:[#allocation18_spill] sm:$0xff] }
 0x32b   : > { %2316 = vmatmul.mubr.f32.gmra.mrb[132].mxu0 %v2121_v29  ;;  %v2125_v19 = vmul.f32 %v5919_v34, %v5919_v34 }
 0x32c   : > { %v2126_v63 = vmul.f32 %v5925_v23, %v5925_v23  ;;  %v1561_v44 = vpop.f32.mrb[72].mxu1  ;;  %4284 = vmatpush1.bf16.msra.mxu0 %v7696_v48 }
 0x32d   : > { %v5934_v21 = vsub.f32 %v7697_v20, %v1561_v44  ;;  %v1563_v16 = vpop.f32.mrb[73].mxu1  ;;  %3948 = vmatmul.mubr.msk.f32.gmra.mrb[178].mxu1 %vm1374_vm1, %v5778_v25  ;;  %4285 = vmatprep.subr.bf16.mxu0 %v7596_v8  ;;  %v7703_v44 = vld [vmem:[#allocation24_spill] sm:$0xff] }
 0x32e   : > { %v5940_v42 = vsub.f32 %v7698_v38, %v1563_v16  ;;  %2320 = vmatprep.mubr.f32.mxu0 %v2126_v63  ;;  %1948 = vmatprep.mubr.f32.mxu1 %v7685_v14 }
 0x32f   : > { %2321 = vmatmul.mubr.f32.gmra.mrb[134].mxu0 %v2125_v19  ;;  %v2129_v1 = vmul.f32 %v5934_v21, %v5934_v21  ;;  %v7704_v19 = vld [vmem:[#allocation27_spill] sm:$0xff] }
 0x330   : > { %v2130_v41 = vmul.f32 %v5940_v42, %v5940_v42  ;;  %v1567_v30 = vpop.f32.mrb[74].mxu1  ;;  %4287 = vmatpush1.bf16.msra.mxu0 %v7699_v50  ;;  %v7706_v50 = vld [vmem:[#allocation28_spill] sm:$0xff] }
 0x331   : > { %v5949_v25 = vsub.f32 %v7700_v58, %v1567_v30  ;;  %v1569_v62 = vpop.f32.mrb[75].mxu1  ;;  %3949 = vmatmul.mubr.msk.f32.gmra.mrb[180].mxu1 %vm1374_vm1, %v5783_v22  ;;  %4288 = vmatprep.subr.bf16.mxu0 %v7596_v8  ;;  %v7707_v58 = vld [vmem:[#allocation29_spill] sm:$0xff] }
 0x332   : > { %v5955_v29 = vsub.f32 %v7701_v51, %v1569_v62  ;;  %2325 = vmatprep.mubr.f32.mxu0 %v2130_v41  ;;  %1954 = vmatprep.mubr.f32.mxu1 %v7685_v14  ;;  %v7705_v41 = vld [vmem:[#allocation22_spill] sm:$0xff] }
 0x333   : > { %2326 = vmatmul.mubr.f32.gmra.mrb[136].mxu0 %v2129_v1  ;;  %v2133_v63 = vmul.f32 %v5949_v25, %v5949_v25 }
 0x334   : > { %v2134_v45 = vmul.f32 %v5955_v29, %v5955_v29  ;;  %v1573_v13 = vpop.f32.mrb[76].mxu1  ;;  %4290 = vmatpush1.bf16.msra.mxu0 %v7702_v52 }
 0x335   : > { %v5964_v22 = vsub.f32 %v7703_v44, %v1573_v13  ;;  %v1575_v48 = vpop.f32.mrb[77].mxu1  ;;  %3950 = vmatmul.mubr.msk.f32.gmra.mrb[182].mxu1 %vm1374_vm1, %v5788_v18  ;;  %4291 = vmatprep.subr.bf16.mxu0 %v7596_v8  ;;  %v7708_v13 = vld [vmem:[#allocation25_spill] sm:$0xff] }
 0x336   : > { %v5970_v20 = vsub.f32 %v7704_v19, %v1575_v48  ;;  %2330 = vmatprep.mubr.f32.mxu0 %v2134_v45  ;;  %1960 = vmatprep.mubr.f32.mxu1 %v7685_v14  ;;  %v7710_v48 = vld [vmem:[#allocation34_spill] sm:$0xff] }
 0x337   : > { %2331 = vmatmul.mubr.f32.gmra.mrb[138].mxu0 %v2133_v63  ;;  %v2137_v30 = vmul.f32 %v5964_v22, %v5964_v22  ;;  %v7709_v63 = vld [vmem:[#allocation32_spill] sm:$0xff] }
 0x338   : > { %v2138_v16 = vmul.f32 %v5970_v20, %v5970_v20  ;;  %v1579_v38 = vpop.f32.mrb[78].mxu1  ;;  %4293 = vmatpush1.bf16.msra.mxu0 %v7705_v41  ;;  %v7711_v41 = vld [vmem:[#allocation30_spill] sm:$0xff] }
 0x339   : > { %v5979_v18 = vsub.f32 %v7706_v50, %v1579_v38  ;;  %v1581_v1 = vpop.f32.mrb[79].mxu1  ;;  %3951 = vmatmul.mubr.msk.f32.gmra.mrb[184].mxu1 %vm1374_vm1, %v5793_v17  ;;  %4294 = vmatprep.subr.bf16.mxu0 %v7596_v8  ;;  %v7712_v50 = vld [vmem:[#allocation35_spill] sm:$0xff] }
 0x33a   : > { %v5985_v62 = vsub.f32 %v7707_v58, %v1581_v1  ;;  %2335 = vmatprep.mubr.f32.mxu0 %v2138_v16  ;;  %1966 = vmatprep.mubr.f32.mxu1 %v7685_v14  ;;  %v7713_v58 = vld [vmem:[#allocation36_spill] sm:$0xff] }
 0x33b   : > { %2336 = vmatmul.mubr.f32.gmra.mrb[140].mxu0 %v2137_v30  ;;  %v2141_v52 = vmul.f32 %v5979_v18, %v5979_v18 }
 0x33c   : > { %v2142_v51 = vmul.f32 %v5985_v62, %v5985_v62  ;;  %v1585_v45 = vpop.f32.mrb[80].mxu1  ;;  %4296 = vmatpush1.bf16.msra.mxu0 %v7708_v13 }
 0x33d   : > { %v5994_v17 = vsub.f32 %v7709_v63, %v1585_v45  ;;  %v1587_v44 = vpop.f32.mrb[81].mxu1  ;;  %3952 = vmatmul.mubr.msk.f32.gmra.mrb[186].mxu1 %vm1374_vm1, %v5798_v36  ;;  %4297 = vmatprep.subr.bf16.mxu0 %v7596_v8 }
 0x33e   : > { %v6000_v19 = vsub.f32 %v7710_v48, %v1587_v44  ;;  %2340 = vmatprep.mubr.f32.mxu0 %v2142_v51  ;;  %1972 = vmatprep.mubr.f32.mxu1 %v7685_v14  ;;  %v7715_v44 = vld [vmem:[#allocation38_spill] sm:$0xff] }
 0x33f   : > { %2341 = vmatmul.mubr.f32.gmra.mrb[142].mxu0 %v2141_v52  ;;  %v2145_v30 = vmul.f32 %v5994_v17, %v5994_v17  ;;  %v7714_v52 = vld [vmem:[#allocation33_spill] sm:$0xff] }
 0x340   : > { %v2146_v16 = vmul.f32 %v6000_v19, %v6000_v19  ;;  %v1591_v38 = vpop.f32.mrb[82].mxu1  ;;  %4299 = vmatpush1.bf16.msra.mxu0 %v7711_v41 }
 0x341   : > { %v6009_v36 = vsub.f32 %v7712_v50, %v1591_v38  ;;  %v1593_v1 = vpop.f32.mrb[83].mxu1  ;;  %3953 = vmatmul.mubr.msk.f32.gmra.mrb[188].mxu1 %vm1374_vm1, %v5803_v31  ;;  %4300 = vmatprep.subr.bf16.mxu0 %v7596_v8  ;;  %v7718_v50 = vld [vmem:[#allocation37_spill] sm:$0xff] }
 0x342   : > { %v6015_v51 = vsub.f32 %v7713_v58, %v1593_v1  ;;  %2345 = vmatprep.mubr.f32.mxu0 %v2146_v16  ;;  %1978 = vmatprep.mubr.f32.mxu1 %v7685_v14  ;;  %v7716_v16 = vld [vmem:[#allocation40_spill] sm:$0xff]  ;;  %v7719_v58 = vld [vmem:[#allocation41_spill] sm:$0xff] }
 0x343   : > { %2346 = vmatmul.mubr.f32.gmra.mrb[144].mxu0 %v2145_v30  ;;  %v2149_v63 = vmul.f32 %v6009_v36, %v6009_v36 }
 0x344   : > { %v2150_v45 = vmul.f32 %v6015_v51, %v6015_v51  ;;  %v1597_v13 = vpop.f32.mrb[84].mxu1  ;;  %4302 = vmatpush1.bf16.msra.mxu0 %v7714_v52  ;;  %v7721_v52 = vld [vmem:[#allocation42_spill] sm:$0xff] }
 0x345   : > { %v6024_v31 = vsub.f32 %v7715_v44, %v1597_v13  ;;  %v1599_v48 = vpop.f32.mrb[85].mxu1  ;;  %3954 = vmatmul.mubr.msk.f32.gmra.mrb[190].mxu1 %vm1374_vm1, %v5808_v35  ;;  %4303 = vmatprep.subr.bf16.mxu0 %v7596_v8 }
 0x346   : > { %v6030_v38 = vsub.f32 %v7716_v16, %v1599_v48  ;;  %2350 = vmatprep.mubr.f32.mxu0 %v2150_v45  ;;  %2891 = vmatprep.mubr.f32.mxu1 %v7685_v14  ;;  %v7723_v48 = vld [vmem:[#allocation39_spill] sm:$0xff] }
 0x347   : > { %2351 = vmatmul.mubr.f32.gmra.mrb[146].mxu0 %v2149_v63  ;;  %v2153_v1 = vmul.f32 %v6024_v31, %v6024_v31 }
 0x348   : > { %7717 = vst [vmem:[#allocation5_spill] sm:$0xff] %v6030_v38  ;;  %v2154_v41 = vmul.f32 %v6030_v38, %v6030_v38  ;;  %v1603_v30 = vpop.f32.mrb[86].mxu1  ;;  %4305 = vmatpush1.bf16.msra.mxu0 %v7718_v50  ;;  %v7724_v50 = vld [vmem:[#allocation44_spill] sm:$0xff]  ;;  %v7726_v38 = vld [vmem:[#allocation46_spill] sm:$0xff] }
 0x349   : > { %v6039_v35 = vsub.f32 %v7719_v58, %v1603_v30  ;;  %v1605_v13 = vpop.f32.mrb[87].mxu1  ;;  %4306 = vmatprep.subr.bf16.mxu0 %v7596_v8 }
 0x34a   : > { %v6043_v45 = vsub.f32 %v7721_v52, %v1605_v13  ;;  %2355 = vmatprep.mubr.f32.mxu0 %v2154_v41  ;;  %v7728_v52 = vld [vmem:[#allocation43_spill] sm:$0xff] }
 0x34b   : > { %7720 = vst [vmem:[#allocation7_spill] sm:$0xff] %v6039_v35  ;;  %2356 = vmatmul.mubr.f32.gmra.mrb[148].mxu0 %v2153_v1  ;;  %v2157_v16 = vmul.f32 %v6039_v35, %v6039_v35  ;;  %v7731_v35 = vld [vmem:[#allocation48_spill] sm:$0xff] }
 0x34c   : > { %7722 = vst [vmem:[#allocation8_spill] sm:$0xff] %v6043_v45  ;;  %v2158_v63 = vmul.f32 %v6043_v45, %v6043_v45  ;;  %v1609_v44 = vpop.f32.mrb[88].mxu1  ;;  %4308 = vmatpush1.bf16.msra.mxu0 %v7723_v48  ;;  %v7729_v45 = vld [vmem:[#allocation47_spill] sm:$0xff] }
 0x34d   : > { %v6051_v30 = vsub.f32 %v7724_v50, %v1609_v44  ;;  %v1611_v58 = vpop.f32.mrb[89].mxu1  ;;  %4309 = vmatprep.subr.bf16.mxu0 %v7596_v8 }
 0x34e   : > { %v6055_v13 = vsub.f32 %v7726_v38, %v1611_v58  ;;  %2360 = vmatprep.mubr.f32.mxu0 %v2158_v63  ;;  %v7733_v58 = vld [vmem:[#allocation45_spill] sm:$0xff] }
 0x34f   : > { %7725 = vst [vmem:[#allocation9_spill] sm:$0xff] %v6051_v30  ;;  %2361 = vmatmul.mubr.f32.gmra.mrb[150].mxu0 %v2157_v16  ;;  %v2161_v48 = vmul.f32 %v6051_v30, %v6051_v30  ;;  %v7736_v30 = vld [vmem:[#allocation52_spill] sm:$0xff] }
 0x350   : > { %7727 = vst [vmem:[#allocation6_spill] sm:$0xff] %v6055_v13  ;;  %v2162_v41 = vmul.f32 %v6055_v13, %v6055_v13  ;;  %v1615_v1 = vpop.f32.mrb[90].mxu1  ;;  %4311 = vmatpush1.bf16.msra.mxu0 %v7728_v52  ;;  %v7734_v13 = vld [vmem:[#allocation50_spill] sm:$0xff] }
 0x351   : > { %v6063_v44 = vsub.f32 %v7729_v45, %v1615_v1  ;;  %v1617_v50 = vpop.f32.mrb[91].mxu1  ;;  %4312 = vmatprep.subr.bf16.mxu0 %v7596_v8 }
 0x352   : > { %v6067_v38 = vsub.f32 %v7731_v35, %v1617_v50  ;;  %2365 = vmatprep.mubr.f32.mxu0 %v2162_v41  ;;  %v7738_v50 = vld [vmem:[#allocation49_spill] sm:$0xff] }
 0x353   : > { %7730 = vst [vmem:[#allocation11_spill] sm:$0xff] %v6063_v44  ;;  %2366 = vmatmul.mubr.f32.gmra.mrb[152].mxu0 %v2161_v48  ;;  %v2165_v52 = vmul.f32 %v6063_v44, %v6063_v44  ;;  %v7741_v44 = vld [vmem:[#allocation54_spill] sm:$0xff] }
 0x354   : > { %7732 = vst [vmem:[#allocation13_spill] sm:$0xff] %v6067_v38  ;;  %v2166_v63 = vmul.f32 %v6067_v38, %v6067_v38  ;;  %v1621_v16 = vpop.f32.mrb[92].mxu1  ;;  %4314 = vmatpush1.bf16.msra.mxu0 %v7733_v58  ;;  %v7739_v38 = vld [vmem:[#allocation53_spill] sm:$0xff] }
 0x355   : > { %v6075_v45 = vsub.f32 %v7734_v13, %v1621_v16  ;;  %v1623_v1 = vpop.f32.mrb[93].mxu1  ;;  %4315 = vmatprep.subr.bf16.mxu0 %v7596_v8 }
 0x356   : > { %v6079_v35 = vsub.f32 %v7736_v30, %v1623_v1  ;;  %2370 = vmatprep.mubr.f32.mxu0 %v2166_v63  ;;  %v7743_v1 = vld [vmem:[#allocation51_spill] sm:$0xff] }
 0x357   : > { %7735 = vst [vmem:[#allocation10_spill] sm:$0xff] %v6075_v45  ;;  %2371 = vmatmul.mubr.f32.gmra.mrb[154].mxu0 %v2165_v52  ;;  %v2169_v58 = vmul.f32 %v6075_v45, %v6075_v45  ;;  %v7746_v45 = vld [vmem:[#allocation57_spill] sm:$0xff] }
 0x358   : > { %7737 = vst [vmem:[#allocation14_spill] sm:$0xff] %v6079_v35  ;;  %v2170_v41 = vmul.f32 %v6079_v35, %v6079_v35  ;;  %v1627_v48 = vpop.f32.mrb[94].mxu1  ;;  %4317 = vmatpush1.bf16.msra.mxu0 %v7738_v50  ;;  %v7744_v35 = vld [vmem:[#allocation56_spill] sm:$0xff] }
 0x359   : > { %v6087_v13 = vsub.f32 %v7739_v38, %v1627_v48  ;;  %v1629_v16 = vpop.f32.mrb[95].mxu1  ;;  %4318 = vmatprep.subr.bf16.mxu0 %v7596_v8 }
 0x35a   : > { %v6091_v30 = vsub.f32 %v7741_v44, %v1629_v16  ;;  %2375 = vmatprep.mubr.f32.mxu0 %v2170_v41  ;;  %v7748_v16 = vld [vmem:[#allocation55_spill] sm:$0xff] }
 0x35b   : > { %7740 = vst [vmem:[#allocation15_spill] sm:$0xff] %v6087_v13  ;;  %2376 = vmatmul.mubr.f32.gmra.mrb[156].mxu0 %v2169_v58  ;;  %v2173_v50 = vmul.f32 %v6087_v13, %v6087_v13  ;;  %v7751_v13 = vld [vmem:[#allocation59_spill] sm:$0xff] }
 0x35c   : > { %7742 = vst [vmem:[#allocation12_spill] sm:$0xff] %v6091_v30  ;;  %v2174_v63 = vmul.f32 %v6091_v30, %v6091_v30  ;;  %v1633_v52 = vpop.f32.mrb[96].mxu1  ;;  %4320 = vmatpush1.bf16.msra.mxu0 %v7743_v1  ;;  %v7749_v30 = vld [vmem:[#allocation58_spill] sm:$0xff] }
 0x35d   : > { %v6099_v38 = vsub.f32 %v7744_v35, %v1633_v52  ;;  %v1635_v48 = vpop.f32.mrb[97].mxu1  ;;  %4321 = vmatprep.subr.bf16.mxu0 %v7596_v8 }
 0x35e   : > { %v6103_v44 = vsub.f32 %v7746_v45, %v1635_v48  ;;  %2380 = vmatprep.mubr.f32.mxu0 %v2174_v63  ;;  %v7753_v48 = vld [vmem:[#allocation60_spill] sm:$0xff] }
 0x35f   : > { %7745 = vst [vmem:[#allocation17_spill] sm:$0xff] %v6099_v38  ;;  %2381 = vmatmul.mubr.f32.gmra.mrb[158].mxu0 %v2173_v50  ;;  %v2177_v1 = vmul.f32 %v6099_v38, %v6099_v38  ;;  %v7755_v38 = vld [vmem:[#allocation61_spill] sm:$0xff] }
 0x360   : > { %7747 = vst [vmem:[#allocation19_spill] sm:$0xff] %v6103_v44  ;;  %v2178_v41 = vmul.f32 %v6103_v44, %v6103_v44  ;;  %v1639_v58 = vpop.f32.mrb[98].mxu1  ;;  %4323 = vmatpush1.bf16.msra.mxu0 %v7748_v16 }
 0x361   : > { %v6111_v35 = vsub.f32 %v7749_v30, %v1639_v58  ;;  %v1641_v52 = vpop.f32.mrb[99].mxu1 }
 0x362   : > { %v6114_v8 = vsub.f32 %v7751_v13, %v1641_v52  ;;  %2385 = vmatprep.mubr.f32.mxu0 %v2178_v41 }
 0x363   : > { %7750 = vst [vmem:[#allocation16_spill] sm:$0xff] %v6111_v35  ;;  %2386 = vmatmul.mubr.f32.gmra.mrb[160].mxu0 %v2177_v1  ;;  %v2181_v50 = vmul.f32 %v6111_v35, %v6111_v35  ;;  %v7757_v1 = vld [vmem:[#allocation62_spill] sm:$0xff]  ;;  %v7759_v35 = vld [vmem:[#allocation63_spill] sm:$0xff] }
 0x364   : > { %7752 = vst [vmem:[#allocation20_spill] sm:$0xff] %v6114_v8  ;;  %v2182_v45 = vmul.f32 %v6114_v8, %v6114_v8  ;;  %v1645_v63 = vpop.f32.mrb[100].mxu1 }
 0x365   : > { %v6121_v16 = vsub.f32 %v7753_v48, %v1645_v63  ;;  %v1647_v44 = vpop.f32.mrb[101].mxu1 }
 0x366   : > { %v6124_v30 = vsub.f32 %v7755_v38, %v1647_v44  ;;  %2390 = vmatprep.mubr.f32.mxu0 %v2182_v45 }
 0x367   : > { %7754 = vst [vmem:[#allocation21_spill] sm:$0xff] %v6121_v16  ;;  %2391 = vmatmul.mubr.f32.gmra.mrb[162].mxu0 %v2181_v50  ;;  %v2185_v58 = vmul.f32 %v6121_v16, %v6121_v16  ;;  %v7761_v50 = vld [vmem:[#allocation66_spill] sm:$0xff]  ;;  %v7763_v16 = vld [vmem:[#allocation68_spill] sm:$0xff] }
 0x368   : > { %7756 = vst [vmem:[#allocation18_spill] sm:$0xff] %v6124_v30  ;;  %v2186_v13 = vmul.f32 %v6124_v30, %v6124_v30  ;;  %v1651_v41 = vpop.f32.mrb[102].mxu1 }
 0x369   : > { %v6131_v52 = vsub.f32 %v7757_v1, %v1651_v41  ;;  %v1653_v8 = vpop.f32.mrb[103].mxu1 }
 0x36a   : > { %v6134_v63 = vsub.f32 %v7759_v35, %v1653_v8  ;;  %2395 = vmatprep.mubr.f32.mxu0 %v2186_v13 }
 0x36b   : > { %7758 = vst [vmem:[#allocation24_spill] sm:$0xff] %v6131_v52  ;;  %2396 = vmatmul.mubr.f32.gmra.mrb[164].mxu0 %v2185_v58  ;;  %v2189_v45 = vmul.f32 %v6131_v52, %v6131_v52  ;;  %v7765_v58 = vld [vmem:[#allocation69_spill] sm:$0xff]  ;;  %v7767_v52 = vld [vmem:[#allocation70_spill] sm:$0xff] }
 0x36c   : > { %7760 = vst [vmem:[#allocation27_spill] sm:$0xff] %v6134_v63  ;;  %v2190_v38 = vmul.f32 %v6134_v63, %v6134_v63  ;;  %v1657_v44 = vpop.f32.mrb[104].mxu1 }
 0x36d   : > { %v6141_v48 = vsub.f32 %v7761_v50, %v1657_v44  ;;  %v1659_v30 = vpop.f32.mrb[105].mxu1 }
 0x36e   : > { %v6144_v41 = vsub.f32 %v7763_v16, %v1659_v30  ;;  %2400 = vmatprep.mubr.f32.mxu0 %v2190_v38 }
 0x36f   : > { %7762 = vst [vmem:[#allocation22_spill] sm:$0xff] %v6141_v48  ;;  %2401 = vmatmul.mubr.f32.gmra.mrb[166].mxu0 %v2189_v45  ;;  %v2193_v13 = vmul.f32 %v6141_v48, %v6141_v48  ;;  %v7769_v45 = vld [vmem:[#allocation74_spill] sm:$0xff]  ;;  %v7771_v48 = vld [vmem:[#allocation76_spill] sm:$0xff] }
 0x370   : > { %7764 = vst [vmem:[#allocation28_spill] sm:$0xff] %v6144_v41  ;;  %v2194_v35 = vmul.f32 %v6144_v41, %v6144_v41  ;;  %v1663_v8 = vpop.f32.mrb[106].mxu1 }
 0x371   : > { %v6151_v1 = vsub.f32 %v7765_v58, %v1663_v8  ;;  %v1665_v63 = vpop.f32.mrb[107].mxu1 }
 0x372   : > { %v6154_v44 = vsub.f32 %v7767_v52, %v1665_v63  ;;  %2405 = vmatprep.mubr.f32.mxu0 %v2194_v35 }
 0x373   : > { %7766 = vst [vmem:[#allocation29_spill] sm:$0xff] %v6151_v1  ;;  %2406 = vmatmul.mubr.f32.gmra.mrb[168].mxu0 %v2193_v13  ;;  %v2197_v38 = vmul.f32 %v6151_v1, %v6151_v1  ;;  %v7773_v13 = vld [vmem:[#allocation77_spill] sm:$0xff]  ;;  %v7775_v1 = vld [vmem:[#allocation78_spill] sm:$0xff] }
 0x374   : > { %7768 = vst [vmem:[#allocation25_spill] sm:$0xff] %v6154_v44  ;;  %v2198_v16 = vmul.f32 %v6154_v44, %v6154_v44  ;;  %v1669_v30 = vpop.f32.mrb[108].mxu1 }
 0x375   : > { %v6161_v50 = vsub.f32 %v7769_v45, %v1669_v30  ;;  %v1671_v41 = vpop.f32.mrb[109].mxu1 }
 0x376   : > { %v6164_v8 = vsub.f32 %v7771_v48, %v1671_v41  ;;  %2410 = vmatprep.mubr.f32.mxu0 %v2198_v16 }
 0x377   : > { %7770 = vst [vmem:[#allocation32_spill] sm:$0xff] %v6161_v50  ;;  %2411 = vmatmul.mubr.f32.gmra.mrb[170].mxu0 %v2197_v38  ;;  %v2201_v35 = vmul.f32 %v6161_v50, %v6161_v50  ;;  %v7777_v38 = vld [vmem:[#allocation82_spill] sm:$0xff]  ;;  %v7779_v50 = vld [vmem:[#allocation84_spill] sm:$0xff] }
 0x378   : > { %7772 = vst [vmem:[#allocation34_spill] sm:$0xff] %v6164_v8  ;;  %v2202_v52 = vmul.f32 %v6164_v8, %v6164_v8  ;;  %v1675_v63 = vpop.f32.mrb[110].mxu1 }
 0x379   : > { %v6171_v58 = vsub.f32 %v7773_v13, %v1675_v63  ;;  %v1677_v44 = vpop.f32.mrb[111].mxu1 }
 0x37a   : > { %v6174_v30 = vsub.f32 %v7775_v1, %v1677_v44  ;;  %2415 = vmatprep.mubr.f32.mxu0 %v2202_v52 }
 0x37b   : > { %7774 = vst [vmem:[#allocation30_spill] sm:$0xff] %v6171_v58  ;;  %2416 = vmatmul.mubr.f32.gmra.mrb[172].mxu0 %v2201_v35  ;;  %v2205_v16 = vmul.f32 %v6171_v58, %v6171_v58  ;;  %v7781_v35 = vld [vmem:[#allocation85_spill] sm:$0xff]  ;;  %v7783_v58 = vld [vmem:[#allocation86_spill] sm:$0xff] }
 0x37c   : > { %7776 = vst [vmem:[#allocation35_spill] sm:$0xff] %v6174_v30  ;;  %v2206_v48 = vmul.f32 %v6174_v30, %v6174_v30  ;;  %v1681_v41 = vpop.f32.mrb[112].mxu1 }
 0x37d   : > { %v6181_v45 = vsub.f32 %v7777_v38, %v1681_v41  ;;  %v1683_v8 = vpop.f32.mrb[113].mxu1 }
 0x37e   : > { %v6184_v63 = vsub.f32 %v7779_v50, %v1683_v8  ;;  %2420 = vmatprep.mubr.f32.mxu0 %v2206_v48  ;;  %v2724_v48 = vld [vmem:[%s7327_s4 + $0x8] sm:$0xff] }
 0x37f   : > { %7778 = vst [vmem:[#allocation36_spill] sm:$0xff] %v6181_v45  ;;  %2421 = vmatmul.mubr.f32.gmra.mrb[174].mxu0 %v2205_v16  ;;  %v2209_v52 = vmul.f32 %v6181_v45, %v6181_v45  ;;  %v2728_v16 = vld [vmem:[%s7327_s4 + $0x28] sm:$0xff] }
 0x380   : > { %7780 = vst [vmem:[#allocation33_spill] sm:$0xff] %v6184_v63  ;;  %v2210_v1 = vmul.f32 %v6184_v63, %v6184_v63  ;;  %v1687_v44 = vpop.f32.mrb[114].mxu1  ;;  %v2727_v63 = vld [vmem:[%s7327_s4 + $0x20] sm:$0xff] }
 0x381   : > { %v6191_v13 = vsub.f32 %v7781_v35, %v1687_v44  ;;  %v1689_v30 = vpop.f32.mrb[115].mxu1  ;;  %v7785_v44 = vld [vmem:[#allocation90_spill] sm:$0xff] }
 0x382   : > { %v6194_v41 = vsub.f32 %v7783_v58, %v1689_v30  ;;  %2425 = vmatprep.mubr.f32.mxu0 %v2210_v1  ;;  %v4324_v1 = vpack.c.bf16 %v2728_v16, %v2724_v48  ;;  %v7789_v16 = vld [vmem:[#allocation93_spill] sm:$0xff] }
 0x383   : > { %7782 = vst [vmem:[#allocation38_spill] sm:$0xff] %v6191_v13  ;;  %2426 = vmatmul.mubr.f32.gmra.mrb[176].mxu0 %v2209_v52  ;;  %v2213_v38 = vmul.f32 %v6191_v13, %v6191_v13  ;;  %v7787_v52 = vld [vmem:[#allocation92_spill] sm:$0xff] }
 0x384   : > { %7784 = vst [vmem:[#allocation40_spill] sm:$0xff] %v6194_v41  ;;  %v2214_v50 = vmul.f32 %v6194_v41, %v6194_v41  ;;  %v1693_v8 = vpop.f32.mrb[116].mxu1  ;;  %4325 = vmatprep.subr.bf16.mxu1 %v4324_v1  ;;  %v2723_v41 = vld [vmem:[%s7327_s4] sm:$0xff] }
 0x385   : > { %v6207_v58 = vsub.f32 %v7785_v44, %v1693_v8  ;;  %v1695_v30 = vpop.f32.mrb[117].mxu1  ;;  %v4326_v13 = vpack.c.bf16 %v2727_v63, %v2723_v41  ;;  %v7793_v41 = vld [vmem:[#allocation98_spill] sm:$0xff] }
 0x386   : > { %v6210_v35 = vsub.f32 %v7787_v52, %v1695_v30  ;;  %2430 = vmatprep.mubr.f32.mxu0 %v2214_v50  ;;  %v7791_v30 = vld [vmem:[#allocation94_spill] sm:$0xff] }
 0x387   : > { %7786 = vst [vmem:[#allocation37_spill] sm:$0xff] %v6207_v58  ;;  %2431 = vmatmul.mubr.f32.gmra.mrb[178].mxu0 %v2213_v38  ;;  %v2217_v48 = vmul.f32 %v6207_v58, %v6207_v58  ;;  %4327 = vmatpush1.bf16.msra.mxu1 %v4326_v13 }
 0x388   : > { %7788 = vst [vmem:[#allocation41_spill] sm:$0xff] %v6210_v35  ;;  %v2218_v8 = vmul.f32 %v6210_v35, %v6210_v35  ;;  %v1699_v44 = vpop.f32.mrb[118].mxu1 }
 0x389   : > { %v6223_v50 = vsub.f32 %v7789_v16, %v1699_v44  ;;  %v1701_v38 = vpop.f32.mrb[119].mxu1  ;;  %v7794_v44 = vld [vmem:[#allocation100_spill] sm:$0xff] }
 0x38a   : > { %v6226_v1 = vsub.f32 %v7791_v30, %v1701_v38  ;;  %2435 = vmatprep.mubr.f32.mxu0 %v2218_v8  ;;  %v7796_v38 = vld [vmem:[#allocation101_spill] sm:$0xff] }
 0x38b   : > { %7790 = vst [vmem:[#allocation42_spill] sm:$0xff] %v6223_v50  ;;  %2436 = vmatmul.mubr.f32.gmra.mrb[180].mxu0 %v2217_v48  ;;  %v2221_v63 = vmul.f32 %v6223_v50, %v6223_v50  ;;  %v7798_v50 = vld [vmem:[#allocation102_spill] sm:$0xff] }
 0x38c   : > { %7792 = vst [vmem:[#allocation39_spill] sm:$0xff] %v6226_v1  ;;  %v2222_v52 = vmul.f32 %v6226_v1, %v6226_v1  ;;  %v1705_v45 = vpop.f32.mrb[120].mxu1 }
 0x38d   : > { %v6233_v35 = vsub.f32 %v7793_v41, %v1705_v45  ;;  %v1707_v58 = vpop.f32.mrb[121].mxu1 }
 0x38e   : > { %v6236_v16 = vsub.f32 %v7794_v44, %v1707_v58  ;;  %2440 = vmatprep.mubr.f32.mxu0 %v2222_v52 }
 0x38f   : > { %2441 = vmatmul.mubr.f32.gmra.mrb[182].mxu0 %v2221_v63  ;;  %v2225_v48 = vmul.f32 %v6233_v35, %v6233_v35 }
 0x390   : > { %7795 = vst [vmem:[#allocation44_spill] sm:$0xff] %v6236_v16  ;;  %v2226_v13 = vmul.f32 %v6236_v16, %v6236_v16  ;;  %v1711_v8 = vpop.f32.mrb[122].mxu1  ;;  %v7800_v16 = vld [vmem:[#allocation107_spill] sm:$0xff] }
 0x391   : > { %v6243_v30 = vsub.f32 %v7796_v38, %v1711_v8  ;;  %v1713_v1 = vpop.f32.mrb[123].mxu1 }
 0x392   : > { %v6246_v45 = vsub.f32 %v7798_v50, %v1713_v1  ;;  %2445 = vmatprep.mubr.f32.mxu0 %v2226_v13 }
 0x393   : > { %7797 = vst [vmem:[#allocation46_spill] sm:$0xff] %v6243_v30  ;;  %2446 = vmatmul.mubr.f32.gmra.mrb[184].mxu0 %v2225_v48  ;;  %v2229_v63 = vmul.f32 %v6243_v30, %v6243_v30  ;;  %v7802_v48 = vld [vmem:[#allocation108_spill] sm:$0xff]  ;;  %v7803_v30 = vld [vmem:[#allocation109_spill] sm:$0xff] }
 0x394   : > { %7799 = vst [vmem:[#allocation43_spill] sm:$0xff] %v6246_v45  ;;  %v2230_v58 = vmul.f32 %v6246_v45, %v6246_v45  ;;  %v1717_v52 = vpop.f32.mrb[124].mxu1 }
 0x395   : > { %v6253_v41 = vsub.f32 %v5506_v24, %v1717_v52  ;;  %v1719_v44 = vpop.f32.mrb[125].mxu1 }
 0x396   : > { %v6256_v8 = vsub.f32 %v7800_v16, %v1719_v44  ;;  %2450 = vmatprep.mubr.f32.mxu0 %v2230_v58 }
 0x397   : > { %2451 = vmatmul.mubr.f32.gmra.mrb[186].mxu0 %v2229_v63  ;;  %v2233_v13 = vmul.f32 %v6253_v41, %v6253_v41 }
 0x398   : > { %7801 = vst [vmem:[#allocation47_spill] sm:$0xff] %v6256_v8  ;;  %v2234_v50 = vmul.f32 %v6256_v8, %v6256_v8  ;;  %v1723_v1 = vpop.f32.mrb[126].mxu1  ;;  %v7805_v8 = vld [vmem:[#allocation23_spill] sm:$0xff] }
 0x399   : > { %v6263_v38 = vsub.f32 %v7802_v48, %v1723_v1  ;;  %v1725_v45 = vpop.f32.mrb[127].mxu1 }
 0x39a   : > { %v6266_v24 = vsub.f32 %v7803_v30, %v1725_v45  ;;  %2455 = vmatprep.mubr.f32.mxu0 %v2234_v50 }
 0x39b   : > { %2456 = vmatmul.mubr.f32.gmra.mrb[188].mxu0 %v2233_v13  ;;  %v2237_v52 = vmul.f32 %v6263_v38, %v6263_v38 }
 0x39c   : > { %7804 = vst [vmem:[#allocation48_spill] sm:$0xff] %v6266_v24  ;;  %v2238_v16 = vmul.f32 %v6266_v24, %v6266_v24  ;;  %v1794_v58 = vpop.f32.mrb[128].mxu1  ;;  %v7807_v24 = vld [vmem:[#allocation26_spill] sm:$0xff] }
 0x39d   : > { %v6273_v63 = vsub.f32 %v5151_v56, %v1794_v58  ;;  %v1796_v44 = vpop.f32.mrb[129].mxu1 }
 0x39e   : > { %v6276_v1 = vsub.f32 %v7805_v8, %v1796_v44  ;;  %2460 = vmatprep.mubr.f32.mxu0 %v2238_v16 }
 0x39f   : > { %2461 = vmatmul.mubr.f32.gmra.mrb[190].mxu0 %v2237_v52  ;;  %v2115_v50 = vmul.f32 %v6273_v63, %v6273_v63 }
 0x3a0   : > { %7806 = vst [vmem:[#allocation45_spill] sm:$0xff] %v6276_v1  ;;  %v2116_v30 = vmul.f32 %v6276_v1, %v6276_v1  ;;  %v1800_v45 = vpop.f32.mrb[130].mxu1  ;;  %v7809_v1 = vld [vmem:[#allocation31_spill] sm:$0xff] }
 0x3a1   : > { %v6283_v13 = vsub.f32 %v5156_v59, %v1800_v45  ;;  %v1802_v48 = vpop.f32.mrb[131].mxu1 }
 0x3a2   : > { %v6286_v56 = vsub.f32 %v7807_v24, %v1802_v48  ;;  %2530 = vmatprep.mubr.f32.mxu0 %v2116_v30 }
 0x3a3   : > { %2531 = vmatmul.mubr.f32.vlgmr.msra.gmra.mrb[128].mxu0 %v2115_v50  ;;  %v2119_v58 = vmul.f32 %v6283_v13, %v6283_v13 }
 0x3a4   : > { %v2120_v8 = vmul.f32 %v6286_v56, %v6286_v56  ;;  %v1806_v16 = vpop.f32.mrb[132].mxu1 }
 0x3a5   : > { %v6293_v52 = vsub.f32 %v5191_v10, %v1806_v16  ;;  %v1808_v44 = vpop.f32.mrb[133].mxu1 }
 0x3a6   : > { %v6296_v59 = vsub.f32 %v7809_v1, %v1808_v44  ;;  %2535 = vmatprep.mubr.f32.mxu0 %v2120_v8 }
 0x3a7   : > { %7808 = vst [vmem:[#allocation50_spill] sm:$0xff] %v6293_v52  ;;  %2536 = vmatmul.mubr.f32.gmra.mrb[130].mxu0 %v2119_v58  ;;  %v2123_v45 = vmul.f32 %v6293_v52, %v6293_v52 }
 0x3a8   : > { %7810 = vst [vmem:[#allocation52_spill] sm:$0xff] %v6296_v59  ;;  %v2124_v24 = vmul.f32 %v6296_v59, %v6296_v59  ;;  %v1812_v30 = vpop.f32.mrb[134].mxu1 }
 0x3a9   : > { %v6303_v50 = vsub.f32 %v5196_v15, %v1812_v30  ;;  %v1814_v48 = vpop.f32.mrb[135].mxu1 }
 0x3aa   : > { %v6306_v10 = vsub.f32 %v5203_v26, %v1814_v48  ;;  %2540 = vmatprep.mubr.f32.mxu0 %v2124_v24 }
 0x3ab   : > { %7811 = vst [vmem:[#allocation49_spill] sm:$0xff] %v6303_v50  ;;  %2541 = vmatmul.mubr.f32.gmra.mrb[132].mxu0 %v2123_v45  ;;  %v2127_v16 = vmul.f32 %v6303_v50, %v6303_v50 }
 0x3ac   : > { %7812 = vst [vmem:[#allocation53_spill] sm:$0xff] %v6306_v10  ;;  %v2128_v1 = vmul.f32 %v6306_v10, %v6306_v10  ;;  %v1818_v8 = vpop.f32.mrb[136].mxu1 }
 0x3ad   : > { %v6313_v58 = vsub.f32 %v5231_v54, %v1818_v8  ;;  %v1820_v44 = vpop.f32.mrb[137].mxu1 }
 0x3ae   : > { %v6316_v15 = vsub.f32 %v5233_v3, %v1820_v44  ;;  %2545 = vmatprep.mubr.f32.mxu0 %v2128_v1 }
 0x3af   : > { %7813 = vst [vmem:[#allocation54_spill] sm:$0xff] %v6313_v58  ;;  %2546 = vmatmul.mubr.f32.gmra.mrb[134].mxu0 %v2127_v16  ;;  %v2131_v30 = vmul.f32 %v6313_v58, %v6313_v58 }
 0x3b0   : > { %7814 = vst [vmem:[#allocation51_spill] sm:$0xff] %v6316_v15  ;;  %v2132_v26 = vmul.f32 %v6316_v15, %v6316_v15  ;;  %v1824_v24 = vpop.f32.mrb[138].mxu1 }
 0x3b1   : > { %v6323_v45 = vsub.f32 %v5236_v4, %v1824_v24  ;;  %v1826_v48 = vpop.f32.mrb[139].mxu1 }
 0x3b2   : > { %v6326_v54 = vsub.f32 %v5243_v32, %v1826_v48  ;;  %2550 = vmatprep.mubr.f32.mxu0 %v2132_v26 }
 0x3b3   : > { %7815 = vst [vmem:[#allocation56_spill] sm:$0xff] %v6323_v45  ;;  %2551 = vmatmul.mubr.f32.gmra.mrb[136].mxu0 %v2131_v30  ;;  %v2135_v8 = vmul.f32 %v6323_v45, %v6323_v45 }
 0x3b4   : > { %7816 = vst [vmem:[#allocation57_spill] sm:$0xff] %v6326_v54  ;;  %v2136_v3 = vmul.f32 %v6326_v54, %v6326_v54  ;;  %v1830_v1 = vpop.f32.mrb[140].mxu1 }
 0x3b5   : > { %v6333_v16 = vsub.f32 %v5271_v7, %v1830_v1  ;;  %v1832_v44 = vpop.f32.mrb[141].mxu1 }
 0x3b6   : > { %v6336_v4 = vsub.f32 %v5273_v27, %v1832_v44  ;;  %2555 = vmatprep.mubr.f32.mxu0 %v2136_v3 }
 0x3b7   : > { %7817 = vst [vmem:[#allocation55_spill] sm:$0xff] %v6333_v16  ;;  %2556 = vmatmul.mubr.f32.gmra.mrb[138].mxu0 %v2135_v8  ;;  %v2139_v24 = vmul.f32 %v6333_v16, %v6333_v16 }
 0x3b8   : > { %7818 = vst [vmem:[#allocation58_spill] sm:$0xff] %v6336_v4  ;;  %v2140_v32 = vmul.f32 %v6336_v4, %v6336_v4  ;;  %v1836_v26 = vpop.f32.mrb[142].mxu1 }
 0x3b9   : > { %v6343_v30 = vsub.f32 %v5276_v47, %v1836_v26  ;;  %v1838_v48 = vpop.f32.mrb[143].mxu1 }
 0x3ba   : > { %v6346_v7 = vsub.f32 %v5283_v12, %v1838_v48  ;;  %2560 = vmatprep.mubr.f32.mxu0 %v2140_v32 }
 0x3bb   : > { %7819 = vst [vmem:[#allocation59_spill] sm:$0xff] %v6343_v30  ;;  %2561 = vmatmul.mubr.f32.gmra.mrb[140].mxu0 %v2139_v24  ;;  %v2143_v1 = vmul.f32 %v6343_v30, %v6343_v30 }
 0x3bc   : > { %7820 = vst [vmem:[#allocation60_spill] sm:$0xff] %v6346_v7  ;;  %v2144_v27 = vmul.f32 %v6346_v7, %v6346_v7  ;;  %v1842_v3 = vpop.f32.mrb[144].mxu1 }
 0x3bd   : > { %v6353_v8 = vsub.f32 %v5311_v6, %v1842_v3  ;;  %v1844_v44 = vpop.f32.mrb[145].mxu1 }
 0x3be   : > { %v6356_v47 = vsub.f32 %v5313_v5, %v1844_v44  ;;  %2565 = vmatprep.mubr.f32.mxu0 %v2144_v27 }
 0x3bf   : > { %7821 = vst [vmem:[#allocation61_spill] sm:$0xff] %v6353_v8  ;;  %2566 = vmatmul.mubr.f32.gmra.mrb[142].mxu0 %v2143_v1  ;;  %v2147_v26 = vmul.f32 %v6353_v8, %v6353_v8 }
 0x3c0   : > { %7822 = vst [vmem:[#allocation62_spill] sm:$0xff] %v6356_v47  ;;  %v2148_v12 = vmul.f32 %v6356_v47, %v6356_v47  ;;  %v1848_v32 = vpop.f32.mrb[146].mxu1 }
 0x3c1   : > { %v6363_v24 = vsub.f32 %v5316_v46, %v1848_v32  ;;  %v1850_v48 = vpop.f32.mrb[147].mxu1 }
 0x3c2   : > { %v6366_v6 = vsub.f32 %v5323_v40, %v1850_v48  ;;  %2570 = vmatprep.mubr.f32.mxu0 %v2148_v12 }
 0x3c3   : > { %7823 = vst [vmem:[#allocation63_spill] sm:$0xff] %v6363_v24  ;;  %2571 = vmatmul.mubr.f32.gmra.mrb[144].mxu0 %v2147_v26  ;;  %v2151_v3 = vmul.f32 %v6363_v24, %v6363_v24 }
 0x3c4   : > { %7824 = vst [vmem:[#allocation66_spill] sm:$0xff] %v6366_v6  ;;  %v2152_v5 = vmul.f32 %v6366_v6, %v6366_v6  ;;  %v1854_v27 = vpop.f32.mrb[148].mxu1 }
 0x3c5   : > { %v6373_v1 = vsub.f32 %v5345_v33, %v1854_v27  ;;  %v1856_v44 = vpop.f32.mrb[149].mxu1 }
 0x3c6   : > { %v6376_v46 = vsub.f32 %v5347_v60, %v1856_v44  ;;  %2575 = vmatprep.mubr.f32.mxu0 %v2152_v5 }
 0x3c7   : > { %7825 = vst [vmem:[#allocation68_spill] sm:$0xff] %v6373_v1  ;;  %2576 = vmatmul.mubr.f32.gmra.mrb[146].mxu0 %v2151_v3  ;;  %v2155_v32 = vmul.f32 %v6373_v1, %v6373_v1 }
 0x3c8   : > { %7826 = vst [vmem:[#allocation69_spill] sm:$0xff] %v6376_v46  ;;  %v2156_v40 = vmul.f32 %v6376_v46, %v6376_v46  ;;  %v1860_v12 = vpop.f32.mrb[150].mxu1 }
 0x3c9   : > { %v6383_v26 = vsub.f32 %v5350_v43, %v1860_v12  ;;  %v1862_v48 = vpop.f32.mrb[151].mxu1 }
 0x3ca   : > { %v6386_v33 = vsub.f32 %v5355_v2, %v1862_v48  ;;  %2580 = vmatprep.mubr.f32.mxu0 %v2156_v40 }
 0x3cb   : > { %7827 = vst [vmem:[#allocation70_spill] sm:$0xff] %v6383_v26  ;;  %2581 = vmatmul.mubr.f32.gmra.mrb[148].mxu0 %v2155_v32  ;;  %v2159_v27 = vmul.f32 %v6383_v26, %v6383_v26 }
 0x3cc   : > { %7828 = vst [vmem:[#allocation74_spill] sm:$0xff] %v6386_v33  ;;  %v2160_v60 = vmul.f32 %v6386_v33, %v6386_v33  ;;  %v1866_v5 = vpop.f32.mrb[152].mxu1 }
 0x3cd   : > { %v6393_v3 = vsub.f32 %v5367_v39, %v1866_v5  ;;  %v1868_v44 = vpop.f32.mrb[153].mxu1 }
 0x3ce   : > { %v6396_v43 = vsub.f32 %v5369_v0, %v1868_v44  ;;  %2585 = vmatprep.mubr.f32.mxu0 %v2160_v60 }
 0x3cf   : > { %7829 = vst [vmem:[#allocation76_spill] sm:$0xff] %v6393_v3  ;;  %2586 = vmatmul.mubr.f32.gmra.mrb[150].mxu0 %v2159_v27  ;;  %v2163_v12 = vmul.f32 %v6393_v3, %v6393_v3  ;;  %v7886_v3 = vld [vmem:[#allocation113_spill] sm:$0xff] }
 0x3d0   : > { %7830 = vst [vmem:[#allocation77_spill] sm:$0xff] %v6396_v43  ;;  %v2164_v2 = vmul.f32 %v6396_v43, %v6396_v43  ;;  %v1872_v40 = vpop.f32.mrb[154].mxu1  ;;  %v7834_v43 = vld [vmem:[#allocation64_spill] sm:$0xff] }
 0x3d1   : > { %v6403_v32 = vsub.f32 %v5372_v53, %v1872_v40  ;;  %v1874_v48 = vpop.f32.mrb[155].mxu1 }
 0x3d2   : > { %v6406_v39 = vsub.f32 %v5376_v49, %v1874_v48  ;;  %2590 = vmatprep.mubr.f32.mxu0 %v2164_v2 }
 0x3d3   : > { %7831 = vst [vmem:[#allocation78_spill] sm:$0xff] %v6403_v32  ;;  %2591 = vmatmul.mubr.f32.gmra.mrb[152].mxu0 %v2163_v12  ;;  %v2167_v5 = vmul.f32 %v6403_v32, %v6403_v32  ;;  %v7836_v12 = vld [vmem:[#allocation65_spill] sm:$0xff]  ;;  %v7838_v32 = vld [vmem:[#allocation67_spill] sm:$0xff] }
 0x3d4   : > { %7832 = vst [vmem:[#allocation82_spill] sm:$0xff] %v6406_v39  ;;  %v2168_v0 = vmul.f32 %v6406_v39, %v6406_v39  ;;  %v1878_v60 = vpop.f32.mrb[156].mxu1 }
 0x3d5   : > { %v6413_v27 = vsub.f32 %v5387_v61, %v1878_v60  ;;  %v1880_v44 = vpop.f32.mrb[157].mxu1 }
 0x3d6   : > { %v6416_v53 = vsub.f32 %v7834_v43, %v1880_v44  ;;  %2595 = vmatprep.mubr.f32.mxu0 %v2168_v0 }
 0x3d7   : > { %7833 = vst [vmem:[#allocation84_spill] sm:$0xff] %v6413_v27  ;;  %2596 = vmatmul.mubr.f32.gmra.mrb[154].mxu0 %v2167_v5  ;;  %v2171_v40 = vmul.f32 %v6413_v27, %v6413_v27  ;;  %v7840_v5 = vld [vmem:[#allocation71_spill] sm:$0xff]  ;;  %v7842_v27 = vld [vmem:[#allocation72_spill] sm:$0xff] }
 0x3d8   : > { %7835 = vst [vmem:[#allocation85_spill] sm:$0xff] %v6416_v53  ;;  %v2172_v49 = vmul.f32 %v6416_v53, %v6416_v53  ;;  %v1884_v2 = vpop.f32.mrb[158].mxu1 }
 0x3d9   : > { %v6423_v48 = vsub.f32 %v7836_v12, %v1884_v2  ;;  %v1886_v39 = vpop.f32.mrb[159].mxu1 }
 0x3da   : > { %v6426_v61 = vsub.f32 %v7838_v32, %v1886_v39  ;;  %2600 = vmatprep.mubr.f32.mxu0 %v2172_v49 }
 0x3db   : > { %7837 = vst [vmem:[#allocation86_spill] sm:$0xff] %v6423_v48  ;;  %2601 = vmatmul.mubr.f32.gmra.mrb[156].mxu0 %v2171_v40  ;;  %v2175_v60 = vmul.f32 %v6423_v48, %v6423_v48  ;;  %v7844_v40 = vld [vmem:[#allocation73_spill] sm:$0xff]  ;;  %v7846_v48 = vld [vmem:[#allocation75_spill] sm:$0xff] }
 0x3dc   : > { %7839 = vst [vmem:[#allocation90_spill] sm:$0xff] %v6426_v61  ;;  %v2176_v43 = vmul.f32 %v6426_v61, %v6426_v61  ;;  %v1890_v0 = vpop.f32.mrb[160].mxu1 }
 0x3dd   : > { %v6433_v44 = vsub.f32 %v7840_v5, %v1890_v0  ;;  %v1892_v53 = vpop.f32.mrb[161].mxu1 }
 0x3de   : > { %v6436_v2 = vsub.f32 %v7842_v27, %v1892_v53  ;;  %2605 = vmatprep.mubr.f32.mxu0 %v2176_v43 }
 0x3df   : > { %7841 = vst [vmem:[#allocation92_spill] sm:$0xff] %v6433_v44  ;;  %2606 = vmatmul.mubr.f32.gmra.mrb[158].mxu0 %v2175_v60  ;;  %v2179_v49 = vmul.f32 %v6433_v44, %v6433_v44  ;;  %v7848_v60 = vld [vmem:[#allocation79_spill] sm:$0xff]  ;;  %v7850_v44 = vld [vmem:[#allocation80_spill] sm:$0xff] }
 0x3e0   : > { %7843 = vst [vmem:[#allocation93_spill] sm:$0xff] %v6436_v2  ;;  %v2180_v32 = vmul.f32 %v6436_v2, %v6436_v2  ;;  %v1896_v39 = vpop.f32.mrb[162].mxu1 }
 0x3e1   : > { %v6443_v12 = vsub.f32 %v7844_v40, %v1896_v39  ;;  %v1898_v61 = vpop.f32.mrb[163].mxu1 }
 0x3e2   : > { %v6446_v0 = vsub.f32 %v7846_v48, %v1898_v61  ;;  %2610 = vmatprep.mubr.f32.mxu0 %v2180_v32 }
 0x3e3   : > { %7845 = vst [vmem:[#allocation94_spill] sm:$0xff] %v6443_v12  ;;  %2611 = vmatmul.mubr.f32.gmra.mrb[160].mxu0 %v2179_v49  ;;  %v2183_v43 = vmul.f32 %v6443_v12, %v6443_v12  ;;  %v7852_v49 = vld [vmem:[#allocation81_spill] sm:$0xff]  ;;  %v7854_v12 = vld [vmem:[#allocation83_spill] sm:$0xff] }
 0x3e4   : > { %7847 = vst [vmem:[#allocation98_spill] sm:$0xff] %v6446_v0  ;;  %v2184_v27 = vmul.f32 %v6446_v0, %v6446_v0  ;;  %v1902_v53 = vpop.f32.mrb[164].mxu1 }
 0x3e5   : > { %v6453_v5 = vsub.f32 %v7848_v60, %v1902_v53  ;;  %v1904_v2 = vpop.f32.mrb[165].mxu1 }
 0x3e6   : > { %v6456_v39 = vsub.f32 %v7850_v44, %v1904_v2  ;;  %2615 = vmatprep.mubr.f32.mxu0 %v2184_v27 }
 0x3e7   : > { %7849 = vst [vmem:[#allocation100_spill] sm:$0xff] %v6453_v5  ;;  %2616 = vmatmul.mubr.f32.gmra.mrb[162].mxu0 %v2183_v43  ;;  %v2187_v32 = vmul.f32 %v6453_v5, %v6453_v5  ;;  %v7856_v43 = vld [vmem:[#allocation87_spill] sm:$0xff]  ;;  %v7858_v5 = vld [vmem:[#allocation88_spill] sm:$0xff] }
 0x3e8   : > { %7851 = vst [vmem:[#allocation101_spill] sm:$0xff] %v6456_v39  ;;  %v2188_v48 = vmul.f32 %v6456_v39, %v6456_v39  ;;  %v1908_v61 = vpop.f32.mrb[166].mxu1 }
 0x3e9   : > { %v6463_v40 = vsub.f32 %v7852_v49, %v1908_v61  ;;  %v1910_v0 = vpop.f32.mrb[167].mxu1 }
 0x3ea   : > { %v6466_v53 = vsub.f32 %v7854_v12, %v1910_v0  ;;  %2620 = vmatprep.mubr.f32.mxu0 %v2188_v48 }
 0x3eb   : > { %7853 = vst [vmem:[#allocation102_spill] sm:$0xff] %v6463_v40  ;;  %2621 = vmatmul.mubr.f32.gmra.mrb[164].mxu0 %v2187_v32  ;;  %v2191_v27 = vmul.f32 %v6463_v40, %v6463_v40  ;;  %v7860_v32 = vld [vmem:[#allocation89_spill] sm:$0xff]  ;;  %v7862_v40 = vld [vmem:[#allocation91_spill] sm:$0xff] }
 0x3ec   : > { %7855 = vst [vmem:[#allocation107_spill] sm:$0xff] %v6466_v53  ;;  %v2192_v44 = vmul.f32 %v6466_v53, %v6466_v53  ;;  %v1914_v2 = vpop.f32.mrb[168].mxu1 }
 0x3ed   : > { %v6473_v60 = vsub.f32 %v7856_v43, %v1914_v2  ;;  %v1916_v39 = vpop.f32.mrb[169].mxu1 }
 0x3ee   : > { %v6476_v61 = vsub.f32 %v7858_v5, %v1916_v39  ;;  %2625 = vmatprep.mubr.f32.mxu0 %v2192_v44 }
 0x3ef   : > { %7857 = vst [vmem:[#allocation108_spill] sm:$0xff] %v6473_v60  ;;  %2626 = vmatmul.mubr.f32.gmra.mrb[166].mxu0 %v2191_v27  ;;  %v2195_v48 = vmul.f32 %v6473_v60, %v6473_v60  ;;  %v7864_v27 = vld [vmem:[#allocation95_spill] sm:$0xff]  ;;  %v7866_v60 = vld [vmem:[#allocation96_spill] sm:$0xff] }
 0x3f0   : > { %7859 = vst [vmem:[#allocation109_spill] sm:$0xff] %v6476_v61  ;;  %v2196_v12 = vmul.f32 %v6476_v61, %v6476_v61  ;;  %v1920_v0 = vpop.f32.mrb[170].mxu1 }
 0x3f1   : > { %v6483_v49 = vsub.f32 %v7860_v32, %v1920_v0  ;;  %v1922_v53 = vpop.f32.mrb[171].mxu1 }
 0x3f2   : > { %v6486_v2 = vsub.f32 %v7862_v40, %v1922_v53  ;;  %2630 = vmatprep.mubr.f32.mxu0 %v2196_v12 }
 0x3f3   : > { %7861 = vst [vmem:[#allocation23_spill] sm:$0xff] %v6483_v49  ;;  %2631 = vmatmul.mubr.f32.gmra.mrb[168].mxu0 %v2195_v48  ;;  %v2199_v44 = vmul.f32 %v6483_v49, %v6483_v49  ;;  %v7868_v48 = vld [vmem:[#allocation97_spill] sm:$0xff]  ;;  %v7870_v49 = vld [vmem:[#allocation99_spill] sm:$0xff] }
 0x3f4   : > { %7863 = vst [vmem:[#allocation26_spill] sm:$0xff] %v6486_v2  ;;  %v2200_v5 = vmul.f32 %v6486_v2, %v6486_v2  ;;  %v1926_v39 = vpop.f32.mrb[172].mxu1 }
 0x3f5   : > { %v6493_v43 = vsub.f32 %v7864_v27, %v1926_v39  ;;  %v1928_v61 = vpop.f32.mrb[173].mxu1 }
 0x3f6   : > { %v6496_v0 = vsub.f32 %v7866_v60, %v1928_v61  ;;  %2635 = vmatprep.mubr.f32.mxu0 %v2200_v5 }
 0x3f7   : > { %7865 = vst [vmem:[#allocation31_spill] sm:$0xff] %v6493_v43  ;;  %2636 = vmatmul.mubr.f32.gmra.mrb[170].mxu0 %v2199_v44  ;;  %v2203_v12 = vmul.f32 %v6493_v43, %v6493_v43  ;;  %v7872_v44 = vld [vmem:[#allocation103_spill] sm:$0xff]  ;;  %v7874_v43 = vld [vmem:[#allocation104_spill] sm:$0xff] }
 0x3f8   : > { %7867 = vst [vmem:[#allocation64_spill] sm:$0xff] %v6496_v0  ;;  %v2204_v40 = vmul.f32 %v6496_v0, %v6496_v0  ;;  %v1932_v53 = vpop.f32.mrb[174].mxu1 }
 0x3f9   : > { %v6503_v32 = vsub.f32 %v7868_v48, %v1932_v53  ;;  %v1934_v2 = vpop.f32.mrb[175].mxu1 }
 0x3fa   : > { %v6506_v39 = vsub.f32 %v7870_v49, %v1934_v2  ;;  %2640 = vmatprep.mubr.f32.mxu0 %v2204_v40 }
 0x3fb   : > { %7869 = vst [vmem:[#allocation65_spill] sm:$0xff] %v6503_v32  ;;  %2641 = vmatmul.mubr.f32.gmra.mrb[172].mxu0 %v2203_v12  ;;  %v2207_v5 = vmul.f32 %v6503_v32, %v6503_v32  ;;  %v7876_v12 = vld [vmem:[#allocation105_spill] sm:$0xff]  ;;  %v7878_v32 = vld [vmem:[#allocation106_spill] sm:$0xff] }
 0x3fc   : > { %7871 = vst [vmem:[#allocation67_spill] sm:$0xff] %v6506_v39  ;;  %v2208_v60 = vmul.f32 %v6506_v39, %v6506_v39  ;;  %v1938_v61 = vpop.f32.mrb[176].mxu1 }
 0x3fd   : > { %v6513_v27 = vsub.f32 %v7872_v44, %v1938_v61  ;;  %v1940_v0 = vpop.f32.mrb[177].mxu1 }
 0x3fe   : > { %v6516_v53 = vsub.f32 %v7874_v43, %v1940_v0  ;;  %2645 = vmatprep.mubr.f32.mxu0 %v2208_v60 }
 0x3ff   : > { %7873 = vst [vmem:[#allocation71_spill] sm:$0xff] %v6513_v27  ;;  %2646 = vmatmul.mubr.f32.gmra.mrb[174].mxu0 %v2207_v5  ;;  %v2211_v40 = vmul.f32 %v6513_v27, %v6513_v27  ;;  %v7880_v5 = vld [vmem:[#allocation110_spill] sm:$0xff] }
 0x400   : > { %7875 = vst [vmem:[#allocation72_spill] sm:$0xff] %v6516_v53  ;;  %v2212_v49 = vmul.f32 %v6516_v53, %v6516_v53  ;;  %v1944_v2 = vpop.f32.mrb[178].mxu1 }
 0x401   : > { %v6523_v48 = vsub.f32 %v7876_v12, %v1944_v2  ;;  %v1946_v39 = vpop.f32.mrb[179].mxu1  ;;  %v2726_v2 = vld [vmem:[%s7327_s4 + $0x18] sm:$0xff] }
 0x402   : > { %v6526_v61 = vsub.f32 %v7878_v32, %v1946_v39  ;;  %2650 = vmatprep.mubr.f32.mxu0 %v2212_v49  ;;  %v2730_v32 = vld [vmem:[%s7327_s4 + $0x38] sm:$0xff]  ;;  %v7882_v39 = vld [vmem:[#allocation111_spill] sm:$0xff] }
 0x403   : > { %7877 = vst [vmem:[#allocation73_spill] sm:$0xff] %v6523_v48  ;;  %2651 = vmatmul.mubr.f32.gmra.mrb[176].mxu0 %v2211_v40  ;;  %v2215_v60 = vmul.f32 %v6523_v48, %v6523_v48  ;;  %v4328_v40 = vpack.c.bf16 %v2730_v32, %v2726_v2  ;;  %v7888_v2 = vld [vmem:[#allocation114_spill] sm:$0xff] }
 0x404   : > { %7879 = vst [vmem:[#allocation75_spill] sm:$0xff] %v6526_v61  ;;  %v2216_v43 = vmul.f32 %v6526_v61, %v6526_v61  ;;  %v1950_v0 = vpop.f32.mrb[180].mxu1  ;;  %v7884_v61 = vld [vmem:[#allocation112_spill] sm:$0xff] }
 0x405   : > { %v6533_v44 = vsub.f32 %v7880_v5, %v1950_v0  ;;  %v1952_v53 = vpop.f32.mrb[181].mxu1  ;;  %4329 = vmatprep.subr.bf16.mxu1 %v4328_v40  ;;  %v7890_v40 = vld [vmem:[#allocation115_spill] sm:$0xff] }
 0x406   : > { %v6542_v49 = vsub.f32 %v7882_v39, %v1952_v53  ;;  %2655 = vmatprep.mubr.f32.mxu0 %v2216_v43 }
 0x407   : > { %7881 = vst [vmem:[#allocation79_spill] sm:$0xff] %v6533_v44  ;;  %2656 = vmatmul.mubr.f32.gmra.mrb[178].mxu0 %v2215_v60  ;;  %v2219_v5 = vmul.f32 %v6533_v44, %v6533_v44 }
 0x408   : > { %7883 = vst [vmem:[#allocation80_spill] sm:$0xff] %v6542_v49  ;;  %v2220_v12 = vmul.f32 %v6542_v49, %v6542_v49  ;;  %v1956_v0 = vpop.f32.mrb[182].mxu1 }
 0x409   : > { %v6549_v48 = vsub.f32 %v7884_v61, %v1956_v0  ;;  %v1958_v27 = vpop.f32.mrb[183].mxu1  ;;  %v7892_v0 = vld [vmem:[#allocation116_spill] sm:$0xff] }
 0x40a   : > { %v6552_v33 = vsub.f32 %v7886_v3, %v1958_v27  ;;  %2660 = vmatprep.mubr.f32.mxu0 %v2220_v12 }
 0x40b   : > { %7885 = vst [vmem:[#allocation81_spill] sm:$0xff] %v6549_v48  ;;  %2661 = vmatmul.mubr.f32.gmra.mrb[180].mxu0 %v2219_v5  ;;  %v2223_v60 = vmul.f32 %v6549_v48, %v6549_v48  ;;  %v7894_v48 = vld [vmem:[#allocation117_spill] sm:$0xff] }
 0x40c   : > { %7887 = vst [vmem:[#allocation83_spill] sm:$0xff] %v6552_v33  ;;  %v2224_v53 = vmul.f32 %v6552_v33, %v6552_v33  ;;  %v1962_v43 = vpop.f32.mrb[184].mxu1 }
 0x40d   : > { %v6559_v32 = vsub.f32 %v7888_v2, %v1962_v43  ;;  %v1964_v39 = vpop.f32.mrb[185].mxu1 }
 0x40e   : > { %v6562_v61 = vsub.f32 %v7890_v40, %v1964_v39  ;;  %2665 = vmatprep.mubr.f32.mxu0 %v2224_v53  ;;  %v7896_v39 = vld [vmem:[#allocation118_spill] sm:$0xff] }
 0x40f   : > { %7889 = vst [vmem:[#allocation87_spill] sm:$0xff] %v6559_v32  ;;  %2666 = vmatmul.mubr.f32.gmra.mrb[182].mxu0 %v2223_v60  ;;  %v2227_v12 = vmul.f32 %v6559_v32, %v6559_v32  ;;  %v7898_v32 = vld [vmem:[#allocation119_spill] sm:$0xff] }
 0x410   : > { %7891 = vst [vmem:[#allocation88_spill] sm:$0xff] %v6562_v61  ;;  %v2228_v3 = vmul.f32 %v6562_v61, %v6562_v61  ;;  %v1968_v27 = vpop.f32.mrb[186].mxu1 }
 0x411   : > { %v6569_v5 = vsub.f32 %v7892_v0, %v1968_v27  ;;  %v1970_v33 = vpop.f32.mrb[187].mxu1 }
 0x412   : > { %v6572_v43 = vsub.f32 %v7894_v48, %v1970_v33  ;;  %2670 = vmatprep.mubr.f32.mxu0 %v2228_v3 }
 0x413   : > { %7893 = vst [vmem:[#allocation89_spill] sm:$0xff] %v6569_v5  ;;  %2671 = vmatmul.mubr.f32.gmra.mrb[184].mxu0 %v2227_v12  ;;  %v2231_v2 = vmul.f32 %v6569_v5, %v6569_v5  ;;  %v7900_v12 = vld [vmem:[#allocation120_spill] sm:$0xff]  ;;  %v7902_v5 = vld [vmem:[#allocation121_spill] sm:$0xff] }
 0x414   : > { %7895 = vst [vmem:[#allocation91_spill] sm:$0xff] %v6572_v43  ;;  %v2232_v53 = vmul.f32 %v6572_v43, %v6572_v43  ;;  %v1974_v60 = vpop.f32.mrb[188].mxu1 }
 0x415   : > { %v6579_v40 = vsub.f32 %v7896_v39, %v1974_v60  ;;  %v1976_v61 = vpop.f32.mrb[189].mxu1 }
 0x416   : > { %v6582_v27 = vsub.f32 %v7898_v32, %v1976_v61  ;;  %2675 = vmatprep.mubr.f32.mxu0 %v2232_v53 }
 0x417   : > { %7897 = vst [vmem:[#allocation95_spill] sm:$0xff] %v6579_v40  ;;  %2676 = vmatmul.mubr.f32.gmra.mrb[186].mxu0 %v2231_v2  ;;  %v2235_v3 = vmul.f32 %v6579_v40, %v6579_v40 }
 0x418   : > { %7899 = vst [vmem:[#allocation96_spill] sm:$0xff] %v6582_v27  ;;  %v2236_v33 = vmul.f32 %v6582_v27, %v6582_v27  ;;  %v1980_v48 = vpop.f32.mrb[190].mxu1 }
 0x419   : > { %v6589_v0 = vsub.f32 %v7900_v12, %v1980_v48  ;;  %v1982_v43 = vpop.f32.mrb[191].mxu1 }
 0x41a   : > { %v6592_v60 = vsub.f32 %v7902_v5, %v1982_v43  ;;  %2680 = vmatprep.mubr.f32.mxu0 %v2236_v33  ;;  %v2725_v43 = vld [vmem:[%s7327_s4 + $0x10] sm:$0xff] }
 0x41b   : > { %7901 = vst [vmem:[#allocation97_spill] sm:$0xff] %v6589_v0  ;;  %2681 = vmatmul.mubr.f32.gmra.mrb[188].mxu0 %v2235_v3  ;;  %v2239_v61 = vmul.f32 %v6589_v0, %v6589_v0  ;;  %v2729_v33 = vld [vmem:[%s7327_s4 + $0x30] sm:$0xff] }
 0x41c   : > { %7903 = vst [vmem:[#allocation99_spill] sm:$0xff] %v6592_v60  ;;  %v2240_v32 = vmul.f32 %v6592_v60, %v6592_v60 }
 0x41e   : > { %2685 = vmatprep.mubr.f32.mxu0 %v2240_v32 }
 0x41f   : > { %2686 = vmatmul.mubr.f32.gmra.mrb[190].mxu0 %v2239_v61  ;;  %v4330_v61 = vpack.c.bf16 %v2729_v33, %v2725_v43 }
 0x476   : > { %v2532_v53 = vpop.f32.mrb[128].mxu0 }
 0x477   : > { %v4332_v2 = vadd.f32 1e-05, %v2532_v53  ;;  %v2534_v39 = vpop.f32.mrb[129].mxu0 }
 0x479   : > { %4564 = vrsqrt.f32 %v4332_v2 }
 0x47a   : > { %v2537_v48 = vpop.f32.mrb[130].mxu0 }
 0x47b   : > { %v4333_v12 = vadd.f32 1e-05, %v2537_v48  ;;  %v2539_v27 = vpop.f32.mrb[131].mxu0 }
 0x47d   : > { %4566 = vrsqrt.f32 %v4333_v12 }
 0x47e   : > { %v2542_v5 = vpop.f32.mrb[132].mxu0 }
 0x47f   : > { %v4334_v3 = vadd.f32 1e-05, %v2542_v5  ;;  %v2544_v32 = vpop.f32.mrb[133].mxu0 }
 0x481   : > { %4568 = vrsqrt.f32 %v4334_v3 }
 0x482   : > { %v2547_v53 = vpop.f32.mrb[134].mxu0 }
 0x483   : > { %v6604_v39 = vpop.eup %4564  ;;  %v4335_v2 = vadd.f32 1e-05, %v2547_v53  ;;  %v2549_v48 = vpop.f32.mrb[135].mxu0 }
 0x484   : > { %3955 = vmatmul.mubr.msk.f32.vlgmr.msra.gmra.mrb[192].mxu1 %vm1374_vm1, %v6604_v39 }
 0x485   : > { %4570 = vrsqrt.f32 %v4335_v2  ;;  %4331 = vmatpush1.bf16.msra.mxu1 %v4330_v61  ;;  %2897 = vmatprep.mubr.f32.mxu1 %v7685_v14 }
 0x486   : > { %v2552_v27 = vpop.f32.mrb[136].mxu0 }
 0x487   : > { %v6609_v12 = vpop.eup %4566  ;;  %v4336_v60 = vadd.f32 1e-05, %v2552_v27  ;;  %v2554_v5 = vpop.f32.mrb[137].mxu0 }
 0x488   : > { %3956 = vmatmul.mubr.msk.f32.gmra.mrb[194].mxu1 %vm1374_vm1, %v6609_v12 }
 0x489   : > { %4572 = vrsqrt.f32 %v4336_v60  ;;  %2903 = vmatprep.mubr.f32.mxu1 %v7685_v14 }
 0x48a   : > { %v2557_v43 = vpop.f32.mrb[138].mxu0 }
 0x48b   : > { %v6614_v33 = vpop.eup %4568  ;;  %v4337_v3 = vadd.f32 1e-05, %v2557_v43  ;;  %v2559_v32 = vpop.f32.mrb[139].mxu0 }
 0x48c   : > { %3957 = vmatmul.mubr.msk.f32.gmra.mrb[196].mxu1 %vm1374_vm1, %v6614_v33 }
 0x48d   : > { %4574 = vrsqrt.f32 %v4337_v3  ;;  %2909 = vmatprep.mubr.f32.mxu1 %v7685_v14 }
 0x48e   : > { %v2562_v61 = vpop.f32.mrb[140].mxu0 }
 0x48f   : > { %v6619_v53 = vpop.eup %4570  ;;  %v4338_v2 = vadd.f32 1e-05, %v2562_v61  ;;  %v2564_v48 = vpop.f32.mrb[141].mxu0 }
 0x490   : > { %3958 = vmatmul.mubr.msk.f32.gmra.mrb[198].mxu1 %vm1374_vm1, %v6619_v53 }
 0x491   : > { %4576 = vrsqrt.f32 %v4338_v2  ;;  %2915 = vmatprep.mubr.f32.mxu1 %v7685_v14 }
 0x492   : > { %v2567_v60 = vpop.f32.mrb[142].mxu0 }
 0x493   : > { %v6624_v27 = vpop.eup %4572  ;;  %v4339_v5 = vadd.f32 1e-05, %v2567_v60  ;;  %v2569_v43 = vpop.f32.mrb[143].mxu0 }
 0x494   : > { %3959 = vmatmul.mubr.msk.f32.gmra.mrb[200].mxu1 %vm1374_vm1, %v6624_v27 }
 0x495   : > { %4578 = vrsqrt.f32 %v4339_v5  ;;  %2921 = vmatprep.mubr.f32.mxu1 %v7685_v14 }
 0x496   : > { %v2572_v3 = vpop.f32.mrb[144].mxu0 }
 0x497   : > { %v6629_v32 = vpop.eup %4574  ;;  %v4340_v61 = vadd.f32 1e-05, %v2572_v3  ;;  %v2574_v48 = vpop.f32.mrb[145].mxu0 }
 0x498   : > { %3960 = vmatmul.mubr.msk.f32.gmra.mrb[202].mxu1 %vm1374_vm1, %v6629_v32 }
 0x499   : > { %4580 = vrsqrt.f32 %v4340_v61  ;;  %2927 = vmatprep.mubr.f32.mxu1 %v7685_v14 }
 0x49a   : > { %v2577_v2 = vpop.f32.mrb[146].mxu0 }
 0x49b   : > { %v6634_v60 = vpop.eup %4576  ;;  %v4341_v43 = vadd.f32 1e-05, %v2577_v2  ;;  %v2579_v0 = vpop.f32.mrb[147].mxu0 }
 0x49c   : > { %3961 = vmatmul.mubr.msk.f32.gmra.mrb[204].mxu1 %vm1374_vm1, %v6634_v60 }
 0x49d   : > { %4582 = vrsqrt.f32 %v4341_v43  ;;  %2933 = vmatprep.mubr.f32.mxu1 %v7685_v14 }
 0x49e   : > { %v2582_v5 = vpop.f32.mrb[148].mxu0 }
 0x49f   : > { %v6639_v3 = vpop.eup %4578  ;;  %v4342_v48 = vadd.f32 1e-05, %v2582_v5  ;;  %v2584_v40 = vpop.f32.mrb[149].mxu0 }
 0x4a0   : > { %3962 = vmatmul.mubr.msk.f32.gmra.mrb[206].mxu1 %vm1374_vm1, %v6639_v3 }
 0x4a1   : > { %4584 = vrsqrt.f32 %v4342_v48  ;;  %2939 = vmatprep.mubr.f32.mxu1 %v7685_v14 }
 0x4a2   : > { %v2587_v61 = vpop.f32.mrb[150].mxu0 }
 0x4a3   : > { %v6644_v2 = vpop.eup %4580  ;;  %v4343_v0 = vadd.f32 1e-05, %v2587_v61  ;;  %v2589_v49 = vpop.f32.mrb[151].mxu0 }
 0x4a4   : > { %3963 = vmatmul.mubr.msk.f32.gmra.mrb[208].mxu1 %vm1374_vm1, %v6644_v2 }
 0x4a5   : > { %4586 = vrsqrt.f32 %v4343_v0  ;;  %2945 = vmatprep.mubr.f32.mxu1 %v7685_v14 }
 0x4a6   : > { %v2592_v43 = vpop.f32.mrb[152].mxu0 }
 0x4a7   : > { %v6649_v5 = vpop.eup %4582  ;;  %v4344_v40 = vadd.f32 1e-05, %v2592_v43  ;;  %v2594_v44 = vpop.f32.mrb[153].mxu0 }
 0x4a8   : > { %3964 = vmatmul.mubr.msk.f32.gmra.mrb[210].mxu1 %vm1374_vm1, %v6649_v5 }
 0x4a9   : > { %4588 = vrsqrt.f32 %v4344_v40  ;;  %2951 = vmatprep.mubr.f32.mxu1 %v7685_v14 }
 0x4aa   : > { %v2597_v48 = vpop.f32.mrb[154].mxu0 }
 0x4ab   : > { %v6654_v61 = vpop.eup %4584  ;;  %v4345_v49 = vadd.f32 1e-05, %v2597_v48  ;;  %v2599_v26 = vpop.f32.mrb[155].mxu0 }
 0x4ac   : > { %3965 = vmatmul.mubr.msk.f32.gmra.mrb[212].mxu1 %vm1374_vm1, %v6654_v61 }
 0x4ad   : > { %4590 = vrsqrt.f32 %v4345_v49  ;;  %2957 = vmatprep.mubr.f32.mxu1 %v7685_v14 }
 0x4ae   : > { %v2602_v0 = vpop.f32.mrb[156].mxu0 }
 0x4af   : > { %v6659_v43 = vpop.eup %4586  ;;  %v4346_v44 = vadd.f32 1e-05, %v2602_v0  ;;  %v2604_v46 = vpop.f32.mrb[157].mxu0 }
 0x4b0   : > { %3966 = vmatmul.mubr.msk.f32.gmra.mrb[214].mxu1 %vm1374_vm1, %v6659_v43 }
 0x4b1   : > { %4592 = vrsqrt.f32 %v4346_v44  ;;  %2963 = vmatprep.mubr.f32.mxu1 %v7685_v14 }
 0x4b2   : > { %v2607_v40 = vpop.f32.mrb[158].mxu0 }
 0x4b3   : > { %v6664_v48 = vpop.eup %4588  ;;  %v4347_v26 = vadd.f32 1e-05, %v2607_v40  ;;  %v2609_v1 = vpop.f32.mrb[159].mxu0 }
 0x4b4   : > { %3967 = vmatmul.mubr.msk.f32.gmra.mrb[216].mxu1 %vm1374_vm1, %v6664_v48 }
 0x4b5   : > { %4594 = vrsqrt.f32 %v4347_v26  ;;  %2969 = vmatprep.mubr.f32.mxu1 %v7685_v14 }
 0x4b6   : > { %v2612_v49 = vpop.f32.mrb[160].mxu0 }
 0x4b7   : > { %v6669_v0 = vpop.eup %4590  ;;  %v4348_v46 = vadd.f32 1e-05, %v2612_v49  ;;  %v2614_v6 = vpop.f32.mrb[161].mxu0 }
 0x4b8   : > { %3968 = vmatmul.mubr.msk.f32.gmra.mrb[218].mxu1 %vm1374_vm1, %v6669_v0 }
 0x4b9   : > { %4596 = vrsqrt.f32 %v4348_v46  ;;  %2975 = vmatprep.mubr.f32.mxu1 %v7685_v14 }
 0x4ba   : > { %v2617_v44 = vpop.f32.mrb[162].mxu0 }
 0x4bb   : > { %v6674_v40 = vpop.eup %4592  ;;  %v4349_v1 = vadd.f32 1e-05, %v2617_v44  ;;  %v2619_v24 = vpop.f32.mrb[163].mxu0 }
 0x4bc   : > { %3969 = vmatmul.mubr.msk.f32.gmra.mrb[220].mxu1 %vm1374_vm1, %v6674_v40 }
 0x4bd   : > { %4598 = vrsqrt.f32 %v4349_v1  ;;  %2981 = vmatprep.mubr.f32.mxu1 %v7685_v14 }
 0x4be   : > { %v2622_v26 = vpop.f32.mrb[164].mxu0 }
 0x4bf   : > { %v6679_v49 = vpop.eup %4594  ;;  %v4350_v6 = vadd.f32 1e-05, %v2622_v26  ;;  %v2624_v47 = vpop.f32.mrb[165].mxu0 }
 0x4c0   : > { %3970 = vmatmul.mubr.msk.f32.gmra.mrb[222].mxu1 %vm1374_vm1, %v6679_v49 }
 0x4c1   : > { %4600 = vrsqrt.f32 %v4350_v6  ;;  %2987 = vmatprep.mubr.f32.mxu1 %v7685_v14 }
 0x4c2   : > { %v2627_v46 = vpop.f32.mrb[166].mxu0 }
 0x4c3   : > { %v6684_v44 = vpop.eup %4596  ;;  %v4351_v24 = vadd.f32 1e-05, %v2627_v46  ;;  %v2629_v8 = vpop.f32.mrb[167].mxu0 }
 0x4c4   : > { %3971 = vmatmul.mubr.msk.f32.gmra.mrb[224].mxu1 %vm1374_vm1, %v6684_v44 }
 0x4c5   : > { %4602 = vrsqrt.f32 %v4351_v24  ;;  %2993 = vmatprep.mubr.f32.mxu1 %v7685_v14 }
 0x4c6   : > { %v2632_v1 = vpop.f32.mrb[168].mxu0 }
 0x4c7   : > { %v6689_v26 = vpop.eup %4598  ;;  %v4352_v47 = vadd.f32 1e-05, %v2632_v1  ;;  %v2634_v7 = vpop.f32.mrb[169].mxu0 }
 0x4c8   : > { %3972 = vmatmul.mubr.msk.f32.gmra.mrb[226].mxu1 %vm1374_vm1, %v6689_v26 }
 0x4c9   : > { %4604 = vrsqrt.f32 %v4352_v47  ;;  %2999 = vmatprep.mubr.f32.mxu1 %v7685_v14 }
 0x4ca   : > { %v2637_v6 = vpop.f32.mrb[170].mxu0 }
 0x4cb   : > { %v6694_v46 = vpop.eup %4600  ;;  %v4353_v8 = vadd.f32 1e-05, %v2637_v6  ;;  %v2639_v30 = vpop.f32.mrb[171].mxu0 }
 0x4cc   : > { %3973 = vmatmul.mubr.msk.f32.gmra.mrb[228].mxu1 %vm1374_vm1, %v6694_v46 }
 0x4cd   : > { %4606 = vrsqrt.f32 %v4353_v8  ;;  %3005 = vmatprep.mubr.f32.mxu1 %v7685_v14 }
 0x4ce   : > { %v2642_v24 = vpop.f32.mrb[172].mxu0 }
 0x4cf   : > { %v6699_v1 = vpop.eup %4602  ;;  %v4354_v7 = vadd.f32 1e-05, %v2642_v24  ;;  %v2644_v4 = vpop.f32.mrb[173].mxu0 }
 0x4d0   : > { %3974 = vmatmul.mubr.msk.f32.gmra.mrb[230].mxu1 %vm1374_vm1, %v6699_v1 }
 0x4d1   : > { %4608 = vrsqrt.f32 %v4354_v7  ;;  %3011 = vmatprep.mubr.f32.mxu1 %v7685_v14 }
 0x4d2   : > { %v2647_v47 = vpop.f32.mrb[174].mxu0 }
 0x4d3   : > { %v6704_v6 = vpop.eup %4604  ;;  %v4355_v30 = vadd.f32 1e-05, %v2647_v47  ;;  %v2649_v16 = vpop.f32.mrb[175].mxu0 }
 0x4d4   : > { %3975 = vmatmul.mubr.msk.f32.gmra.mrb[232].mxu1 %vm1374_vm1, %v6704_v6 }
 0x4d5   : > { %4610 = vrsqrt.f32 %v4355_v30  ;;  %3017 = vmatprep.mubr.f32.mxu1 %v7685_v14 }
 0x4d6   : > { %v2652_v8 = vpop.f32.mrb[176].mxu0 }
 0x4d7   : > { %v6709_v24 = vpop.eup %4606  ;;  %v4356_v4 = vadd.f32 1e-05, %v2652_v8  ;;  %v2654_v54 = vpop.f32.mrb[177].mxu0 }
 0x4d8   : > { %3976 = vmatmul.mubr.msk.f32.gmra.mrb[234].mxu1 %vm1374_vm1, %v6709_v24 }
 0x4d9   : > { %4612 = vrsqrt.f32 %v4356_v4  ;;  %3023 = vmatprep.mubr.f32.mxu1 %v7685_v14 }
 0x4da   : > { %v2657_v7 = vpop.f32.mrb[178].mxu0 }
 0x4db   : > { %v6714_v47 = vpop.eup %4608  ;;  %v4357_v16 = vadd.f32 1e-05, %v2657_v7  ;;  %v2659_v45 = vpop.f32.mrb[179].mxu0 }
 0x4dc   : > { %3977 = vmatmul.mubr.msk.f32.gmra.mrb[236].mxu1 %vm1374_vm1, %v6714_v47 }
 0x4dd   : > { %4614 = vrsqrt.f32 %v4357_v16  ;;  %3029 = vmatprep.mubr.f32.mxu1 %v7685_v14 }
 0x4de   : > { %v2662_v30 = vpop.f32.mrb[180].mxu0 }
 0x4df   : > { %v6719_v8 = vpop.eup %4610  ;;  %v4358_v54 = vadd.f32 1e-05, %v2662_v30  ;;  %v2664_v15 = vpop.f32.mrb[181].mxu0 }
 0x4e0   : > { %3978 = vmatmul.mubr.msk.f32.gmra.mrb[238].mxu1 %vm1374_vm1, %v6719_v8 }
 0x4e1   : > { %4616 = vrsqrt.f32 %v4358_v54  ;;  %3035 = vmatprep.mubr.f32.mxu1 %v7685_v14 }
 0x4e2   : > { %v2667_v4 = vpop.f32.mrb[182].mxu0 }
 0x4e3   : > { %v6724_v7 = vpop.eup %4612  ;;  %v4359_v45 = vadd.f32 1e-05, %v2667_v4  ;;  %v2669_v58 = vpop.f32.mrb[183].mxu0 }
 0x4e4   : > { %3979 = vmatmul.mubr.msk.f32.gmra.mrb[240].mxu1 %vm1374_vm1, %v6724_v7 }
 0x4e5   : > { %4618 = vrsqrt.f32 %v4359_v45  ;;  %3041 = vmatprep.mubr.f32.mxu1 %v7685_v14 }
 0x4e6   : > { %v2672_v16 = vpop.f32.mrb[184].mxu0 }
 0x4e7   : > { %v6729_v30 = vpop.eup %4614  ;;  %v4360_v15 = vadd.f32 1e-05, %v2672_v16  ;;  %v2674_v10 = vpop.f32.mrb[185].mxu0 }
 0x4e8   : > { %3980 = vmatmul.mubr.msk.f32.gmra.mrb[242].mxu1 %vm1374_vm1, %v6729_v30 }
 0x4e9   : > { %4620 = vrsqrt.f32 %v4360_v15  ;;  %3047 = vmatprep.mubr.f32.mxu1 %v7685_v14 }
 0x4ea   : > { %v2677_v54 = vpop.f32.mrb[186].mxu0 }
 0x4eb   : > { %v6734_v4 = vpop.eup %4616  ;;  %v4361_v58 = vadd.f32 1e-05, %v2677_v54  ;;  %v2679_v50 = vpop.f32.mrb[187].mxu0 }
 0x4ec   : > { %3981 = vmatmul.mubr.msk.f32.gmra.mrb[244].mxu1 %vm1374_vm1, %v6734_v4 }
 0x4ed   : > { %4622 = vrsqrt.f32 %v4361_v58  ;;  %3053 = vmatprep.mubr.f32.mxu1 %v7685_v14 }
 0x4ee   : > { %v2682_v45 = vpop.f32.mrb[188].mxu0 }
 0x4ef   : > { %v6739_v16 = vpop.eup %4618  ;;  %v4362_v10 = vadd.f32 1e-05, %v2682_v45  ;;  %v2684_v59 = vpop.f32.mrb[189].mxu0 }
 0x4f0   : > { %3982 = vmatmul.mubr.msk.f32.gmra.mrb[246].mxu1 %vm1374_vm1, %v6739_v16 }
 0x4f1   : > { %4624 = vrsqrt.f32 %v4362_v10  ;;  %3059 = vmatprep.mubr.f32.mxu1 %v7685_v14 }
 0x4f2   : > { %v2687_v15 = vpop.f32.mrb[190].mxu0 }
 0x4f3   : > { %v6744_v54 = vpop.eup %4620  ;;  %v4363_v50 = vadd.f32 1e-05, %v2687_v15  ;;  %v2689_v52 = vpop.f32.mrb[191].mxu0 }
 0x4f4   : > { %3983 = vmatmul.mubr.msk.f32.gmra.mrb[248].mxu1 %vm1374_vm1, %v6744_v54 }
 0x4f5   : > { %4626 = vrsqrt.f32 %v4363_v50  ;;  %3065 = vmatprep.mubr.f32.mxu1 %v7685_v14 }
 0x4f7   : > { %v6749_v58 = vpop.eup %4622 }
 0x4f8   : > { %3984 = vmatmul.mubr.msk.f32.gmra.mrb[250].mxu1 %vm1374_vm1, %v6749_v58 }
 0x4f9   : > { %3071 = vmatprep.mubr.f32.mxu1 %v7685_v14 }
 0x4fb   : > { %v6754_v59 = vpop.eup %4624 }
 0x4fc   : > { %3985 = vmatmul.mubr.msk.f32.gmra.mrb[252].mxu1 %vm1374_vm1, %v6754_v59 }
 0x4fd   : > { %3077 = vmatprep.mubr.f32.mxu1 %v7685_v14 }
 0x4ff   : > { %v6759_v52 = vpop.eup %4626 }
 0x500   : > { %3986 = vmatmul.mubr.msk.f32.gmra.mrb[254].mxu1 %vm1374_vm1, %v6759_v52 }
 0x501   : > { %3148 = vmatprep.mubr.f32.mxu1 %v7685_v14 }
 0x504   : > { %3987 = vmatmul.mubr.msk.f32.vlgmr.msra.gmra.mrb[0].mxu1 %vm1374_vm1, %v6604_v39  ;;  %v3471_v39 = vlaneseq }
 0x505   : > { %3154 = vmatprep.mubr.f32.mxu1 %v7685_v14 }
 0x508   : > { %3988 = vmatmul.mubr.msk.f32.gmra.mrb[2].mxu1 %vm1374_vm1, %v6609_v12  ;;  %v6821_v12 = vshrl.u32 %v3471_v39, 7 }
 0x509   : > { %3160 = vmatprep.mubr.f32.mxu1 %v7685_v14 }
 0x50c   : > { %3989 = vmatmul.mubr.msk.f32.gmra.mrb[4].mxu1 %vm1374_vm1, %v6614_v33  ;;  %v3473_v33 = vsub.s32 0, %v6821_v12 }
 0x50d   : > { %3166 = vmatprep.mubr.f32.mxu1 %v7685_v14 }
 0x510   : > { %3990 = vmatmul.mubr.msk.f32.gmra.mrb[6].mxu1 %vm1374_vm1, %v6619_v53  ;;  %v6831_v53 = vld [vmem:[%s7328_s5] sm:$0xf] }
 0x511   : > { %3172 = vmatprep.mubr.f32.mxu1 %v7685_v14 }
 0x514   : > { %3991 = vmatmul.mubr.msk.f32.gmra.mrb[8].mxu1 %vm1374_vm1, %v6624_v27  ;;  %v3477_v27 = vsub.s32 1, %v6821_v12 }
 0x515   : > { %3178 = vmatprep.mubr.f32.mxu1 %v7685_v14 }
 0x518   : > { %3992 = vmatmul.mubr.msk.f32.gmra.mrb[10].mxu1 %vm1374_vm1, %v6629_v32  ;;  %v6840_v32 = vrot.slane %v6831_v53, %v3473_v33 }
 0x519   : > { %3184 = vmatprep.mubr.f32.mxu1 %v7685_v14 }
 0x51c   : > { %3993 = vmatmul.mubr.msk.f32.gmra.mrb[12].mxu1 %vm1374_vm1, %v6634_v60 }
 0x51d   : > { %3190 = vmatprep.mubr.f32.mxu1 %v7685_v14 }
 0x520   : > { %3994 = vmatmul.mubr.msk.f32.gmra.mrb[14].mxu1 %vm1374_vm1, %v6639_v3  ;;  %v6843_v3 = vrot.slane %v6831_v53, %v3477_v27 }
 0x521   : > { %3196 = vmatprep.mubr.f32.mxu1 %v7685_v14 }
 0x524   : > { %3995 = vmatmul.mubr.msk.f32.gmra.mrb[16].mxu1 %vm1374_vm1, %v6644_v2 }
 0x525   : > { %3202 = vmatprep.mubr.f32.mxu1 %v7685_v14 }
 0x528   : > { %3996 = vmatmul.mubr.msk.f32.gmra.mrb[18].mxu1 %vm1374_vm1, %v6649_v5 }
 0x529   : > { %3208 = vmatprep.mubr.f32.mxu1 %v7685_v14 }
 0x52c   : > { %3997 = vmatmul.mubr.msk.f32.gmra.mrb[20].mxu1 %vm1374_vm1, %v6654_v61 }
 0x52d   : > { %3214 = vmatprep.mubr.f32.mxu1 %v7685_v14 }
 0x530   : > { %3998 = vmatmul.mubr.msk.f32.gmra.mrb[22].mxu1 %vm1374_vm1, %v6659_v43 }
 0x531   : > { %3220 = vmatprep.mubr.f32.mxu1 %v7685_v14 }
 0x534   : > { %3999 = vmatmul.mubr.msk.f32.gmra.mrb[24].mxu1 %vm1374_vm1, %v6664_v48 }
 0x535   : > { %3226 = vmatprep.mubr.f32.mxu1 %v7685_v14 }
 0x538   : > { %4000 = vmatmul.mubr.msk.f32.gmra.mrb[26].mxu1 %vm1374_vm1, %v6669_v0 }
 0x539   : > { %3232 = vmatprep.mubr.f32.mxu1 %v7685_v14 }
 0x53c   : > { %4001 = vmatmul.mubr.msk.f32.gmra.mrb[28].mxu1 %vm1374_vm1, %v6674_v40 }
 0x53d   : > { %3238 = vmatprep.mubr.f32.mxu1 %v7685_v14 }
 0x540   : > { %4002 = vmatmul.mubr.msk.f32.gmra.mrb[30].mxu1 %vm1374_vm1, %v6679_v49 }
 0x541   : > { %3244 = vmatprep.mubr.f32.mxu1 %v7685_v14 }
 0x544   : > { %4003 = vmatmul.mubr.msk.f32.gmra.mrb[32].mxu1 %vm1374_vm1, %v6684_v44 }
 0x545   : > { %3250 = vmatprep.mubr.f32.mxu1 %v7685_v14 }
 0x548   : > { %4004 = vmatmul.mubr.msk.f32.gmra.mrb[34].mxu1 %vm1374_vm1, %v6689_v26 }
 0x549   : > { %3256 = vmatprep.mubr.f32.mxu1 %v7685_v14 }
 0x54c   : > { %4005 = vmatmul.mubr.msk.f32.gmra.mrb[36].mxu1 %vm1374_vm1, %v6694_v46 }
 0x54d   : > { %3262 = vmatprep.mubr.f32.mxu1 %v7685_v14 }
 0x550   : > { %4006 = vmatmul.mubr.msk.f32.gmra.mrb[38].mxu1 %vm1374_vm1, %v6699_v1 }
 0x551   : > { %3268 = vmatprep.mubr.f32.mxu1 %v7685_v14 }
 0x554   : > { %4007 = vmatmul.mubr.msk.f32.gmra.mrb[40].mxu1 %vm1374_vm1, %v6704_v6 }
 0x555   : > { %3274 = vmatprep.mubr.f32.mxu1 %v7685_v14 }
 0x557   : > { %v2893_v60 = vpop.f32.mrb[192].mxu1 }
 0x558   : > { %v3341_v2 = vmul.f32 %v2893_v60, %v5877_v57  ;;  %v2895_v5 = vpop.f32.mrb[193].mxu1  ;;  %4008 = vmatmul.mubr.msk.f32.gmra.mrb[42].mxu1 %vm1374_vm1, %v6709_v24 }
 0x559   : > { %v3342_v61 = vmul.f32 %v2895_v5, %v5882_v11  ;;  %3280 = vmatprep.mubr.f32.mxu1 %v7685_v14 }
 0x55a   : > { %v3491_v43 = vadd.f32 %v6840_v32, %v3341_v2 }
 0x55b   : > { %v3492_v48 = vadd.f32 %v6843_v3, %v3342_v61  ;;  %v2899_v0 = vpop.f32.mrb[194].mxu1 }
 0x55c   : > { %3619 = vst [vmem:[%s6852_s18] sm:$0xff] %v3491_v43  ;;  %v3345_v57 = vmul.f32 %v2899_v0, %v5890_v55  ;;  %v2901_v40 = vpop.f32.mrb[195].mxu1  ;;  %4009 = vmatmul.mubr.msk.f32.gmra.mrb[44].mxu1 %vm1374_vm1, %v6714_v47 }
 0x55d   : > { %4019 = vst [vmem:[%s6852_s18 + $0x10] sm:$0xff] %v3492_v48  ;;  %v3346_v11 = vmul.f32 %v2901_v40, %v5895_v28  ;;  %3286 = vmatprep.mubr.f32.mxu1 %v7685_v14 }
 0x55e   : > { %v3495_v49 = vadd.f32 %v6840_v32, %v3345_v57 }
 0x55f   : > { %v3496_v44 = vadd.f32 %v6843_v3, %v3346_v11  ;;  %v2905_v26 = vpop.f32.mrb[196].mxu1 }
 0x560   : > { %3620 = vst [vmem:[%s6852_s18 + $0x8] sm:$0xff] %v3495_v49  ;;  %v3349_v46 = vmul.f32 %v2905_v26, %v5904_v9  ;;  %v2907_v55 = vpop.f32.mrb[197].mxu1  ;;  %4010 = vmatmul.mubr.msk.f32.gmra.mrb[46].mxu1 %vm1374_vm1, %v6719_v8 }
 0x561   : > { %4020 = vst [vmem:[%s6852_s18 + $0x18] sm:$0xff] %v3496_v44  ;;  %v3350_v1 = vmul.f32 %v2907_v55, %v5910_v37  ;;  %3292 = vmatprep.mubr.f32.mxu1 %v7685_v14 }
 0x562   : > { %v3499_v28 = vadd.f32 %v6840_v32, %v3349_v46 }
 0x563   : > { %v3500_v6 = vadd.f32 %v6843_v3, %v3350_v1  ;;  %v2911_v24 = vpop.f32.mrb[198].mxu1 }
 0x564   : > { %3621 = vst [vmem:[%s6852_s18 + $0x40] sm:$0xff] %v3499_v28  ;;  %v3353_v47 = vmul.f32 %v2911_v24, %v5919_v34  ;;  %v2913_v9 = vpop.f32.mrb[199].mxu1  ;;  %4011 = vmatmul.mubr.msk.f32.gmra.mrb[48].mxu1 %vm1374_vm1, %v6724_v7  ;;  %v7905_v28 = vld [vmem:[#allocation7_spill] sm:$0xff] }
 0x565   : > { %4021 = vst [vmem:[%s6852_s18 + $0x50] sm:$0xff] %v3500_v6  ;;  %v3354_v8 = vmul.f32 %v2913_v9, %v5925_v23  ;;  %3298 = vmatprep.mubr.f32.mxu1 %v7685_v14 }
 0x566   : > { %v3503_v37 = vadd.f32 %v6840_v32, %v3353_v47 }
 0x567   : > { %v3504_v45 = vadd.f32 %v6843_v3, %v3354_v8  ;;  %v2917_v10 = vpop.f32.mrb[200].mxu1 }
 0x568   : > { %3622 = vst [vmem:[%s6852_s18 + $0x48] sm:$0xff] %v3503_v37  ;;  %v3357_v15 = vmul.f32 %v2917_v10, %v5934_v21  ;;  %v2919_v34 = vpop.f32.mrb[201].mxu1  ;;  %4012 = vmatmul.mubr.msk.f32.gmra.mrb[50].mxu1 %vm1374_vm1, %v6729_v30  ;;  %v7907_v37 = vld [vmem:[#allocation9_spill] sm:$0xff] }
 0x569   : > { %4022 = vst [vmem:[%s6852_s18 + $0x58] sm:$0xff] %v3504_v45  ;;  %v3358_v7 = vmul.f32 %v2919_v34, %v5940_v42  ;;  %3304 = vmatprep.mubr.f32.mxu1 %v7685_v14 }
 0x56a   : > { %v3507_v23 = vadd.f32 %v6840_v32, %v3357_v15  ;;  %v7908_v15 = vld [vmem:[#allocation6_spill] sm:$0xff] }
 0x56b   : > { %v3508_v50 = vadd.f32 %v6843_v3, %v3358_v7  ;;  %v2923_v39 = vpop.f32.mrb[202].mxu1 }
 0x56c   : > { %3623 = vst [vmem:[%s6852_s18 + $0x80] sm:$0xff] %v3507_v23  ;;  %v3361_v33 = vmul.f32 %v2923_v39, %v5949_v25  ;;  %v2925_v21 = vpop.f32.mrb[203].mxu1  ;;  %4013 = vmatmul.mubr.msk.f32.gmra.mrb[52].mxu1 %vm1374_vm1, %v6734_v4  ;;  %v7909_v39 = vld [vmem:[#allocation11_spill] sm:$0xff] }
 0x56d   : > { %4023 = vst [vmem:[%s6852_s18 + $0x90] sm:$0xff] %v3508_v50  ;;  %v3362_v30 = vmul.f32 %v2925_v21, %v5955_v29  ;;  %3310 = vmatprep.mubr.f32.mxu1 %v7685_v14 }
 0x56e   : > { %v3511_v42 = vadd.f32 %v6840_v32, %v3361_v33 }
 0x56f   : > { %v3512_v27 = vadd.f32 %v6843_v3, %v3362_v30  ;;  %v2929_v60 = vpop.f32.mrb[204].mxu1  ;;  %v7910_v30 = vld [vmem:[#allocation13_spill] sm:$0xff] }
 0x570   : > { %3624 = vst [vmem:[%s6852_s18 + $0x88] sm:$0xff] %v3511_v42  ;;  %v3365_v2 = vmul.f32 %v2929_v60, %v5964_v22  ;;  %v2931_v25 = vpop.f32.mrb[205].mxu1  ;;  %4014 = vmatmul.mubr.msk.f32.gmra.mrb[54].mxu1 %vm1374_vm1, %v6739_v16 }
 0x571   : > { %4024 = vst [vmem:[%s6852_s18 + $0x98] sm:$0xff] %v3512_v27  ;;  %v3366_v4 = vmul.f32 %v2931_v25, %v5970_v20  ;;  %3316 = vmatprep.mubr.f32.mxu1 %v7685_v14  ;;  %v7911_v25 = vld [vmem:[#allocation10_spill] sm:$0xff] }
 0x572   : > { %v3515_v29 = vadd.f32 %v6840_v32, %v3365_v2 }
 0x573   : > { %v3516_v5 = vadd.f32 %v6843_v3, %v3366_v4  ;;  %v2935_v61 = vpop.f32.mrb[206].mxu1 }
 0x574   : > { %3625 = vst [vmem:[%s6852_s18 + $0xc0] sm:$0xff] %v3515_v29  ;;  %v3369_v43 = vmul.f32 %v2935_v61, %v5979_v18  ;;  %v2937_v22 = vpop.f32.mrb[207].mxu1  ;;  %4015 = vmatmul.mubr.msk.f32.gmra.mrb[56].mxu1 %vm1374_vm1, %v6744_v54 }
 0x575   : > { %4025 = vst [vmem:[%s6852_s18 + $0xd0] sm:$0xff] %v3516_v5  ;;  %v3370_v16 = vmul.f32 %v2937_v22, %v5985_v62  ;;  %3322 = vmatprep.mubr.f32.mxu1 %v7685_v14  ;;  %v7912_v5 = vld [vmem:[#allocation14_spill] sm:$0xff] }
 0x576   : > { %v3519_v20 = vadd.f32 %v6840_v32, %v3369_v43 }
 0x577   : > { %v3520_v48 = vadd.f32 %v6843_v3, %v3370_v16  ;;  %v2941_v0 = vpop.f32.mrb[208].mxu1 }
 0x578   : > { %3626 = vst [vmem:[%s6852_s18 + $0xc8] sm:$0xff] %v3519_v20  ;;  %v3373_v57 = vmul.f32 %v2941_v0, %v5994_v17  ;;  %v2943_v18 = vpop.f32.mrb[209].mxu1  ;;  %4016 = vmatmul.mubr.msk.f32.gmra.mrb[58].mxu1 %vm1374_vm1, %v6749_v58  ;;  %v7913_v20 = vld [vmem:[#allocation15_spill] sm:$0xff] }
 0x579   : > { %4026 = vst [vmem:[%s6852_s18 + $0xd8] sm:$0xff] %v3520_v48  ;;  %v3374_v54 = vmul.f32 %v2943_v18, %v6000_v19  ;;  %3328 = vmatprep.mubr.f32.mxu1 %v7685_v14 }
 0x57a   : > { %v3523_v62 = vadd.f32 %v6840_v32, %v3373_v57  ;;  %v7914_v57 = vld [vmem:[#allocation12_spill] sm:$0xff] }
 0x57b   : > { %v3524_v40 = vadd.f32 %v6843_v3, %v3374_v54  ;;  %v2947_v11 = vpop.f32.mrb[210].mxu1 }
 0x57c   : > { %3627 = vst [vmem:[%s6852_s18 + $0x100] sm:$0xff] %v3523_v62  ;;  %v3377_v49 = vmul.f32 %v2947_v11, %v6009_v36  ;;  %v2949_v17 = vpop.f32.mrb[211].mxu1  ;;  %4017 = vmatmul.mubr.msk.f32.gmra.mrb[60].mxu1 %vm1374_vm1, %v6754_v59  ;;  %v7904_v59 = vld [vmem:[#allocation5_spill] sm:$0xff] }
 0x57d   : > { %4027 = vst [vmem:[%s6852_s18 + $0x110] sm:$0xff] %v3524_v40  ;;  %v3378_v58 = vmul.f32 %v2949_v17, %v6015_v51  ;;  %3334 = vmatprep.mubr.f32.mxu1 %v7685_v14  ;;  %v7915_v11 = vld [vmem:[#allocation17_spill] sm:$0xff] }
 0x57e   : > { %v3527_v19 = vadd.f32 %v6840_v32, %v3377_v49 }
 0x57f   : > { %v3528_v44 = vadd.f32 %v6843_v3, %v3378_v58  ;;  %v2953_v26 = vpop.f32.mrb[212].mxu1  ;;  %v7916_v58 = vld [vmem:[#allocation19_spill] sm:$0xff] }
 0x580   : > { %3628 = vst [vmem:[%s6852_s18 + $0x108] sm:$0xff] %v3527_v19  ;;  %v3381_v46 = vmul.f32 %v2953_v26, %v6024_v31  ;;  %v2955_v36 = vpop.f32.mrb[213].mxu1  ;;  %4018 = vmatmul.mubr.msk.f32.gmra.mrb[62].mxu1 %vm1374_vm1, %v6759_v52  ;;  %v7906_v31 = vld [vmem:[#allocation8_spill] sm:$0xff] }
 0x581   : > { %4028 = vst [vmem:[%s6852_s18 + $0x118] sm:$0xff] %v3528_v44  ;;  %v3382_v51 = vmul.f32 %v2955_v36, %v7904_v59  ;;  %v7917_v36 = vld [vmem:[#allocation16_spill] sm:$0xff] }
 0x582   : > { %v3531_v14 = vadd.f32 %v6840_v32, %v3381_v46 }
 0x583   : > { %v3532_v55 = vadd.f32 %v6843_v3, %v3382_v51  ;;  %v2959_v1 = vpop.f32.mrb[214].mxu1 }
 0x584   : > { %3629 = vst [vmem:[%s6852_s18 + $0x140] sm:$0xff] %v3531_v14  ;;  %v3385_v6 = vmul.f32 %v2959_v1, %v7905_v28  ;;  %v2961_v24 = vpop.f32.mrb[215].mxu1  ;;  %v7918_v14 = vld [vmem:[#allocation20_spill] sm:$0xff] }
 0x585   : > { %4029 = vst [vmem:[%s6852_s18 + $0x150] sm:$0xff] %v3532_v55  ;;  %v3386_v47 = vmul.f32 %v2961_v24, %v7906_v31  ;;  %v7919_v24 = vld [vmem:[#allocation21_spill] sm:$0xff] }
 0x586   : > { %v3535_v52 = vadd.f32 %v6840_v32, %v3385_v6 }
 0x587   : > { %v3536_v9 = vadd.f32 %v6843_v3, %v3386_v47  ;;  %v2965_v8 = vpop.f32.mrb[216].mxu1 }
 0x588   : > { %3630 = vst [vmem:[%s6852_s18 + $0x148] sm:$0xff] %v3535_v52  ;;  %v3389_v45 = vmul.f32 %v2965_v8, %v7907_v37  ;;  %v2967_v10 = vpop.f32.mrb[217].mxu1  ;;  %v7920_v52 = vld [vmem:[#allocation18_spill] sm:$0xff] }
 0x589   : > { %4030 = vst [vmem:[%s6852_s18 + $0x158] sm:$0xff] %v3536_v9  ;;  %v3390_v34 = vmul.f32 %v2967_v10, %v7908_v15  ;;  %v7921_v10 = vld [vmem:[#allocation24_spill] sm:$0xff] }
 0x58a   : > { %v3539_v7 = vadd.f32 %v6840_v32, %v3389_v45 }
 0x58b   : > { %v3540_v23 = vadd.f32 %v6843_v3, %v3390_v34  ;;  %v2971_v50 = vpop.f32.mrb[218].mxu1 }
 0x58c   : > { %3631 = vst [vmem:[%s6852_s18 + $0x180] sm:$0xff] %v3539_v7  ;;  %v3393_v33 = vmul.f32 %v2971_v50, %v7909_v39  ;;  %v2973_v21 = vpop.f32.mrb[219].mxu1  ;;  %v7922_v7 = vld [vmem:[#allocation27_spill] sm:$0xff] }
 0x58d   : > { %4031 = vst [vmem:[%s6852_s18 + $0x190] sm:$0xff] %v3540_v23  ;;  %v3394_v42 = vmul.f32 %v2973_v21, %v7910_v30  ;;  %v7923_v21 = vld [vmem:[#allocation22_spill] sm:$0xff] }
 0x58e   : > { %v3543_v27 = vadd.f32 %v6840_v32, %v3393_v33 }
 0x58f   : > { %v3544_v60 = vadd.f32 %v6843_v3, %v3394_v42  ;;  %v2977_v2 = vpop.f32.mrb[220].mxu1 }
 0x590   : > { %3632 = vst [vmem:[%s6852_s18 + $0x188] sm:$0xff] %v3543_v27  ;;  %v3397_v4 = vmul.f32 %v2977_v2, %v7911_v25  ;;  %v2979_v29 = vpop.f32.mrb[221].mxu1  ;;  %v7924_v27 = vld [vmem:[#allocation28_spill] sm:$0xff] }
 0x591   : > { %4032 = vst [vmem:[%s6852_s18 + $0x198] sm:$0xff] %v3544_v60  ;;  %v3398_v61 = vmul.f32 %v2979_v29, %v7912_v5  ;;  %v7925_v29 = vld [vmem:[#allocation29_spill] sm:$0xff] }
 0x592   : > { %v3547_v43 = vadd.f32 %v6840_v32, %v3397_v4 }
 0x593   : > { %v3548_v22 = vadd.f32 %v6843_v3, %v3398_v61  ;;  %v2983_v16 = vpop.f32.mrb[222].mxu1 }
 0x594   : > { %3633 = vst [vmem:[%s6852_s18 + $0x1c0] sm:$0xff] %v3547_v43  ;;  %v3401_v48 = vmul.f32 %v2983_v16, %v7913_v20  ;;  %v2985_v0 = vpop.f32.mrb[223].mxu1  ;;  %v7926_v43 = vld [vmem:[#allocation25_spill] sm:$0xff] }
 0x595   : > { %4033 = vst [vmem:[%s6852_s18 + $0x1d0] sm:$0xff] %v3548_v22  ;;  %v3402_v18 = vmul.f32 %v2985_v0, %v7914_v57  ;;  %v7927_v0 = vld [vmem:[#allocation32_spill] sm:$0xff] }
 0x596   : > { %v3551_v54 = vadd.f32 %v6840_v32, %v3401_v48 }
 0x597   : > { %v3552_v62 = vadd.f32 %v6843_v3, %v3402_v18  ;;  %v2989_v40 = vpop.f32.mrb[224].mxu1 }
 0x598   : > { %3634 = vst [vmem:[%s6852_s18 + $0x1c8] sm:$0xff] %v3551_v54  ;;  %v3405_v49 = vmul.f32 %v2989_v40, %v7915_v11  ;;  %v2991_v17 = vpop.f32.mrb[225].mxu1  ;;  %v7928_v54 = vld [vmem:[#allocation34_spill] sm:$0xff] }
 0x599   : > { %4034 = vst [vmem:[%s6852_s18 + $0x1d8] sm:$0xff] %v3552_v62  ;;  %v3406_v19 = vmul.f32 %v2991_v17, %v7916_v58  ;;  %v7929_v17 = vld [vmem:[#allocation30_spill] sm:$0xff] }
 0x59a   : > { %v3555_v44 = vadd.f32 %v6840_v32, %v3405_v49 }
 0x59b   : > { %v3556_v26 = vadd.f32 %v6843_v3, %v3406_v19  ;;  %v2995_v46 = vpop.f32.mrb[226].mxu1 }
 0x59c   : > { %3635 = vst [vmem:[%s6852_s18 + $0x200] sm:$0xff] %v3555_v44  ;;  %v3409_v59 = vmul.f32 %v2995_v46, %v7917_v36  ;;  %v2997_v51 = vpop.f32.mrb[227].mxu1  ;;  %v7930_v44 = vld [vmem:[#allocation35_spill] sm:$0xff] }
 0x59d   : > { %4035 = vst [vmem:[%s6852_s18 + $0x210] sm:$0xff] %v3556_v26  ;;  %v3410_v55 = vmul.f32 %v2997_v51, %v7918_v14  ;;  %v7931_v51 = vld [vmem:[#allocation36_spill] sm:$0xff] }
 0x59e   : > { %v3559_v1 = vadd.f32 %v6840_v32, %v3409_v59 }
 0x59f   : > { %v3560_v28 = vadd.f32 %v6843_v3, %v3410_v55  ;;  %v3001_v6 = vpop.f32.mrb[228].mxu1 }
 0x5a0   : > { %3636 = vst [vmem:[%s6852_s18 + $0x208] sm:$0xff] %v3559_v1  ;;  %v3413_v31 = vmul.f32 %v3001_v6, %v7919_v24  ;;  %v3003_v47 = vpop.f32.mrb[229].mxu1  ;;  %v7932_v1 = vld [vmem:[#allocation33_spill] sm:$0xff] }
 0x5a1   : > { %4036 = vst [vmem:[%s6852_s18 + $0x218] sm:$0xff] %v3560_v28  ;;  %v3414_v9 = vmul.f32 %v3003_v47, %v7920_v52  ;;  %v7933_v47 = vld [vmem:[#allocation38_spill] sm:$0xff] }
 0x5a2   : > { %v3563_v8 = vadd.f32 %v6840_v32, %v3413_v31 }
 0x5a3   : > { %v3564_v37 = vadd.f32 %v6843_v3, %v3414_v9  ;;  %v3007_v45 = vpop.f32.mrb[230].mxu1 }
 0x5a4   : > { %3637 = vst [vmem:[%s6852_s18 + $0x240] sm:$0xff] %v3563_v8  ;;  %v3417_v15 = vmul.f32 %v3007_v45, %v7921_v10  ;;  %v3009_v34 = vpop.f32.mrb[231].mxu1  ;;  %v7934_v8 = vld [vmem:[#allocation40_spill] sm:$0xff] }
 0x5a5   : > { %4037 = vst [vmem:[%s6852_s18 + $0x250] sm:$0xff] %v3564_v37  ;;  %v3418_v23 = vmul.f32 %v3009_v34, %v7922_v7  ;;  %v7935_v34 = vld [vmem:[#allocation37_spill] sm:$0xff] }
 0x5a6   : > { %v3567_v50 = vadd.f32 %v6840_v32, %v3417_v15 }
 0x5a7   : > { %v3568_v39 = vadd.f32 %v6843_v3, %v3418_v23  ;;  %v3013_v33 = vpop.f32.mrb[232].mxu1 }
 0x5a8   : > { %3638 = vst [vmem:[%s6852_s18 + $0x248] sm:$0xff] %v3567_v50  ;;  %v3421_v30 = vmul.f32 %v3013_v33, %v7923_v21  ;;  %v3015_v42 = vpop.f32.mrb[233].mxu1  ;;  %v7936_v50 = vld [vmem:[#allocation41_spill] sm:$0xff] }
 0x5a9   : > { %4038 = vst [vmem:[%s6852_s18 + $0x258] sm:$0xff] %v3568_v39  ;;  %v3422_v60 = vmul.f32 %v3015_v42, %v7924_v27  ;;  %v7937_v42 = vld [vmem:[#allocation42_spill] sm:$0xff] }
 0x5aa   : > { %v3571_v2 = vadd.f32 %v6840_v32, %v3421_v30 }
 0x5ab   : > { %v3572_v25 = vadd.f32 %v6843_v3, %v3422_v60  ;;  %v3019_v4 = vpop.f32.mrb[234].mxu1 }
 0x5ac   : > { %3639 = vst [vmem:[%s6852_s18 + $0x280] sm:$0xff] %v3571_v2  ;;  %v3425_v5 = vmul.f32 %v3019_v4, %v7925_v29  ;;  %v3021_v61 = vpop.f32.mrb[235].mxu1  ;;  %v7938_v2 = vld [vmem:[#allocation39_spill] sm:$0xff] }
 0x5ad   : > { %4039 = vst [vmem:[%s6852_s18 + $0x290] sm:$0xff] %v3572_v25  ;;  %v3426_v22 = vmul.f32 %v3021_v61, %v7926_v43 }
 0x5ae   : > { %v3575_v16 = vadd.f32 %v6840_v32, %v3425_v5 }
 0x5af   : > { %v3576_v20 = vadd.f32 %v6843_v3, %v3426_v22  ;;  %v3025_v48 = vpop.f32.mrb[236].mxu1  ;;  %v7939_v22 = vld [vmem:[#allocation44_spill] sm:$0xff] }
 0x5b0   : > { %3640 = vst [vmem:[%s6852_s18 + $0x288] sm:$0xff] %v3575_v16  ;;  %v3429_v57 = vmul.f32 %v3025_v48, %v7927_v0  ;;  %v3027_v18 = vpop.f32.mrb[237].mxu1 }
 0x5b1   : > { %4040 = vst [vmem:[%s6852_s18 + $0x298] sm:$0xff] %v3576_v20  ;;  %v3430_v62 = vmul.f32 %v3027_v18, %v7928_v54 }
 0x5b2   : > { %v3579_v40 = vadd.f32 %v6840_v32, %v3429_v57  ;;  %v7940_v57 = vld [vmem:[#allocation46_spill] sm:$0xff] }
 0x5b3   : > { %v3580_v11 = vadd.f32 %v6843_v3, %v3430_v62  ;;  %v3031_v49 = vpop.f32.mrb[238].mxu1  ;;  %v7941_v62 = vld [vmem:[#allocation43_spill] sm:$0xff] }
 0x5b4   : > { %3641 = vst [vmem:[%s6852_s18 + $0x2c0] sm:$0xff] %v3579_v40  ;;  %v3433_v58 = vmul.f32 %v3031_v49, %v7929_v17  ;;  %v3033_v19 = vpop.f32.mrb[239].mxu1 }
 0x5b5   : > { %4041 = vst [vmem:[%s6852_s18 + $0x2d0] sm:$0xff] %v3580_v11  ;;  %v3434_v26 = vmul.f32 %v3033_v19, %v7930_v44  ;;  %v7942_v19 = vld [vmem:[#allocation47_spill] sm:$0xff] }
 0x5b6   : > { %v3583_v46 = vadd.f32 %v6840_v32, %v3433_v58 }
 0x5b7   : > { %v3584_v36 = vadd.f32 %v6843_v3, %v3434_v26  ;;  %v3037_v59 = vpop.f32.mrb[240].mxu1 }
 0x5b8   : > { %3642 = vst [vmem:[%s6852_s18 + $0x2c8] sm:$0xff] %v3583_v46  ;;  %v3437_v14 = vmul.f32 %v3037_v59, %v7931_v51  ;;  %v3039_v55 = vpop.f32.mrb[241].mxu1  ;;  %v3481_v46 = vsub.s32 2, %v6821_v12  ;;  %v3485_v51 = vsub.s32 3, %v6821_v12 }
 0x5b9   : > { %4042 = vst [vmem:[%s6852_s18 + $0x2d8] sm:$0xff] %v3584_v36  ;;  %v3438_v28 = vmul.f32 %v3039_v55, %v7932_v1 }
 0x5ba   : > { %v3587_v6 = vadd.f32 %v6840_v32, %v3437_v14 }
 0x5bb   : > { %v3588_v24 = vadd.f32 %v6843_v3, %v3438_v28  ;;  %v3043_v31 = vpop.f32.mrb[242].mxu1 }
 0x5bc   : > { %3643 = vst [vmem:[%s6852_s18 + $0x300] sm:$0xff] %v3587_v6  ;;  %v3441_v52 = vmul.f32 %v3043_v31, %v7933_v47  ;;  %v3045_v9 = vpop.f32.mrb[243].mxu1  ;;  %v7071_v6 = vrot.slane %v6831_v53, %v3481_v46  ;;  %v7075_v47 = vrot.slane %v6831_v53, %v3485_v51 }
 0x5bd   : > { %4043 = vst [vmem:[%s6852_s18 + $0x310] sm:$0xff] %v3588_v24  ;;  %v3442_v37 = vmul.f32 %v3045_v9, %v7934_v8 }
 0x5be   : > { %v3591_v45 = vadd.f32 %v6840_v32, %v3441_v52  ;;  %v7944_v52 = vld [vmem:[#allocation45_spill] sm:$0xff] }
 0x5bf   : > { %v3592_v10 = vadd.f32 %v6843_v3, %v3442_v37  ;;  %v3049_v15 = vpop.f32.mrb[244].mxu1 }
 0x5c0   : > { %3644 = vst [vmem:[%s6852_s18 + $0x308] sm:$0xff] %v3591_v45  ;;  %v3445_v7 = vmul.f32 %v3049_v15, %v7935_v34  ;;  %v3051_v23 = vpop.f32.mrb[245].mxu1  ;;  %v7945_v34 = vld [vmem:[#allocation50_spill] sm:$0xff] }
 0x5c1   : > { %4044 = vst [vmem:[%s6852_s18 + $0x318] sm:$0xff] %v3592_v10  ;;  %v3446_v39 = vmul.f32 %v3051_v23, %v7936_v50  ;;  %v7946_v50 = vld [vmem:[#allocation52_spill] sm:$0xff] }
 0x5c2   : > { %v3595_v33 = vadd.f32 %v6840_v32, %v3445_v7 }
 0x5c3   : > { %v3596_v21 = vadd.f32 %v6843_v3, %v3446_v39  ;;  %v3055_v30 = vpop.f32.mrb[246].mxu1 }
 0x5c4   : > { %3645 = vst [vmem:[%s6852_s18 + $0x340] sm:$0xff] %v3595_v33  ;;  %v3449_v27 = vmul.f32 %v3055_v30, %v7937_v42  ;;  %v3057_v60 = vpop.f32.mrb[247].mxu1 }
 0x5c5   : > { %4045 = vst [vmem:[%s6852_s18 + $0x350] sm:$0xff] %v3596_v21  ;;  %v3450_v25 = vmul.f32 %v3057_v60, %v7938_v2 }
 0x5c6   : > { %v3599_v4 = vadd.f32 %v6840_v32, %v3449_v27  ;;  %v7948_v27 = vld [vmem:[#allocation53_spill] sm:$0xff] }
 0x5c7   : > { %v3600_v29 = vadd.f32 %v6843_v3, %v3450_v25  ;;  %v3061_v5 = vpop.f32.mrb[248].mxu1 }
 0x5c8   : > { %3646 = vst [vmem:[%s6852_s18 + $0x348] sm:$0xff] %v3599_v4  ;;  %v3453_v61 = vmul.f32 %v3061_v5, %v6233_v35  ;;  %v3063_v43 = vpop.f32.mrb[249].mxu1 }
 0x5c9   : > { %4046 = vst [vmem:[%s6852_s18 + $0x358] sm:$0xff] %v3600_v29  ;;  %v3454_v16 = vmul.f32 %v3063_v43, %v7939_v22  ;;  %v7949_v29 = vld [vmem:[#allocation54_spill] sm:$0xff]  ;;  %v7950_v43 = vld [vmem:[#allocation51_spill] sm:$0xff] }
 0x5ca   : > { %v3603_v20 = vadd.f32 %v6840_v32, %v3453_v61 }
 0x5cb   : > { %v3604_v48 = vadd.f32 %v6843_v3, %v3454_v16  ;;  %v3067_v0 = vpop.f32.mrb[250].mxu1 }
 0x5cc   : > { %3647 = vst [vmem:[%s6852_s18 + $0x380] sm:$0xff] %v3603_v20  ;;  %v3457_v18 = vmul.f32 %v3067_v0, %v7940_v57  ;;  %v3069_v54 = vpop.f32.mrb[251].mxu1  ;;  %v7951_v0 = vld [vmem:[#allocation56_spill] sm:$0xff] }
 0x5cd   : > { %4047 = vst [vmem:[%s6852_s18 + $0x390] sm:$0xff] %v3604_v48  ;;  %v3458_v40 = vmul.f32 %v3069_v54, %v7941_v62  ;;  %v7952_v54 = vld [vmem:[#allocation57_spill] sm:$0xff] }
 0x5ce   : > { %v3607_v35 = vadd.f32 %v6840_v32, %v3457_v18 }
 0x5cf   : > { %v3608_v11 = vadd.f32 %v6843_v3, %v3458_v40  ;;  %v3073_v49 = vpop.f32.mrb[252].mxu1 }
 0x5d0   : > { %3648 = vst [vmem:[%s6852_s18 + $0x388] sm:$0xff] %v3607_v35  ;;  %v3461_v17 = vmul.f32 %v3073_v49, %v6253_v41  ;;  %v3075_v58 = vpop.f32.mrb[253].mxu1  ;;  %v7943_v41 = vld [vmem:[#allocation48_spill] sm:$0xff]  ;;  %v7953_v49 = vld [vmem:[#allocation55_spill] sm:$0xff] }
 0x5d1   : > { %4048 = vst [vmem:[%s6852_s18 + $0x398] sm:$0xff] %v3608_v11  ;;  %v3462_v44 = vmul.f32 %v3075_v58, %v7942_v19  ;;  %v7954_v19 = vld [vmem:[#allocation58_spill] sm:$0xff] }
 0x5d2   : > { %v3611_v26 = vadd.f32 %v6840_v32, %v3461_v17 }
 0x5d3   : > { %v3612_v36 = vadd.f32 %v6843_v3, %v3462_v44  ;;  %v3079_v59 = vpop.f32.mrb[254].mxu1 }
 0x5d4   : > { %3649 = vst [vmem:[%s6852_s18 + $0x3c0] sm:$0xff] %v3611_v26  ;;  %v3465_v14 = vmul.f32 %v3079_v59, %v6263_v38  ;;  %v3081_v55 = vpop.f32.mrb[255].mxu1  ;;  %v7955_v59 = vld [vmem:[#allocation59_spill] sm:$0xff] }
 0x5d5   : > { %4049 = vst [vmem:[%s6852_s18 + $0x3d0] sm:$0xff] %v3612_v36  ;;  %v3466_v1 = vmul.f32 %v3081_v55, %v7943_v41  ;;  %v7956_v55 = vld [vmem:[#allocation60_spill] sm:$0xff] }
 0x5d6   : > { %v3615_v28 = vadd.f32 %v6840_v32, %v3465_v14 }
 0x5d7   : > { %v3616_v24 = vadd.f32 %v6843_v3, %v3466_v1  ;;  %v3150_v31 = vpop.f32.mrb[0].mxu1 }
 0x5d8   : > { %3650 = vst [vmem:[%s6852_s18 + $0x3c8] sm:$0xff] %v3615_v28  ;;  %v3343_v38 = vmul.f32 %v3150_v31, %v6273_v63  ;;  %v3152_v12 = vpop.f32.mrb[1].mxu1  ;;  %v7957_v31 = vld [vmem:[#allocation61_spill] sm:$0xff] }
 0x5d9   : > { %4050 = vst [vmem:[%s6852_s18 + $0x3d8] sm:$0xff] %v3616_v24  ;;  %v3344_v9 = vmul.f32 %v3152_v12, %v7944_v52  ;;  %v7958_v52 = vld [vmem:[#allocation62_spill] sm:$0xff] }
 0x5da   : > { %v3493_v32 = vadd.f32 %v7071_v6, %v3343_v38 }
 0x5db   : > { %v3494_v8 = vadd.f32 %v7075_v47, %v3344_v9  ;;  %v3156_v37 = vpop.f32.mrb[2].mxu1 }
 0x5dc   : > { %4051 = vst [vmem:[%s6852_s18 + $0x20] sm:$0xff] %v3493_v32  ;;  %v3347_v3 = vmul.f32 %v3156_v37, %v6283_v13  ;;  %v3158_v53 = vpop.f32.mrb[3].mxu1 }
 0x5dd   : > { %4083 = vst [vmem:[%s6852_s18 + $0x30] sm:$0xff] %v3494_v8  ;;  %v3348_v45 = vmul.f32 %v3158_v53, %v6286_v56  ;;  %v7947_v56 = vld [vmem:[#allocation49_spill] sm:$0xff] }
 0x5de   : > { %v3497_v63 = vadd.f32 %v7071_v6, %v3347_v3  ;;  %v7959_v3 = vld [vmem:[#allocation63_spill] sm:$0xff] }
 0x5df   : > { %v3498_v10 = vadd.f32 %v7075_v47, %v3348_v45  ;;  %v3162_v15 = vpop.f32.mrb[4].mxu1 }
 0x5e0   : > { %4052 = vst [vmem:[%s6852_s18 + $0x28] sm:$0xff] %v3497_v63  ;;  %v3351_v7 = vmul.f32 %v3162_v15, %v7945_v34  ;;  %v3164_v23 = vpop.f32.mrb[5].mxu1  ;;  %v7960_v63 = vld [vmem:[#allocation66_spill] sm:$0xff] }
 0x5e1   : > { %4084 = vst [vmem:[%s6852_s18 + $0x38] sm:$0xff] %v3498_v10  ;;  %v3352_v39 = vmul.f32 %v3164_v23, %v7946_v50  ;;  %v7961_v23 = vld [vmem:[#allocation68_spill] sm:$0xff] }
 0x5e2   : > { %v3501_v13 = vadd.f32 %v7071_v6, %v3351_v7 }
 0x5e3   : > { %v3502_v33 = vadd.f32 %v7075_v47, %v3352_v39  ;;  %v3168_v21 = vpop.f32.mrb[6].mxu1 }
 0x5e4   : > { %4053 = vst [vmem:[%s6852_s18 + $0x60] sm:$0xff] %v3501_v13  ;;  %v3355_v30 = vmul.f32 %v3168_v21, %v7947_v56  ;;  %v3170_v42 = vpop.f32.mrb[7].mxu1  ;;  %v7962_v13 = vld [vmem:[#allocation69_spill] sm:$0xff] }
 0x5e5   : > { %4085 = vst [vmem:[%s6852_s18 + $0x70] sm:$0xff] %v3502_v33  ;;  %v3356_v60 = vmul.f32 %v3170_v42, %v7948_v27  ;;  %v7963_v42 = vld [vmem:[#allocation70_spill] sm:$0xff] }
 0x5e6   : > { %v3505_v2 = vadd.f32 %v7071_v6, %v3355_v30 }
 0x5e7   : > { %v3506_v25 = vadd.f32 %v7075_v47, %v3356_v60  ;;  %v3174_v4 = vpop.f32.mrb[8].mxu1 }
 0x5e8   : > { %4054 = vst [vmem:[%s6852_s18 + $0x68] sm:$0xff] %v3505_v2  ;;  %v3359_v5 = vmul.f32 %v3174_v4, %v7949_v29  ;;  %v3176_v61 = vpop.f32.mrb[9].mxu1  ;;  %v7964_v2 = vld [vmem:[#allocation74_spill] sm:$0xff] }
 0x5e9   : > { %4086 = vst [vmem:[%s6852_s18 + $0x78] sm:$0xff] %v3506_v25  ;;  %v3360_v22 = vmul.f32 %v3176_v61, %v7950_v43  ;;  %v7965_v61 = vld [vmem:[#allocation76_spill] sm:$0xff] }
 0x5ea   : > { %v3509_v16 = vadd.f32 %v7071_v6, %v3359_v5 }
 0x5eb   : > { %v3510_v20 = vadd.f32 %v7075_v47, %v3360_v22  ;;  %v3180_v48 = vpop.f32.mrb[10].mxu1 }
 0x5ec   : > { %4055 = vst [vmem:[%s6852_s18 + $0xa0] sm:$0xff] %v3509_v16  ;;  %v3363_v57 = vmul.f32 %v3180_v48, %v7951_v0  ;;  %v3182_v18 = vpop.f32.mrb[11].mxu1  ;;  %v7966_v16 = vld [vmem:[#allocation77_spill] sm:$0xff] }
 0x5ed   : > { %4087 = vst [vmem:[%s6852_s18 + $0xb0] sm:$0xff] %v3510_v20  ;;  %v3364_v62 = vmul.f32 %v3182_v18, %v7952_v54  ;;  %v7967_v18 = vld [vmem:[#allocation78_spill] sm:$0xff] }
 0x5ee   : > { %v3513_v40 = vadd.f32 %v7071_v6, %v3363_v57 }
 0x5ef   : > { %v3514_v35 = vadd.f32 %v7075_v47, %v3364_v62  ;;  %v3186_v11 = vpop.f32.mrb[12].mxu1 }
 0x5f0   : > { %4056 = vst [vmem:[%s6852_s18 + $0xa8] sm:$0xff] %v3513_v40  ;;  %v3367_v17 = vmul.f32 %v3186_v11, %v7953_v49  ;;  %v3188_v58 = vpop.f32.mrb[13].mxu1  ;;  %v7968_v40 = vld [vmem:[#allocation82_spill] sm:$0xff] }
 0x5f1   : > { %4088 = vst [vmem:[%s6852_s18 + $0xb8] sm:$0xff] %v3514_v35  ;;  %v3368_v44 = vmul.f32 %v3188_v58, %v7954_v19  ;;  %v7969_v58 = vld [vmem:[#allocation84_spill] sm:$0xff] }
 0x5f2   : > { %v3517_v26 = vadd.f32 %v7071_v6, %v3367_v17 }
 0x5f3   : > { %v3518_v46 = vadd.f32 %v7075_v47, %v3368_v44  ;;  %v3192_v36 = vpop.f32.mrb[14].mxu1 }
 0x5f4   : > { %4057 = vst [vmem:[%s6852_s18 + $0xe0] sm:$0xff] %v3517_v26  ;;  %v3371_v51 = vmul.f32 %v3192_v36, %v7955_v59  ;;  %v3194_v14 = vpop.f32.mrb[15].mxu1  ;;  %v7970_v26 = vld [vmem:[#allocation85_spill] sm:$0xff] }
 0x5f5   : > { %4089 = vst [vmem:[%s6852_s18 + $0xf0] sm:$0xff] %v3518_v46  ;;  %v3372_v41 = vmul.f32 %v3194_v14, %v7956_v55  ;;  %v7971_v14 = vld [vmem:[#allocation86_spill] sm:$0xff] }
 0x5f6   : > { %v3521_v1 = vadd.f32 %v7071_v6, %v3371_v51 }
 0x5f7   : > { %v3522_v28 = vadd.f32 %v7075_v47, %v3372_v41  ;;  %v3198_v24 = vpop.f32.mrb[16].mxu1 }
 0x5f8   : > { %4058 = vst [vmem:[%s6852_s18 + $0xe8] sm:$0xff] %v3521_v1  ;;  %v3375_v38 = vmul.f32 %v3198_v24, %v7957_v31  ;;  %v3200_v12 = vpop.f32.mrb[17].mxu1  ;;  %v7972_v1 = vld [vmem:[#allocation90_spill] sm:$0xff] }
 0x5f9   : > { %4090 = vst [vmem:[%s6852_s18 + $0xf8] sm:$0xff] %v3522_v28  ;;  %v3376_v9 = vmul.f32 %v3200_v12, %v7958_v52  ;;  %v7973_v12 = vld [vmem:[#allocation92_spill] sm:$0xff] }
 0x5fa   : > { %v3525_v32 = vadd.f32 %v7071_v6, %v3375_v38 }
 0x5fb   : > { %v3526_v8 = vadd.f32 %v7075_v47, %v3376_v9  ;;  %v3204_v37 = vpop.f32.mrb[18].mxu1 }
 0x5fc   : > { %4059 = vst [vmem:[%s6852_s18 + $0x120] sm:$0xff] %v3525_v32  ;;  %v3379_v53 = vmul.f32 %v3204_v37, %v7959_v3  ;;  %v3206_v45 = vpop.f32.mrb[19].mxu1  ;;  %v7974_v32 = vld [vmem:[#allocation93_spill] sm:$0xff] }
 0x5fd   : > { %4091 = vst [vmem:[%s6852_s18 + $0x130] sm:$0xff] %v3526_v8  ;;  %v3380_v10 = vmul.f32 %v3206_v45, %v7960_v63  ;;  %v7975_v45 = vld [vmem:[#allocation94_spill] sm:$0xff] }
 0x5fe   : > { %v3529_v15 = vadd.f32 %v7071_v6, %v3379_v53 }
 0x5ff   : > { %v3530_v34 = vadd.f32 %v7075_v47, %v3380_v10  ;;  %v3210_v7 = vpop.f32.mrb[20].mxu1 }
 0x600   : > { %4060 = vst [vmem:[%s6852_s18 + $0x128] sm:$0xff] %v3529_v15  ;;  %v3383_v50 = vmul.f32 %v3210_v7, %v7961_v23  ;;  %v3212_v39 = vpop.f32.mrb[21].mxu1  ;;  %v7976_v15 = vld [vmem:[#allocation98_spill] sm:$0xff] }
 0x601   : > { %4092 = vst [vmem:[%s6852_s18 + $0x138] sm:$0xff] %v3530_v34  ;;  %v3384_v33 = vmul.f32 %v3212_v39, %v7962_v13  ;;  %v7977_v39 = vld [vmem:[#allocation100_spill] sm:$0xff] }
 0x602   : > { %v3533_v21 = vadd.f32 %v7071_v6, %v3383_v50 }
 0x603   : > { %v3534_v56 = vadd.f32 %v7075_v47, %v3384_v33  ;;  %v3216_v30 = vpop.f32.mrb[22].mxu1 }
 0x604   : > { %4061 = vst [vmem:[%s6852_s18 + $0x160] sm:$0xff] %v3533_v21  ;;  %v3387_v27 = vmul.f32 %v3216_v30, %v7963_v42  ;;  %v3218_v60 = vpop.f32.mrb[23].mxu1  ;;  %v7978_v21 = vld [vmem:[#allocation101_spill] sm:$0xff] }
 0x605   : > { %4093 = vst [vmem:[%s6852_s18 + $0x170] sm:$0xff] %v3534_v56  ;;  %v3388_v25 = vmul.f32 %v3218_v60, %v7964_v2  ;;  %v7979_v60 = vld [vmem:[#allocation102_spill] sm:$0xff] }
 0x606   : > { %v3537_v4 = vadd.f32 %v7071_v6, %v3387_v27 }
 0x607   : > { %v3538_v29 = vadd.f32 %v7075_v47, %v3388_v25  ;;  %v3222_v5 = vpop.f32.mrb[24].mxu1 }
 0x608   : > { %4062 = vst [vmem:[%s6852_s18 + $0x168] sm:$0xff] %v3537_v4  ;;  %v3391_v43 = vmul.f32 %v3222_v5, %v7965_v61  ;;  %v3224_v22 = vpop.f32.mrb[25].mxu1  ;;  %v7980_v4 = vld [vmem:[#allocation107_spill] sm:$0xff] }
 0x609   : > { %4094 = vst [vmem:[%s6852_s18 + $0x178] sm:$0xff] %v3538_v29  ;;  %v3392_v20 = vmul.f32 %v3224_v22, %v7966_v16  ;;  %v7981_v22 = vld [vmem:[#allocation108_spill] sm:$0xff] }
 0x60a   : > { %v3541_v48 = vadd.f32 %v7071_v6, %v3391_v43 }
 0x60b   : > { %v3542_v0 = vadd.f32 %v7075_v47, %v3392_v20  ;;  %v3228_v57 = vpop.f32.mrb[26].mxu1 }
 0x60c   : > { %4063 = vst [vmem:[%s6852_s18 + $0x1a0] sm:$0xff] %v3541_v48  ;;  %v3395_v54 = vmul.f32 %v3228_v57, %v7967_v18  ;;  %v3230_v62 = vpop.f32.mrb[27].mxu1  ;;  %v7982_v48 = vld [vmem:[#allocation109_spill] sm:$0xff] }
 0x60d   : > { %4095 = vst [vmem:[%s6852_s18 + $0x1b0] sm:$0xff] %v3542_v0  ;;  %v3396_v35 = vmul.f32 %v3230_v62, %v7968_v40  ;;  %v7983_v62 = vld [vmem:[#allocation23_spill] sm:$0xff] }
 0x60e   : > { %v3545_v11 = vadd.f32 %v7071_v6, %v3395_v54 }
 0x60f   : > { %v3546_v49 = vadd.f32 %v7075_v47, %v3396_v35  ;;  %v3234_v17 = vpop.f32.mrb[28].mxu1 }
 0x610   : > { %4064 = vst [vmem:[%s6852_s18 + $0x1a8] sm:$0xff] %v3545_v11  ;;  %v3399_v19 = vmul.f32 %v3234_v17, %v7969_v58  ;;  %v3236_v44 = vpop.f32.mrb[29].mxu1  ;;  %v7984_v11 = vld [vmem:[#allocation26_spill] sm:$0xff] }
 0x611   : > { %4096 = vst [vmem:[%s6852_s18 + $0x1b8] sm:$0xff] %v3546_v49  ;;  %v3400_v46 = vmul.f32 %v3236_v44, %v7970_v26  ;;  %v7985_v44 = vld [vmem:[#allocation31_spill] sm:$0xff] }
 0x612   : > { %v3549_v36 = vadd.f32 %v7071_v6, %v3399_v19 }
 0x613   : > { %v3550_v59 = vadd.f32 %v7075_v47, %v3400_v46  ;;  %v3240_v51 = vpop.f32.mrb[30].mxu1 }
 0x614   : > { %4065 = vst [vmem:[%s6852_s18 + $0x1e0] sm:$0xff] %v3549_v36  ;;  %v3403_v55 = vmul.f32 %v3240_v51, %v7971_v14  ;;  %v3242_v41 = vpop.f32.mrb[31].mxu1  ;;  %v7986_v36 = vld [vmem:[#allocation64_spill] sm:$0xff] }
 0x615   : > { %4097 = vst [vmem:[%s6852_s18 + $0x1f0] sm:$0xff] %v3550_v59  ;;  %v3404_v28 = vmul.f32 %v3242_v41, %v7972_v1  ;;  %v7987_v41 = vld [vmem:[#allocation65_spill] sm:$0xff] }
 0x616   : > { %v3553_v24 = vadd.f32 %v7071_v6, %v3403_v55 }
 0x617   : > { %v3554_v31 = vadd.f32 %v7075_v47, %v3404_v28  ;;  %v3246_v38 = vpop.f32.mrb[32].mxu1 }
 0x618   : > { %4066 = vst [vmem:[%s6852_s18 + $0x1e8] sm:$0xff] %v3553_v24  ;;  %v3407_v52 = vmul.f32 %v3246_v38, %v7973_v12  ;;  %v3248_v9 = vpop.f32.mrb[33].mxu1  ;;  %v7988_v24 = vld [vmem:[#allocation67_spill] sm:$0xff] }
 0x619   : > { %4098 = vst [vmem:[%s6852_s18 + $0x1f8] sm:$0xff] %v3554_v31  ;;  %v3408_v8 = vmul.f32 %v3248_v9, %v7974_v32  ;;  %v7989_v9 = vld [vmem:[#allocation71_spill] sm:$0xff] }
 0x61a   : > { %v3557_v37 = vadd.f32 %v7071_v6, %v3407_v52 }
 0x61b   : > { %v3558_v3 = vadd.f32 %v7075_v47, %v3408_v8  ;;  %v3252_v53 = vpop.f32.mrb[34].mxu1 }
 0x61c   : > { %4067 = vst [vmem:[%s6852_s18 + $0x220] sm:$0xff] %v3557_v37  ;;  %v3411_v63 = vmul.f32 %v3252_v53, %v7975_v45  ;;  %v3254_v10 = vpop.f32.mrb[35].mxu1  ;;  %v7990_v37 = vld [vmem:[#allocation72_spill] sm:$0xff] }
 0x61d   : > { %4099 = vst [vmem:[%s6852_s18 + $0x230] sm:$0xff] %v3558_v3  ;;  %v3412_v34 = vmul.f32 %v3254_v10, %v7976_v15  ;;  %v7991_v10 = vld [vmem:[#allocation73_spill] sm:$0xff] }
 0x61e   : > { %v3561_v7 = vadd.f32 %v7071_v6, %v3411_v63 }
 0x61f   : > { %v3562_v23 = vadd.f32 %v7075_v47, %v3412_v34  ;;  %v3258_v50 = vpop.f32.mrb[36].mxu1 }
 0x620   : > { %4068 = vst [vmem:[%s6852_s18 + $0x228] sm:$0xff] %v3561_v7  ;;  %v3415_v13 = vmul.f32 %v3258_v50, %v7977_v39  ;;  %v3260_v33 = vpop.f32.mrb[37].mxu1  ;;  %v7992_v7 = vld [vmem:[#allocation75_spill] sm:$0xff] }
 0x621   : > { %4100 = vst [vmem:[%s6852_s18 + $0x238] sm:$0xff] %v3562_v23  ;;  %v3416_v56 = vmul.f32 %v3260_v33, %v7978_v21  ;;  %v7993_v33 = vld [vmem:[#allocation79_spill] sm:$0xff] }
 0x622   : > { %v3565_v30 = vadd.f32 %v7071_v6, %v3415_v13 }
 0x623   : > { %v3566_v42 = vadd.f32 %v7075_v47, %v3416_v56  ;;  %v3264_v27 = vpop.f32.mrb[38].mxu1 }
 0x624   : > { %4069 = vst [vmem:[%s6852_s18 + $0x260] sm:$0xff] %v3565_v30  ;;  %v3419_v2 = vmul.f32 %v3264_v27, %v7979_v60  ;;  %v3266_v25 = vpop.f32.mrb[39].mxu1  ;;  %v7994_v30 = vld [vmem:[#allocation80_spill] sm:$0xff] }
 0x625   : > { %4101 = vst [vmem:[%s6852_s18 + $0x270] sm:$0xff] %v3566_v42  ;;  %v3420_v29 = vmul.f32 %v3266_v25, %v7980_v4  ;;  %v7995_v25 = vld [vmem:[#allocation81_spill] sm:$0xff] }
 0x626   : > { %v3569_v5 = vadd.f32 %v7071_v6, %v3419_v2 }
 0x627   : > { %v3570_v61 = vadd.f32 %v7075_v47, %v3420_v29  ;;  %v3270_v43 = vpop.f32.mrb[40].mxu1 }
 0x628   : > { %4070 = vst [vmem:[%s6852_s18 + $0x268] sm:$0xff] %v3569_v5  ;;  %v3423_v16 = vmul.f32 %v3270_v43, %v7981_v22  ;;  %v3272_v20 = vpop.f32.mrb[41].mxu1  ;;  %v7996_v5 = vld [vmem:[#allocation83_spill] sm:$0xff] }
 0x629   : > { %4102 = vst [vmem:[%s6852_s18 + $0x278] sm:$0xff] %v3570_v61  ;;  %v3424_v0 = vmul.f32 %v3272_v20, %v7982_v48  ;;  %v7997_v20 = vld [vmem:[#allocation87_spill] sm:$0xff] }
 0x62a   : > { %v3573_v57 = vadd.f32 %v7071_v6, %v3423_v16 }
 0x62b   : > { %v3574_v18 = vadd.f32 %v7075_v47, %v3424_v0  ;;  %v3276_v54 = vpop.f32.mrb[42].mxu1 }
 0x62c   : > { %4071 = vst [vmem:[%s6852_s18 + $0x2a0] sm:$0xff] %v3573_v57  ;;  %v3427_v40 = vmul.f32 %v3276_v54, %v7983_v62  ;;  %v3278_v35 = vpop.f32.mrb[43].mxu1  ;;  %v7998_v57 = vld [vmem:[#allocation88_spill] sm:$0xff] }
 0x62d   : > { %4103 = vst [vmem:[%s6852_s18 + $0x2b0] sm:$0xff] %v3574_v18  ;;  %v3428_v49 = vmul.f32 %v3278_v35, %v7984_v11  ;;  %v7999_v35 = vld [vmem:[#allocation89_spill] sm:$0xff] }
 0x62e   : > { %v3577_v17 = vadd.f32 %v7071_v6, %v3427_v40 }
 0x62f   : > { %v3578_v58 = vadd.f32 %v7075_v47, %v3428_v49  ;;  %v3282_v19 = vpop.f32.mrb[44].mxu1 }
 0x630   : > { %4072 = vst [vmem:[%s6852_s18 + $0x2a8] sm:$0xff] %v3577_v17  ;;  %v3431_v26 = vmul.f32 %v3282_v19, %v7985_v44  ;;  %v3284_v46 = vpop.f32.mrb[45].mxu1  ;;  %v8000_v17 = vld [vmem:[#allocation91_spill] sm:$0xff] }
 0x631   : > { %4104 = vst [vmem:[%s6852_s18 + $0x2b8] sm:$0xff] %v3578_v58  ;;  %v3432_v59 = vmul.f32 %v3284_v46, %v7986_v36  ;;  %v8001_v46 = vld [vmem:[#allocation95_spill] sm:$0xff] }
 0x632   : > { %v3581_v51 = vadd.f32 %v7071_v6, %v3431_v26 }
 0x633   : > { %v3582_v14 = vadd.f32 %v7075_v47, %v3432_v59  ;;  %v3288_v55 = vpop.f32.mrb[46].mxu1 }
 0x634   : > { %4073 = vst [vmem:[%s6852_s18 + $0x2e0] sm:$0xff] %v3581_v51  ;;  %v3435_v1 = vmul.f32 %v3288_v55, %v7987_v41  ;;  %v3290_v28 = vpop.f32.mrb[47].mxu1  ;;  %v8002_v51 = vld [vmem:[#allocation96_spill] sm:$0xff] }
 0x635   : > { %4105 = vst [vmem:[%s6852_s18 + $0x2f0] sm:$0xff] %v3582_v14  ;;  %v3436_v31 = vmul.f32 %v3290_v28, %v7988_v24  ;;  %v8003_v28 = vld [vmem:[#allocation97_spill] sm:$0xff] }
 0x636   : > { %v3585_v38 = vadd.f32 %v7071_v6, %v3435_v1 }
 0x637   : > { %v3586_v12 = vadd.f32 %v7075_v47, %v3436_v31  ;;  %v3294_v52 = vpop.f32.mrb[48].mxu1 }
 0x638   : > { %4074 = vst [vmem:[%s6852_s18 + $0x2e8] sm:$0xff] %v3585_v38  ;;  %v3439_v32 = vmul.f32 %v3294_v52, %v7989_v9  ;;  %v3296_v8 = vpop.f32.mrb[49].mxu1  ;;  %v8004_v38 = vld [vmem:[#allocation99_spill] sm:$0xff] }
 0x639   : > { %4106 = vst [vmem:[%s6852_s18 + $0x2f8] sm:$0xff] %v3586_v12  ;;  %v3440_v3 = vmul.f32 %v3296_v8, %v7990_v37 }
 0x63a   : > { %v3589_v53 = vadd.f32 %v7071_v6, %v3439_v32 }
 0x63b   : > { %v3590_v45 = vadd.f32 %v7075_v47, %v3440_v3  ;;  %v3300_v63 = vpop.f32.mrb[50].mxu1 }
 0x63c   : > { %4075 = vst [vmem:[%s6852_s18 + $0x320] sm:$0xff] %v3589_v53  ;;  %v3443_v15 = vmul.f32 %v3300_v63, %v7991_v10  ;;  %v3302_v34 = vpop.f32.mrb[51].mxu1 }
 0x63d   : > { %4107 = vst [vmem:[%s6852_s18 + $0x330] sm:$0xff] %v3590_v45  ;;  %v3444_v23 = vmul.f32 %v3302_v34, %v7992_v7 }
 0x63e   : > { %v3593_v50 = vadd.f32 %v7071_v6, %v3443_v15 }
 0x63f   : > { %v3594_v39 = vadd.f32 %v7075_v47, %v3444_v23  ;;  %v3306_v13 = vpop.f32.mrb[52].mxu1 }
 0x640   : > { %4076 = vst [vmem:[%s6852_s18 + $0x328] sm:$0xff] %v3593_v50  ;;  %v3447_v21 = vmul.f32 %v3306_v13, %v7993_v33  ;;  %v3308_v56 = vpop.f32.mrb[53].mxu1 }
 0x641   : > { %4108 = vst [vmem:[%s6852_s18 + $0x338] sm:$0xff] %v3594_v39  ;;  %v3448_v42 = vmul.f32 %v3308_v56, %v7994_v30 }
 0x642   : > { %v3597_v27 = vadd.f32 %v7071_v6, %v3447_v21 }
 0x643   : > { %v3598_v60 = vadd.f32 %v7075_v47, %v3448_v42  ;;  %v3312_v2 = vpop.f32.mrb[54].mxu1 }
 0x644   : > { %4077 = vst [vmem:[%s6852_s18 + $0x360] sm:$0xff] %v3597_v27  ;;  %v3451_v4 = vmul.f32 %v3312_v2, %v7995_v25  ;;  %v3314_v29 = vpop.f32.mrb[55].mxu1 }
 0x645   : > { %4109 = vst [vmem:[%s6852_s18 + $0x370] sm:$0xff] %v3598_v60  ;;  %v3452_v61 = vmul.f32 %v3314_v29, %v7996_v5 }
 0x646   : > { %v3601_v43 = vadd.f32 %v7071_v6, %v3451_v4 }
 0x647   : > { %v3602_v22 = vadd.f32 %v7075_v47, %v3452_v61  ;;  %v3318_v16 = vpop.f32.mrb[56].mxu1 }
 0x648   : > { %4078 = vst [vmem:[%s6852_s18 + $0x368] sm:$0xff] %v3601_v43  ;;  %v3455_v48 = vmul.f32 %v3318_v16, %v7997_v20  ;;  %v3320_v0 = vpop.f32.mrb[57].mxu1 }
 0x649   : > { %4110 = vst [vmem:[%s6852_s18 + $0x378] sm:$0xff] %v3602_v22  ;;  %v3456_v18 = vmul.f32 %v3320_v0, %v7998_v57 }
 0x64a   : > { %v3605_v54 = vadd.f32 %v7071_v6, %v3455_v48 }
 0x64b   : > { %v3606_v62 = vadd.f32 %v7075_v47, %v3456_v18  ;;  %v3324_v40 = vpop.f32.mrb[58].mxu1 }
 0x64c   : > { %4079 = vst [vmem:[%s6852_s18 + $0x3a0] sm:$0xff] %v3605_v54  ;;  %v3459_v11 = vmul.f32 %v3324_v40, %v7999_v35  ;;  %v3326_v49 = vpop.f32.mrb[59].mxu1 }
 0x64d   : > { %4111 = vst [vmem:[%s6852_s18 + $0x3b0] sm:$0xff] %v3606_v62  ;;  %v3460_v58 = vmul.f32 %v3326_v49, %v8000_v17 }
 0x64e   : > { %v3609_v19 = vadd.f32 %v7071_v6, %v3459_v11 }
 0x64f   : > { %v3610_v44 = vadd.f32 %v7075_v47, %v3460_v58  ;;  %v3330_v26 = vpop.f32.mrb[60].mxu1 }
 0x650   : > { %4080 = vst [vmem:[%s6852_s18 + $0x3a8] sm:$0xff] %v3609_v19  ;;  %v3463_v36 = vmul.f32 %v3330_v26, %v8001_v46  ;;  %v3332_v59 = vpop.f32.mrb[61].mxu1 }
 0x651   : > { %4112 = vst [vmem:[%s6852_s18 + $0x3b8] sm:$0xff] %v3610_v44  ;;  %v3464_v14 = vmul.f32 %v3332_v59, %v8002_v51 }
 0x652   : > { %v3613_v55 = vadd.f32 %v7071_v6, %v3463_v36 }
 0x653   : > { %v3614_v41 = vadd.f32 %v7075_v47, %v3464_v14  ;;  %v3336_v1 = vpop.f32.mrb[62].mxu1 }
 0x654   : > { %4081 = vst [vmem:[%s6852_s18 + $0x3e0] sm:$0xff] %v3613_v55  ;;  %v3467_v24 = vmul.f32 %v3336_v1, %v8003_v28  ;;  %v3338_v31 = vpop.f32.mrb[63].mxu1 }
 0x655   : > { %4113 = vst [vmem:[%s6852_s18 + $0x3f0] sm:$0xff] %v3614_v41  ;;  %v3468_v12 = vmul.f32 %v3338_v31, %v8004_v38 }
 0x656   : > { %v3617_v52 = vadd.f32 %v7071_v6, %v3467_v24 }
 0x657   : > { %v3618_v9 = vadd.f32 %v7075_v47, %v3468_v12 }
 0x658   : > { %4082 = vst [vmem:[%s6852_s18 + $0x3e8] sm:$0xff] %v3617_v52 }
 0x659   : > { %4114 = vst [vmem:[%s6852_s18 + $0x3f8] sm:$0xff] %v3618_v9 }
 0x65a   : > { %4641 = shalt.err (!%p4638_p3)
}
 0x65b   : > { %s4642_s14 = scalar_lea.hbm %s7273_s29, 16384  ;;  %s4646_s17 = scalar_lea.hbm %s7329_s6, 32768 }
 0x65c   : > { %p4643_p4 = scmp.ne.s32.totalorder %s7273_s29, %s4642_s14  ;;  %p4647_p9 = scmp.lt.u32.totalorder %s7273_s29, %s7329_s6 }
 0x65d   : > { %p4648_p10 = scmp.lt.u32.totalorder %s4646_s17, %s4642_s14  ;;  %p4650_p12 = scmp.lt.u32.totalorder %s4642_s14, %s7273_s29 }
 0x65e   : > { %p4644_p7 = pnand %p4643_p4, %p4771_p5 }
 0x65f   : > { %p4649_p11 = por %p4648_p10, %p4647_p9 }
 0x660   : > { %p4645_p8 = pneg %p4644_p7 }
 0x661   : > { %p4651_p13 = por %p4650_p12, %p4649_p11 }
 0x663   : > { %p4652_p0 = pnand %p4651_p13, %p4645_p8 }
 0x665   : > { %4655 = shalt.err (!%p4652_p0)
}
 0x666   : > { %s4696_s19 = smov 128   ;;  %s4697_s26 = smov 8  }
 0x667   : > { %4492 = dma.vmem_to_hbm [thread:$0]  (%p4771_p5), %s7275_s20, 16384, %s7273_s29, %s7282_s25, %s4696_s19, %s4696_s19, %s4697_s26  }
 0x668 PF: > { %p4498_p1 = scmp.ge.s32.totalorder %s4690_s24, 2  ;;  %s3780_s28 = sand.u32 1, %s4678_s21  }
 0x669   : > { %s3781_s9 = scalar_lea.sflag [#allocation3], %s3780_s28 }
 0x66a   : > { %p4495_p2 = pnand %p4498_p1, %p4775_p6 }
 0x66c   : > { %4673 = dma.done.wait (!%p4495_p2), %s3781_s9, 16384  }
 0x66d   : > { %4675 = vsyncadd (!%p4495_p2), %s3781_s9, 4294950912  ;;  %p16_p3 = scmp.ge.s32.totalorder %s4758_s27, 4   ;;  %s8005_s21 = smov %s4682_s22 }
 0x66e   : > { %s8006_s22 = smov %s4686_s23  ;;  %s8007_s23 = smov %s4769_s30 }
 0x66f   : > { %s8008_s24 = smov %s4758_s27  ;;  %18 = sbr.rel (!%p16_p3) target bundleno = 3 (0x3), region = 82 }
 0x676   :  { %3786 = vsyncpa [#allocation3], 1 }
 0x677   :  { %3788 = vsyncpa [#allocation3 + $0x1], 1 }

// kernel: tpu_custom_call.1
= control target key start
LH: loop header
LB: loop body
LE: loop exit
PB: predicated region body
PF: predicated region fallthrough
CT: control target
= control target key end

     0   :  { %11 = vsyncpa [#allocation3], 0  ;;  %s7323_s0 = inlined_call_operand.vmem [shape: bf16[32,16,32], index: 0, kind: input, shape index: {}]   ;;  %s7324_s1 = inlined_call_operand.vmem [shape: bf16[32,512], index: 1, kind: input, shape index: {}]   ;;  %s7325_s2 = inlined_call_operand.vmem [shape: f32[512,16], index: 2, kind: input, shape index: {}]   ;;  %s7326_s3 = inlined_call_operand.vmem [shape: f32[16,512], index: 3, kind: input, shape index: {}]   ;;  %s7327_s4 = inlined_call_operand.vmem [shape: f32[16,512], index: 4, kind: input, shape index: {}]   ;;  %s7328_s5 = inlined_call_operand.vmem [shape: f32[1,512], index: 5, kind: input, shape index: {}]   ;;  %s7329_s6 = inlined_call_operand.hbm [shape: f32[32,4,16,128], index: 6, kind: output, shape index: {}]  }
   0x1   :  { %13 = vsyncpa [#allocation3 + $0x1], 0  ;;  %s4733_s21 = smov 0   ;;  %s4735_s22 = smov 0  }
   0x2   :  { %s4737_s23 = smov 0   ;;  %s4739_s24 = smov 0  }
   0x3 LB: > { %s4754_s25 = sadd.s32 4294967295, %s4690_s24   ;;  %s3827_s26 = sadd.s32 4294967294, %s4690_s24   ;;  %s4690_s24 = sphi %s4739_s24, %s8008_s24   ;;  %s4686_s23 = sphi %s4737_s23, %s8007_s23   ;;  %s4682_s22 = sphi %s4735_s22, %s8006_s22   ;;  %s4678_s21 = sphi %s4733_s21, %s8005_s21  }
   0x4   : > { %s4758_s27 = sadd.s32 1, %s4690_s24   ;;  %s157_s28 = sadd.s32 1, %s4686_s23 }
   0x5   : > { %s154_s29 = ssub.s32 %s4690_s24, %s4758_s27  ;;  %p167_p0 = scmp.ne.s32.totalorder %s4686_s23, %s4682_s22 }
   0x6   : > { %p155_p1 = scmp.eq.s32.totalorder %s154_s29, 0  ;;  %p168_p2 = scmp.eq.s32.totalorder %s4754_s25, 1 }
   0x7   : > { %p173_p3 = scmp.ne.s32.totalorder %s4682_s22, %s4678_s21  ;;  %p174_p4 = scmp.eq.s32.totalorder %s3827_s26, 1 }
   0x8   : > { %s4769_s30 = scalar_select %p155_p1, %s4686_s23, %s157_s28  }
   0x9   : > { %p4771_p5 = por %p168_p2, %p167_p0  ;;  %p4775_p6 = por %p174_p4, %p173_p3 }
   0xa   : > { %p3830_p7 = scmp.ge.s32.totalorder %s4690_s24, 1  ;;  %p217_p8 = scmp.lt.s32.totalorder %s4690_s24, 3 }
   0xc   : > { %p218_p9 = pnand %p3830_p7, %p217_p8 }
   0xe   : > { %221 = sbr.rel (%p218_p9) target bundleno = 1640 (0x668), region = 44 }
  0x15   : > { %v4536_v0 = vld [vmem:[%s7324_s1 + $0x4] ss:$16 sps:$4 sm:$0xff]   ;;  %s3832_s11 = sshll.u32 %s4754_s25, 4  ;;  %v4538_v1 = vld [vmem:[%s7324_s1] ss:$16 sps:$4 sm:$0xff]   ;;  %v4692_v2 = vmov 0  }
  0x16   : > { %498 = vmatprep.mubr.bf16.mxu0 %v4692_v2  ;;  %p249_p10 = scmp.lt.s32.totalorder %s3832_s11, 31  ;;  %691 = vmatprep.mubr.bf16.mxu1 %v4692_v2  ;;  %v4539_v3 = vld [vmem:[%s7324_s1 + $0x24] ss:$16 sps:$4 sm:$0xff]   ;;  %v4541_v4 = vld [vmem:[%s7324_s1 + $0x20] ss:$16 sps:$4 sm:$0xff]   ;;  %v853_v6 = vld [vmem:[%s7325_s2 + $0x8] sm:$0xff] }
  0x17   : > { %466 = vmatprep.subr.bf16.mxu0 %v4536_v0  ;;  %v852_v5 = vld [vmem:[%s7325_s2] sm:$0xff]  ;;  %v854_v7 = vld [vmem:[%s7325_s2 + $0x10] sm:$0xff]  ;;  %v4557_v8 = vld [vmem:[%s7324_s1 + $0xc] ss:$16 sps:$4 sm:$0xff]   ;;  %vm417_vm0 = vcmask 261120   ;;  %v7338_v12 = vmov 0.0|0.0  }
  0x18   : > { %467 = vmatpush1.bf16.msra.mxu0 %v4538_v1  ;;  %s8010_s11 = smov (!%p249_p10, %s3832_s11), 31  ;;  %v4559_v9 = vld [vmem:[%s7324_s1 + $0x8] ss:$16 sps:$4 sm:$0xff]   ;;  %v4817_v11 = vpack.c.bf16 %v853_v6, %v852_v5  ;;  %659 = vmatprep.subr.bf16.mxu1 %v4557_v8  ;;  %v856_v15 = vld [vmem:[%s7325_s2 + $0x20] sm:$0xff]  ;;  %v858_v19 = vld [vmem:[%s7325_s2 + $0x30] sm:$0xff]  ;;  %vm1374_vm1 = vcmask 130048  }
  0x19   : > { %468 = vmatprep.subr.bf16.mxu0 %v4539_v3  ;;  %s4121_s28 = sshll.u32 %s8010_s11, 3  ;;  %v855_v13 = vld [vmem:[%s7325_s2 + $0x18] sm:$0xff]  ;;  %660 = vmatpush1.bf16.msra.mxu1 %v4559_v9  ;;  %v857_v16 = vld [vmem:[%s7325_s2 + $0x28] sm:$0xff]  ;;  %v860_v22 = vld [vmem:[%s7325_s2 + $0x40] sm:$0xff]  ;;  %s245_s15 = sand.u32 1, %s4682_s22  }
  0x1a   : > { %s4805_s10 = scalar_lea.vmem %s7323_s0, %s4121_s28  ;;  %v4826_v14 = vpack.c.bf16 %v855_v13, %v854_v7  ;;  %v4837_v18 = vpack.c.bf16 %v857_v16, %v856_v15  ;;  %v859_v20 = vld [vmem:[%s7325_s2 + $0x38] sm:$0xff]  ;;  %v861_v24 = vld [vmem:[%s7325_s2 + $0x48] sm:$0xff]  ;;  %v862_v28 = vld [vmem:[%s7325_s2 + $0x50] sm:$0xff]  ;;  %s3831_s11 = sshll.u32 %s245_s15, 10 }
  0x1b   : > { %v4542_v10 = vld [vmem:[%s4805_s10] sm:$0xff]   ;;  %v4543_v17 = vld [vmem:[%s4805_s10 + $0x8] sm:$0xff]   ;;  %v4849_v21 = vpack.c.bf16 %v859_v20, %v858_v19  ;;  %v4544_v23 = vld [vmem:[%s4805_s10 + $0x10] sm:$0xff]   ;;  %v4860_v25 = vpack.c.bf16 %v861_v24, %v860_v22  ;;  %s6852_s18 = scalar_lea.vmem [#allocation2], %s3831_s11  ;;  %s4123_s19 = sshll.u32 %s4754_s25, 14 }
  0x1c   : > { %469 = vmatpush1.bf16.msra.mxu0 %v4541_v4  ;;  %v4561_v26 = vld [vmem:[%s7324_s1 + $0x2c] ss:$16 sps:$4 sm:$0xff]   ;;  %v4563_v27 = vld [vmem:[%s7324_s1 + $0x28] ss:$16 sps:$4 sm:$0xff]   ;;  %v864_v31 = vld [vmem:[%s7325_s2 + $0x60] sm:$0xff]  ;;  %s3765_s20 = sshll.u32 %s6852_s18, 4  ;;  %s7273_s29 = scalar_lea.hbm %s7329_s6, %s4123_s19  ;;  %s7275_s20 = int_to_ptr.vmem [resolvable:$true] %s3765_s20 }
  0x1d   : > { %4124 = vmatprep.subr.bf16.mxu0 %v7338_v12  ;;  %v863_v29 = vld [vmem:[%s7325_s2 + $0x58] sm:$0xff]  ;;  %661 = vmatprep.subr.bf16.mxu1 %v4561_v26  ;;  %v865_v32 = vld [vmem:[%s7325_s2 + $0x68] sm:$0xff]  ;;  %v866_v35 = vld [vmem:[%s7325_s2 + $0x70] sm:$0xff]  ;;  %s7282_s25 = scalar_lea.sflag [#allocation3], %s245_s15  ;;  %s4628_s9 = scalar_lea.vmem %s7275_s20, 16384 }
  0x1e   : > { %v4878_v30 = vpack.c.bf16 %v863_v29, %v862_v28  ;;  %662 = vmatpush1.bf16.msra.mxu1 %v4563_v27  ;;  %v4545_v33 = vld [vmem:[%s4805_s10 + $0x18] sm:$0xff]   ;;  %v4890_v34 = vpack.c.bf16 %v865_v32, %v864_v31  ;;  %v868_v38 = vld [vmem:[%s7325_s2 + $0x80] sm:$0xff]  ;;  %v869_v39 = vld [vmem:[%s7325_s2 + $0x88] sm:$0xff]  ;;  %p4629_p11 = scmp.ne.s32.totalorder %s7275_s20, %s4628_s9 }
  0x1f   : > { %3859 = vmatmul.mubr.msk.bf16.vlgmr.msra.gmra.mrb[0].mxu0 %vm417_vm0, %v4542_v10  ;;  %v867_v36 = vld [vmem:[%s7325_s2 + $0x78] sm:$0xff]  ;;  %v4546_v40 = vld [vmem:[%s4805_s10 + $0x20] sm:$0xff]   ;;  %v4915_v41 = vpack.c.bf16 %v869_v39, %v868_v38  ;;  %v870_v42 = vld [vmem:[%s7325_s2 + $0x90] sm:$0xff] }
  0x20   : > { %508 = vmatprep.mubr.bf16.mxu0 %v4692_v2  ;;  %4126 = vmatpush1.bf16.msra.mxu0 %v4817_v11  ;;  %v4903_v37 = vpack.c.bf16 %v867_v36, %v866_v35  ;;  %v871_v43 = vld [vmem:[%s7325_s2 + $0x98] sm:$0xff]  ;;  %v872_v45 = vld [vmem:[%s7325_s2 + $0xa0] sm:$0xff]  ;;  %v873_v46 = vld [vmem:[%s7325_s2 + $0xa8] sm:$0xff]  ;;  %p4630_p12 = pnand %p4629_p11, %p4771_p5 }
  0x21   : > { %4127 = vmatprep.subr.bf16.mxu0 %v7338_v12  ;;  %3875 = vmatmul.mubr.msk.bf16.vlgmr.msra.gmra.mrb[0].mxu1 %vm417_vm0, %v4542_v10  ;;  %v4928_v44 = vpack.c.bf16 %v871_v43, %v870_v42  ;;  %v4547_v47 = vld [vmem:[%s4805_s10 + $0x28] sm:$0xff]   ;;  %v4940_v48 = vpack.c.bf16 %v873_v46, %v872_v45  ;;  %v874_v49 = vld [vmem:[%s7325_s2 + $0xb0] sm:$0xff]  ;;  %v875_v50 = vld [vmem:[%s7325_s2 + $0xb8] sm:$0xff] }
  0x22   : > { %701 = vmatprep.mubr.bf16.mxu1 %v4692_v2  ;;  %v4953_v51 = vpack.c.bf16 %v875_v50, %v874_v49  ;;  %v876_v52 = vld [vmem:[%s7325_s2 + $0xc0] sm:$0xff]  ;;  %v877_v53 = vld [vmem:[%s7325_s2 + $0xc8] sm:$0xff]  ;;  %v4548_v54 = vld [vmem:[%s4805_s10 + $0x30] sm:$0xff]   ;;  %p4631_p13 = pneg %p4630_p12 }
  0x23   : > { %v4965_v55 = vpack.c.bf16 %v877_v53, %v876_v52  ;;  %v878_v56 = vld [vmem:[%s7325_s2 + $0xd0] sm:$0xff]  ;;  %v879_v57 = vld [vmem:[%s7325_s2 + $0xd8] sm:$0xff]  ;;  %v880_v59 = vld [vmem:[%s7325_s2 + $0xe0] sm:$0xff] }
  0x24   : > { %4129 = vmatpush1.bf16.msra.mxu0 %v4826_v14  ;;  %v4978_v58 = vpack.c.bf16 %v879_v57, %v878_v56  ;;  %v881_v60 = vld [vmem:[%s7325_s2 + $0xe8] sm:$0xff]  ;;  %v4549_v61 = vld [vmem:[%s4805_s10 + $0x38] sm:$0xff]   ;;  %v882_v63 = vld [vmem:[%s7325_s2 + $0xf0] sm:$0xff] }
  0x25   : > { %4130 = vmatprep.subr.bf16.mxu0 %v7338_v12  ;;  %v4990_v62 = vpack.c.bf16 %v881_v60, %v880_v59  ;;  %v883_v0 = vld [vmem:[%s7325_s2 + $0xf8] sm:$0xff]  ;;  %v4550_v3 = vld [vmem:[%s4805_s10 + $0x40] sm:$0xff]   ;;  %v4551_v4 = vld [vmem:[%s4805_s10 + $0x48] sm:$0xff]  }
  0x26   : > { %v5003_v1 = vpack.c.bf16 %v883_v0, %v882_v63  ;;  %v4552_v5 = vld [vmem:[%s4805_s10 + $0x50] sm:$0xff]   ;;  %v4553_v6 = vld [vmem:[%s4805_s10 + $0x58] sm:$0xff]   ;;  %v4554_v7 = vld [vmem:[%s4805_s10 + $0x60] sm:$0xff]  }
  0x27   : > { %3860 = vmatmul.mubr.msk.bf16.gmra.mrb[4].mxu0 %vm417_vm0, %v4543_v17  ;;  %v4555_v8 = vld [vmem:[%s4805_s10 + $0x68] sm:$0xff]   ;;  %v4556_v9 = vld [vmem:[%s4805_s10 + $0x70] sm:$0xff]   ;;  %v4560_v10 = vld [vmem:[%s4805_s10 + $0x78] sm:$0xff]   ;;  %s4695_s10 = smov [#allocation2]  }
  0x28   : > { %518 = vmatprep.mubr.bf16.mxu0 %v4692_v2  ;;  %4132 = vmatpush1.bf16.msra.mxu0 %v4837_v18  ;;  %v884_v13 = vld [vmem:[%s7325_s2 + $0x100] sm:$0xff]  ;;  %v885_v15 = vld [vmem:[%s7325_s2 + $0x108] sm:$0xff]  ;;  %v887_v20 = vld [vmem:[%s7325_s2 + $0x118] sm:$0xff]  ;;  %s4632_s12 = sshll.u32 %s4695_s10, 4  ;;  %s4633_s12 = int_to_ptr.vmem [resolvable:$false] %s4632_s12 }
  0x29   : > { %4133 = vmatprep.subr.bf16.mxu0 %v7338_v12  ;;  %3876 = vmatmul.mubr.msk.bf16.gmra.mrb[4].mxu1 %vm417_vm0, %v4543_v17  ;;  %v5060_v17 = vpack.c.bf16 %v885_v15, %v884_v13  ;;  %v888_v26 = vld [vmem:[%s7325_s2 + $0x120] sm:$0xff]  ;;  %v889_v27 = vld [vmem:[%s7325_s2 + $0x128] sm:$0xff]  ;;  %v890_v32 = vld [vmem:[%s7325_s2 + $0x130] sm:$0xff]  ;;  %s4634_s13 = scalar_lea.vmem %s4633_s12, 32768  ;;  %p4635_p0 = scmp.lt.s32.totalorder %s7275_s20, %s4633_s12 }
  0x2a   : > { %711 = vmatprep.mubr.bf16.mxu1 %v4692_v2  ;;  %v5091_v29 = vpack.c.bf16 %v889_v27, %v888_v26  ;;  %v892_v39 = vld [vmem:[%s7325_s2 + $0x140] sm:$0xff]  ;;  %v894_v46 = vld [vmem:[%s7325_s2 + $0x150] sm:$0xff]  ;;  %p4636_p1 = scmp.lt.s32.totalorder %s4634_s13, %s4628_s9 }
  0x2b   : > { %7555 = vst [vmem:[#allocation6_spill] sm:$0xff] %v5060_v17  ;;  %v896_v53 = vld [vmem:[%s7325_s2 + $0x160] sm:$0xff] }
  0x2c   : > { %4135 = vmatpush1.bf16.msra.mxu0 %v4849_v21  ;;  %7561 = vst [vmem:[#allocation12_spill] sm:$0xff] %v5091_v29  ;;  %p4637_p2 = por %p4636_p1, %p4635_p0 }
  0x2d   : > { %4136 = vmatprep.subr.bf16.mxu0 %v7338_v12 }
  0x2e   : > { %p4638_p3 = pnand %p4637_p2, %p4631_p13 }
  0x2f   : > { %3861 = vmatmul.mubr.msk.bf16.gmra.mrb[8].mxu0 %vm417_vm0, %v4544_v23 }
  0x30   : > { %528 = vmatprep.mubr.bf16.mxu0 %v4692_v2  ;;  %4138 = vmatpush1.bf16.msra.mxu0 %v4860_v25 }
  0x31   : > { %4139 = vmatprep.subr.bf16.mxu0 %v7338_v12  ;;  %3877 = vmatmul.mubr.msk.bf16.gmra.mrb[8].mxu1 %vm417_vm0, %v4544_v23 }
  0x32   : > { %721 = vmatprep.mubr.bf16.mxu1 %v4692_v2 }
  0x34   : > { %4141 = vmatpush1.bf16.msra.mxu0 %v4878_v30 }
  0x35   : > { %4142 = vmatprep.subr.bf16.mxu0 %v7338_v12 }
  0x37   : > { %3862 = vmatmul.mubr.msk.bf16.gmra.mrb[12].mxu0 %vm417_vm0, %v4545_v33 }
  0x38   : > { %538 = vmatprep.mubr.bf16.mxu0 %v4692_v2  ;;  %4144 = vmatpush1.bf16.msra.mxu0 %v4890_v34 }
  0x39   : > { %4145 = vmatprep.subr.bf16.mxu0 %v7338_v12  ;;  %3878 = vmatmul.mubr.msk.bf16.gmra.mrb[12].mxu1 %vm417_vm0, %v4545_v33  ;;  %v891_v33 = vld [vmem:[%s7325_s2 + $0x138] sm:$0xff] }
  0x3a   : > { %731 = vmatprep.mubr.bf16.mxu1 %v4692_v2  ;;  %v5110_v38 = vpack.c.bf16 %v891_v33, %v890_v32  ;;  %v902_v32 = vld [vmem:[%s7325_s2 + $0x190] sm:$0xff]  ;;  %v903_v33 = vld [vmem:[%s7325_s2 + $0x198] sm:$0xff] }
  0x3c   : > { %4147 = vmatpush1.bf16.msra.mxu0 %v4903_v37  ;;  %7565 = vst [vmem:[#allocation16_spill] sm:$0xff] %v5110_v38 }
  0x3d   : > { %4148 = vmatprep.subr.bf16.mxu0 %v7338_v12 }
  0x3f   : > { %3863 = vmatmul.mubr.msk.bf16.gmra.mrb[16].mxu0 %vm417_vm0, %v4546_v40 }
  0x40   : > { %548 = vmatprep.mubr.bf16.mxu0 %v4692_v2  ;;  %4150 = vmatpush1.bf16.msra.mxu0 %v4915_v41 }
  0x41   : > { %4151 = vmatprep.subr.bf16.mxu0 %v7338_v12  ;;  %3879 = vmatmul.mubr.msk.bf16.gmra.mrb[16].mxu1 %vm417_vm0, %v4546_v40  ;;  %v893_v40 = vld [vmem:[%s7325_s2 + $0x148] sm:$0xff] }
  0x42   : > { %741 = vmatprep.mubr.bf16.mxu1 %v4692_v2  ;;  %v5123_v43 = vpack.c.bf16 %v893_v40, %v892_v39 }
  0x44   : > { %4153 = vmatpush1.bf16.msra.mxu0 %v4928_v44  ;;  %7567 = vst [vmem:[#allocation18_spill] sm:$0xff] %v5123_v43 }
  0x45   : > { %4154 = vmatprep.subr.bf16.mxu0 %v7338_v12 }
  0x47   : > { %3864 = vmatmul.mubr.msk.bf16.gmra.mrb[20].mxu0 %vm417_vm0, %v4547_v47 }
  0x48   : > { %558 = vmatprep.mubr.bf16.mxu0 %v4692_v2  ;;  %4156 = vmatpush1.bf16.msra.mxu0 %v4940_v48 }
  0x49   : > { %4157 = vmatprep.subr.bf16.mxu0 %v7338_v12  ;;  %3880 = vmatmul.mubr.msk.bf16.gmra.mrb[20].mxu1 %vm417_vm0, %v4547_v47  ;;  %v895_v47 = vld [vmem:[%s7325_s2 + $0x158] sm:$0xff] }
  0x4a   : > { %751 = vmatprep.mubr.bf16.mxu1 %v4692_v2  ;;  %v5142_v52 = vpack.c.bf16 %v895_v47, %v894_v46  ;;  %v5222_v46 = vpack.c.bf16 %v903_v33, %v902_v32  ;;  %v904_v47 = vld [vmem:[%s7325_s2 + $0x1a0] sm:$0xff] }
  0x4c   : > { %4159 = vmatpush1.bf16.msra.mxu0 %v4953_v51  ;;  %7571 = vst [vmem:[#allocation22_spill] sm:$0xff] %v5142_v52  ;;  %7586 = vst [vmem:[#allocation37_spill] sm:$0xff] %v5222_v46 }
  0x4d   : > { %4160 = vmatprep.subr.bf16.mxu0 %v7338_v12 }
  0x4f   : > { %3865 = vmatmul.mubr.msk.bf16.gmra.mrb[24].mxu0 %vm417_vm0, %v4548_v54 }
  0x50   : > { %568 = vmatprep.mubr.bf16.mxu0 %v4692_v2  ;;  %4162 = vmatpush1.bf16.msra.mxu0 %v4965_v55 }
  0x51   : > { %4163 = vmatprep.subr.bf16.mxu0 %v7338_v12  ;;  %3881 = vmatmul.mubr.msk.bf16.gmra.mrb[24].mxu1 %vm417_vm0, %v4548_v54  ;;  %v897_v54 = vld [vmem:[%s7325_s2 + $0x168] sm:$0xff] }
  0x52   : > { %761 = vmatprep.mubr.bf16.mxu1 %v4692_v2 }
  0x54   : > { %4165 = vmatpush1.bf16.msra.mxu0 %v4978_v58 }
  0x55   : > { %4166 = vmatprep.subr.bf16.mxu0 %v7338_v12 }
  0x57   : > { %3866 = vmatmul.mubr.msk.bf16.gmra.mrb[28].mxu0 %vm417_vm0, %v4549_v61 }
  0x58   : > { %578 = vmatprep.mubr.bf16.mxu0 %v4692_v2  ;;  %4168 = vmatpush1.bf16.msra.mxu0 %v4990_v62 }
  0x59   : > { %4169 = vmatprep.subr.bf16.mxu0 %v7338_v12  ;;  %3882 = vmatmul.mubr.msk.bf16.gmra.mrb[28].mxu1 %vm417_vm0, %v4549_v61  ;;  %v5161_v61 = vpack.c.bf16 %v897_v54, %v896_v53  ;;  %v905_v53 = vld [vmem:[%s7325_s2 + $0x1a8] sm:$0xff] }
  0x5a   : > { %771 = vmatprep.mubr.bf16.mxu1 %v4692_v2 }
  0x5b   : > { %7574 = vst [vmem:[#allocation25_spill] sm:$0xff] %v5161_v61 }
  0x5c   : > { %4171 = vmatpush1.bf16.msra.mxu0 %v5003_v1 }
  0x5d   : > { %4172 = vmatprep.subr.bf16.mxu0 %v7338_v12 }
  0x5f   : > { %3867 = vmatmul.mubr.msk.bf16.gmra.mrb[32].mxu0 %vm417_vm0, %v4550_v3 }
  0x60   : > { %588 = vmatprep.mubr.bf16.mxu0 %v4692_v2 }
  0x61   : > { %3883 = vmatmul.mubr.msk.bf16.gmra.mrb[32].mxu1 %vm417_vm0, %v4550_v3  ;;  %v898_v3 = vld [vmem:[%s7325_s2 + $0x170] sm:$0xff] }
  0x62   : > { %781 = vmatprep.mubr.bf16.mxu1 %v4692_v2 }
  0x67   : > { %3868 = vmatmul.mubr.msk.bf16.gmra.mrb[36].mxu0 %vm417_vm0, %v4551_v4 }
  0x68   : > { %598 = vmatprep.mubr.bf16.mxu0 %v4692_v2 }
  0x69   : > { %3884 = vmatmul.mubr.msk.bf16.gmra.mrb[36].mxu1 %vm417_vm0, %v4551_v4  ;;  %v899_v4 = vld [vmem:[%s7325_s2 + $0x178] sm:$0xff] }
  0x6a   : > { %791 = vmatprep.mubr.bf16.mxu1 %v4692_v2 }
  0x6f   : > { %3869 = vmatmul.mubr.msk.bf16.gmra.mrb[40].mxu0 %vm417_vm0, %v4552_v5 }
  0x70   : > { %608 = vmatprep.mubr.bf16.mxu0 %v4692_v2 }
  0x71   : > { %3885 = vmatmul.mubr.msk.bf16.gmra.mrb[40].mxu1 %vm417_vm0, %v4552_v5 }
  0x72   : > { %801 = vmatprep.mubr.bf16.mxu1 %v4692_v2 }
  0x77   : > { %3870 = vmatmul.mubr.msk.bf16.gmra.mrb[44].mxu0 %vm417_vm0, %v4553_v6 }
  0x78   : > { %618 = vmatprep.mubr.bf16.mxu0 %v4692_v2 }
  0x79   : > { %3886 = vmatmul.mubr.msk.bf16.gmra.mrb[44].mxu1 %vm417_vm0, %v4553_v6 }
  0x7a   : > { %811 = vmatprep.mubr.bf16.mxu1 %v4692_v2 }
  0x7f   : > { %3871 = vmatmul.mubr.msk.bf16.gmra.mrb[48].mxu0 %vm417_vm0, %v4554_v7 }
  0x80   : > { %628 = vmatprep.mubr.bf16.mxu0 %v4692_v2 }
  0x81   : > { %3887 = vmatmul.mubr.msk.bf16.gmra.mrb[48].mxu1 %vm417_vm0, %v4554_v7  ;;  %v5182_v7 = vpack.c.bf16 %v899_v4, %v898_v3 }
  0x82   : > { %821 = vmatprep.mubr.bf16.mxu1 %v4692_v2 }
  0x83   : > { %7579 = vst [vmem:[#allocation30_spill] sm:$0xff] %v5182_v7 }
  0x87   : > { %3872 = vmatmul.mubr.msk.bf16.gmra.mrb[52].mxu0 %vm417_vm0, %v4555_v8 }
  0x88   : > { %638 = vmatprep.mubr.bf16.mxu0 %v4692_v2 }
  0x89   : > { %3888 = vmatmul.mubr.msk.bf16.gmra.mrb[52].mxu1 %vm417_vm0, %v4555_v8  ;;  %v900_v8 = vld [vmem:[%s7325_s2 + $0x180] sm:$0xff] }
  0x8a   : > { %831 = vmatprep.mubr.bf16.mxu1 %v4692_v2 }
  0x8f   : > { %3873 = vmatmul.mubr.msk.bf16.gmra.mrb[56].mxu0 %vm417_vm0, %v4556_v9 }
  0x90   : > { %648 = vmatprep.mubr.bf16.mxu0 %v4692_v2 }
  0x91   : > { %3889 = vmatmul.mubr.msk.bf16.gmra.mrb[56].mxu1 %vm417_vm0, %v4556_v9  ;;  %v901_v9 = vld [vmem:[%s7325_s2 + $0x188] sm:$0xff] }
  0x92   : > { %841 = vmatprep.mubr.bf16.mxu1 %v4692_v2  ;;  %v886_v2 = vld [vmem:[%s7325_s2 + $0x110] sm:$0xff] }
  0x93   : > { %v5078_v24 = vpack.c.bf16 %v887_v20, %v886_v2  ;;  %v5201_v20 = vpack.c.bf16 %v901_v9, %v900_v8  ;;  %v5241_v9 = vpack.c.bf16 %v905_v53, %v904_v47 }
  0x95   : > { %7559 = vst [vmem:[#allocation10_spill] sm:$0xff] %v5078_v24  ;;  %7582 = vst [vmem:[#allocation33_spill] sm:$0xff] %v5201_v20 }
  0x96   : > { %7588 = vst [vmem:[#allocation39_spill] sm:$0xff] %v5241_v9 }
  0x97   : > { %3874 = vmatmul.mubr.msk.bf16.gmra.mrb[60].mxu0 %vm417_vm0, %v4560_v10 }
  0x99   : > { %3890 = vmatmul.mubr.msk.bf16.gmra.mrb[60].mxu1 %vm417_vm0, %v4560_v10 }
  0xf2   : > { %v5058_v16 = vpop.f32.mrb[0].mxu0 }
  0xf3   : > { %7554 = vst [vmem:[#allocation5_spill] sm:$0xff] %v5058_v16  ;;  %v5062_v19 = vpop.f32.mrb[1].mxu0 }
  0xf4   : > { %7556 = vst [vmem:[#allocation7_spill] sm:$0xff] %v5062_v19  ;;  %v5070_v22 = vpop.f32.mrb[2].mxu0  ;;  %980 = vmatprep.mubr.f32.mxu0 %v5062_v19  ;;  %v5151_v56 = vpop.f32.mrb[0].mxu1 }
  0xf5   : > { %7557 = vst [vmem:[#allocation8_spill] sm:$0xff] %v5070_v22  ;;  %v5073_v23 = vpop.f32.mrb[3].mxu0  ;;  %981 = vmatmul.mubr.f32.vlgmr.msra.gmra.mrb[64].mxu0 %v5058_v16  ;;  %v5153_v57 = vpop.f32.mrb[1].mxu1 }
  0xf6   : > { %7558 = vst [vmem:[#allocation9_spill] sm:$0xff] %v5073_v23  ;;  %4174 = vmatpush1.bf16.msra.mxu0 %v5060_v17  ;;  %985 = vmatprep.mubr.f32.mxu0 %v5073_v23  ;;  %7572 = vst [vmem:[#allocation23_spill] sm:$0xff] %v5153_v57  ;;  %v5156_v59 = vpop.f32.mrb[2].mxu1 }
  0xf7   : > { %4175 = vmatprep.subr.bf16.mxu0 %v7338_v12  ;;  %v5163_v63 = vpop.f32.mrb[3].mxu1 }
  0xf8   : > { %7575 = vst [vmem:[#allocation26_spill] sm:$0xff] %v5163_v63 }
  0xf9   : > { %986 = vmatmul.mubr.f32.gmra.mrb[66].mxu0 %v5070_v22 }
  0xfa   : > { %v5088_v28 = vpop.f32.mrb[4].mxu0  ;;  %4177 = vmatpush1.bf16.msra.mxu0 %v5078_v24 }
  0xfb   : > { %7560 = vst [vmem:[#allocation11_spill] sm:$0xff] %v5088_v28  ;;  %v5093_v31 = vpop.f32.mrb[5].mxu0  ;;  %4178 = vmatprep.subr.bf16.mxu0 %v7338_v12 }
  0xfc   : > { %7562 = vst [vmem:[#allocation13_spill] sm:$0xff] %v5093_v31  ;;  %v5102_v35 = vpop.f32.mrb[6].mxu0  ;;  %990 = vmatprep.mubr.f32.mxu0 %v5093_v31  ;;  %v5191_v10 = vpop.f32.mrb[4].mxu1 }
  0xfd   : > { %7563 = vst [vmem:[#allocation14_spill] sm:$0xff] %v5102_v35  ;;  %v5105_v36 = vpop.f32.mrb[7].mxu0  ;;  %991 = vmatmul.mubr.f32.gmra.mrb[68].mxu0 %v5088_v28  ;;  %v5193_v13 = vpop.f32.mrb[5].mxu1 }
  0xfe   : > { %7564 = vst [vmem:[#allocation15_spill] sm:$0xff] %v5105_v36  ;;  %995 = vmatprep.mubr.f32.mxu0 %v5105_v36  ;;  %4180 = vmatpush1.bf16.msra.mxu0 %v5091_v29  ;;  %7580 = vst [vmem:[#allocation31_spill] sm:$0xff] %v5193_v13  ;;  %v5196_v15 = vpop.f32.mrb[6].mxu1 }
  0xff   : > { %4181 = vmatprep.subr.bf16.mxu0 %v7338_v12  ;;  %v5203_v26 = vpop.f32.mrb[7].mxu1 }
 0x101   : > { %996 = vmatmul.mubr.f32.gmra.mrb[70].mxu0 %v5102_v35 }
 0x102   : > { %v5120_v42 = vpop.f32.mrb[8].mxu0  ;;  %4183 = vmatpush1.bf16.msra.mxu0 %v5110_v38 }
 0x103   : > { %7566 = vst [vmem:[#allocation17_spill] sm:$0xff] %v5120_v42  ;;  %v5125_v45 = vpop.f32.mrb[9].mxu0  ;;  %4184 = vmatprep.subr.bf16.mxu0 %v7338_v12 }
 0x104   : > { %7568 = vst [vmem:[#allocation19_spill] sm:$0xff] %v5125_v45  ;;  %v5134_v49 = vpop.f32.mrb[10].mxu0  ;;  %1000 = vmatprep.mubr.f32.mxu0 %v5125_v45  ;;  %v5231_v54 = vpop.f32.mrb[8].mxu1 }
 0x105   : > { %7569 = vst [vmem:[#allocation20_spill] sm:$0xff] %v5134_v49  ;;  %v5137_v50 = vpop.f32.mrb[11].mxu0  ;;  %1001 = vmatmul.mubr.f32.gmra.mrb[72].mxu0 %v5120_v42  ;;  %v5233_v3 = vpop.f32.mrb[9].mxu1 }
 0x106   : > { %7570 = vst [vmem:[#allocation21_spill] sm:$0xff] %v5137_v50  ;;  %1005 = vmatprep.mubr.f32.mxu0 %v5137_v50  ;;  %4186 = vmatpush1.bf16.msra.mxu0 %v5123_v43  ;;  %v5236_v4 = vpop.f32.mrb[10].mxu1 }
 0x107   : > { %4187 = vmatprep.subr.bf16.mxu0 %v7338_v12  ;;  %v5243_v32 = vpop.f32.mrb[11].mxu1 }
 0x109   : > { %1006 = vmatmul.mubr.f32.gmra.mrb[74].mxu0 %v5134_v49 }
 0x10a   : > { %v5158_v60 = vpop.f32.mrb[12].mxu0  ;;  %4189 = vmatpush1.bf16.msra.mxu0 %v5142_v52  ;;  %v914_v52 = vld [vmem:[%s7325_s2 + $0x1f0] sm:$0xff] }
 0x10b   : > { %7573 = vst [vmem:[#allocation24_spill] sm:$0xff] %v5158_v60  ;;  %v5165_v0 = vpop.f32.mrb[13].mxu0  ;;  %4190 = vmatprep.subr.bf16.mxu0 %v7338_v12 }
 0x10c   : > { %7576 = vst [vmem:[#allocation27_spill] sm:$0xff] %v5165_v0  ;;  %v5174_v5 = vpop.f32.mrb[14].mxu0  ;;  %1010 = vmatprep.mubr.f32.mxu0 %v5165_v0 }
 0x10d   : > { %7577 = vst [vmem:[#allocation28_spill] sm:$0xff] %v5174_v5  ;;  %v5177_v6 = vpop.f32.mrb[15].mxu0  ;;  %1011 = vmatmul.mubr.f32.gmra.mrb[76].mxu0 %v5158_v60 }
 0x10e   : > { %7578 = vst [vmem:[#allocation29_spill] sm:$0xff] %v5177_v6  ;;  %1015 = vmatprep.mubr.f32.mxu0 %v5177_v6  ;;  %4192 = vmatpush1.bf16.msra.mxu0 %v5161_v61 }
 0x10f   : > { %4193 = vmatprep.subr.bf16.mxu0 %v7338_v12 }
 0x111   : > { %1016 = vmatmul.mubr.f32.gmra.mrb[78].mxu0 %v5174_v5 }
 0x112   : > { %v5198_v2 = vpop.f32.mrb[16].mxu0  ;;  %4195 = vmatpush1.bf16.msra.mxu0 %v5182_v7  ;;  %v5271_v7 = vpop.f32.mrb[12].mxu1 }
 0x113   : > { %7581 = vst [vmem:[#allocation32_spill] sm:$0xff] %v5198_v2  ;;  %v5205_v27 = vpop.f32.mrb[17].mxu0  ;;  %4196 = vmatprep.subr.bf16.mxu0 %v7338_v12 }
 0x114   : > { %7583 = vst [vmem:[#allocation34_spill] sm:$0xff] %v5205_v27  ;;  %v5214_v39 = vpop.f32.mrb[18].mxu0  ;;  %1020 = vmatprep.mubr.f32.mxu0 %v5205_v27  ;;  %v5273_v27 = vpop.f32.mrb[13].mxu1 }
 0x115   : > { %7584 = vst [vmem:[#allocation35_spill] sm:$0xff] %v5214_v39  ;;  %v5217_v40 = vpop.f32.mrb[19].mxu0  ;;  %1021 = vmatmul.mubr.f32.gmra.mrb[80].mxu0 %v5198_v2  ;;  %v910_v2 = vld [vmem:[%s7325_s2 + $0x1d0] sm:$0xff] }
 0x116   : > { %7585 = vst [vmem:[#allocation36_spill] sm:$0xff] %v5217_v40  ;;  %1025 = vmatprep.mubr.f32.mxu0 %v5217_v40  ;;  %4198 = vmatpush1.bf16.msra.mxu0 %v5201_v20  ;;  %v906_v20 = vld [vmem:[%s7325_s2 + $0x1b0] sm:$0xff]  ;;  %v907_v40 = vld [vmem:[%s7325_s2 + $0x1b8] sm:$0xff] }
 0x117   : > { %4199 = vmatprep.subr.bf16.mxu0 %v7338_v12  ;;  %v5262_v53 = vpack.c.bf16 %v907_v40, %v906_v20 }
 0x119   : > { %1026 = vmatmul.mubr.f32.gmra.mrb[82].mxu0 %v5214_v39  ;;  %7592 = vst [vmem:[#allocation43_spill] sm:$0xff] %v5262_v53 }
 0x11a   : > { %v5238_v8 = vpop.f32.mrb[20].mxu0  ;;  %4201 = vmatpush1.bf16.msra.mxu0 %v5222_v46  ;;  %v908_v46 = vld [vmem:[%s7325_s2 + $0x1c0] sm:$0xff] }
 0x11b   : > { %7587 = vst [vmem:[#allocation38_spill] sm:$0xff] %v5238_v8  ;;  %v5245_v33 = vpop.f32.mrb[21].mxu0  ;;  %4202 = vmatprep.subr.bf16.mxu0 %v7338_v12 }
 0x11c   : > { %7589 = vst [vmem:[#allocation40_spill] sm:$0xff] %v5245_v33  ;;  %v5254_v39 = vpop.f32.mrb[22].mxu0  ;;  %1030 = vmatprep.mubr.f32.mxu0 %v5245_v33  ;;  %v909_v33 = vld [vmem:[%s7325_s2 + $0x1c8] sm:$0xff] }
 0x11d   : > { %7590 = vst [vmem:[#allocation41_spill] sm:$0xff] %v5254_v39  ;;  %v5257_v47 = vpop.f32.mrb[23].mxu0  ;;  %1031 = vmatmul.mubr.f32.gmra.mrb[84].mxu0 %v5238_v8  ;;  %v5281_v40 = vpack.c.bf16 %v909_v33, %v908_v46  ;;  %v7596_v8 = vmov 0.0|0.0  }
 0x11e   : > { %7591 = vst [vmem:[#allocation42_spill] sm:$0xff] %v5257_v47  ;;  %1035 = vmatprep.mubr.f32.mxu0 %v5257_v47  ;;  %4204 = vmatpush1.bf16.msra.mxu0 %v5241_v9  ;;  %v5276_v47 = vpop.f32.mrb[14].mxu1 }
 0x11f   : > { %4205 = vmatprep.subr.bf16.mxu0 %v7338_v12  ;;  %7594 = vst [vmem:[#allocation45_spill] sm:$0xff] %v5281_v40  ;;  %v5283_v12 = vpop.f32.mrb[15].mxu1 }
 0x120   : > { %v5311_v6 = vpop.f32.mrb[16].mxu1 }
 0x121   : > { %1036 = vmatmul.mubr.f32.gmra.mrb[86].mxu0 %v5254_v39  ;;  %v911_v39 = vld [vmem:[%s7325_s2 + $0x1d8] sm:$0xff]  ;;  %v5313_v5 = vpop.f32.mrb[17].mxu1 }
 0x122   : > { %v5278_v20 = vpop.f32.mrb[24].mxu0  ;;  %4207 = vmatpush1.bf16.msra.mxu0 %v5262_v53  ;;  %v5302_v33 = vpack.c.bf16 %v911_v39, %v910_v2  ;;  %v912_v53 = vld [vmem:[%s7325_s2 + $0x1e0] sm:$0xff] }
 0x123   : > { %7593 = vst [vmem:[#allocation44_spill] sm:$0xff] %v5278_v20  ;;  %v5285_v9 = vpop.f32.mrb[25].mxu0  ;;  %4208 = vmatprep.subr.bf16.mxu0 %v7596_v8 }
 0x124   : > { %7595 = vst [vmem:[#allocation46_spill] sm:$0xff] %v5285_v9  ;;  %v5294_v61 = vpop.f32.mrb[26].mxu0  ;;  %1040 = vmatprep.mubr.f32.mxu0 %v5285_v9  ;;  %7599 = vst [vmem:[#allocation49_spill] sm:$0xff] %v5302_v33  ;;  %v913_v9 = vld [vmem:[%s7325_s2 + $0x1e8] sm:$0xff] }
 0x125   : > { %7597 = vst [vmem:[#allocation47_spill] sm:$0xff] %v5294_v61  ;;  %v5297_v46 = vpop.f32.mrb[27].mxu0  ;;  %1041 = vmatmul.mubr.f32.gmra.mrb[88].mxu0 %v5278_v20  ;;  %v5321_v39 = vpack.c.bf16 %v913_v9, %v912_v53 }
 0x126   : > { %7598 = vst [vmem:[#allocation48_spill] sm:$0xff] %v5297_v46  ;;  %1045 = vmatprep.mubr.f32.mxu0 %v5297_v46  ;;  %4210 = vmatpush1.bf16.msra.mxu0 %v5281_v40  ;;  %v5316_v46 = vpop.f32.mrb[18].mxu1 }
 0x127   : > { %4211 = vmatprep.subr.bf16.mxu0 %v7596_v8  ;;  %7601 = vst [vmem:[#allocation51_spill] sm:$0xff] %v5321_v39  ;;  %v5323_v40 = vpop.f32.mrb[19].mxu1 }
 0x129   : > { %1046 = vmatmul.mubr.f32.gmra.mrb[90].mxu0 %v5294_v61  ;;  %v915_v61 = vld [vmem:[%s7325_s2 + $0x1f8] sm:$0xff] }
 0x12a   : > { %v5318_v2 = vpop.f32.mrb[28].mxu0  ;;  %4213 = vmatpush1.bf16.msra.mxu0 %v5302_v33  ;;  %v5342_v53 = vpack.c.bf16 %v915_v61, %v914_v52  ;;  %v5345_v33 = vpop.f32.mrb[20].mxu1 }
 0x12b   : > { %7600 = vst [vmem:[#allocation50_spill] sm:$0xff] %v5318_v2  ;;  %v5325_v20 = vpop.f32.mrb[29].mxu0  ;;  %4214 = vmatprep.subr.bf16.mxu0 %v7596_v8  ;;  %v5347_v60 = vpop.f32.mrb[21].mxu1 }
 0x12c   : > { %7602 = vst [vmem:[#allocation52_spill] sm:$0xff] %v5325_v20  ;;  %v5334_v0 = vpop.f32.mrb[30].mxu0  ;;  %1050 = vmatprep.mubr.f32.mxu0 %v5325_v20  ;;  %7605 = vst [vmem:[#allocation55_spill] sm:$0xff] %v5342_v53  ;;  %v5350_v43 = vpop.f32.mrb[22].mxu1 }
 0x12d   : > { %7603 = vst [vmem:[#allocation53_spill] sm:$0xff] %v5334_v0  ;;  %v5337_v9 = vpop.f32.mrb[31].mxu0  ;;  %1051 = vmatmul.mubr.f32.gmra.mrb[92].mxu0 %v5318_v2  ;;  %v5355_v2 = vpop.f32.mrb[23].mxu1 }
 0x12e   : > { %7604 = vst [vmem:[#allocation54_spill] sm:$0xff] %v5337_v9  ;;  %1055 = vmatprep.mubr.f32.mxu0 %v5337_v9  ;;  %4216 = vmatpush1.bf16.msra.mxu0 %v5321_v39  ;;  %v5367_v39 = vpop.f32.mrb[24].mxu1 }
 0x12f   : > { %4217 = vmatprep.subr.bf16.mxu0 %v7596_v8 }
 0x131   : > { %1056 = vmatmul.mubr.f32.gmra.mrb[94].mxu0 %v5334_v0  ;;  %v5369_v0 = vpop.f32.mrb[25].mxu1 }
 0x132   : > { %v5352_v20 = vpop.f32.mrb[32].mxu0  ;;  %4219 = vmatpush1.bf16.msra.mxu0 %v5342_v53  ;;  %v5372_v53 = vpop.f32.mrb[26].mxu1 }
 0x133   : > { %7606 = vst [vmem:[#allocation56_spill] sm:$0xff] %v5352_v20  ;;  %v5357_v9 = vpop.f32.mrb[33].mxu0  ;;  %4228 = vmatprep.subr.bf16.mxu0 %v7596_v8  ;;  %v5376_v49 = vpop.f32.mrb[27].mxu1 }
 0x134   : > { %7607 = vst [vmem:[#allocation57_spill] sm:$0xff] %v5357_v9  ;;  %v5360_v52 = vpop.f32.mrb[34].mxu0  ;;  %1060 = vmatprep.mubr.f32.mxu0 %v5357_v9 }
 0x135   : > { %7608 = vst [vmem:[#allocation58_spill] sm:$0xff] %v5360_v52  ;;  %v5363_v61 = vpop.f32.mrb[35].mxu0  ;;  %1061 = vmatmul.mubr.f32.gmra.mrb[96].mxu0 %v5352_v20 }
 0x136   : > { %7609 = vst [vmem:[#allocation59_spill] sm:$0xff] %v5363_v61  ;;  %1065 = vmatprep.mubr.f32.mxu0 %v5363_v61  ;;  %v5387_v61 = vpop.f32.mrb[28].mxu1 }
 0x139   : > { %1066 = vmatmul.mubr.f32.gmra.mrb[98].mxu0 %v5360_v52  ;;  %v5389_v52 = vpop.f32.mrb[29].mxu1 }
 0x13a   : > { %v5374_v50 = vpop.f32.mrb[36].mxu0  ;;  %7614 = vst [vmem:[#allocation64_spill] sm:$0xff] %v5389_v52  ;;  %v5392_v45 = vpop.f32.mrb[30].mxu1 }
 0x13b   : > { %7610 = vst [vmem:[#allocation60_spill] sm:$0xff] %v5374_v50  ;;  %v5378_v38 = vpop.f32.mrb[37].mxu0  ;;  %7615 = vst [vmem:[#allocation65_spill] sm:$0xff] %v5392_v45  ;;  %v5396_v29 = vpop.f32.mrb[31].mxu1 }
 0x13c   : > { %7611 = vst [vmem:[#allocation61_spill] sm:$0xff] %v5378_v38  ;;  %v5380_v9 = vpop.f32.mrb[38].mxu0  ;;  %1070 = vmatprep.mubr.f32.mxu0 %v5378_v38  ;;  %7617 = vst [vmem:[#allocation67_spill] sm:$0xff] %v5396_v29  ;;  %v5413_v35 = vpop.f32.mrb[32].mxu1 }
 0x13d   : > { %7612 = vst [vmem:[#allocation62_spill] sm:$0xff] %v5380_v9  ;;  %v5383_v20 = vpop.f32.mrb[39].mxu0  ;;  %1071 = vmatmul.mubr.f32.gmra.mrb[100].mxu0 %v5374_v50  ;;  %7621 = vst [vmem:[#allocation71_spill] sm:$0xff] %v5413_v35  ;;  %v5415_v31 = vpop.f32.mrb[33].mxu1 }
 0x13e   : > { %7613 = vst [vmem:[#allocation63_spill] sm:$0xff] %v5383_v20  ;;  %1075 = vmatprep.mubr.f32.mxu0 %v5383_v20  ;;  %v1367_v20 = vld [vmem:[%s7326_s3 + $0x8] sm:$0xff]  ;;  %7622 = vst [vmem:[#allocation72_spill] sm:$0xff] %v5415_v31 }
 0x141   : > { %1076 = vmatmul.mubr.f32.gmra.mrb[102].mxu0 %v5380_v9  ;;  %v1371_v9 = vld [vmem:[%s7326_s3 + $0x28] sm:$0xff] }
 0x142   : > { %v5394_v42 = vpop.f32.mrb[40].mxu0  ;;  %v4220_v24 = vpack.c.bf16 %v1371_v9, %v1367_v20 }
 0x143   : > { %7616 = vst [vmem:[#allocation66_spill] sm:$0xff] %v5394_v42  ;;  %v5398_v36 = vpop.f32.mrb[41].mxu0 }
 0x144   : > { %7618 = vst [vmem:[#allocation68_spill] sm:$0xff] %v5398_v36  ;;  %v5400_v38 = vpop.f32.mrb[42].mxu0  ;;  %1080 = vmatprep.mubr.f32.mxu0 %v5398_v36  ;;  %v5418_v36 = vpop.f32.mrb[34].mxu1  ;;  %4221 = vmatprep.subr.bf16.mxu1 %v4220_v24 }
 0x145   : > { %7619 = vst [vmem:[#allocation69_spill] sm:$0xff] %v5400_v38  ;;  %v5403_v50 = vpop.f32.mrb[43].mxu0  ;;  %1081 = vmatmul.mubr.f32.gmra.mrb[104].mxu0 %v5394_v42  ;;  %7623 = vst [vmem:[#allocation73_spill] sm:$0xff] %v5418_v36  ;;  %v1370_v42 = vld [vmem:[%s7326_s3 + $0x20] sm:$0xff]  ;;  %v5428_v17 = vpop.f32.mrb[35].mxu1 }
 0x146   : > { %7620 = vst [vmem:[#allocation70_spill] sm:$0xff] %v5403_v50  ;;  %1085 = vmatprep.mubr.f32.mxu0 %v5403_v50  ;;  %v1366_v50 = vld [vmem:[%s7326_s3] sm:$0xff]  ;;  %7625 = vst [vmem:[#allocation75_spill] sm:$0xff] %v5428_v17 }
 0x147   : > { %v4222_v20 = vpack.c.bf16 %v1370_v42, %v1366_v50 }
 0x149   : > { %1086 = vmatmul.mubr.f32.gmra.mrb[106].mxu0 %v5400_v38  ;;  %4223 = vmatpush1.bf16.msra.mxu1 %v4222_v20  ;;  %v5439_v38 = vpop.f32.mrb[36].mxu1 }
 0x14a   : > { %v5426_v28 = vpop.f32.mrb[44].mxu0  ;;  %7629 = vst [vmem:[#allocation79_spill] sm:$0xff] %v5439_v38  ;;  %v5441_v22 = vpop.f32.mrb[37].mxu1 }
 0x14b   : > { %7624 = vst [vmem:[#allocation74_spill] sm:$0xff] %v5426_v28  ;;  %v5430_v9 = vpop.f32.mrb[45].mxu0  ;;  %7630 = vst [vmem:[#allocation80_spill] sm:$0xff] %v5441_v22  ;;  %v5444_v42 = vpop.f32.mrb[38].mxu1 }
 0x14c   : > { %7626 = vst [vmem:[#allocation76_spill] sm:$0xff] %v5430_v9  ;;  %v5432_v23 = vpop.f32.mrb[46].mxu0  ;;  %1090 = vmatprep.mubr.f32.mxu0 %v5430_v9  ;;  %7631 = vst [vmem:[#allocation81_spill] sm:$0xff] %v5444_v42  ;;  %v5448_v19 = vpop.f32.mrb[39].mxu1 }
 0x14d   : > { %7627 = vst [vmem:[#allocation77_spill] sm:$0xff] %v5432_v23  ;;  %v5435_v24 = vpop.f32.mrb[47].mxu0  ;;  %1091 = vmatmul.mubr.f32.gmra.mrb[108].mxu0 %v5426_v28  ;;  %7633 = vst [vmem:[#allocation83_spill] sm:$0xff] %v5448_v19 }
 0x14e   : > { %7628 = vst [vmem:[#allocation78_spill] sm:$0xff] %v5435_v24  ;;  %1095 = vmatprep.mubr.f32.mxu0 %v5435_v24  ;;  %v5459_v24 = vpop.f32.mrb[40].mxu1 }
 0x14f   : > { %7637 = vst [vmem:[#allocation87_spill] sm:$0xff] %v5459_v24 }
 0x151   : > { %1096 = vmatmul.mubr.f32.gmra.mrb[110].mxu0 %v5432_v23  ;;  %v5461_v23 = vpop.f32.mrb[41].mxu1 }
 0x152   : > { %v5446_v50 = vpop.f32.mrb[48].mxu0  ;;  %7638 = vst [vmem:[#allocation88_spill] sm:$0xff] %v5461_v23  ;;  %v5464_v16 = vpop.f32.mrb[42].mxu1 }
 0x153   : > { %7632 = vst [vmem:[#allocation82_spill] sm:$0xff] %v5446_v50  ;;  %v5450_v9 = vpop.f32.mrb[49].mxu0  ;;  %7639 = vst [vmem:[#allocation89_spill] sm:$0xff] %v5464_v16  ;;  %v5468_v19 = vpop.f32.mrb[43].mxu1 }
 0x154   : > { %7634 = vst [vmem:[#allocation84_spill] sm:$0xff] %v5450_v9  ;;  %v5452_v20 = vpop.f32.mrb[50].mxu0  ;;  %1100 = vmatprep.mubr.f32.mxu0 %v5450_v9  ;;  %7641 = vst [vmem:[#allocation91_spill] sm:$0xff] %v5468_v19 }
 0x155   : > { %7635 = vst [vmem:[#allocation85_spill] sm:$0xff] %v5452_v20  ;;  %v5455_v28 = vpop.f32.mrb[51].mxu0  ;;  %1101 = vmatmul.mubr.f32.gmra.mrb[112].mxu0 %v5446_v50 }
 0x156   : > { %7636 = vst [vmem:[#allocation86_spill] sm:$0xff] %v5455_v28  ;;  %1105 = vmatprep.mubr.f32.mxu0 %v5455_v28  ;;  %v5479_v28 = vpop.f32.mrb[44].mxu1 }
 0x157   : > { %7645 = vst [vmem:[#allocation95_spill] sm:$0xff] %v5479_v28 }
 0x159   : > { %1106 = vmatmul.mubr.f32.gmra.mrb[114].mxu0 %v5452_v20  ;;  %v5481_v20 = vpop.f32.mrb[45].mxu1 }
 0x15a   : > { %v5466_v42 = vpop.f32.mrb[52].mxu0  ;;  %7646 = vst [vmem:[#allocation96_spill] sm:$0xff] %v5481_v20  ;;  %v5484_v16 = vpop.f32.mrb[46].mxu1 }
 0x15b   : > { %7640 = vst [vmem:[#allocation90_spill] sm:$0xff] %v5466_v42  ;;  %v5470_v38 = vpop.f32.mrb[53].mxu0  ;;  %7647 = vst [vmem:[#allocation97_spill] sm:$0xff] %v5484_v16  ;;  %v5488_v24 = vpop.f32.mrb[47].mxu1 }
 0x15c   : > { %7642 = vst [vmem:[#allocation92_spill] sm:$0xff] %v5470_v38  ;;  %v5472_v9 = vpop.f32.mrb[54].mxu0  ;;  %1110 = vmatprep.mubr.f32.mxu0 %v5470_v38  ;;  %7649 = vst [vmem:[#allocation99_spill] sm:$0xff] %v5488_v24 }
 0x15d   : > { %7643 = vst [vmem:[#allocation93_spill] sm:$0xff] %v5472_v9  ;;  %v5475_v50 = vpop.f32.mrb[55].mxu0  ;;  %1111 = vmatmul.mubr.f32.gmra.mrb[116].mxu0 %v5466_v42 }
 0x15e   : > { %7644 = vst [vmem:[#allocation94_spill] sm:$0xff] %v5475_v50  ;;  %1115 = vmatprep.mubr.f32.mxu0 %v5475_v50  ;;  %v5499_v50 = vpop.f32.mrb[48].mxu1 }
 0x15f   : > { %7653 = vst [vmem:[#allocation103_spill] sm:$0xff] %v5499_v50 }
 0x161   : > { %1116 = vmatmul.mubr.f32.gmra.mrb[118].mxu0 %v5472_v9  ;;  %v5501_v9 = vpop.f32.mrb[49].mxu1 }
 0x162   : > { %v5486_v19 = vpop.f32.mrb[56].mxu0  ;;  %7654 = vst [vmem:[#allocation104_spill] sm:$0xff] %v5501_v9  ;;  %v5504_v16 = vpop.f32.mrb[50].mxu1 }
 0x163   : > { %7648 = vst [vmem:[#allocation98_spill] sm:$0xff] %v5486_v19  ;;  %v5490_v23 = vpop.f32.mrb[57].mxu0  ;;  %7655 = vst [vmem:[#allocation105_spill] sm:$0xff] %v5504_v16  ;;  %v5508_v28 = vpop.f32.mrb[51].mxu1 }
 0x164   : > { %7650 = vst [vmem:[#allocation100_spill] sm:$0xff] %v5490_v23  ;;  %v5492_v38 = vpop.f32.mrb[58].mxu0  ;;  %1120 = vmatprep.mubr.f32.mxu0 %v5490_v23  ;;  %7656 = vst [vmem:[#allocation106_spill] sm:$0xff] %v5508_v28 }
 0x165   : > { %7651 = vst [vmem:[#allocation101_spill] sm:$0xff] %v5492_v38  ;;  %v5495_v42 = vpop.f32.mrb[59].mxu0  ;;  %1121 = vmatmul.mubr.f32.gmra.mrb[120].mxu0 %v5486_v19 }
 0x166   : > { %7652 = vst [vmem:[#allocation102_spill] sm:$0xff] %v5495_v42  ;;  %1125 = vmatprep.mubr.f32.mxu0 %v5495_v42  ;;  %v5519_v42 = vpop.f32.mrb[52].mxu1 }
 0x167   : > { %7660 = vst [vmem:[#allocation110_spill] sm:$0xff] %v5519_v42 }
 0x169   : > { %1126 = vmatmul.mubr.f32.gmra.mrb[122].mxu0 %v5492_v38  ;;  %v5521_v38 = vpop.f32.mrb[53].mxu1 }
 0x16a   : > { %v5506_v24 = vpop.f32.mrb[60].mxu0  ;;  %7661 = vst [vmem:[#allocation111_spill] sm:$0xff] %v5521_v38  ;;  %v5524_v16 = vpop.f32.mrb[54].mxu1 }
 0x16b   : > { %v5510_v20 = vpop.f32.mrb[61].mxu0  ;;  %7662 = vst [vmem:[#allocation112_spill] sm:$0xff] %v5524_v16  ;;  %v5527_v28 = vpop.f32.mrb[55].mxu1 }
 0x16c   : > { %7657 = vst [vmem:[#allocation107_spill] sm:$0xff] %v5510_v20  ;;  %v5512_v23 = vpop.f32.mrb[62].mxu0  ;;  %1130 = vmatprep.mubr.f32.mxu0 %v5510_v20  ;;  %7663 = vst [vmem:[#allocation113_spill] sm:$0xff] %v5527_v28  ;;  %v5532_v20 = vpop.f32.mrb[56].mxu1 }
 0x16d   : > { %7658 = vst [vmem:[#allocation108_spill] sm:$0xff] %v5512_v23  ;;  %v5515_v19 = vpop.f32.mrb[63].mxu0  ;;  %1131 = vmatmul.mubr.f32.gmra.mrb[124].mxu0 %v5506_v24  ;;  %7664 = vst [vmem:[#allocation114_spill] sm:$0xff] %v5532_v20 }
 0x16e   : > { %7659 = vst [vmem:[#allocation109_spill] sm:$0xff] %v5515_v19  ;;  %1135 = vmatprep.mubr.f32.mxu0 %v5515_v19  ;;  %v5535_v19 = vpop.f32.mrb[57].mxu1 }
 0x16f   : > { %7665 = vst [vmem:[#allocation115_spill] sm:$0xff] %v5535_v19 }
 0x171   : > { %1136 = vmatmul.mubr.f32.gmra.mrb[126].mxu0 %v5512_v23  ;;  %v5538_v23 = vpop.f32.mrb[58].mxu1 }
 0x172   : > { %1205 = vmatprep.mubr.f32.mxu0 %v5153_v57  ;;  %7666 = vst [vmem:[#allocation116_spill] sm:$0xff] %v5538_v23  ;;  %v5541_v57 = vpop.f32.mrb[59].mxu1 }
 0x173   : > { %7667 = vst [vmem:[#allocation117_spill] sm:$0xff] %v5541_v57 }
 0x175   : > { %1206 = vmatmul.mubr.f32.vlgmr.msra.gmra.mrb[64].mxu0 %v5151_v56 }
 0x176   : > { %1210 = vmatprep.mubr.f32.mxu0 %v5163_v63  ;;  %4230 = vmatpush1.bf16.msra.mxu0 %v4817_v11  ;;  %v5548_v11 = vpop.f32.mrb[60].mxu1 }
 0x177   : > { %4231 = vmatprep.subr.bf16.mxu0 %v7596_v8  ;;  %7668 = vst [vmem:[#allocation118_spill] sm:$0xff] %v5548_v11  ;;  %v5551_v63 = vpop.f32.mrb[61].mxu1 }
 0x178   : > { %7669 = vst [vmem:[#allocation119_spill] sm:$0xff] %v5551_v63 }
 0x179   : > { %1211 = vmatmul.mubr.f32.gmra.mrb[66].mxu0 %v5156_v59 }
 0x17a   : > { %1215 = vmatprep.mubr.f32.mxu0 %v5193_v13  ;;  %4233 = vmatpush1.bf16.msra.mxu0 %v4826_v14  ;;  %v5554_v13 = vpop.f32.mrb[62].mxu1 }
 0x17b   : > { %4234 = vmatprep.subr.bf16.mxu0 %v7596_v8  ;;  %7670 = vst [vmem:[#allocation120_spill] sm:$0xff] %v5554_v13  ;;  %v5557_v14 = vpop.f32.mrb[63].mxu1 }
 0x17c   : > { %7671 = vst [vmem:[#allocation121_spill] sm:$0xff] %v5557_v14 }
 0x17d   : > { %1216 = vmatmul.mubr.f32.gmra.mrb[68].mxu0 %v5191_v10 }
 0x17e   : > { %1220 = vmatprep.mubr.f32.mxu0 %v5203_v26  ;;  %4236 = vmatpush1.bf16.msra.mxu0 %v4837_v18  ;;  %v7672_v18 = vld [vmem:[#allocation79_spill] sm:$0xff] }
 0x17f   : > { %4237 = vmatprep.subr.bf16.mxu0 %v7596_v8 }
 0x181   : > { %1221 = vmatmul.mubr.f32.gmra.mrb[70].mxu0 %v5196_v15 }
 0x182   : > { %1225 = vmatprep.mubr.f32.mxu0 %v5233_v3  ;;  %4239 = vmatpush1.bf16.msra.mxu0 %v4849_v21  ;;  %v7673_v21 = vld [vmem:[#allocation83_spill] sm:$0xff] }
 0x183   : > { %4240 = vmatprep.subr.bf16.mxu0 %v7596_v8 }
 0x185   : > { %1226 = vmatmul.mubr.f32.gmra.mrb[72].mxu0 %v5231_v54 }
 0x186   : > { %1230 = vmatprep.mubr.f32.mxu0 %v5243_v32  ;;  %4242 = vmatpush1.bf16.msra.mxu0 %v4860_v25  ;;  %v7674_v25 = vld [vmem:[#allocation81_spill] sm:$0xff] }
 0x187   : > { %4243 = vmatprep.subr.bf16.mxu0 %v7596_v8 }
 0x189   : > { %1231 = vmatmul.mubr.f32.gmra.mrb[74].mxu0 %v5236_v4 }
 0x18a   : > { %1235 = vmatprep.mubr.f32.mxu0 %v5273_v27  ;;  %4245 = vmatpush1.bf16.msra.mxu0 %v4878_v30  ;;  %v7675_v30 = vld [vmem:[#allocation88_spill] sm:$0xff] }
 0x18b   : > { %4246 = vmatprep.subr.bf16.mxu0 %v7596_v8 }
 0x18d   : > { %1236 = vmatmul.mubr.f32.gmra.mrb[76].mxu0 %v5271_v7 }
 0x18e   : > { %1240 = vmatprep.mubr.f32.mxu0 %v5283_v12  ;;  %4248 = vmatpush1.bf16.msra.mxu0 %v4890_v34  ;;  %v7676_v34 = vld [vmem:[#allocation87_spill] sm:$0xff] }
 0x18f   : > { %4249 = vmatprep.subr.bf16.mxu0 %v7596_v8 }
 0x191   : > { %1241 = vmatmul.mubr.f32.gmra.mrb[78].mxu0 %v5276_v47 }
 0x192   : > { %1245 = vmatprep.mubr.f32.mxu0 %v5313_v5  ;;  %4251 = vmatpush1.bf16.msra.mxu0 %v4903_v37  ;;  %v7677_v37 = vld [vmem:[#allocation91_spill] sm:$0xff] }
 0x193   : > { %4252 = vmatprep.subr.bf16.mxu0 %v7596_v8 }
 0x195   : > { %1246 = vmatmul.mubr.f32.gmra.mrb[80].mxu0 %v5311_v6 }
 0x196   : > { %1250 = vmatprep.mubr.f32.mxu0 %v5323_v40  ;;  %4254 = vmatpush1.bf16.msra.mxu0 %v4915_v41  ;;  %v7427_v41 = vmov 0.0  }
 0x197   : > { %4255 = vmatprep.subr.bf16.mxu0 %v7596_v8  ;;  %1535 = vmatprep.mubr.f32.mxu1 %v7427_v41  ;;  %v7683_v41 = vld [vmem:[#allocation106_spill] sm:$0xff] }
 0x199   : > { %1251 = vmatmul.mubr.f32.gmra.mrb[82].mxu0 %v5316_v46 }
 0x19a   : > { %1255 = vmatprep.mubr.f32.mxu0 %v5347_v60  ;;  %4257 = vmatpush1.bf16.msra.mxu0 %v4928_v44  ;;  %v1369_v44 = vld [vmem:[%s7326_s3 + $0x18] sm:$0xff] }
 0x19b   : > { %4258 = vmatprep.subr.bf16.mxu0 %v7596_v8 }
 0x19d   : > { %1256 = vmatmul.mubr.f32.gmra.mrb[84].mxu0 %v5345_v33 }
 0x19e   : > { %1260 = vmatprep.mubr.f32.mxu0 %v5355_v2  ;;  %4260 = vmatpush1.bf16.msra.mxu0 %v4940_v48  ;;  %v1373_v48 = vld [vmem:[%s7326_s3 + $0x38] sm:$0xff] }
 0x19f   : > { %4261 = vmatprep.subr.bf16.mxu0 %v7596_v8 }
 0x1a1   : > { %1261 = vmatmul.mubr.f32.gmra.mrb[86].mxu0 %v5350_v43 }
 0x1a2   : > { %1265 = vmatprep.mubr.f32.mxu0 %v5369_v0  ;;  %4263 = vmatpush1.bf16.msra.mxu0 %v4953_v51  ;;  %v7678_v51 = vld [vmem:[#allocation89_spill] sm:$0xff] }
 0x1a3   : > { %4264 = vmatprep.subr.bf16.mxu0 %v7596_v8 }
 0x1a5   : > { %1266 = vmatmul.mubr.f32.gmra.mrb[88].mxu0 %v5367_v39 }
 0x1a6   : > { %1270 = vmatprep.mubr.f32.mxu0 %v5376_v49  ;;  %4266 = vmatpush1.bf16.msra.mxu0 %v4965_v55  ;;  %v4224_v55 = vpack.c.bf16 %v1373_v48, %v1369_v44  ;;  %v1368_v44 = vld [vmem:[%s7326_s3 + $0x10] sm:$0xff] }
 0x1a7   : > { %4267 = vmatprep.subr.bf16.mxu0 %v7596_v8  ;;  %v1372_v48 = vld [vmem:[%s7326_s3 + $0x30] sm:$0xff] }
 0x1a8   : > { %4225 = vmatprep.subr.bf16.mxu1 %v4224_v55  ;;  %v4226_v55 = vpack.c.bf16 %v1372_v48, %v1368_v44 }
 0x1a9   : > { %1271 = vmatmul.mubr.f32.gmra.mrb[90].mxu0 %v5372_v53 }
 0x1aa   : > { %1275 = vmatprep.mubr.f32.mxu0 %v5389_v52  ;;  %4269 = vmatpush1.bf16.msra.mxu0 %v4978_v58  ;;  %v7679_v58 = vld [vmem:[#allocation96_spill] sm:$0xff] }
 0x1ab   : > { %4270 = vmatprep.subr.bf16.mxu0 %v7596_v8 }
 0x1ad   : > { %1276 = vmatmul.mubr.f32.gmra.mrb[92].mxu0 %v5387_v61 }
 0x1ae   : > { %1280 = vmatprep.mubr.f32.mxu0 %v5396_v29  ;;  %4272 = vmatpush1.bf16.msra.mxu0 %v4990_v62  ;;  %v7680_v62 = vld [vmem:[#allocation95_spill] sm:$0xff] }
 0x1af   : > { %4273 = vmatprep.subr.bf16.mxu0 %v7596_v8 }
 0x1b1   : > { %1281 = vmatmul.mubr.f32.gmra.mrb[94].mxu0 %v5392_v45 }
 0x1b2   : > { %1285 = vmatprep.mubr.f32.mxu0 %v5415_v31  ;;  %4275 = vmatpush1.bf16.msra.mxu0 %v5003_v1  ;;  %v7681_v1 = vld [vmem:[#allocation99_spill] sm:$0xff] }
 0x1b3   : > { %4276 = vmatprep.subr.bf16.mxu0 %v7596_v8 }
 0x1b5   : > { %1286 = vmatmul.mubr.f32.gmra.mrb[96].mxu0 %v5413_v35 }
 0x1b6   : > { %1290 = vmatprep.mubr.f32.mxu0 %v5428_v17 }
 0x1b9   : > { %1291 = vmatmul.mubr.f32.gmra.mrb[98].mxu0 %v5418_v36 }
 0x1ba   : > { %1295 = vmatprep.mubr.f32.mxu0 %v5441_v22 }
 0x1bd   : > { %1296 = vmatmul.mubr.f32.gmra.mrb[100].mxu0 %v7672_v18 }
 0x1be   : > { %1300 = vmatprep.mubr.f32.mxu0 %v7673_v21 }
 0x1c1   : > { %1301 = vmatmul.mubr.f32.gmra.mrb[102].mxu0 %v7674_v25 }
 0x1c2   : > { %1305 = vmatprep.mubr.f32.mxu0 %v7675_v30  ;;  %v7684_v30 = vld [vmem:[#allocation105_spill] sm:$0xff] }
 0x1c5   : > { %1306 = vmatmul.mubr.f32.gmra.mrb[104].mxu0 %v7676_v34 }
 0x1c6   : > { %1310 = vmatprep.mubr.f32.mxu0 %v7677_v37  ;;  %v7682_v37 = vld [vmem:[#allocation97_spill] sm:$0xff] }
 0x1c9   : > { %1311 = vmatmul.mubr.f32.gmra.mrb[106].mxu0 %v7678_v51 }
 0x1ca   : > { %1315 = vmatprep.mubr.f32.mxu0 %v7679_v58 }
 0x1cd   : > { %1316 = vmatmul.mubr.f32.gmra.mrb[108].mxu0 %v7680_v62 }
 0x1ce   : > { %1320 = vmatprep.mubr.f32.mxu0 %v7681_v1 }
 0x1d1   : > { %1321 = vmatmul.mubr.f32.gmra.mrb[110].mxu0 %v7682_v37 }
 0x1d2   : > { %1325 = vmatprep.mubr.f32.mxu0 %v5501_v9 }
 0x1d5   : > { %1326 = vmatmul.mubr.f32.gmra.mrb[112].mxu0 %v5499_v50 }
 0x1d6   : > { %1330 = vmatprep.mubr.f32.mxu0 %v7683_v41 }
 0x1d9   : > { %1331 = vmatmul.mubr.f32.gmra.mrb[114].mxu0 %v7684_v30 }
 0x1da   : > { %1335 = vmatprep.mubr.f32.mxu0 %v5521_v38 }
 0x1dd   : > { %1336 = vmatmul.mubr.f32.gmra.mrb[116].mxu0 %v5519_v42 }
 0x1de   : > { %1340 = vmatprep.mubr.f32.mxu0 %v5527_v28 }
 0x1e1   : > { %1341 = vmatmul.mubr.f32.gmra.mrb[118].mxu0 %v5524_v16 }
 0x1e2   : > { %1345 = vmatprep.mubr.f32.mxu0 %v5535_v19 }
 0x1e5   : > { %1346 = vmatmul.mubr.f32.gmra.mrb[120].mxu0 %v5532_v20 }
 0x1e6   : > { %1350 = vmatprep.mubr.f32.mxu0 %v5541_v57 }
 0x1e9   : > { %1351 = vmatmul.mubr.f32.gmra.mrb[122].mxu0 %v5538_v23 }
 0x1ea   : > { %1355 = vmatprep.mubr.f32.mxu0 %v5551_v63 }
 0x1ed   : > { %1356 = vmatmul.mubr.f32.gmra.mrb[124].mxu0 %v5548_v11 }
 0x1ee   : > { %1360 = vmatprep.mubr.f32.mxu0 %v5557_v14  ;;  %v7685_v14 = vmov 0.0  }
 0x1f1   : > { %1361 = vmatmul.mubr.f32.gmra.mrb[126].mxu0 %v5554_v13 }
 0x248   : > { %v5653_v57 = vpop.f32.mrb[64].mxu0 }
 0x249   : > { %v1209_v23 = vpop.f32.mrb[65].mxu0  ;;  %3891 = vmatmul.mubr.msk.f32.vlgmr.msra.gmra.mrb[64].mxu1 %vm1374_vm1, %v5653_v57 }
 0x24a   : > { %4227 = vmatpush1.bf16.msra.mxu1 %v4226_v55  ;;  %1541 = vmatprep.mubr.f32.mxu1 %v7685_v14 }
 0x24c   : > { %v5658_v13 = vpop.f32.mrb[66].mxu0 }
 0x24d   : > { %v1214_v63 = vpop.f32.mrb[67].mxu0  ;;  %3892 = vmatmul.mubr.msk.f32.gmra.mrb[66].mxu1 %vm1374_vm1, %v5658_v13 }
 0x24e   : > { %1547 = vmatprep.mubr.f32.mxu1 %v7685_v14 }
 0x250   : > { %v5663_v11 = vpop.f32.mrb[68].mxu0 }
 0x251   : > { %v1219_v44 = vpop.f32.mrb[69].mxu0  ;;  %3893 = vmatmul.mubr.msk.f32.gmra.mrb[68].mxu1 %vm1374_vm1, %v5663_v11 }
 0x252   : > { %1553 = vmatprep.mubr.f32.mxu1 %v7685_v14 }
 0x254   : > { %v5668_v23 = vpop.f32.mrb[70].mxu0 }
 0x255   : > { %v1224_v48 = vpop.f32.mrb[71].mxu0  ;;  %3894 = vmatmul.mubr.msk.f32.gmra.mrb[70].mxu1 %vm1374_vm1, %v5668_v23 }
 0x256   : > { %1559 = vmatprep.mubr.f32.mxu1 %v7685_v14 }
 0x258   : > { %v5673_v63 = vpop.f32.mrb[72].mxu0 }
 0x259   : > { %v1229_v55 = vpop.f32.mrb[73].mxu0  ;;  %3895 = vmatmul.mubr.msk.f32.gmra.mrb[72].mxu1 %vm1374_vm1, %v5673_v63 }
 0x25a   : > { %1565 = vmatprep.mubr.f32.mxu1 %v7685_v14 }
 0x25c   : > { %v5678_v44 = vpop.f32.mrb[74].mxu0 }
 0x25d   : > { %v1234_v19 = vpop.f32.mrb[75].mxu0  ;;  %3896 = vmatmul.mubr.msk.f32.gmra.mrb[74].mxu1 %vm1374_vm1, %v5678_v44 }
 0x25e   : > { %1571 = vmatprep.mubr.f32.mxu1 %v7685_v14 }
 0x260   : > { %v5683_v48 = vpop.f32.mrb[76].mxu0 }
 0x261   : > { %v1239_v20 = vpop.f32.mrb[77].mxu0  ;;  %3897 = vmatmul.mubr.msk.f32.gmra.mrb[76].mxu1 %vm1374_vm1, %v5683_v48 }
 0x262   : > { %1577 = vmatprep.mubr.f32.mxu1 %v7685_v14 }
 0x264   : > { %v5688_v55 = vpop.f32.mrb[78].mxu0 }
 0x265   : > { %v1244_v28 = vpop.f32.mrb[79].mxu0  ;;  %3898 = vmatmul.mubr.msk.f32.gmra.mrb[78].mxu1 %vm1374_vm1, %v5688_v55 }
 0x266   : > { %1583 = vmatprep.mubr.f32.mxu1 %v7685_v14 }
 0x268   : > { %v5693_v19 = vpop.f32.mrb[80].mxu0 }
 0x269   : > { %v1249_v16 = vpop.f32.mrb[81].mxu0  ;;  %3899 = vmatmul.mubr.msk.f32.gmra.mrb[80].mxu1 %vm1374_vm1, %v5693_v19 }
 0x26a   : > { %1589 = vmatprep.mubr.f32.mxu1 %v7685_v14 }
 0x26c   : > { %v5698_v20 = vpop.f32.mrb[82].mxu0 }
 0x26d   : > { %v1254_v38 = vpop.f32.mrb[83].mxu0  ;;  %3900 = vmatmul.mubr.msk.f32.gmra.mrb[82].mxu1 %vm1374_vm1, %v5698_v20 }
 0x26e   : > { %1595 = vmatprep.mubr.f32.mxu1 %v7685_v14 }
 0x270   : > { %v5703_v28 = vpop.f32.mrb[84].mxu0 }
 0x271   : > { %v1259_v42 = vpop.f32.mrb[85].mxu0  ;;  %3901 = vmatmul.mubr.msk.f32.gmra.mrb[84].mxu1 %vm1374_vm1, %v5703_v28 }
 0x272   : > { %1601 = vmatprep.mubr.f32.mxu1 %v7685_v14 }
 0x274   : > { %v5708_v16 = vpop.f32.mrb[86].mxu0 }
 0x275   : > { %v1264_v41 = vpop.f32.mrb[87].mxu0  ;;  %3902 = vmatmul.mubr.msk.f32.gmra.mrb[86].mxu1 %vm1374_vm1, %v5708_v16 }
 0x276   : > { %1607 = vmatprep.mubr.f32.mxu1 %v7685_v14 }
 0x278   : > { %v5713_v38 = vpop.f32.mrb[88].mxu0 }
 0x279   : > { %v1269_v30 = vpop.f32.mrb[89].mxu0  ;;  %3903 = vmatmul.mubr.msk.f32.gmra.mrb[88].mxu1 %vm1374_vm1, %v5713_v38 }
 0x27a   : > { %1613 = vmatprep.mubr.f32.mxu1 %v7685_v14 }
 0x27c   : > { %v5718_v42 = vpop.f32.mrb[90].mxu0 }
 0x27d   : > { %v1274_v9 = vpop.f32.mrb[91].mxu0  ;;  %3904 = vmatmul.mubr.msk.f32.gmra.mrb[90].mxu1 %vm1374_vm1, %v5718_v42 }
 0x27e   : > { %1619 = vmatprep.mubr.f32.mxu1 %v7685_v14 }
 0x280   : > { %v5723_v41 = vpop.f32.mrb[92].mxu0 }
 0x281   : > { %v1279_v50 = vpop.f32.mrb[93].mxu0  ;;  %3905 = vmatmul.mubr.msk.f32.gmra.mrb[92].mxu1 %vm1374_vm1, %v5723_v41 }
 0x282   : > { %1625 = vmatprep.mubr.f32.mxu1 %v7685_v14 }
 0x284   : > { %v5728_v30 = vpop.f32.mrb[94].mxu0 }
 0x285   : > { %v1284_v1 = vpop.f32.mrb[95].mxu0  ;;  %3906 = vmatmul.mubr.msk.f32.gmra.mrb[94].mxu1 %vm1374_vm1, %v5728_v30 }
 0x286   : > { %1631 = vmatprep.mubr.f32.mxu1 %v7685_v14 }
 0x288   : > { %v5733_v9 = vpop.f32.mrb[96].mxu0 }
 0x289   : > { %v1289_v37 = vpop.f32.mrb[97].mxu0  ;;  %3907 = vmatmul.mubr.msk.f32.gmra.mrb[96].mxu1 %vm1374_vm1, %v5733_v9 }
 0x28a   : > { %1637 = vmatprep.mubr.f32.mxu1 %v7685_v14 }
 0x28c   : > { %v5738_v50 = vpop.f32.mrb[98].mxu0 }
 0x28d   : > { %v1294_v58 = vpop.f32.mrb[99].mxu0  ;;  %3908 = vmatmul.mubr.msk.f32.gmra.mrb[98].mxu1 %vm1374_vm1, %v5738_v50 }
 0x28e   : > { %1643 = vmatprep.mubr.f32.mxu1 %v7685_v14 }
 0x290   : > { %v5743_v1 = vpop.f32.mrb[100].mxu0 }
 0x291   : > { %v1299_v62 = vpop.f32.mrb[101].mxu0  ;;  %3909 = vmatmul.mubr.msk.f32.gmra.mrb[100].mxu1 %vm1374_vm1, %v5743_v1 }
 0x292   : > { %1649 = vmatprep.mubr.f32.mxu1 %v7685_v14 }
 0x294   : > { %v5748_v37 = vpop.f32.mrb[102].mxu0 }
 0x295   : > { %v1304_v51 = vpop.f32.mrb[103].mxu0  ;;  %3910 = vmatmul.mubr.msk.f32.gmra.mrb[102].mxu1 %vm1374_vm1, %v5748_v37 }
 0x296   : > { %1655 = vmatprep.mubr.f32.mxu1 %v7685_v14 }
 0x298   : > { %v5753_v58 = vpop.f32.mrb[104].mxu0 }
 0x299   : > { %v1309_v34 = vpop.f32.mrb[105].mxu0  ;;  %3911 = vmatmul.mubr.msk.f32.gmra.mrb[104].mxu1 %vm1374_vm1, %v5753_v58 }
 0x29a   : > { %1661 = vmatprep.mubr.f32.mxu1 %v7685_v14 }
 0x29c   : > { %v5758_v62 = vpop.f32.mrb[106].mxu0 }
 0x29d   : > { %v1314_v21 = vpop.f32.mrb[107].mxu0  ;;  %3912 = vmatmul.mubr.msk.f32.gmra.mrb[106].mxu1 %vm1374_vm1, %v5758_v62 }
 0x29e   : > { %1667 = vmatprep.mubr.f32.mxu1 %v7685_v14 }
 0x2a0   : > { %v5763_v51 = vpop.f32.mrb[108].mxu0 }
 0x2a1   : > { %v1319_v25 = vpop.f32.mrb[109].mxu0  ;;  %3913 = vmatmul.mubr.msk.f32.gmra.mrb[108].mxu1 %vm1374_vm1, %v5763_v51 }
 0x2a2   : > { %1673 = vmatprep.mubr.f32.mxu1 %v7685_v14 }
 0x2a4   : > { %v5768_v34 = vpop.f32.mrb[110].mxu0 }
 0x2a5   : > { %v1324_v22 = vpop.f32.mrb[111].mxu0  ;;  %3914 = vmatmul.mubr.msk.f32.gmra.mrb[110].mxu1 %vm1374_vm1, %v5768_v34 }
 0x2a6   : > { %1679 = vmatprep.mubr.f32.mxu1 %v7685_v14 }
 0x2a8   : > { %v5773_v21 = vpop.f32.mrb[112].mxu0 }
 0x2a9   : > { %v1329_v18 = vpop.f32.mrb[113].mxu0  ;;  %3915 = vmatmul.mubr.msk.f32.gmra.mrb[112].mxu1 %vm1374_vm1, %v5773_v21 }
 0x2aa   : > { %1685 = vmatprep.mubr.f32.mxu1 %v7685_v14 }
 0x2ac   : > { %v5778_v25 = vpop.f32.mrb[114].mxu0 }
 0x2ad   : > { %v1334_v17 = vpop.f32.mrb[115].mxu0  ;;  %3916 = vmatmul.mubr.msk.f32.gmra.mrb[114].mxu1 %vm1374_vm1, %v5778_v25 }
 0x2ae   : > { %1691 = vmatprep.mubr.f32.mxu1 %v7685_v14 }
 0x2b0   : > { %v5783_v22 = vpop.f32.mrb[116].mxu0 }
 0x2b1   : > { %v1339_v36 = vpop.f32.mrb[117].mxu0  ;;  %3917 = vmatmul.mubr.msk.f32.gmra.mrb[116].mxu1 %vm1374_vm1, %v5783_v22 }
 0x2b2   : > { %1697 = vmatprep.mubr.f32.mxu1 %v7685_v14 }
 0x2b4   : > { %v5788_v18 = vpop.f32.mrb[118].mxu0 }
 0x2b5   : > { %v1344_v31 = vpop.f32.mrb[119].mxu0  ;;  %3918 = vmatmul.mubr.msk.f32.gmra.mrb[118].mxu1 %vm1374_vm1, %v5788_v18 }
 0x2b6   : > { %1703 = vmatprep.mubr.f32.mxu1 %v7685_v14 }
 0x2b8   : > { %v5793_v17 = vpop.f32.mrb[120].mxu0 }
 0x2b9   : > { %v1349_v35 = vpop.f32.mrb[121].mxu0  ;;  %3919 = vmatmul.mubr.msk.f32.gmra.mrb[120].mxu1 %vm1374_vm1, %v5793_v17 }
 0x2ba   : > { %1709 = vmatprep.mubr.f32.mxu1 %v7685_v14 }
 0x2bc   : > { %v5798_v36 = vpop.f32.mrb[122].mxu0 }
 0x2bd   : > { %v1354_v29 = vpop.f32.mrb[123].mxu0  ;;  %3920 = vmatmul.mubr.msk.f32.gmra.mrb[122].mxu1 %vm1374_vm1, %v5798_v36 }
 0x2be   : > { %1715 = vmatprep.mubr.f32.mxu1 %v7685_v14 }
 0x2c0   : > { %v5803_v31 = vpop.f32.mrb[124].mxu0 }
 0x2c1   : > { %v1359_v45 = vpop.f32.mrb[125].mxu0  ;;  %3921 = vmatmul.mubr.msk.f32.gmra.mrb[124].mxu1 %vm1374_vm1, %v5803_v31 }
 0x2c2   : > { %1721 = vmatprep.mubr.f32.mxu1 %v7685_v14  ;;  %v7686_v45 = vld [vmem:[#allocation5_spill] sm:$0xff] }
 0x2c4   : > { %v5808_v35 = vpop.f32.mrb[126].mxu0 }
 0x2c5   : > { %v1364_v52 = vpop.f32.mrb[127].mxu0  ;;  %3922 = vmatmul.mubr.msk.f32.gmra.mrb[126].mxu1 %vm1374_vm1, %v5808_v35 }
 0x2c6   : > { %1792 = vmatprep.mubr.f32.mxu1 %v7685_v14  ;;  %v7687_v52 = vld [vmem:[#allocation7_spill] sm:$0xff] }
 0x2c9   : > { %3923 = vmatmul.mubr.msk.f32.vlgmr.msra.gmra.mrb[128].mxu1 %vm1374_vm1, %v5653_v57 }
 0x2ca   : > { %1798 = vmatprep.mubr.f32.mxu1 %v7685_v14 }
 0x2cd   : > { %3924 = vmatmul.mubr.msk.f32.gmra.mrb[130].mxu1 %vm1374_vm1, %v5658_v13 }
 0x2ce   : > { %1804 = vmatprep.mubr.f32.mxu1 %v7685_v14 }
 0x2d1   : > { %3925 = vmatmul.mubr.msk.f32.gmra.mrb[132].mxu1 %vm1374_vm1, %v5663_v11 }
 0x2d2   : > { %1810 = vmatprep.mubr.f32.mxu1 %v7685_v14 }
 0x2d5   : > { %3926 = vmatmul.mubr.msk.f32.gmra.mrb[134].mxu1 %vm1374_vm1, %v5668_v23 }
 0x2d6   : > { %1816 = vmatprep.mubr.f32.mxu1 %v7685_v14 }
 0x2d9   : > { %3927 = vmatmul.mubr.msk.f32.gmra.mrb[136].mxu1 %vm1374_vm1, %v5673_v63 }
 0x2da   : > { %1822 = vmatprep.mubr.f32.mxu1 %v7685_v14 }
 0x2dd   : > { %3928 = vmatmul.mubr.msk.f32.gmra.mrb[138].mxu1 %vm1374_vm1, %v5678_v44 }
 0x2de   : > { %1828 = vmatprep.mubr.f32.mxu1 %v7685_v14 }
 0x2e1   : > { %3929 = vmatmul.mubr.msk.f32.gmra.mrb[140].mxu1 %vm1374_vm1, %v5683_v48  ;;  %v7688_v48 = vld [vmem:[#allocation8_spill] sm:$0xff] }
 0x2e2   : > { %1834 = vmatprep.mubr.f32.mxu1 %v7685_v14 }
 0x2e5   : > { %3930 = vmatmul.mubr.msk.f32.gmra.mrb[142].mxu1 %vm1374_vm1, %v5688_v55 }
 0x2e6   : > { %1840 = vmatprep.mubr.f32.mxu1 %v7685_v14 }
 0x2e9   : > { %3931 = vmatmul.mubr.msk.f32.gmra.mrb[144].mxu1 %vm1374_vm1, %v5693_v19 }
 0x2ea   : > { %1846 = vmatprep.mubr.f32.mxu1 %v7685_v14 }
 0x2ed   : > { %3932 = vmatmul.mubr.msk.f32.gmra.mrb[146].mxu1 %vm1374_vm1, %v5698_v20  ;;  %v7689_v20 = vld [vmem:[#allocation9_spill] sm:$0xff] }
 0x2ee   : > { %1852 = vmatprep.mubr.f32.mxu1 %v7685_v14 }
 0x2f1   : > { %3933 = vmatmul.mubr.msk.f32.gmra.mrb[148].mxu1 %vm1374_vm1, %v5703_v28 }
 0x2f2   : > { %1858 = vmatprep.mubr.f32.mxu1 %v7685_v14 }
 0x2f5   : > { %3934 = vmatmul.mubr.msk.f32.gmra.mrb[150].mxu1 %vm1374_vm1, %v5708_v16 }
 0x2f6   : > { %1864 = vmatprep.mubr.f32.mxu1 %v7685_v14 }
 0x2f9   : > { %3935 = vmatmul.mubr.msk.f32.gmra.mrb[152].mxu1 %vm1374_vm1, %v5713_v38  ;;  %v7690_v38 = vld [vmem:[#allocation6_spill] sm:$0xff] }
 0x2fa   : > { %1870 = vmatprep.mubr.f32.mxu1 %v7685_v14 }
 0x2fd   : > { %3936 = vmatmul.mubr.msk.f32.gmra.mrb[154].mxu1 %vm1374_vm1, %v5718_v42 }
 0x2fe   : > { %1876 = vmatprep.mubr.f32.mxu1 %v7685_v14 }
 0x301   : > { %3937 = vmatmul.mubr.msk.f32.gmra.mrb[156].mxu1 %vm1374_vm1, %v5723_v41 }
 0x302   : > { %1882 = vmatprep.mubr.f32.mxu1 %v7685_v14 }
 0x305   : > { %3938 = vmatmul.mubr.msk.f32.gmra.mrb[158].mxu1 %vm1374_vm1, %v5728_v30  ;;  %v7691_v30 = vld [vmem:[#allocation11_spill] sm:$0xff] }
 0x306   : > { %1888 = vmatprep.mubr.f32.mxu1 %v7685_v14 }
 0x309   : > { %3939 = vmatmul.mubr.msk.f32.gmra.mrb[160].mxu1 %vm1374_vm1, %v5733_v9 }
 0x30a   : > { %1894 = vmatprep.mubr.f32.mxu1 %v7685_v14 }
 0x30d   : > { %3940 = vmatmul.mubr.msk.f32.gmra.mrb[162].mxu1 %vm1374_vm1, %v5738_v50 }
 0x30e   : > { %1900 = vmatprep.mubr.f32.mxu1 %v7685_v14 }
 0x311   : > { %3941 = vmatmul.mubr.msk.f32.gmra.mrb[164].mxu1 %vm1374_vm1, %v5743_v1  ;;  %v7692_v1 = vld [vmem:[#allocation13_spill] sm:$0xff] }
 0x312   : > { %1906 = vmatprep.mubr.f32.mxu1 %v7685_v14 }
 0x315   : > { %3942 = vmatmul.mubr.msk.f32.gmra.mrb[166].mxu1 %vm1374_vm1, %v5748_v37 }
 0x316   : > { %1912 = vmatprep.mubr.f32.mxu1 %v7685_v14 }
 0x319   : > { %3943 = vmatmul.mubr.msk.f32.gmra.mrb[168].mxu1 %vm1374_vm1, %v5753_v58 }
 0x31a   : > { %1918 = vmatprep.mubr.f32.mxu1 %v7685_v14 }
 0x31c   : > { %v1537_v29 = vpop.f32.mrb[64].mxu1 }
 0x31d   : > { %v5877_v57 = vsub.f32 %v7686_v45, %v1537_v29  ;;  %v1539_v13 = vpop.f32.mrb[65].mxu1  ;;  %3944 = vmatmul.mubr.msk.f32.gmra.mrb[170].mxu1 %vm1374_vm1, %v5758_v62  ;;  %v7694_v45 = vld [vmem:[#allocation14_spill] sm:$0xff] }
 0x31e   : > { %v5882_v11 = vsub.f32 %v7687_v52, %v1539_v13  ;;  %1924 = vmatprep.mubr.f32.mxu1 %v7685_v14  ;;  %v7695_v52 = vld [vmem:[#allocation15_spill] sm:$0xff] }
 0x31f   : > { %v2113_v44 = vmul.f32 %v5877_v57, %v5877_v57 }
 0x320   : > { %v2114_v23 = vmul.f32 %v5882_v11, %v5882_v11  ;;  %v1543_v63 = vpop.f32.mrb[66].mxu1 }
 0x321   : > { %v5890_v55 = vsub.f32 %v7688_v48, %v1543_v63  ;;  %v1545_v19 = vpop.f32.mrb[67].mxu1  ;;  %3945 = vmatmul.mubr.msk.f32.gmra.mrb[172].mxu1 %vm1374_vm1, %v5763_v51  ;;  %v7693_v51 = vld [vmem:[#allocation10_spill] sm:$0xff]  ;;  %v7696_v48 = vld [vmem:[#allocation12_spill] sm:$0xff] }
 0x322   : > { %v5895_v28 = vsub.f32 %v7689_v20, %v1545_v19  ;;  %2305 = vmatprep.mubr.f32.mxu0 %v2114_v23  ;;  %1930 = vmatprep.mubr.f32.mxu1 %v7685_v14  ;;  %v7697_v20 = vld [vmem:[#allocation17_spill] sm:$0xff] }
 0x323   : > { %2306 = vmatmul.mubr.f32.vlgmr.msra.gmra.mrb[128].mxu0 %v2113_v44  ;;  %v2117_v41 = vmul.f32 %v5890_v55, %v5890_v55 }
 0x324   : > { %v2118_v16 = vmul.f32 %v5895_v28, %v5895_v28  ;;  %4278 = vmatpush1.bf16.msra.mxu0 %v7690_v38  ;;  %v1549_v42 = vpop.f32.mrb[68].mxu1  ;;  %v7698_v38 = vld [vmem:[#allocation19_spill] sm:$0xff] }
 0x325   : > { %v5904_v9 = vsub.f32 %v7691_v30, %v1549_v42  ;;  %v1551_v50 = vpop.f32.mrb[69].mxu1  ;;  %3946 = vmatmul.mubr.msk.f32.gmra.mrb[174].mxu1 %vm1374_vm1, %v5768_v34  ;;  %4279 = vmatprep.subr.bf16.mxu0 %v7596_v8 }
 0x326   : > { %v5910_v37 = vsub.f32 %v7692_v1, %v1551_v50  ;;  %2310 = vmatprep.mubr.f32.mxu0 %v2118_v16  ;;  %1936 = vmatprep.mubr.f32.mxu1 %v7685_v14  ;;  %v7699_v50 = vld [vmem:[#allocation16_spill] sm:$0xff] }
 0x327   : > { %2311 = vmatmul.mubr.f32.gmra.mrb[130].mxu0 %v2117_v41  ;;  %v2121_v29 = vmul.f32 %v5904_v9, %v5904_v9 }
 0x328   : > { %v2122_v58 = vmul.f32 %v5910_v37, %v5910_v37  ;;  %v1555_v62 = vpop.f32.mrb[70].mxu1  ;;  %4281 = vmatpush1.bf16.msra.mxu0 %v7693_v51  ;;  %v7701_v51 = vld [vmem:[#allocation21_spill] sm:$0xff] }
 0x329   : > { %v5919_v34 = vsub.f32 %v7694_v45, %v1555_v62  ;;  %v1557_v13 = vpop.f32.mrb[71].mxu1  ;;  %3947 = vmatmul.mubr.msk.f32.gmra.mrb[176].mxu1 %vm1374_vm1, %v5773_v21  ;;  %4282 = vmatprep.subr.bf16.mxu0 %v7596_v8 }
 0x32a   : > { %v5925_v23 = vsub.f32 %v7695_v52, %v1557_v13  ;;  %2315 = vmatprep.mubr.f32.mxu0 %v2122_v58  ;;  %1942 = vmatprep.mubr.f32.mxu1 %v7685_v14  ;;  %v7700_v58 = vld [vmem:[#allocation20_spill] sm:$0xff]  ;;  %v7702_v52 = vld [vmem:[#allocation18_spill] sm:$0xff] }
 0x32b   : > { %2316 = vmatmul.mubr.f32.gmra.mrb[132].mxu0 %v2121_v29  ;;  %v2125_v19 = vmul.f32 %v5919_v34, %v5919_v34 }
 0x32c   : > { %v2126_v63 = vmul.f32 %v5925_v23, %v5925_v23  ;;  %v1561_v44 = vpop.f32.mrb[72].mxu1  ;;  %4284 = vmatpush1.bf16.msra.mxu0 %v7696_v48 }
 0x32d   : > { %v5934_v21 = vsub.f32 %v7697_v20, %v1561_v44  ;;  %v1563_v16 = vpop.f32.mrb[73].mxu1  ;;  %3948 = vmatmul.mubr.msk.f32.gmra.mrb[178].mxu1 %vm1374_vm1, %v5778_v25  ;;  %4285 = vmatprep.subr.bf16.mxu0 %v7596_v8  ;;  %v7703_v44 = vld [vmem:[#allocation24_spill] sm:$0xff] }
 0x32e   : > { %v5940_v42 = vsub.f32 %v7698_v38, %v1563_v16  ;;  %2320 = vmatprep.mubr.f32.mxu0 %v2126_v63  ;;  %1948 = vmatprep.mubr.f32.mxu1 %v7685_v14 }
 0x32f   : > { %2321 = vmatmul.mubr.f32.gmra.mrb[134].mxu0 %v2125_v19  ;;  %v2129_v1 = vmul.f32 %v5934_v21, %v5934_v21  ;;  %v7704_v19 = vld [vmem:[#allocation27_spill] sm:$0xff] }
 0x330   : > { %v2130_v41 = vmul.f32 %v5940_v42, %v5940_v42  ;;  %v1567_v30 = vpop.f32.mrb[74].mxu1  ;;  %4287 = vmatpush1.bf16.msra.mxu0 %v7699_v50  ;;  %v7706_v50 = vld [vmem:[#allocation28_spill] sm:$0xff] }
 0x331   : > { %v5949_v25 = vsub.f32 %v7700_v58, %v1567_v30  ;;  %v1569_v62 = vpop.f32.mrb[75].mxu1  ;;  %3949 = vmatmul.mubr.msk.f32.gmra.mrb[180].mxu1 %vm1374_vm1, %v5783_v22  ;;  %4288 = vmatprep.subr.bf16.mxu0 %v7596_v8  ;;  %v7707_v58 = vld [vmem:[#allocation29_spill] sm:$0xff] }
 0x332   : > { %v5955_v29 = vsub.f32 %v7701_v51, %v1569_v62  ;;  %2325 = vmatprep.mubr.f32.mxu0 %v2130_v41  ;;  %1954 = vmatprep.mubr.f32.mxu1 %v7685_v14  ;;  %v7705_v41 = vld [vmem:[#allocation22_spill] sm:$0xff] }
 0x333   : > { %2326 = vmatmul.mubr.f32.gmra.mrb[136].mxu0 %v2129_v1  ;;  %v2133_v63 = vmul.f32 %v5949_v25, %v5949_v25 }
 0x334   : > { %v2134_v45 = vmul.f32 %v5955_v29, %v5955_v29  ;;  %v1573_v13 = vpop.f32.mrb[76].mxu1  ;;  %4290 = vmatpush1.bf16.msra.mxu0 %v7702_v52 }
 0x335   : > { %v5964_v22 = vsub.f32 %v7703_v44, %v1573_v13  ;;  %v1575_v48 = vpop.f32.mrb[77].mxu1  ;;  %3950 = vmatmul.mubr.msk.f32.gmra.mrb[182].mxu1 %vm1374_vm1, %v5788_v18  ;;  %4291 = vmatprep.subr.bf16.mxu0 %v7596_v8  ;;  %v7708_v13 = vld [vmem:[#allocation25_spill] sm:$0xff] }
 0x336   : > { %v5970_v20 = vsub.f32 %v7704_v19, %v1575_v48  ;;  %2330 = vmatprep.mubr.f32.mxu0 %v2134_v45  ;;  %1960 = vmatprep.mubr.f32.mxu1 %v7685_v14  ;;  %v7710_v48 = vld [vmem:[#allocation34_spill] sm:$0xff] }
 0x337   : > { %2331 = vmatmul.mubr.f32.gmra.mrb[138].mxu0 %v2133_v63  ;;  %v2137_v30 = vmul.f32 %v5964_v22, %v5964_v22  ;;  %v7709_v63 = vld [vmem:[#allocation32_spill] sm:$0xff] }
 0x338   : > { %v2138_v16 = vmul.f32 %v5970_v20, %v5970_v20  ;;  %v1579_v38 = vpop.f32.mrb[78].mxu1  ;;  %4293 = vmatpush1.bf16.msra.mxu0 %v7705_v41  ;;  %v7711_v41 = vld [vmem:[#allocation30_spill] sm:$0xff] }
 0x339   : > { %v5979_v18 = vsub.f32 %v7706_v50, %v1579_v38  ;;  %v1581_v1 = vpop.f32.mrb[79].mxu1  ;;  %3951 = vmatmul.mubr.msk.f32.gmra.mrb[184].mxu1 %vm1374_vm1, %v5793_v17  ;;  %4294 = vmatprep.subr.bf16.mxu0 %v7596_v8  ;;  %v7712_v50 = vld [vmem:[#allocation35_spill] sm:$0xff] }
 0x33a   : > { %v5985_v62 = vsub.f32 %v7707_v58, %v1581_v1  ;;  %2335 = vmatprep.mubr.f32.mxu0 %v2138_v16  ;;  %1966 = vmatprep.mubr.f32.mxu1 %v7685_v14  ;;  %v7713_v58 = vld [vmem:[#allocation36_spill] sm:$0xff] }
 0x33b   : > { %2336 = vmatmul.mubr.f32.gmra.mrb[140].mxu0 %v2137_v30  ;;  %v2141_v52 = vmul.f32 %v5979_v18, %v5979_v18 }
 0x33c   : > { %v2142_v51 = vmul.f32 %v5985_v62, %v5985_v62  ;;  %v1585_v45 = vpop.f32.mrb[80].mxu1  ;;  %4296 = vmatpush1.bf16.msra.mxu0 %v7708_v13 }
 0x33d   : > { %v5994_v17 = vsub.f32 %v7709_v63, %v1585_v45  ;;  %v1587_v44 = vpop.f32.mrb[81].mxu1  ;;  %3952 = vmatmul.mubr.msk.f32.gmra.mrb[186].mxu1 %vm1374_vm1, %v5798_v36  ;;  %4297 = vmatprep.subr.bf16.mxu0 %v7596_v8 }
 0x33e   : > { %v6000_v19 = vsub.f32 %v7710_v48, %v1587_v44  ;;  %2340 = vmatprep.mubr.f32.mxu0 %v2142_v51  ;;  %1972 = vmatprep.mubr.f32.mxu1 %v7685_v14  ;;  %v7715_v44 = vld [vmem:[#allocation38_spill] sm:$0xff] }
 0x33f   : > { %2341 = vmatmul.mubr.f32.gmra.mrb[142].mxu0 %v2141_v52  ;;  %v2145_v30 = vmul.f32 %v5994_v17, %v5994_v17  ;;  %v7714_v52 = vld [vmem:[#allocation33_spill] sm:$0xff] }
 0x340   : > { %v2146_v16 = vmul.f32 %v6000_v19, %v6000_v19  ;;  %v1591_v38 = vpop.f32.mrb[82].mxu1  ;;  %4299 = vmatpush1.bf16.msra.mxu0 %v7711_v41 }
 0x341   : > { %v6009_v36 = vsub.f32 %v7712_v50, %v1591_v38  ;;  %v1593_v1 = vpop.f32.mrb[83].mxu1  ;;  %3953 = vmatmul.mubr.msk.f32.gmra.mrb[188].mxu1 %vm1374_vm1, %v5803_v31  ;;  %4300 = vmatprep.subr.bf16.mxu0 %v7596_v8  ;;  %v7718_v50 = vld [vmem:[#allocation37_spill] sm:$0xff] }
 0x342   : > { %v6015_v51 = vsub.f32 %v7713_v58, %v1593_v1  ;;  %2345 = vmatprep.mubr.f32.mxu0 %v2146_v16  ;;  %1978 = vmatprep.mubr.f32.mxu1 %v7685_v14  ;;  %v7716_v16 = vld [vmem:[#allocation40_spill] sm:$0xff]  ;;  %v7719_v58 = vld [vmem:[#allocation41_spill] sm:$0xff] }
 0x343   : > { %2346 = vmatmul.mubr.f32.gmra.mrb[144].mxu0 %v2145_v30  ;;  %v2149_v63 = vmul.f32 %v6009_v36, %v6009_v36 }
 0x344   : > { %v2150_v45 = vmul.f32 %v6015_v51, %v6015_v51  ;;  %v1597_v13 = vpop.f32.mrb[84].mxu1  ;;  %4302 = vmatpush1.bf16.msra.mxu0 %v7714_v52  ;;  %v7721_v52 = vld [vmem:[#allocation42_spill] sm:$0xff] }
 0x345   : > { %v6024_v31 = vsub.f32 %v7715_v44, %v1597_v13  ;;  %v1599_v48 = vpop.f32.mrb[85].mxu1  ;;  %3954 = vmatmul.mubr.msk.f32.gmra.mrb[190].mxu1 %vm1374_vm1, %v5808_v35  ;;  %4303 = vmatprep.subr.bf16.mxu0 %v7596_v8 }
 0x346   : > { %v6030_v38 = vsub.f32 %v7716_v16, %v1599_v48  ;;  %2350 = vmatprep.mubr.f32.mxu0 %v2150_v45  ;;  %2891 = vmatprep.mubr.f32.mxu1 %v7685_v14  ;;  %v7723_v48 = vld [vmem:[#allocation39_spill] sm:$0xff] }
 0x347   : > { %2351 = vmatmul.mubr.f32.gmra.mrb[146].mxu0 %v2149_v63  ;;  %v2153_v1 = vmul.f32 %v6024_v31, %v6024_v31 }
 0x348   : > { %7717 = vst [vmem:[#allocation5_spill] sm:$0xff] %v6030_v38  ;;  %v2154_v41 = vmul.f32 %v6030_v38, %v6030_v38  ;;  %v1603_v30 = vpop.f32.mrb[86].mxu1  ;;  %4305 = vmatpush1.bf16.msra.mxu0 %v7718_v50  ;;  %v7724_v50 = vld [vmem:[#allocation44_spill] sm:$0xff]  ;;  %v7726_v38 = vld [vmem:[#allocation46_spill] sm:$0xff] }
 0x349   : > { %v6039_v35 = vsub.f32 %v7719_v58, %v1603_v30  ;;  %v1605_v13 = vpop.f32.mrb[87].mxu1  ;;  %4306 = vmatprep.subr.bf16.mxu0 %v7596_v8 }
 0x34a   : > { %v6043_v45 = vsub.f32 %v7721_v52, %v1605_v13  ;;  %2355 = vmatprep.mubr.f32.mxu0 %v2154_v41  ;;  %v7728_v52 = vld [vmem:[#allocation43_spill] sm:$0xff] }
 0x34b   : > { %7720 = vst [vmem:[#allocation7_spill] sm:$0xff] %v6039_v35  ;;  %2356 = vmatmul.mubr.f32.gmra.mrb[148].mxu0 %v2153_v1  ;;  %v2157_v16 = vmul.f32 %v6039_v35, %v6039_v35  ;;  %v7731_v35 = vld [vmem:[#allocation48_spill] sm:$0xff] }
 0x34c   : > { %7722 = vst [vmem:[#allocation8_spill] sm:$0xff] %v6043_v45  ;;  %v2158_v63 = vmul.f32 %v6043_v45, %v6043_v45  ;;  %v1609_v44 = vpop.f32.mrb[88].mxu1  ;;  %4308 = vmatpush1.bf16.msra.mxu0 %v7723_v48  ;;  %v7729_v45 = vld [vmem:[#allocation47_spill] sm:$0xff] }
 0x34d   : > { %v6051_v30 = vsub.f32 %v7724_v50, %v1609_v44  ;;  %v1611_v58 = vpop.f32.mrb[89].mxu1  ;;  %4309 = vmatprep.subr.bf16.mxu0 %v7596_v8 }
 0x34e   : > { %v6055_v13 = vsub.f32 %v7726_v38, %v1611_v58  ;;  %2360 = vmatprep.mubr.f32.mxu0 %v2158_v63  ;;  %v7733_v58 = vld [vmem:[#allocation45_spill] sm:$0xff] }
 0x34f   : > { %7725 = vst [vmem:[#allocation9_spill] sm:$0xff] %v6051_v30  ;;  %2361 = vmatmul.mubr.f32.gmra.mrb[150].mxu0 %v2157_v16  ;;  %v2161_v48 = vmul.f32 %v6051_v30, %v6051_v30  ;;  %v7736_v30 = vld [vmem:[#allocation52_spill] sm:$0xff] }
 0x350   : > { %7727 = vst [vmem:[#allocation6_spill] sm:$0xff] %v6055_v13  ;;  %v2162_v41 = vmul.f32 %v6055_v13, %v6055_v13  ;;  %v1615_v1 = vpop.f32.mrb[90].mxu1  ;;  %4311 = vmatpush1.bf16.msra.mxu0 %v7728_v52  ;;  %v7734_v13 = vld [vmem:[#allocation50_spill] sm:$0xff] }
 0x351   : > { %v6063_v44 = vsub.f32 %v7729_v45, %v1615_v1  ;;  %v1617_v50 = vpop.f32.mrb[91].mxu1  ;;  %4312 = vmatprep.subr.bf16.mxu0 %v7596_v8 }
 0x352   : > { %v6067_v38 = vsub.f32 %v7731_v35, %v1617_v50  ;;  %2365 = vmatprep.mubr.f32.mxu0 %v2162_v41  ;;  %v7738_v50 = vld [vmem:[#allocation49_spill] sm:$0xff] }
 0x353   : > { %7730 = vst [vmem:[#allocation11_spill] sm:$0xff] %v6063_v44  ;;  %2366 = vmatmul.mubr.f32.gmra.mrb[152].mxu0 %v2161_v48  ;;  %v2165_v52 = vmul.f32 %v6063_v44, %v6063_v44  ;;  %v7741_v44 = vld [vmem:[#allocation54_spill] sm:$0xff] }
 0x354   : > { %7732 = vst [vmem:[#allocation13_spill] sm:$0xff] %v6067_v38  ;;  %v2166_v63 = vmul.f32 %v6067_v38, %v6067_v38  ;;  %v1621_v16 = vpop.f32.mrb[92].mxu1  ;;  %4314 = vmatpush1.bf16.msra.mxu0 %v7733_v58  ;;  %v7739_v38 = vld [vmem:[#allocation53_spill] sm:$0xff] }
 0x355   : > { %v6075_v45 = vsub.f32 %v7734_v13, %v1621_v16  ;;  %v1623_v1 = vpop.f32.mrb[93].mxu1  ;;  %4315 = vmatprep.subr.bf16.mxu0 %v7596_v8 }
 0x356   : > { %v6079_v35 = vsub.f32 %v7736_v30, %v1623_v1  ;;  %2370 = vmatprep.mubr.f32.mxu0 %v2166_v63  ;;  %v7743_v1 = vld [vmem:[#allocation51_spill] sm:$0xff] }
 0x357   : > { %7735 = vst [vmem:[#allocation10_spill] sm:$0xff] %v6075_v45  ;;  %2371 = vmatmul.mubr.f32.gmra.mrb[154].mxu0 %v2165_v52  ;;  %v2169_v58 = vmul.f32 %v6075_v45, %v6075_v45  ;;  %v7746_v45 = vld [vmem:[#allocation57_spill] sm:$0xff] }
 0x358   : > { %7737 = vst [vmem:[#allocation14_spill] sm:$0xff] %v6079_v35  ;;  %v2170_v41 = vmul.f32 %v6079_v35, %v6079_v35  ;;  %v1627_v48 = vpop.f32.mrb[94].mxu1  ;;  %4317 = vmatpush1.bf16.msra.mxu0 %v7738_v50  ;;  %v7744_v35 = vld [vmem:[#allocation56_spill] sm:$0xff] }
 0x359   : > { %v6087_v13 = vsub.f32 %v7739_v38, %v1627_v48  ;;  %v1629_v16 = vpop.f32.mrb[95].mxu1  ;;  %4318 = vmatprep.subr.bf16.mxu0 %v7596_v8 }
 0x35a   : > { %v6091_v30 = vsub.f32 %v7741_v44, %v1629_v16  ;;  %2375 = vmatprep.mubr.f32.mxu0 %v2170_v41  ;;  %v7748_v16 = vld [vmem:[#allocation55_spill] sm:$0xff] }
 0x35b   : > { %7740 = vst [vmem:[#allocation15_spill] sm:$0xff] %v6087_v13  ;;  %2376 = vmatmul.mubr.f32.gmra.mrb[156].mxu0 %v2169_v58  ;;  %v2173_v50 = vmul.f32 %v6087_v13, %v6087_v13  ;;  %v7751_v13 = vld [vmem:[#allocation59_spill] sm:$0xff] }
 0x35c   : > { %7742 = vst [vmem:[#allocation12_spill] sm:$0xff] %v6091_v30  ;;  %v2174_v63 = vmul.f32 %v6091_v30, %v6091_v30  ;;  %v1633_v52 = vpop.f32.mrb[96].mxu1  ;;  %4320 = vmatpush1.bf16.msra.mxu0 %v7743_v1  ;;  %v7749_v30 = vld [vmem:[#allocation58_spill] sm:$0xff] }
 0x35d   : > { %v6099_v38 = vsub.f32 %v7744_v35, %v1633_v52  ;;  %v1635_v48 = vpop.f32.mrb[97].mxu1  ;;  %4321 = vmatprep.subr.bf16.mxu0 %v7596_v8 }
 0x35e   : > { %v6103_v44 = vsub.f32 %v7746_v45, %v1635_v48  ;;  %2380 = vmatprep.mubr.f32.mxu0 %v2174_v63  ;;  %v7753_v48 = vld [vmem:[#allocation60_spill] sm:$0xff] }
 0x35f   : > { %7745 = vst [vmem:[#allocation17_spill] sm:$0xff] %v6099_v38  ;;  %2381 = vmatmul.mubr.f32.gmra.mrb[158].mxu0 %v2173_v50  ;;  %v2177_v1 = vmul.f32 %v6099_v38, %v6099_v38  ;;  %v7755_v38 = vld [vmem:[#allocation61_spill] sm:$0xff] }
 0x360   : > { %7747 = vst [vmem:[#allocation19_spill] sm:$0xff] %v6103_v44  ;;  %v2178_v41 = vmul.f32 %v6103_v44, %v6103_v44  ;;  %v1639_v58 = vpop.f32.mrb[98].mxu1  ;;  %4323 = vmatpush1.bf16.msra.mxu0 %v7748_v16 }
 0x361   : > { %v6111_v35 = vsub.f32 %v7749_v30, %v1639_v58  ;;  %v1641_v52 = vpop.f32.mrb[99].mxu1 }
 0x362   : > { %v6114_v8 = vsub.f32 %v7751_v13, %v1641_v52  ;;  %2385 = vmatprep.mubr.f32.mxu0 %v2178_v41 }
 0x363   : > { %7750 = vst [vmem:[#allocation16_spill] sm:$0xff] %v6111_v35  ;;  %2386 = vmatmul.mubr.f32.gmra.mrb[160].mxu0 %v2177_v1  ;;  %v2181_v50 = vmul.f32 %v6111_v35, %v6111_v35  ;;  %v7757_v1 = vld [vmem:[#allocation62_spill] sm:$0xff]  ;;  %v7759_v35 = vld [vmem:[#allocation63_spill] sm:$0xff] }
 0x364   : > { %7752 = vst [vmem:[#allocation20_spill] sm:$0xff] %v6114_v8  ;;  %v2182_v45 = vmul.f32 %v6114_v8, %v6114_v8  ;;  %v1645_v63 = vpop.f32.mrb[100].mxu1 }
 0x365   : > { %v6121_v16 = vsub.f32 %v7753_v48, %v1645_v63  ;;  %v1647_v44 = vpop.f32.mrb[101].mxu1 }
 0x366   : > { %v6124_v30 = vsub.f32 %v7755_v38, %v1647_v44  ;;  %2390 = vmatprep.mubr.f32.mxu0 %v2182_v45 }
 0x367   : > { %7754 = vst [vmem:[#allocation21_spill] sm:$0xff] %v6121_v16  ;;  %2391 = vmatmul.mubr.f32.gmra.mrb[162].mxu0 %v2181_v50  ;;  %v2185_v58 = vmul.f32 %v6121_v16, %v6121_v16  ;;  %v7761_v50 = vld [vmem:[#allocation66_spill] sm:$0xff]  ;;  %v7763_v16 = vld [vmem:[#allocation68_spill] sm:$0xff] }
 0x368   : > { %7756 = vst [vmem:[#allocation18_spill] sm:$0xff] %v6124_v30  ;;  %v2186_v13 = vmul.f32 %v6124_v30, %v6124_v30  ;;  %v1651_v41 = vpop.f32.mrb[102].mxu1 }
 0x369   : > { %v6131_v52 = vsub.f32 %v7757_v1, %v1651_v41  ;;  %v1653_v8 = vpop.f32.mrb[103].mxu1 }
 0x36a   : > { %v6134_v63 = vsub.f32 %v7759_v35, %v1653_v8  ;;  %2395 = vmatprep.mubr.f32.mxu0 %v2186_v13 }
 0x36b   : > { %7758 = vst [vmem:[#allocation24_spill] sm:$0xff] %v6131_v52  ;;  %2396 = vmatmul.mubr.f32.gmra.mrb[164].mxu0 %v2185_v58  ;;  %v2189_v45 = vmul.f32 %v6131_v52, %v6131_v52  ;;  %v7765_v58 = vld [vmem:[#allocation69_spill] sm:$0xff]  ;;  %v7767_v52 = vld [vmem:[#allocation70_spill] sm:$0xff] }
 0x36c   : > { %7760 = vst [vmem:[#allocation27_spill] sm:$0xff] %v6134_v63  ;;  %v2190_v38 = vmul.f32 %v6134_v63, %v6134_v63  ;;  %v1657_v44 = vpop.f32.mrb[104].mxu1 }
 0x36d   : > { %v6141_v48 = vsub.f32 %v7761_v50, %v1657_v44  ;;  %v1659_v30 = vpop.f32.mrb[105].mxu1 }
 0x36e   : > { %v6144_v41 = vsub.f32 %v7763_v16, %v1659_v30  ;;  %2400 = vmatprep.mubr.f32.mxu0 %v2190_v38 }
 0x36f   : > { %7762 = vst [vmem:[#allocation22_spill] sm:$0xff] %v6141_v48  ;;  %2401 = vmatmul.mubr.f32.gmra.mrb[166].mxu0 %v2189_v45  ;;  %v2193_v13 = vmul.f32 %v6141_v48, %v6141_v48  ;;  %v7769_v45 = vld [vmem:[#allocation74_spill] sm:$0xff]  ;;  %v7771_v48 = vld [vmem:[#allocation76_spill] sm:$0xff] }
 0x370   : > { %7764 = vst [vmem:[#allocation28_spill] sm:$0xff] %v6144_v41  ;;  %v2194_v35 = vmul.f32 %v6144_v41, %v6144_v41  ;;  %v1663_v8 = vpop.f32.mrb[106].mxu1 }
 0x371   : > { %v6151_v1 = vsub.f32 %v7765_v58, %v1663_v8  ;;  %v1665_v63 = vpop.f32.mrb[107].mxu1 }
 0x372   : > { %v6154_v44 = vsub.f32 %v7767_v52, %v1665_v63  ;;  %2405 = vmatprep.mubr.f32.mxu0 %v2194_v35 }
 0x373   : > { %7766 = vst [vmem:[#allocation29_spill] sm:$0xff] %v6151_v1  ;;  %2406 = vmatmul.mubr.f32.gmra.mrb[168].mxu0 %v2193_v13  ;;  %v2197_v38 = vmul.f32 %v6151_v1, %v6151_v1  ;;  %v7773_v13 = vld [vmem:[#allocation77_spill] sm:$0xff]  ;;  %v7775_v1 = vld [vmem:[#allocation78_spill] sm:$0xff] }
 0x374   : > { %7768 = vst [vmem:[#allocation25_spill] sm:$0xff] %v6154_v44  ;;  %v2198_v16 = vmul.f32 %v6154_v44, %v6154_v44  ;;  %v1669_v30 = vpop.f32.mrb[108].mxu1 }
 0x375   : > { %v6161_v50 = vsub.f32 %v7769_v45, %v1669_v30  ;;  %v1671_v41 = vpop.f32.mrb[109].mxu1 }
 0x376   : > { %v6164_v8 = vsub.f32 %v7771_v48, %v1671_v41  ;;  %2410 = vmatprep.mubr.f32.mxu0 %v2198_v16 }
 0x377   : > { %7770 = vst [vmem:[#allocation32_spill] sm:$0xff] %v6161_v50  ;;  %2411 = vmatmul.mubr.f32.gmra.mrb[170].mxu0 %v2197_v38  ;;  %v2201_v35 = vmul.f32 %v6161_v50, %v6161_v50  ;;  %v7777_v38 = vld [vmem:[#allocation82_spill] sm:$0xff]  ;;  %v7779_v50 = vld [vmem:[#allocation84_spill] sm:$0xff] }
 0x378   : > { %7772 = vst [vmem:[#allocation34_spill] sm:$0xff] %v6164_v8  ;;  %v2202_v52 = vmul.f32 %v6164_v8, %v6164_v8  ;;  %v1675_v63 = vpop.f32.mrb[110].mxu1 }
 0x379   : > { %v6171_v58 = vsub.f32 %v7773_v13, %v1675_v63  ;;  %v1677_v44 = vpop.f32.mrb[111].mxu1 }
 0x37a   : > { %v6174_v30 = vsub.f32 %v7775_v1, %v1677_v44  ;;  %2415 = vmatprep.mubr.f32.mxu0 %v2202_v52 }
 0x37b   : > { %7774 = vst [vmem:[#allocation30_spill] sm:$0xff] %v6171_v58  ;;  %2416 = vmatmul.mubr.f32.gmra.mrb[172].mxu0 %v2201_v35  ;;  %v2205_v16 = vmul.f32 %v6171_v58, %v6171_v58  ;;  %v7781_v35 = vld [vmem:[#allocation85_spill] sm:$0xff]  ;;  %v7783_v58 = vld [vmem:[#allocation86_spill] sm:$0xff] }
 0x37c   : > { %7776 = vst [vmem:[#allocation35_spill] sm:$0xff] %v6174_v30  ;;  %v2206_v48 = vmul.f32 %v6174_v30, %v6174_v30  ;;  %v1681_v41 = vpop.f32.mrb[112].mxu1 }
 0x37d   : > { %v6181_v45 = vsub.f32 %v7777_v38, %v1681_v41  ;;  %v1683_v8 = vpop.f32.mrb[113].mxu1 }
 0x37e   : > { %v6184_v63 = vsub.f32 %v7779_v50, %v1683_v8  ;;  %2420 = vmatprep.mubr.f32.mxu0 %v2206_v48  ;;  %v2724_v48 = vld [vmem:[%s7327_s4 + $0x8] sm:$0xff] }
 0x37f   : > { %7778 = vst [vmem:[#allocation36_spill] sm:$0xff] %v6181_v45  ;;  %2421 = vmatmul.mubr.f32.gmra.mrb[174].mxu0 %v2205_v16  ;;  %v2209_v52 = vmul.f32 %v6181_v45, %v6181_v45  ;;  %v2728_v16 = vld [vmem:[%s7327_s4 + $0x28] sm:$0xff] }
 0x380   : > { %7780 = vst [vmem:[#allocation33_spill] sm:$0xff] %v6184_v63  ;;  %v2210_v1 = vmul.f32 %v6184_v63, %v6184_v63  ;;  %v1687_v44 = vpop.f32.mrb[114].mxu1  ;;  %v2727_v63 = vld [vmem:[%s7327_s4 + $0x20] sm:$0xff] }
 0x381   : > { %v6191_v13 = vsub.f32 %v7781_v35, %v1687_v44  ;;  %v1689_v30 = vpop.f32.mrb[115].mxu1  ;;  %v7785_v44 = vld [vmem:[#allocation90_spill] sm:$0xff] }
 0x382   : > { %v6194_v41 = vsub.f32 %v7783_v58, %v1689_v30  ;;  %2425 = vmatprep.mubr.f32.mxu0 %v2210_v1  ;;  %v4324_v1 = vpack.c.bf16 %v2728_v16, %v2724_v48  ;;  %v7789_v16 = vld [vmem:[#allocation93_spill] sm:$0xff] }
 0x383   : > { %7782 = vst [vmem:[#allocation38_spill] sm:$0xff] %v6191_v13  ;;  %2426 = vmatmul.mubr.f32.gmra.mrb[176].mxu0 %v2209_v52  ;;  %v2213_v38 = vmul.f32 %v6191_v13, %v6191_v13  ;;  %v7787_v52 = vld [vmem:[#allocation92_spill] sm:$0xff] }
 0x384   : > { %7784 = vst [vmem:[#allocation40_spill] sm:$0xff] %v6194_v41  ;;  %v2214_v50 = vmul.f32 %v6194_v41, %v6194_v41  ;;  %v1693_v8 = vpop.f32.mrb[116].mxu1  ;;  %4325 = vmatprep.subr.bf16.mxu1 %v4324_v1  ;;  %v2723_v41 = vld [vmem:[%s7327_s4] sm:$0xff] }
 0x385   : > { %v6207_v58 = vsub.f32 %v7785_v44, %v1693_v8  ;;  %v1695_v30 = vpop.f32.mrb[117].mxu1  ;;  %v4326_v13 = vpack.c.bf16 %v2727_v63, %v2723_v41  ;;  %v7793_v41 = vld [vmem:[#allocation98_spill] sm:$0xff] }
 0x386   : > { %v6210_v35 = vsub.f32 %v7787_v52, %v1695_v30  ;;  %2430 = vmatprep.mubr.f32.mxu0 %v2214_v50  ;;  %v7791_v30 = vld [vmem:[#allocation94_spill] sm:$0xff] }
 0x387   : > { %7786 = vst [vmem:[#allocation37_spill] sm:$0xff] %v6207_v58  ;;  %2431 = vmatmul.mubr.f32.gmra.mrb[178].mxu0 %v2213_v38  ;;  %v2217_v48 = vmul.f32 %v6207_v58, %v6207_v58  ;;  %4327 = vmatpush1.bf16.msra.mxu1 %v4326_v13 }
 0x388   : > { %7788 = vst [vmem:[#allocation41_spill] sm:$0xff] %v6210_v35  ;;  %v2218_v8 = vmul.f32 %v6210_v35, %v6210_v35  ;;  %v1699_v44 = vpop.f32.mrb[118].mxu1 }
 0x389   : > { %v6223_v50 = vsub.f32 %v7789_v16, %v1699_v44  ;;  %v1701_v38 = vpop.f32.mrb[119].mxu1  ;;  %v7794_v44 = vld [vmem:[#allocation100_spill] sm:$0xff] }
 0x38a   : > { %v6226_v1 = vsub.f32 %v7791_v30, %v1701_v38  ;;  %2435 = vmatprep.mubr.f32.mxu0 %v2218_v8  ;;  %v7796_v38 = vld [vmem:[#allocation101_spill] sm:$0xff] }
 0x38b   : > { %7790 = vst [vmem:[#allocation42_spill] sm:$0xff] %v6223_v50  ;;  %2436 = vmatmul.mubr.f32.gmra.mrb[180].mxu0 %v2217_v48  ;;  %v2221_v63 = vmul.f32 %v6223_v50, %v6223_v50  ;;  %v7798_v50 = vld [vmem:[#allocation102_spill] sm:$0xff] }
 0x38c   : > { %7792 = vst [vmem:[#allocation39_spill] sm:$0xff] %v6226_v1  ;;  %v2222_v52 = vmul.f32 %v6226_v1, %v6226_v1  ;;  %v1705_v45 = vpop.f32.mrb[120].mxu1 }
 0x38d   : > { %v6233_v35 = vsub.f32 %v7793_v41, %v1705_v45  ;;  %v1707_v58 = vpop.f32.mrb[121].mxu1 }
 0x38e   : > { %v6236_v16 = vsub.f32 %v7794_v44, %v1707_v58  ;;  %2440 = vmatprep.mubr.f32.mxu0 %v2222_v52 }
 0x38f   : > { %2441 = vmatmul.mubr.f32.gmra.mrb[182].mxu0 %v2221_v63  ;;  %v2225_v48 = vmul.f32 %v6233_v35, %v6233_v35 }
 0x390   : > { %7795 = vst [vmem:[#allocation44_spill] sm:$0xff] %v6236_v16  ;;  %v2226_v13 = vmul.f32 %v6236_v16, %v6236_v16  ;;  %v1711_v8 = vpop.f32.mrb[122].mxu1  ;;  %v7800_v16 = vld [vmem:[#allocation107_spill] sm:$0xff] }
 0x391   : > { %v6243_v30 = vsub.f32 %v7796_v38, %v1711_v8  ;;  %v1713_v1 = vpop.f32.mrb[123].mxu1 }
 0x392   : > { %v6246_v45 = vsub.f32 %v7798_v50, %v1713_v1  ;;  %2445 = vmatprep.mubr.f32.mxu0 %v2226_v13 }
 0x393   : > { %7797 = vst [vmem:[#allocation46_spill] sm:$0xff] %v6243_v30  ;;  %2446 = vmatmul.mubr.f32.gmra.mrb[184].mxu0 %v2225_v48  ;;  %v2229_v63 = vmul.f32 %v6243_v30, %v6243_v30  ;;  %v7802_v48 = vld [vmem:[#allocation108_spill] sm:$0xff]  ;;  %v7803_v30 = vld [vmem:[#allocation109_spill] sm:$0xff] }
 0x394   : > { %7799 = vst [vmem:[#allocation43_spill] sm:$0xff] %v6246_v45  ;;  %v2230_v58 = vmul.f32 %v6246_v45, %v6246_v45  ;;  %v1717_v52 = vpop.f32.mrb[124].mxu1 }
 0x395   : > { %v6253_v41 = vsub.f32 %v5506_v24, %v1717_v52  ;;  %v1719_v44 = vpop.f32.mrb[125].mxu1 }
 0x396   : > { %v6256_v8 = vsub.f32 %v7800_v16, %v1719_v44  ;;  %2450 = vmatprep.mubr.f32.mxu0 %v2230_v58 }
 0x397   : > { %2451 = vmatmul.mubr.f32.gmra.mrb[186].mxu0 %v2229_v63  ;;  %v2233_v13 = vmul.f32 %v6253_v41, %v6253_v41 }
 0x398   : > { %7801 = vst [vmem:[#allocation47_spill] sm:$0xff] %v6256_v8  ;;  %v2234_v50 = vmul.f32 %v6256_v8, %v6256_v8  ;;  %v1723_v1 = vpop.f32.mrb[126].mxu1  ;;  %v7805_v8 = vld [vmem:[#allocation23_spill] sm:$0xff] }
 0x399   : > { %v6263_v38 = vsub.f32 %v7802_v48, %v1723_v1  ;;  %v1725_v45 = vpop.f32.mrb[127].mxu1 }
 0x39a   : > { %v6266_v24 = vsub.f32 %v7803_v30, %v1725_v45  ;;  %2455 = vmatprep.mubr.f32.mxu0 %v2234_v50 }
 0x39b   : > { %2456 = vmatmul.mubr.f32.gmra.mrb[188].mxu0 %v2233_v13  ;;  %v2237_v52 = vmul.f32 %v6263_v38, %v6263_v38 }
 0x39c   : > { %7804 = vst [vmem:[#allocation48_spill] sm:$0xff] %v6266_v24  ;;  %v2238_v16 = vmul.f32 %v6266_v24, %v6266_v24  ;;  %v1794_v58 = vpop.f32.mrb[128].mxu1  ;;  %v7807_v24 = vld [vmem:[#allocation26_spill] sm:$0xff] }
 0x39d   : > { %v6273_v63 = vsub.f32 %v5151_v56, %v1794_v58  ;;  %v1796_v44 = vpop.f32.mrb[129].mxu1 }
 0x39e   : > { %v6276_v1 = vsub.f32 %v7805_v8, %v1796_v44  ;;  %2460 = vmatprep.mubr.f32.mxu0 %v2238_v16 }
 0x39f   : > { %2461 = vmatmul.mubr.f32.gmra.mrb[190].mxu0 %v2237_v52  ;;  %v2115_v50 = vmul.f32 %v6273_v63, %v6273_v63 }
 0x3a0   : > { %7806 = vst [vmem:[#allocation45_spill] sm:$0xff] %v6276_v1  ;;  %v2116_v30 = vmul.f32 %v6276_v1, %v6276_v1  ;;  %v1800_v45 = vpop.f32.mrb[130].mxu1  ;;  %v7809_v1 = vld [vmem:[#allocation31_spill] sm:$0xff] }
 0x3a1   : > { %v6283_v13 = vsub.f32 %v5156_v59, %v1800_v45  ;;  %v1802_v48 = vpop.f32.mrb[131].mxu1 }
 0x3a2   : > { %v6286_v56 = vsub.f32 %v7807_v24, %v1802_v48  ;;  %2530 = vmatprep.mubr.f32.mxu0 %v2116_v30 }
 0x3a3   : > { %2531 = vmatmul.mubr.f32.vlgmr.msra.gmra.mrb[128].mxu0 %v2115_v50  ;;  %v2119_v58 = vmul.f32 %v6283_v13, %v6283_v13 }
 0x3a4   : > { %v2120_v8 = vmul.f32 %v6286_v56, %v6286_v56  ;;  %v1806_v16 = vpop.f32.mrb[132].mxu1 }
 0x3a5   : > { %v6293_v52 = vsub.f32 %v5191_v10, %v1806_v16  ;;  %v1808_v44 = vpop.f32.mrb[133].mxu1 }
 0x3a6   : > { %v6296_v59 = vsub.f32 %v7809_v1, %v1808_v44  ;;  %2535 = vmatprep.mubr.f32.mxu0 %v2120_v8 }
 0x3a7   : > { %7808 = vst [vmem:[#allocation50_spill] sm:$0xff] %v6293_v52  ;;  %2536 = vmatmul.mubr.f32.gmra.mrb[130].mxu0 %v2119_v58  ;;  %v2123_v45 = vmul.f32 %v6293_v52, %v6293_v52 }
 0x3a8   : > { %7810 = vst [vmem:[#allocation52_spill] sm:$0xff] %v6296_v59  ;;  %v2124_v24 = vmul.f32 %v6296_v59, %v6296_v59  ;;  %v1812_v30 = vpop.f32.mrb[134].mxu1 }
 0x3a9   : > { %v6303_v50 = vsub.f32 %v5196_v15, %v1812_v30  ;;  %v1814_v48 = vpop.f32.mrb[135].mxu1 }
 0x3aa   : > { %v6306_v10 = vsub.f32 %v5203_v26, %v1814_v48  ;;  %2540 = vmatprep.mubr.f32.mxu0 %v2124_v24 }
 0x3ab   : > { %7811 = vst [vmem:[#allocation49_spill] sm:$0xff] %v6303_v50  ;;  %2541 = vmatmul.mubr.f32.gmra.mrb[132].mxu0 %v2123_v45  ;;  %v2127_v16 = vmul.f32 %v6303_v50, %v6303_v50 }
 0x3ac   : > { %7812 = vst [vmem:[#allocation53_spill] sm:$0xff] %v6306_v10  ;;  %v2128_v1 = vmul.f32 %v6306_v10, %v6306_v10  ;;  %v1818_v8 = vpop.f32.mrb[136].mxu1 }
 0x3ad   : > { %v6313_v58 = vsub.f32 %v5231_v54, %v1818_v8  ;;  %v1820_v44 = vpop.f32.mrb[137].mxu1 }
 0x3ae   : > { %v6316_v15 = vsub.f32 %v5233_v3, %v1820_v44  ;;  %2545 = vmatprep.mubr.f32.mxu0 %v2128_v1 }
 0x3af   : > { %7813 = vst [vmem:[#allocation54_spill] sm:$0xff] %v6313_v58  ;;  %2546 = vmatmul.mubr.f32.gmra.mrb[134].mxu0 %v2127_v16  ;;  %v2131_v30 = vmul.f32 %v6313_v58, %v6313_v58 }
 0x3b0   : > { %7814 = vst [vmem:[#allocation51_spill] sm:$0xff] %v6316_v15  ;;  %v2132_v26 = vmul.f32 %v6316_v15, %v6316_v15  ;;  %v1824_v24 = vpop.f32.mrb[138].mxu1 }
 0x3b1   : > { %v6323_v45 = vsub.f32 %v5236_v4, %v1824_v24  ;;  %v1826_v48 = vpop.f32.mrb[139].mxu1 }
 0x3b2   : > { %v6326_v54 = vsub.f32 %v5243_v32, %v1826_v48  ;;  %2550 = vmatprep.mubr.f32.mxu0 %v2132_v26 }
 0x3b3   : > { %7815 = vst [vmem:[#allocation56_spill] sm:$0xff] %v6323_v45  ;;  %2551 = vmatmul.mubr.f32.gmra.mrb[136].mxu0 %v2131_v30  ;;  %v2135_v8 = vmul.f32 %v6323_v45, %v6323_v45 }
 0x3b4   : > { %7816 = vst [vmem:[#allocation57_spill] sm:$0xff] %v6326_v54  ;;  %v2136_v3 = vmul.f32 %v6326_v54, %v6326_v54  ;;  %v1830_v1 = vpop.f32.mrb[140].mxu1 }
 0x3b5   : > { %v6333_v16 = vsub.f32 %v5271_v7, %v1830_v1  ;;  %v1832_v44 = vpop.f32.mrb[141].mxu1 }
 0x3b6   : > { %v6336_v4 = vsub.f32 %v5273_v27, %v1832_v44  ;;  %2555 = vmatprep.mubr.f32.mxu0 %v2136_v3 }
 0x3b7   : > { %7817 = vst [vmem:[#allocation55_spill] sm:$0xff] %v6333_v16  ;;  %2556 = vmatmul.mubr.f32.gmra.mrb[138].mxu0 %v2135_v8  ;;  %v2139_v24 = vmul.f32 %v6333_v16, %v6333_v16 }
 0x3b8   : > { %7818 = vst [vmem:[#allocation58_spill] sm:$0xff] %v6336_v4  ;;  %v2140_v32 = vmul.f32 %v6336_v4, %v6336_v4  ;;  %v1836_v26 = vpop.f32.mrb[142].mxu1 }
 0x3b9   : > { %v6343_v30 = vsub.f32 %v5276_v47, %v1836_v26  ;;  %v1838_v48 = vpop.f32.mrb[143].mxu1 }
 0x3ba   : > { %v6346_v7 = vsub.f32 %v5283_v12, %v1838_v48  ;;  %2560 = vmatprep.mubr.f32.mxu0 %v2140_v32 }
 0x3bb   : > { %7819 = vst [vmem:[#allocation59_spill] sm:$0xff] %v6343_v30  ;;  %2561 = vmatmul.mubr.f32.gmra.mrb[140].mxu0 %v2139_v24  ;;  %v2143_v1 = vmul.f32 %v6343_v30, %v6343_v30 }
 0x3bc   : > { %7820 = vst [vmem:[#allocation60_spill] sm:$0xff] %v6346_v7  ;;  %v2144_v27 = vmul.f32 %v6346_v7, %v6346_v7  ;;  %v1842_v3 = vpop.f32.mrb[144].mxu1 }
 0x3bd   : > { %v6353_v8 = vsub.f32 %v5311_v6, %v1842_v3  ;;  %v1844_v44 = vpop.f32.mrb[145].mxu1 }
 0x3be   : > { %v6356_v47 = vsub.f32 %v5313_v5, %v1844_v44  ;;  %2565 = vmatprep.mubr.f32.mxu0 %v2144_v27 }
 0x3bf   : > { %7821 = vst [vmem:[#allocation61_spill] sm:$0xff] %v6353_v8  ;;  %2566 = vmatmul.mubr.f32.gmra.mrb[142].mxu0 %v2143_v1  ;;  %v2147_v26 = vmul.f32 %v6353_v8, %v6353_v8 }
 0x3c0   : > { %7822 = vst [vmem:[#allocation62_spill] sm:$0xff] %v6356_v47  ;;  %v2148_v12 = vmul.f32 %v6356_v47, %v6356_v47  ;;  %v1848_v32 = vpop.f32.mrb[146].mxu1 }
 0x3c1   : > { %v6363_v24 = vsub.f32 %v5316_v46, %v1848_v32  ;;  %v1850_v48 = vpop.f32.mrb[147].mxu1 }
 0x3c2   : > { %v6366_v6 = vsub.f32 %v5323_v40, %v1850_v48  ;;  %2570 = vmatprep.mubr.f32.mxu0 %v2148_v12 }
 0x3c3   : > { %7823 = vst [vmem:[#allocation63_spill] sm:$0xff] %v6363_v24  ;;  %2571 = vmatmul.mubr.f32.gmra.mrb[144].mxu0 %v2147_v26  ;;  %v2151_v3 = vmul.f32 %v6363_v24, %v6363_v24 }
 0x3c4   : > { %7824 = vst [vmem:[#allocation66_spill] sm:$0xff] %v6366_v6  ;;  %v2152_v5 = vmul.f32 %v6366_v6, %v6366_v6  ;;  %v1854_v27 = vpop.f32.mrb[148].mxu1 }
 0x3c5   : > { %v6373_v1 = vsub.f32 %v5345_v33, %v1854_v27  ;;  %v1856_v44 = vpop.f32.mrb[149].mxu1 }
 0x3c6   : > { %v6376_v46 = vsub.f32 %v5347_v60, %v1856_v44  ;;  %2575 = vmatprep.mubr.f32.mxu0 %v2152_v5 }
 0x3c7   : > { %7825 = vst [vmem:[#allocation68_spill] sm:$0xff] %v6373_v1  ;;  %2576 = vmatmul.mubr.f32.gmra.mrb[146].mxu0 %v2151_v3  ;;  %v2155_v32 = vmul.f32 %v6373_v1, %v6373_v1 }
 0x3c8   : > { %7826 = vst [vmem:[#allocation69_spill] sm:$0xff] %v6376_v46  ;;  %v2156_v40 = vmul.f32 %v6376_v46, %v6376_v46  ;;  %v1860_v12 = vpop.f32.mrb[150].mxu1 }
 0x3c9   : > { %v6383_v26 = vsub.f32 %v5350_v43, %v1860_v12  ;;  %v1862_v48 = vpop.f32.mrb[151].mxu1 }
 0x3ca   : > { %v6386_v33 = vsub.f32 %v5355_v2, %v1862_v48  ;;  %2580 = vmatprep.mubr.f32.mxu0 %v2156_v40 }
 0x3cb   : > { %7827 = vst [vmem:[#allocation70_spill] sm:$0xff] %v6383_v26  ;;  %2581 = vmatmul.mubr.f32.gmra.mrb[148].mxu0 %v2155_v32  ;;  %v2159_v27 = vmul.f32 %v6383_v26, %v6383_v26 }
 0x3cc   : > { %7828 = vst [vmem:[#allocation74_spill] sm:$0xff] %v6386_v33  ;;  %v2160_v60 = vmul.f32 %v6386_v33, %v6386_v33  ;;  %v1866_v5 = vpop.f32.mrb[152].mxu1 }
 0x3cd   : > { %v6393_v3 = vsub.f32 %v5367_v39, %v1866_v5  ;;  %v1868_v44 = vpop.f32.mrb[153].mxu1 }
 0x3ce   : > { %v6396_v43 = vsub.f32 %v5369_v0, %v1868_v44  ;;  %2585 = vmatprep.mubr.f32.mxu0 %v2160_v60 }
 0x3cf   : > { %7829 = vst [vmem:[#allocation76_spill] sm:$0xff] %v6393_v3  ;;  %2586 = vmatmul.mubr.f32.gmra.mrb[150].mxu0 %v2159_v27  ;;  %v2163_v12 = vmul.f32 %v6393_v3, %v6393_v3  ;;  %v7886_v3 = vld [vmem:[#allocation113_spill] sm:$0xff] }
 0x3d0   : > { %7830 = vst [vmem:[#allocation77_spill] sm:$0xff] %v6396_v43  ;;  %v2164_v2 = vmul.f32 %v6396_v43, %v6396_v43  ;;  %v1872_v40 = vpop.f32.mrb[154].mxu1  ;;  %v7834_v43 = vld [vmem:[#allocation64_spill] sm:$0xff] }
 0x3d1   : > { %v6403_v32 = vsub.f32 %v5372_v53, %v1872_v40  ;;  %v1874_v48 = vpop.f32.mrb[155].mxu1 }
 0x3d2   : > { %v6406_v39 = vsub.f32 %v5376_v49, %v1874_v48  ;;  %2590 = vmatprep.mubr.f32.mxu0 %v2164_v2 }
 0x3d3   : > { %7831 = vst [vmem:[#allocation78_spill] sm:$0xff] %v6403_v32  ;;  %2591 = vmatmul.mubr.f32.gmra.mrb[152].mxu0 %v2163_v12  ;;  %v2167_v5 = vmul.f32 %v6403_v32, %v6403_v32  ;;  %v7836_v12 = vld [vmem:[#allocation65_spill] sm:$0xff]  ;;  %v7838_v32 = vld [vmem:[#allocation67_spill] sm:$0xff] }
 0x3d4   : > { %7832 = vst [vmem:[#allocation82_spill] sm:$0xff] %v6406_v39  ;;  %v2168_v0 = vmul.f32 %v6406_v39, %v6406_v39  ;;  %v1878_v60 = vpop.f32.mrb[156].mxu1 }
 0x3d5   : > { %v6413_v27 = vsub.f32 %v5387_v61, %v1878_v60  ;;  %v1880_v44 = vpop.f32.mrb[157].mxu1 }
 0x3d6   : > { %v6416_v53 = vsub.f32 %v7834_v43, %v1880_v44  ;;  %2595 = vmatprep.mubr.f32.mxu0 %v2168_v0 }
 0x3d7   : > { %7833 = vst [vmem:[#allocation84_spill] sm:$0xff] %v6413_v27  ;;  %2596 = vmatmul.mubr.f32.gmra.mrb[154].mxu0 %v2167_v5  ;;  %v2171_v40 = vmul.f32 %v6413_v27, %v6413_v27  ;;  %v7840_v5 = vld [vmem:[#allocation71_spill] sm:$0xff]  ;;  %v7842_v27 = vld [vmem:[#allocation72_spill] sm:$0xff] }
 0x3d8   : > { %7835 = vst [vmem:[#allocation85_spill] sm:$0xff] %v6416_v53  ;;  %v2172_v49 = vmul.f32 %v6416_v53, %v6416_v53  ;;  %v1884_v2 = vpop.f32.mrb[158].mxu1 }
 0x3d9   : > { %v6423_v48 = vsub.f32 %v7836_v12, %v1884_v2  ;;  %v1886_v39 = vpop.f32.mrb[159].mxu1 }
 0x3da   : > { %v6426_v61 = vsub.f32 %v7838_v32, %v1886_v39  ;;  %2600 = vmatprep.mubr.f32.mxu0 %v2172_v49 }
 0x3db   : > { %7837 = vst [vmem:[#allocation86_spill] sm:$0xff] %v6423_v48  ;;  %2601 = vmatmul.mubr.f32.gmra.mrb[156].mxu0 %v2171_v40  ;;  %v2175_v60 = vmul.f32 %v6423_v48, %v6423_v48  ;;  %v7844_v40 = vld [vmem:[#allocation73_spill] sm:$0xff]  ;;  %v7846_v48 = vld [vmem:[#allocation75_spill] sm:$0xff] }
 0x3dc   : > { %7839 = vst [vmem:[#allocation90_spill] sm:$0xff] %v6426_v61  ;;  %v2176_v43 = vmul.f32 %v6426_v61, %v6426_v61  ;;  %v1890_v0 = vpop.f32.mrb[160].mxu1 }
 0x3dd   : > { %v6433_v44 = vsub.f32 %v7840_v5, %v1890_v0  ;;  %v1892_v53 = vpop.f32.mrb[161].mxu1 }
 0x3de   : > { %v6436_v2 = vsub.f32 %v7842_v27, %v1892_v53  ;;  %2605 = vmatprep.mubr.f32.mxu0 %v2176_v43 }
 0x3df   : > { %7841 = vst [vmem:[#allocation92_spill] sm:$0xff] %v6433_v44  ;;  %2606 = vmatmul.mubr.f32.gmra.mrb[158].mxu0 %v2175_v60  ;;  %v2179_v49 = vmul.f32 %v6433_v44, %v6433_v44  ;;  %v7848_v60 = vld [vmem:[#allocation79_spill] sm:$0xff]  ;;  %v7850_v44 = vld [vmem:[#allocation80_spill] sm:$0xff] }
 0x3e0   : > { %7843 = vst [vmem:[#allocation93_spill] sm:$0xff] %v6436_v2  ;;  %v2180_v32 = vmul.f32 %v6436_v2, %v6436_v2  ;;  %v1896_v39 = vpop.f32.mrb[162].mxu1 }
 0x3e1   : > { %v6443_v12 = vsub.f32 %v7844_v40, %v1896_v39  ;;  %v1898_v61 = vpop.f32.mrb[163].mxu1 }
 0x3e2   : > { %v6446_v0 = vsub.f32 %v7846_v48, %v1898_v61  ;;  %2610 = vmatprep.mubr.f32.mxu0 %v2180_v32 }
 0x3e3   : > { %7845 = vst [vmem:[#allocation94_spill] sm:$0xff] %v6443_v12  ;;  %2611 = vmatmul.mubr.f32.gmra.mrb[160].mxu0 %v2179_v49  ;;  %v2183_v43 = vmul.f32 %v6443_v12, %v6443_v12  ;;  %v7852_v49 = vld [vmem:[#allocation81_spill] sm:$0xff]  ;;  %v7854_v12 = vld [vmem:[#allocation83_spill] sm:$0xff] }
 0x3e4   : > { %7847 = vst [vmem:[#allocation98_spill] sm:$0xff] %v6446_v0  ;;  %v2184_v27 = vmul.f32 %v6446_v0, %v6446_v0  ;;  %v1902_v53 = vpop.f32.mrb[164].mxu1 }
 0x3e5   : > { %v6453_v5 = vsub.f32 %v7848_v60, %v1902_v53  ;;  %v1904_v2 = vpop.f32.mrb[165].mxu1 }
 0x3e6   : > { %v6456_v39 = vsub.f32 %v7850_v44, %v1904_v2  ;;  %2615 = vmatprep.mubr.f32.mxu0 %v2184_v27 }
 0x3e7   : > { %7849 = vst [vmem:[#allocation100_spill] sm:$0xff] %v6453_v5  ;;  %2616 = vmatmul.mubr.f32.gmra.mrb[162].mxu0 %v2183_v43  ;;  %v2187_v32 = vmul.f32 %v6453_v5, %v6453_v5  ;;  %v7856_v43 = vld [vmem:[#allocation87_spill] sm:$0xff]  ;;  %v7858_v5 = vld [vmem:[#allocation88_spill] sm:$0xff] }
 0x3e8   : > { %7851 = vst [vmem:[#allocation101_spill] sm:$0xff] %v6456_v39  ;;  %v2188_v48 = vmul.f32 %v6456_v39, %v6456_v39  ;;  %v1908_v61 = vpop.f32.mrb[166].mxu1 }
 0x3e9   : > { %v6463_v40 = vsub.f32 %v7852_v49, %v1908_v61  ;;  %v1910_v0 = vpop.f32.mrb[167].mxu1 }
 0x3ea   : > { %v6466_v53 = vsub.f32 %v7854_v12, %v1910_v0  ;;  %2620 = vmatprep.mubr.f32.mxu0 %v2188_v48 }
 0x3eb   : > { %7853 = vst [vmem:[#allocation102_spill] sm:$0xff] %v6463_v40  ;;  %2621 = vmatmul.mubr.f32.gmra.mrb[164].mxu0 %v2187_v32  ;;  %v2191_v27 = vmul.f32 %v6463_v40, %v6463_v40  ;;  %v7860_v32 = vld [vmem:[#allocation89_spill] sm:$0xff]  ;;  %v7862_v40 = vld [vmem:[#allocation91_spill] sm:$0xff] }
 0x3ec   : > { %7855 = vst [vmem:[#allocation107_spill] sm:$0xff] %v6466_v53  ;;  %v2192_v44 = vmul.f32 %v6466_v53, %v6466_v53  ;;  %v1914_v2 = vpop.f32.mrb[168].mxu1 }
 0x3ed   : > { %v6473_v60 = vsub.f32 %v7856_v43, %v1914_v2  ;;  %v1916_v39 = vpop.f32.mrb[169].mxu1 }
 0x3ee   : > { %v6476_v61 = vsub.f32 %v7858_v5, %v1916_v39  ;;  %2625 = vmatprep.mubr.f32.mxu0 %v2192_v44 }
 0x3ef   : > { %7857 = vst [vmem:[#allocation108_spill] sm:$0xff] %v6473_v60  ;;  %2626 = vmatmul.mubr.f32.gmra.mrb[166].mxu0 %v2191_v27  ;;  %v2195_v48 = vmul.f32 %v6473_v60, %v6473_v60  ;;  %v7864_v27 = vld [vmem:[#allocation95_spill] sm:$0xff]  ;;  %v7866_v60 = vld [vmem:[#allocation96_spill] sm:$0xff] }
 0x3f0   : > { %7859 = vst [vmem:[#allocation109_spill] sm:$0xff] %v6476_v61  ;;  %v2196_v12 = vmul.f32 %v6476_v61, %v6476_v61  ;;  %v1920_v0 = vpop.f32.mrb[170].mxu1 }
 0x3f1   : > { %v6483_v49 = vsub.f32 %v7860_v32, %v1920_v0  ;;  %v1922_v53 = vpop.f32.mrb[171].mxu1 }
 0x3f2   : > { %v6486_v2 = vsub.f32 %v7862_v40, %v1922_v53  ;;  %2630 = vmatprep.mubr.f32.mxu0 %v2196_v12 }
 0x3f3   : > { %7861 = vst [vmem:[#allocation23_spill] sm:$0xff] %v6483_v49  ;;  %2631 = vmatmul.mubr.f32.gmra.mrb[168].mxu0 %v2195_v48  ;;  %v2199_v44 = vmul.f32 %v6483_v49, %v6483_v49  ;;  %v7868_v48 = vld [vmem:[#allocation97_spill] sm:$0xff]  ;;  %v7870_v49 = vld [vmem:[#allocation99_spill] sm:$0xff] }
 0x3f4   : > { %7863 = vst [vmem:[#allocation26_spill] sm:$0xff] %v6486_v2  ;;  %v2200_v5 = vmul.f32 %v6486_v2, %v6486_v2  ;;  %v1926_v39 = vpop.f32.mrb[172].mxu1 }
 0x3f5   : > { %v6493_v43 = vsub.f32 %v7864_v27, %v1926_v39  ;;  %v1928_v61 = vpop.f32.mrb[173].mxu1 }
 0x3f6   : > { %v6496_v0 = vsub.f32 %v7866_v60, %v1928_v61  ;;  %2635 = vmatprep.mubr.f32.mxu0 %v2200_v5 }
 0x3f7   : > { %7865 = vst [vmem:[#allocation31_spill] sm:$0xff] %v6493_v43  ;;  %2636 = vmatmul.mubr.f32.gmra.mrb[170].mxu0 %v2199_v44  ;;  %v2203_v12 = vmul.f32 %v6493_v43, %v6493_v43  ;;  %v7872_v44 = vld [vmem:[#allocation103_spill] sm:$0xff]  ;;  %v7874_v43 = vld [vmem:[#allocation104_spill] sm:$0xff] }
 0x3f8   : > { %7867 = vst [vmem:[#allocation64_spill] sm:$0xff] %v6496_v0  ;;  %v2204_v40 = vmul.f32 %v6496_v0, %v6496_v0  ;;  %v1932_v53 = vpop.f32.mrb[174].mxu1 }
 0x3f9   : > { %v6503_v32 = vsub.f32 %v7868_v48, %v1932_v53  ;;  %v1934_v2 = vpop.f32.mrb[175].mxu1 }
 0x3fa   : > { %v6506_v39 = vsub.f32 %v7870_v49, %v1934_v2  ;;  %2640 = vmatprep.mubr.f32.mxu0 %v2204_v40 }
 0x3fb   : > { %7869 = vst [vmem:[#allocation65_spill] sm:$0xff] %v6503_v32  ;;  %2641 = vmatmul.mubr.f32.gmra.mrb[172].mxu0 %v2203_v12  ;;  %v2207_v5 = vmul.f32 %v6503_v32, %v6503_v32  ;;  %v7876_v12 = vld [vmem:[#allocation105_spill] sm:$0xff]  ;;  %v7878_v32 = vld [vmem:[#allocation106_spill] sm:$0xff] }
 0x3fc   : > { %7871 = vst [vmem:[#allocation67_spill] sm:$0xff] %v6506_v39  ;;  %v2208_v60 = vmul.f32 %v6506_v39, %v6506_v39  ;;  %v1938_v61 = vpop.f32.mrb[176].mxu1 }
 0x3fd   : > { %v6513_v27 = vsub.f32 %v7872_v44, %v1938_v61  ;;  %v1940_v0 = vpop.f32.mrb[177].mxu1 }
 0x3fe   : > { %v6516_v53 = vsub.f32 %v7874_v43, %v1940_v0  ;;  %2645 = vmatprep.mubr.f32.mxu0 %v2208_v60 }
 0x3ff   : > { %7873 = vst [vmem:[#allocation71_spill] sm:$0xff] %v6513_v27  ;;  %2646 = vmatmul.mubr.f32.gmra.mrb[174].mxu0 %v2207_v5  ;;  %v2211_v40 = vmul.f32 %v6513_v27, %v6513_v27  ;;  %v7880_v5 = vld [vmem:[#allocation110_spill] sm:$0xff] }
 0x400   : > { %7875 = vst [vmem:[#allocation72_spill] sm:$0xff] %v6516_v53  ;;  %v2212_v49 = vmul.f32 %v6516_v53, %v6516_v53  ;;  %v1944_v2 = vpop.f32.mrb[178].mxu1 }
 0x401   : > { %v6523_v48 = vsub.f32 %v7876_v12, %v1944_v2  ;;  %v1946_v39 = vpop.f32.mrb[179].mxu1  ;;  %v2726_v2 = vld [vmem:[%s7327_s4 + $0x18] sm:$0xff] }
 0x402   : > { %v6526_v61 = vsub.f32 %v7878_v32, %v1946_v39  ;;  %2650 = vmatprep.mubr.f32.mxu0 %v2212_v49  ;;  %v2730_v32 = vld [vmem:[%s7327_s4 + $0x38] sm:$0xff]  ;;  %v7882_v39 = vld [vmem:[#allocation111_spill] sm:$0xff] }
 0x403   : > { %7877 = vst [vmem:[#allocation73_spill] sm:$0xff] %v6523_v48  ;;  %2651 = vmatmul.mubr.f32.gmra.mrb[176].mxu0 %v2211_v40  ;;  %v2215_v60 = vmul.f32 %v6523_v48, %v6523_v48  ;;  %v4328_v40 = vpack.c.bf16 %v2730_v32, %v2726_v2  ;;  %v7888_v2 = vld [vmem:[#allocation114_spill] sm:$0xff] }
 0x404   : > { %7879 = vst [vmem:[#allocation75_spill] sm:$0xff] %v6526_v61  ;;  %v2216_v43 = vmul.f32 %v6526_v61, %v6526_v61  ;;  %v1950_v0 = vpop.f32.mrb[180].mxu1  ;;  %v7884_v61 = vld [vmem:[#allocation112_spill] sm:$0xff] }
 0x405   : > { %v6533_v44 = vsub.f32 %v7880_v5, %v1950_v0  ;;  %v1952_v53 = vpop.f32.mrb[181].mxu1  ;;  %4329 = vmatprep.subr.bf16.mxu1 %v4328_v40  ;;  %v7890_v40 = vld [vmem:[#allocation115_spill] sm:$0xff] }
 0x406   : > { %v6542_v49 = vsub.f32 %v7882_v39, %v1952_v53  ;;  %2655 = vmatprep.mubr.f32.mxu0 %v2216_v43 }
 0x407   : > { %7881 = vst [vmem:[#allocation79_spill] sm:$0xff] %v6533_v44  ;;  %2656 = vmatmul.mubr.f32.gmra.mrb[178].mxu0 %v2215_v60  ;;  %v2219_v5 = vmul.f32 %v6533_v44, %v6533_v44 }
 0x408   : > { %7883 = vst [vmem:[#allocation80_spill] sm:$0xff] %v6542_v49  ;;  %v2220_v12 = vmul.f32 %v6542_v49, %v6542_v49  ;;  %v1956_v0 = vpop.f32.mrb[182].mxu1 }
 0x409   : > { %v6549_v48 = vsub.f32 %v7884_v61, %v1956_v0  ;;  %v1958_v27 = vpop.f32.mrb[183].mxu1  ;;  %v7892_v0 = vld [vmem:[#allocation116_spill] sm:$0xff] }
 0x40a   : > { %v6552_v33 = vsub.f32 %v7886_v3, %v1958_v27  ;;  %2660 = vmatprep.mubr.f32.mxu0 %v2220_v12 }
 0x40b   : > { %7885 = vst [vmem:[#allocation81_spill] sm:$0xff] %v6549_v48  ;;  %2661 = vmatmul.mubr.f32.gmra.mrb[180].mxu0 %v2219_v5  ;;  %v2223_v60 = vmul.f32 %v6549_v48, %v6549_v48  ;;  %v7894_v48 = vld [vmem:[#allocation117_spill] sm:$0xff] }
 0x40c   : > { %7887 = vst [vmem:[#allocation83_spill] sm:$0xff] %v6552_v33  ;;  %v2224_v53 = vmul.f32 %v6552_v33, %v6552_v33  ;;  %v1962_v43 = vpop.f32.mrb[184].mxu1 }
 0x40d   : > { %v6559_v32 = vsub.f32 %v7888_v2, %v1962_v43  ;;  %v1964_v39 = vpop.f32.mrb[185].mxu1 }
 0x40e   : > { %v6562_v61 = vsub.f32 %v7890_v40, %v1964_v39  ;;  %2665 = vmatprep.mubr.f32.mxu0 %v2224_v53  ;;  %v7896_v39 = vld [vmem:[#allocation118_spill] sm:$0xff] }
 0x40f   : > { %7889 = vst [vmem:[#allocation87_spill] sm:$0xff] %v6559_v32  ;;  %2666 = vmatmul.mubr.f32.gmra.mrb[182].mxu0 %v2223_v60  ;;  %v2227_v12 = vmul.f32 %v6559_v32, %v6559_v32  ;;  %v7898_v32 = vld [vmem:[#allocation119_spill] sm:$0xff] }
 0x410   : > { %7891 = vst [vmem:[#allocation88_spill] sm:$0xff] %v6562_v61  ;;  %v2228_v3 = vmul.f32 %v6562_v61, %v6562_v61  ;;  %v1968_v27 = vpop.f32.mrb[186].mxu1 }
 0x411   : > { %v6569_v5 = vsub.f32 %v7892_v0, %v1968_v27  ;;  %v1970_v33 = vpop.f32.mrb[187].mxu1 }
 0x412   : > { %v6572_v43 = vsub.f32 %v7894_v48, %v1970_v33  ;;  %2670 = vmatprep.mubr.f32.mxu0 %v2228_v3 }
 0x413   : > { %7893 = vst [vmem:[#allocation89_spill] sm:$0xff] %v6569_v5  ;;  %2671 = vmatmul.mubr.f32.gmra.mrb[184].mxu0 %v2227_v12  ;;  %v2231_v2 = vmul.f32 %v6569_v5, %v6569_v5  ;;  %v7900_v12 = vld [vmem:[#allocation120_spill] sm:$0xff]  ;;  %v7902_v5 = vld [vmem:[#allocation121_spill] sm:$0xff] }
 0x414   : > { %7895 = vst [vmem:[#allocation91_spill] sm:$0xff] %v6572_v43  ;;  %v2232_v53 = vmul.f32 %v6572_v43, %v6572_v43  ;;  %v1974_v60 = vpop.f32.mrb[188].mxu1 }
 0x415   : > { %v6579_v40 = vsub.f32 %v7896_v39, %v1974_v60  ;;  %v1976_v61 = vpop.f32.mrb[189].mxu1 }
 0x416   : > { %v6582_v27 = vsub.f32 %v7898_v32, %v1976_v61  ;;  %2675 = vmatprep.mubr.f32.mxu0 %v2232_v53 }
 0x417   : > { %7897 = vst [vmem:[#allocation95_spill] sm:$0xff] %v6579_v40  ;;  %2676 = vmatmul.mubr.f32.gmra.mrb[186].mxu0 %v2231_v2  ;;  %v2235_v3 = vmul.f32 %v6579_v40, %v6579_v40 }
 0x418   : > { %7899 = vst [vmem:[#allocation96_spill] sm:$0xff] %v6582_v27  ;;  %v2236_v33 = vmul.f32 %v6582_v27, %v6582_v27  ;;  %v1980_v48 = vpop.f32.mrb[190].mxu1 }
 0x419   : > { %v6589_v0 = vsub.f32 %v7900_v12, %v1980_v48  ;;  %v1982_v43 = vpop.f32.mrb[191].mxu1 }
 0x41a   : > { %v6592_v60 = vsub.f32 %v7902_v5, %v1982_v43  ;;  %2680 = vmatprep.mubr.f32.mxu0 %v2236_v33  ;;  %v2725_v43 = vld [vmem:[%s7327_s4 + $0x10] sm:$0xff] }
 0x41b   : > { %7901 = vst [vmem:[#allocation97_spill] sm:$0xff] %v6589_v0  ;;  %2681 = vmatmul.mubr.f32.gmra.mrb[188].mxu0 %v2235_v3  ;;  %v2239_v61 = vmul.f32 %v6589_v0, %v6589_v0  ;;  %v2729_v33 = vld [vmem:[%s7327_s4 + $0x30] sm:$0xff] }
 0x41c   : > { %7903 = vst [vmem:[#allocation99_spill] sm:$0xff] %v6592_v60  ;;  %v2240_v32 = vmul.f32 %v6592_v60, %v6592_v60 }
 0x41e   : > { %2685 = vmatprep.mubr.f32.mxu0 %v2240_v32 }
 0x41f   : > { %2686 = vmatmul.mubr.f32.gmra.mrb[190].mxu0 %v2239_v61  ;;  %v4330_v61 = vpack.c.bf16 %v2729_v33, %v2725_v43 }
 0x476   : > { %v2532_v53 = vpop.f32.mrb[128].mxu0 }
 0x477   : > { %v4332_v2 = vadd.f32 1e-05, %v2532_v53  ;;  %v2534_v39 = vpop.f32.mrb[129].mxu0 }
 0x479   : > { %4564 = vrsqrt.f32 %v4332_v2 }
 0x47a   : > { %v2537_v48 = vpop.f32.mrb[130].mxu0 }
 0x47b   : > { %v4333_v12 = vadd.f32 1e-05, %v2537_v48  ;;  %v2539_v27 = vpop.f32.mrb[131].mxu0 }
 0x47d   : > { %4566 = vrsqrt.f32 %v4333_v12 }
 0x47e   : > { %v2542_v5 = vpop.f32.mrb[132].mxu0 }
 0x47f   : > { %v4334_v3 = vadd.f32 1e-05, %v2542_v5  ;;  %v2544_v32 = vpop.f32.mrb[133].mxu0 }
 0x481   : > { %4568 = vrsqrt.f32 %v4334_v3 }
 0x482   : > { %v2547_v53 = vpop.f32.mrb[134].mxu0 }
 0x483   : > { %v6604_v39 = vpop.eup %4564  ;;  %v4335_v2 = vadd.f32 1e-05, %v2547_v53  ;;  %v2549_v48 = vpop.f32.mrb[135].mxu0 }
 0x484   : > { %3955 = vmatmul.mubr.msk.f32.vlgmr.msra.gmra.mrb[192].mxu1 %vm1374_vm1, %v6604_v39 }
 0x485   : > { %4570 = vrsqrt.f32 %v4335_v2  ;;  %4331 = vmatpush1.bf16.msra.mxu1 %v4330_v61  ;;  %2897 = vmatprep.mubr.f32.mxu1 %v7685_v14 }
 0x486   : > { %v2552_v27 = vpop.f32.mrb[136].mxu0 }
 0x487   : > { %v6609_v12 = vpop.eup %4566  ;;  %v4336_v60 = vadd.f32 1e-05, %v2552_v27  ;;  %v2554_v5 = vpop.f32.mrb[137].mxu0 }
 0x488   : > { %3956 = vmatmul.mubr.msk.f32.gmra.mrb[194].mxu1 %vm1374_vm1, %v6609_v12 }
 0x489   : > { %4572 = vrsqrt.f32 %v4336_v60  ;;  %2903 = vmatprep.mubr.f32.mxu1 %v7685_v14 }
 0x48a   : > { %v2557_v43 = vpop.f32.mrb[138].mxu0 }
 0x48b   : > { %v6614_v33 = vpop.eup %4568  ;;  %v4337_v3 = vadd.f32 1e-05, %v2557_v43  ;;  %v2559_v32 = vpop.f32.mrb[139].mxu0 }
 0x48c   : > { %3957 = vmatmul.mubr.msk.f32.gmra.mrb[196].mxu1 %vm1374_vm1, %v6614_v33 }
 0x48d   : > { %4574 = vrsqrt.f32 %v4337_v3  ;;  %2909 = vmatprep.mubr.f32.mxu1 %v7685_v14 }
 0x48e   : > { %v2562_v61 = vpop.f32.mrb[140].mxu0 }
 0x48f   : > { %v6619_v53 = vpop.eup %4570  ;;  %v4338_v2 = vadd.f32 1e-05, %v2562_v61  ;;  %v2564_v48 = vpop.f32.mrb[141].mxu0 }
 0x490   : > { %3958 = vmatmul.mubr.msk.f32.gmra.mrb[198].mxu1 %vm1374_vm1, %v6619_v53 }
 0x491   : > { %4576 = vrsqrt.f32 %v4338_v2  ;;  %2915 = vmatprep.mubr.f32.mxu1 %v7685_v14 }
 0x492   : > { %v2567_v60 = vpop.f32.mrb[142].mxu0 }
 0x493   : > { %v6624_v27 = vpop.eup %4572  ;;  %v4339_v5 = vadd.f32 1e-05, %v2567_v60  ;;  %v2569_v43 = vpop.f32.mrb[143].mxu0 }
 0x494   : > { %3959 = vmatmul.mubr.msk.f32.gmra.mrb[200].mxu1 %vm1374_vm1, %v6624_v27 }
 0x495   : > { %4578 = vrsqrt.f32 %v4339_v5  ;;  %2921 = vmatprep.mubr.f32.mxu1 %v7685_v14 }
 0x496   : > { %v2572_v3 = vpop.f32.mrb[144].mxu0 }
 0x497   : > { %v6629_v32 = vpop.eup %4574  ;;  %v4340_v61 = vadd.f32 1e-05, %v2572_v3  ;;  %v2574_v48 = vpop.f32.mrb[145].mxu0 }
 0x498   : > { %3960 = vmatmul.mubr.msk.f32.gmra.mrb[202].mxu1 %vm1374_vm1, %v6629_v32 }
 0x499   : > { %4580 = vrsqrt.f32 %v4340_v61  ;;  %2927 = vmatprep.mubr.f32.mxu1 %v7685_v14 }
 0x49a   : > { %v2577_v2 = vpop.f32.mrb[146].mxu0 }
 0x49b   : > { %v6634_v60 = vpop.eup %4576  ;;  %v4341_v43 = vadd.f32 1e-05, %v2577_v2  ;;  %v2579_v0 = vpop.f32.mrb[147].mxu0 }
 0x49c   : > { %3961 = vmatmul.mubr.msk.f32.gmra.mrb[204].mxu1 %vm1374_vm1, %v6634_v60 }
 0x49d   : > { %4582 = vrsqrt.f32 %v4341_v43  ;;  %2933 = vmatprep.mubr.f32.mxu1 %v7685_v14 }
 0x49e   : > { %v2582_v5 = vpop.f32.mrb[148].mxu0 }
 0x49f   : > { %v6639_v3 = vpop.eup %4578  ;;  %v4342_v48 = vadd.f32 1e-05, %v2582_v5  ;;  %v2584_v40 = vpop.f32.mrb[149].mxu0 }
 0x4a0   : > { %3962 = vmatmul.mubr.msk.f32.gmra.mrb[206].mxu1 %vm1374_vm1, %v6639_v3 }
 0x4a1   : > { %4584 = vrsqrt.f32 %v4342_v48  ;;  %2939 = vmatprep.mubr.f32.mxu1 %v7685_v14 }
 0x4a2   : > { %v2587_v61 = vpop.f32.mrb[150].mxu0 }
 0x4a3   : > { %v6644_v2 = vpop.eup %4580  ;;  %v4343_v0 = vadd.f32 1e-05, %v2587_v61  ;;  %v2589_v49 = vpop.f32.mrb[151].mxu0 }
 0x4a4   : > { %3963 = vmatmul.mubr.msk.f32.gmra.mrb[208].mxu1 %vm1374_vm1, %v6644_v2 }
 0x4a5   : > { %4586 = vrsqrt.f32 %v4343_v0  ;;  %2945 = vmatprep.mubr.f32.mxu1 %v7685_v14 }
 0x4a6   : > { %v2592_v43 = vpop.f32.mrb[152].mxu0 }
 0x4a7   : > { %v6649_v5 = vpop.eup %4582  ;;  %v4344_v40 = vadd.f32 1e-05, %v2592_v43  ;;  %v2594_v44 = vpop.f32.mrb[153].mxu0 }
 0x4a8   : > { %3964 = vmatmul.mubr.msk.f32.gmra.mrb[210].mxu1 %vm1374_vm1, %v6649_v5 }
 0x4a9   : > { %4588 = vrsqrt.f32 %v4344_v40  ;;  %2951 = vmatprep.mubr.f32.mxu1 %v7685_v14 }
 0x4aa   : > { %v2597_v48 = vpop.f32.mrb[154].mxu0 }
 0x4ab   : > { %v6654_v61 = vpop.eup %4584  ;;  %v4345_v49 = vadd.f32 1e-05, %v2597_v48  ;;  %v2599_v26 = vpop.f32.mrb[155].mxu0 }
 0x4ac   : > { %3965 = vmatmul.mubr.msk.f32.gmra.mrb[212].mxu1 %vm1374_vm1, %v6654_v61 }
 0x4ad   : > { %4590 = vrsqrt.f32 %v4345_v49  ;;  %2957 = vmatprep.mubr.f32.mxu1 %v7685_v14 }
 0x4ae   : > { %v2602_v0 = vpop.f32.mrb[156].mxu0 }
 0x4af   : > { %v6659_v43 = vpop.eup %4586  ;;  %v4346_v44 = vadd.f32 1e-05, %v2602_v0  ;;  %v2604_v46 = vpop.f32.mrb[157].mxu0 }
 0x4b0   : > { %3966 = vmatmul.mubr.msk.f32.gmra.mrb[214].mxu1 %vm1374_vm1, %v6659_v43 }
 0x4b1   : > { %4592 = vrsqrt.f32 %v4346_v44  ;;  %2963 = vmatprep.mubr.f32.mxu1 %v7685_v14 }
 0x4b2   : > { %v2607_v40 = vpop.f32.mrb[158].mxu0 }
 0x4b3   : > { %v6664_v48 = vpop.eup %4588  ;;  %v4347_v26 = vadd.f32 1e-05, %v2607_v40  ;;  %v2609_v1 = vpop.f32.mrb[159].mxu0 }
 0x4b4   : > { %3967 = vmatmul.mubr.msk.f32.gmra.mrb[216].mxu1 %vm1374_vm1, %v6664_v48 }
 0x4b5   : > { %4594 = vrsqrt.f32 %v4347_v26  ;;  %2969 = vmatprep.mubr.f32.mxu1 %v7685_v14 }
 0x4b6   : > { %v2612_v49 = vpop.f32.mrb[160].mxu0 }
 0x4b7   : > { %v6669_v0 = vpop.eup %4590  ;;  %v4348_v46 = vadd.f32 1e-05, %v2612_v49  ;;  %v2614_v6 = vpop.f32.mrb[161].mxu0 }
 0x4b8   : > { %3968 = vmatmul.mubr.msk.f32.gmra.mrb[218].mxu1 %vm1374_vm1, %v6669_v0 }
 0x4b9   : > { %4596 = vrsqrt.f32 %v4348_v46  ;;  %2975 = vmatprep.mubr.f32.mxu1 %v7685_v14 }
 0x4ba   : > { %v2617_v44 = vpop.f32.mrb[162].mxu0 }
 0x4bb   : > { %v6674_v40 = vpop.eup %4592  ;;  %v4349_v1 = vadd.f32 1e-05, %v2617_v44  ;;  %v2619_v24 = vpop.f32.mrb[163].mxu0 }
 0x4bc   : > { %3969 = vmatmul.mubr.msk.f32.gmra.mrb[220].mxu1 %vm1374_vm1, %v6674_v40 }
 0x4bd   : > { %4598 = vrsqrt.f32 %v4349_v1  ;;  %2981 = vmatprep.mubr.f32.mxu1 %v7685_v14 }
 0x4be   : > { %v2622_v26 = vpop.f32.mrb[164].mxu0 }
 0x4bf   : > { %v6679_v49 = vpop.eup %4594  ;;  %v4350_v6 = vadd.f32 1e-05, %v2622_v26  ;;  %v2624_v47 = vpop.f32.mrb[165].mxu0 }
 0x4c0   : > { %3970 = vmatmul.mubr.msk.f32.gmra.mrb[222].mxu1 %vm1374_vm1, %v6679_v49 }
 0x4c1   : > { %4600 = vrsqrt.f32 %v4350_v6  ;;  %2987 = vmatprep.mubr.f32.mxu1 %v7685_v14 }
 0x4c2   : > { %v2627_v46 = vpop.f32.mrb[166].mxu0 }
 0x4c3   : > { %v6684_v44 = vpop.eup %4596  ;;  %v4351_v24 = vadd.f32 1e-05, %v2627_v46  ;;  %v2629_v8 = vpop.f32.mrb[167].mxu0 }
 0x4c4   : > { %3971 = vmatmul.mubr.msk.f32.gmra.mrb[224].mxu1 %vm1374_vm1, %v6684_v44 }
 0x4c5   : > { %4602 = vrsqrt.f32 %v4351_v24  ;;  %2993 = vmatprep.mubr.f32.mxu1 %v7685_v14 }
 0x4c6   : > { %v2632_v1 = vpop.f32.mrb[168].mxu0 }
 0x4c7   : > { %v6689_v26 = vpop.eup %4598  ;;  %v4352_v47 = vadd.f32 1e-05, %v2632_v1  ;;  %v2634_v7 = vpop.f32.mrb[169].mxu0 }
 0x4c8   : > { %3972 = vmatmul.mubr.msk.f32.gmra.mrb[226].mxu1 %vm1374_vm1, %v6689_v26 }
 0x4c9   : > { %4604 = vrsqrt.f32 %v4352_v47  ;;  %2999 = vmatprep.mubr.f32.mxu1 %v7685_v14 }
 0x4ca   : > { %v2637_v6 = vpop.f32.mrb[170].mxu0 }
 0x4cb   : > { %v6694_v46 = vpop.eup %4600  ;;  %v4353_v8 = vadd.f32 1e-05, %v2637_v6  ;;  %v2639_v30 = vpop.f32.mrb[171].mxu0 }
 0x4cc   : > { %3973 = vmatmul.mubr.msk.f32.gmra.mrb[228].mxu1 %vm1374_vm1, %v6694_v46 }
 0x4cd   : > { %4606 = vrsqrt.f32 %v4353_v8  ;;  %3005 = vmatprep.mubr.f32.mxu1 %v7685_v14 }
 0x4ce   : > { %v2642_v24 = vpop.f32.mrb[172].mxu0 }
 0x4cf   : > { %v6699_v1 = vpop.eup %4602  ;;  %v4354_v7 = vadd.f32 1e-05, %v2642_v24  ;;  %v2644_v4 = vpop.f32.mrb[173].mxu0 }
 0x4d0   : > { %3974 = vmatmul.mubr.msk.f32.gmra.mrb[230].mxu1 %vm1374_vm1, %v6699_v1 }
 0x4d1   : > { %4608 = vrsqrt.f32 %v4354_v7  ;;  %3011 = vmatprep.mubr.f32.mxu1 %v7685_v14 }
 0x4d2   : > { %v2647_v47 = vpop.f32.mrb[174].mxu0 }
 0x4d3   : > { %v6704_v6 = vpop.eup %4604  ;;  %v4355_v30 = vadd.f32 1e-05, %v2647_v47  ;;  %v2649_v16 = vpop.f32.mrb[175].mxu0 }
 0x4d4   : > { %3975 = vmatmul.mubr.msk.f32.gmra.mrb[232].mxu1 %vm1374_vm1, %v6704_v6 }
 0x4d5   : > { %4610 = vrsqrt.f32 %v4355_v30  ;;  %3017 = vmatprep.mubr.f32.mxu1 %v7685_v14 }
 0x4d6   : > { %v2652_v8 = vpop.f32.mrb[176].mxu0 }
 0x4d7   : > { %v6709_v24 = vpop.eup %4606  ;;  %v4356_v4 = vadd.f32 1e-05, %v2652_v8  ;;  %v2654_v54 = vpop.f32.mrb[177].mxu0 }
 0x4d8   : > { %3976 = vmatmul.mubr.msk.f32.gmra.mrb[234].mxu1 %vm1374_vm1, %v6709_v24 }
 0x4d9   : > { %4612 = vrsqrt.f32 %v4356_v4  ;;  %3023 = vmatprep.mubr.f32.mxu1 %v7685_v14 }
 0x4da   : > { %v2657_v7 = vpop.f32.mrb[178].mxu0 }
 0x4db   : > { %v6714_v47 = vpop.eup %4608  ;;  %v4357_v16 = vadd.f32 1e-05, %v2657_v7  ;;  %v2659_v45 = vpop.f32.mrb[179].mxu0 }
 0x4dc   : > { %3977 = vmatmul.mubr.msk.f32.gmra.mrb[236].mxu1 %vm1374_vm1, %v6714_v47 }
 0x4dd   : > { %4614 = vrsqrt.f32 %v4357_v16  ;;  %3029 = vmatprep.mubr.f32.mxu1 %v7685_v14 }
 0x4de   : > { %v2662_v30 = vpop.f32.mrb[180].mxu0 }
 0x4df   : > { %v6719_v8 = vpop.eup %4610  ;;  %v4358_v54 = vadd.f32 1e-05, %v2662_v30  ;;  %v2664_v15 = vpop.f32.mrb[181].mxu0 }
 0x4e0   : > { %3978 = vmatmul.mubr.msk.f32.gmra.mrb[238].mxu1 %vm1374_vm1, %v6719_v8 }
 0x4e1   : > { %4616 = vrsqrt.f32 %v4358_v54  ;;  %3035 = vmatprep.mubr.f32.mxu1 %v7685_v14 }
 0x4e2   : > { %v2667_v4 = vpop.f32.mrb[182].mxu0 }
 0x4e3   : > { %v6724_v7 = vpop.eup %4612  ;;  %v4359_v45 = vadd.f32 1e-05, %v2667_v4  ;;  %v2669_v58 = vpop.f32.mrb[183].mxu0 }
 0x4e4   : > { %3979 = vmatmul.mubr.msk.f32.gmra.mrb[240].mxu1 %vm1374_vm1, %v6724_v7 }
 0x4e5   : > { %4618 = vrsqrt.f32 %v4359_v45  ;;  %3041 = vmatprep.mubr.f32.mxu1 %v7685_v14 }
 0x4e6   : > { %v2672_v16 = vpop.f32.mrb[184].mxu0 }
 0x4e7   : > { %v6729_v30 = vpop.eup %4614  ;;  %v4360_v15 = vadd.f32 1e-05, %v2672_v16  ;;  %v2674_v10 = vpop.f32.mrb[185].mxu0 }
 0x4e8   : > { %3980 = vmatmul.mubr.msk.f32.gmra.mrb[242].mxu1 %vm1374_vm1, %v6729_v30 }
 0x4e9   : > { %4620 = vrsqrt.f32 %v4360_v15  ;;  %3047 = vmatprep.mubr.f32.mxu1 %v7685_v14 }
 0x4ea   : > { %v2677_v54 = vpop.f32.mrb[186].mxu0 }
 0x4eb   : > { %v6734_v4 = vpop.eup %4616  ;;  %v4361_v58 = vadd.f32 1e-05, %v2677_v54  ;;  %v2679_v50 = vpop.f32.mrb[187].mxu0 }
 0x4ec   : > { %3981 = vmatmul.mubr.msk.f32.gmra.mrb[244].mxu1 %vm1374_vm1, %v6734_v4 }
 0x4ed   : > { %4622 = vrsqrt.f32 %v4361_v58  ;;  %3053 = vmatprep.mubr.f32.mxu1 %v7685_v14 }
 0x4ee   : > { %v2682_v45 = vpop.f32.mrb[188].mxu0 }
 0x4ef   : > { %v6739_v16 = vpop.eup %4618  ;;  %v4362_v10 = vadd.f32 1e-05, %v2682_v45  ;;  %v2684_v59 = vpop.f32.mrb[189].mxu0 }
 0x4f0   : > { %3982 = vmatmul.mubr.msk.f32.gmra.mrb[246].mxu1 %vm1374_vm1, %v6739_v16 }
 0x4f1   : > { %4624 = vrsqrt.f32 %v4362_v10  ;;  %3059 = vmatprep.mubr.f32.mxu1 %v7685_v14 }
 0x4f2   : > { %v2687_v15 = vpop.f32.mrb[190].mxu0 }
 0x4f3   : > { %v6744_v54 = vpop.eup %4620  ;;  %v4363_v50 = vadd.f32 1e-05, %v2687_v15  ;;  %v2689_v52 = vpop.f32.mrb[191].mxu0 }
 0x4f4   : > { %3983 = vmatmul.mubr.msk.f32.gmra.mrb[248].mxu1 %vm1374_vm1, %v6744_v54 }
 0x4f5   : > { %4626 = vrsqrt.f32 %v4363_v50  ;;  %3065 = vmatprep.mubr.f32.mxu1 %v7685_v14 }
 0x4f7   : > { %v6749_v58 = vpop.eup %4622 }
 0x4f8   : > { %3984 = vmatmul.mubr.msk.f32.gmra.mrb[250].mxu1 %vm1374_vm1, %v6749_v58 }
 0x4f9   : > { %3071 = vmatprep.mubr.f32.mxu1 %v7685_v14 }
 0x4fb   : > { %v6754_v59 = vpop.eup %4624 }
 0x4fc   : > { %3985 = vmatmul.mubr.msk.f32.gmra.mrb[252].mxu1 %vm1374_vm1, %v6754_v59 }
 0x4fd   : > { %3077 = vmatprep.mubr.f32.mxu1 %v7685_v14 }
 0x4ff   : > { %v6759_v52 = vpop.eup %4626 }
 0x500   : > { %3986 = vmatmul.mubr.msk.f32.gmra.mrb[254].mxu1 %vm1374_vm1, %v6759_v52 }
 0x501   : > { %3148 = vmatprep.mubr.f32.mxu1 %v7685_v14 }
 0x504   : > { %3987 = vmatmul.mubr.msk.f32.vlgmr.msra.gmra.mrb[0].mxu1 %vm1374_vm1, %v6604_v39  ;;  %v3471_v39 = vlaneseq }
 0x505   : > { %3154 = vmatprep.mubr.f32.mxu1 %v7685_v14 }
 0x508   : > { %3988 = vmatmul.mubr.msk.f32.gmra.mrb[2].mxu1 %vm1374_vm1, %v6609_v12  ;;  %v6821_v12 = vshrl.u32 %v3471_v39, 7 }
 0x509   : > { %3160 = vmatprep.mubr.f32.mxu1 %v7685_v14 }
 0x50c   : > { %3989 = vmatmul.mubr.msk.f32.gmra.mrb[4].mxu1 %vm1374_vm1, %v6614_v33  ;;  %v3473_v33 = vsub.s32 0, %v6821_v12 }
 0x50d   : > { %3166 = vmatprep.mubr.f32.mxu1 %v7685_v14 }
 0x510   : > { %3990 = vmatmul.mubr.msk.f32.gmra.mrb[6].mxu1 %vm1374_vm1, %v6619_v53  ;;  %v6831_v53 = vld [vmem:[%s7328_s5] sm:$0xf] }
 0x511   : > { %3172 = vmatprep.mubr.f32.mxu1 %v7685_v14 }
 0x514   : > { %3991 = vmatmul.mubr.msk.f32.gmra.mrb[8].mxu1 %vm1374_vm1, %v6624_v27  ;;  %v3477_v27 = vsub.s32 1, %v6821_v12 }
 0x515   : > { %3178 = vmatprep.mubr.f32.mxu1 %v7685_v14 }
 0x518   : > { %3992 = vmatmul.mubr.msk.f32.gmra.mrb[10].mxu1 %vm1374_vm1, %v6629_v32  ;;  %v6840_v32 = vrot.slane %v6831_v53, %v3473_v33 }
 0x519   : > { %3184 = vmatprep.mubr.f32.mxu1 %v7685_v14 }
 0x51c   : > { %3993 = vmatmul.mubr.msk.f32.gmra.mrb[12].mxu1 %vm1374_vm1, %v6634_v60 }
 0x51d   : > { %3190 = vmatprep.mubr.f32.mxu1 %v7685_v14 }
 0x520   : > { %3994 = vmatmul.mubr.msk.f32.gmra.mrb[14].mxu1 %vm1374_vm1, %v6639_v3  ;;  %v6843_v3 = vrot.slane %v6831_v53, %v3477_v27 }
 0x521   : > { %3196 = vmatprep.mubr.f32.mxu1 %v7685_v14 }
 0x524   : > { %3995 = vmatmul.mubr.msk.f32.gmra.mrb[16].mxu1 %vm1374_vm1, %v6644_v2 }
 0x525   : > { %3202 = vmatprep.mubr.f32.mxu1 %v7685_v14 }
 0x528   : > { %3996 = vmatmul.mubr.msk.f32.gmra.mrb[18].mxu1 %vm1374_vm1, %v6649_v5 }
 0x529   : > { %3208 = vmatprep.mubr.f32.mxu1 %v7685_v14 }
 0x52c   : > { %3997 = vmatmul.mubr.msk.f32.gmra.mrb[20].mxu1 %vm1374_vm1, %v6654_v61 }
 0x52d   : > { %3214 = vmatprep.mubr.f32.mxu1 %v7685_v14 }
 0x530   : > { %3998 = vmatmul.mubr.msk.f32.gmra.mrb[22].mxu1 %vm1374_vm1, %v6659_v43 }
 0x531   : > { %3220 = vmatprep.mubr.f32.mxu1 %v7685_v14 }
 0x534   : > { %3999 = vmatmul.mubr.msk.f32.gmra.mrb[24].mxu1 %vm1374_vm1, %v6664_v48 }
 0x535   : > { %3226 = vmatprep.mubr.f32.mxu1 %v7685_v14 }
 0x538   : > { %4000 = vmatmul.mubr.msk.f32.gmra.mrb[26].mxu1 %vm1374_vm1, %v6669_v0 }
 0x539   : > { %3232 = vmatprep.mubr.f32.mxu1 %v7685_v14 }
 0x53c   : > { %4001 = vmatmul.mubr.msk.f32.gmra.mrb[28].mxu1 %vm1374_vm1, %v6674_v40 }
 0x53d   : > { %3238 = vmatprep.mubr.f32.mxu1 %v7685_v14 }
 0x540   : > { %4002 = vmatmul.mubr.msk.f32.gmra.mrb[30].mxu1 %vm1374_vm1, %v6679_v49 }
 0x541   : > { %3244 = vmatprep.mubr.f32.mxu1 %v7685_v14 }
 0x544   : > { %4003 = vmatmul.mubr.msk.f32.gmra.mrb[32].mxu1 %vm1374_vm1, %v6684_v44 }
 0x545   : > { %3250 = vmatprep.mubr.f32.mxu1 %v7685_v14 }
 0x548   : > { %4004 = vmatmul.mubr.msk.f32.gmra.mrb[34].mxu1 %vm1374_vm1, %v6689_v26 }
 0x549   : > { %3256 = vmatprep.mubr.f32.mxu1 %v7685_v14 }
 0x54c   : > { %4005 = vmatmul.mubr.msk.f32.gmra.mrb[36].mxu1 %vm1374_vm1, %v6694_v46 }
 0x54d   : > { %3262 = vmatprep.mubr.f32.mxu1 %v7685_v14 }
 0x550   : > { %4006 = vmatmul.mubr.msk.f32.gmra.mrb[38].mxu1 %vm1374_vm1, %v6699_v1 }
 0x551   : > { %3268 = vmatprep.mubr.f32.mxu1 %v7685_v14 }
 0x554   : > { %4007 = vmatmul.mubr.msk.f32.gmra.mrb[40].mxu1 %vm1374_vm1, %v6704_v6 }
 0x555   : > { %3274 = vmatprep.mubr.f32.mxu1 %v7685_v14 }
 0x557   : > { %v2893_v60 = vpop.f32.mrb[192].mxu1 }
 0x558   : > { %v3341_v2 = vmul.f32 %v2893_v60, %v5877_v57  ;;  %v2895_v5 = vpop.f32.mrb[193].mxu1  ;;  %4008 = vmatmul.mubr.msk.f32.gmra.mrb[42].mxu1 %vm1374_vm1, %v6709_v24 }
 0x559   : > { %v3342_v61 = vmul.f32 %v2895_v5, %v5882_v11  ;;  %3280 = vmatprep.mubr.f32.mxu1 %v7685_v14 }
 0x55a   : > { %v3491_v43 = vadd.f32 %v6840_v32, %v3341_v2 }
 0x55b   : > { %v3492_v48 = vadd.f32 %v6843_v3, %v3342_v61  ;;  %v2899_v0 = vpop.f32.mrb[194].mxu1 }
 0x55c   : > { %3619 = vst [vmem:[%s6852_s18] sm:$0xff] %v3491_v43  ;;  %v3345_v57 = vmul.f32 %v2899_v0, %v5890_v55  ;;  %v2901_v40 = vpop.f32.mrb[195].mxu1  ;;  %4009 = vmatmul.mubr.msk.f32.gmra.mrb[44].mxu1 %vm1374_vm1, %v6714_v47 }
 0x55d   : > { %4019 = vst [vmem:[%s6852_s18 + $0x10] sm:$0xff] %v3492_v48  ;;  %v3346_v11 = vmul.f32 %v2901_v40, %v5895_v28  ;;  %3286 = vmatprep.mubr.f32.mxu1 %v7685_v14 }
 0x55e   : > { %v3495_v49 = vadd.f32 %v6840_v32, %v3345_v57 }
 0x55f   : > { %v3496_v44 = vadd.f32 %v6843_v3, %v3346_v11  ;;  %v2905_v26 = vpop.f32.mrb[196].mxu1 }
 0x560   : > { %3620 = vst [vmem:[%s6852_s18 + $0x8] sm:$0xff] %v3495_v49  ;;  %v3349_v46 = vmul.f32 %v2905_v26, %v5904_v9  ;;  %v2907_v55 = vpop.f32.mrb[197].mxu1  ;;  %4010 = vmatmul.mubr.msk.f32.gmra.mrb[46].mxu1 %vm1374_vm1, %v6719_v8 }
 0x561   : > { %4020 = vst [vmem:[%s6852_s18 + $0x18] sm:$0xff] %v3496_v44  ;;  %v3350_v1 = vmul.f32 %v2907_v55, %v5910_v37  ;;  %3292 = vmatprep.mubr.f32.mxu1 %v7685_v14 }
 0x562   : > { %v3499_v28 = vadd.f32 %v6840_v32, %v3349_v46 }
 0x563   : > { %v3500_v6 = vadd.f32 %v6843_v3, %v3350_v1  ;;  %v2911_v24 = vpop.f32.mrb[198].mxu1 }
 0x564   : > { %3621 = vst [vmem:[%s6852_s18 + $0x40] sm:$0xff] %v3499_v28  ;;  %v3353_v47 = vmul.f32 %v2911_v24, %v5919_v34  ;;  %v2913_v9 = vpop.f32.mrb[199].mxu1  ;;  %4011 = vmatmul.mubr.msk.f32.gmra.mrb[48].mxu1 %vm1374_vm1, %v6724_v7  ;;  %v7905_v28 = vld [vmem:[#allocation7_spill] sm:$0xff] }
 0x565   : > { %4021 = vst [vmem:[%s6852_s18 + $0x50] sm:$0xff] %v3500_v6  ;;  %v3354_v8 = vmul.f32 %v2913_v9, %v5925_v23  ;;  %3298 = vmatprep.mubr.f32.mxu1 %v7685_v14 }
 0x566   : > { %v3503_v37 = vadd.f32 %v6840_v32, %v3353_v47 }
 0x567   : > { %v3504_v45 = vadd.f32 %v6843_v3, %v3354_v8  ;;  %v2917_v10 = vpop.f32.mrb[200].mxu1 }
 0x568   : > { %3622 = vst [vmem:[%s6852_s18 + $0x48] sm:$0xff] %v3503_v37  ;;  %v3357_v15 = vmul.f32 %v2917_v10, %v5934_v21  ;;  %v2919_v34 = vpop.f32.mrb[201].mxu1  ;;  %4012 = vmatmul.mubr.msk.f32.gmra.mrb[50].mxu1 %vm1374_vm1, %v6729_v30  ;;  %v7907_v37 = vld [vmem:[#allocation9_spill] sm:$0xff] }
 0x569   : > { %4022 = vst [vmem:[%s6852_s18 + $0x58] sm:$0xff] %v3504_v45  ;;  %v3358_v7 = vmul.f32 %v2919_v34, %v5940_v42  ;;  %3304 = vmatprep.mubr.f32.mxu1 %v7685_v14 }
 0x56a   : > { %v3507_v23 = vadd.f32 %v6840_v32, %v3357_v15  ;;  %v7908_v15 = vld [vmem:[#allocation6_spill] sm:$0xff] }
 0x56b   : > { %v3508_v50 = vadd.f32 %v6843_v3, %v3358_v7  ;;  %v2923_v39 = vpop.f32.mrb[202].mxu1 }
 0x56c   : > { %3623 = vst [vmem:[%s6852_s18 + $0x80] sm:$0xff] %v3507_v23  ;;  %v3361_v33 = vmul.f32 %v2923_v39, %v5949_v25  ;;  %v2925_v21 = vpop.f32.mrb[203].mxu1  ;;  %4013 = vmatmul.mubr.msk.f32.gmra.mrb[52].mxu1 %vm1374_vm1, %v6734_v4  ;;  %v7909_v39 = vld [vmem:[#allocation11_spill] sm:$0xff] }
 0x56d   : > { %4023 = vst [vmem:[%s6852_s18 + $0x90] sm:$0xff] %v3508_v50  ;;  %v3362_v30 = vmul.f32 %v2925_v21, %v5955_v29  ;;  %3310 = vmatprep.mubr.f32.mxu1 %v7685_v14 }
 0x56e   : > { %v3511_v42 = vadd.f32 %v6840_v32, %v3361_v33 }
 0x56f   : > { %v3512_v27 = vadd.f32 %v6843_v3, %v3362_v30  ;;  %v2929_v60 = vpop.f32.mrb[204].mxu1  ;;  %v7910_v30 = vld [vmem:[#allocation13_spill] sm:$0xff] }
 0x570   : > { %3624 = vst [vmem:[%s6852_s18 + $0x88] sm:$0xff] %v3511_v42  ;;  %v3365_v2 = vmul.f32 %v2929_v60, %v5964_v22  ;;  %v2931_v25 = vpop.f32.mrb[205].mxu1  ;;  %4014 = vmatmul.mubr.msk.f32.gmra.mrb[54].mxu1 %vm1374_vm1, %v6739_v16 }
 0x571   : > { %4024 = vst [vmem:[%s6852_s18 + $0x98] sm:$0xff] %v3512_v27  ;;  %v3366_v4 = vmul.f32 %v2931_v25, %v5970_v20  ;;  %3316 = vmatprep.mubr.f32.mxu1 %v7685_v14  ;;  %v7911_v25 = vld [vmem:[#allocation10_spill] sm:$0xff] }
 0x572   : > { %v3515_v29 = vadd.f32 %v6840_v32, %v3365_v2 }
 0x573   : > { %v3516_v5 = vadd.f32 %v6843_v3, %v3366_v4  ;;  %v2935_v61 = vpop.f32.mrb[206].mxu1 }
 0x574   : > { %3625 = vst [vmem:[%s6852_s18 + $0xc0] sm:$0xff] %v3515_v29  ;;  %v3369_v43 = vmul.f32 %v2935_v61, %v5979_v18  ;;  %v2937_v22 = vpop.f32.mrb[207].mxu1  ;;  %4015 = vmatmul.mubr.msk.f32.gmra.mrb[56].mxu1 %vm1374_vm1, %v6744_v54 }
 0x575   : > { %4025 = vst [vmem:[%s6852_s18 + $0xd0] sm:$0xff] %v3516_v5  ;;  %v3370_v16 = vmul.f32 %v2937_v22, %v5985_v62  ;;  %3322 = vmatprep.mubr.f32.mxu1 %v7685_v14  ;;  %v7912_v5 = vld [vmem:[#allocation14_spill] sm:$0xff] }
 0x576   : > { %v3519_v20 = vadd.f32 %v6840_v32, %v3369_v43 }
 0x577   : > { %v3520_v48 = vadd.f32 %v6843_v3, %v3370_v16  ;;  %v2941_v0 = vpop.f32.mrb[208].mxu1 }
 0x578   : > { %3626 = vst [vmem:[%s6852_s18 + $0xc8] sm:$0xff] %v3519_v20  ;;  %v3373_v57 = vmul.f32 %v2941_v0, %v5994_v17  ;;  %v2943_v18 = vpop.f32.mrb[209].mxu1  ;;  %4016 = vmatmul.mubr.msk.f32.gmra.mrb[58].mxu1 %vm1374_vm1, %v6749_v58  ;;  %v7913_v20 = vld [vmem:[#allocation15_spill] sm:$0xff] }
 0x579   : > { %4026 = vst [vmem:[%s6852_s18 + $0xd8] sm:$0xff] %v3520_v48  ;;  %v3374_v54 = vmul.f32 %v2943_v18, %v6000_v19  ;;  %3328 = vmatprep.mubr.f32.mxu1 %v7685_v14 }
 0x57a   : > { %v3523_v62 = vadd.f32 %v6840_v32, %v3373_v57  ;;  %v7914_v57 = vld [vmem:[#allocation12_spill] sm:$0xff] }
 0x57b   : > { %v3524_v40 = vadd.f32 %v6843_v3, %v3374_v54  ;;  %v2947_v11 = vpop.f32.mrb[210].mxu1 }
 0x57c   : > { %3627 = vst [vmem:[%s6852_s18 + $0x100] sm:$0xff] %v3523_v62  ;;  %v3377_v49 = vmul.f32 %v2947_v11, %v6009_v36  ;;  %v2949_v17 = vpop.f32.mrb[211].mxu1  ;;  %4017 = vmatmul.mubr.msk.f32.gmra.mrb[60].mxu1 %vm1374_vm1, %v6754_v59  ;;  %v7904_v59 = vld [vmem:[#allocation5_spill] sm:$0xff] }
 0x57d   : > { %4027 = vst [vmem:[%s6852_s18 + $0x110] sm:$0xff] %v3524_v40  ;;  %v3378_v58 = vmul.f32 %v2949_v17, %v6015_v51  ;;  %3334 = vmatprep.mubr.f32.mxu1 %v7685_v14  ;;  %v7915_v11 = vld [vmem:[#allocation17_spill] sm:$0xff] }
 0x57e   : > { %v3527_v19 = vadd.f32 %v6840_v32, %v3377_v49 }
 0x57f   : > { %v3528_v44 = vadd.f32 %v6843_v3, %v3378_v58  ;;  %v2953_v26 = vpop.f32.mrb[212].mxu1  ;;  %v7916_v58 = vld [vmem:[#allocation19_spill] sm:$0xff] }
 0x580   : > { %3628 = vst [vmem:[%s6852_s18 + $0x108] sm:$0xff] %v3527_v19  ;;  %v3381_v46 = vmul.f32 %v2953_v26, %v6024_v31  ;;  %v2955_v36 = vpop.f32.mrb[213].mxu1  ;;  %4018 = vmatmul.mubr.msk.f32.gmra.mrb[62].mxu1 %vm1374_vm1, %v6759_v52  ;;  %v7906_v31 = vld [vmem:[#allocation8_spill] sm:$0xff] }
 0x581   : > { %4028 = vst [vmem:[%s6852_s18 + $0x118] sm:$0xff] %v3528_v44  ;;  %v3382_v51 = vmul.f32 %v2955_v36, %v7904_v59  ;;  %v7917_v36 = vld [vmem:[#allocation16_spill] sm:$0xff] }
 0x582   : > { %v3531_v14 = vadd.f32 %v6840_v32, %v3381_v46 }
 0x583   : > { %v3532_v55 = vadd.f32 %v6843_v3, %v3382_v51  ;;  %v2959_v1 = vpop.f32.mrb[214].mxu1 }
 0x584   : > { %3629 = vst [vmem:[%s6852_s18 + $0x140] sm:$0xff] %v3531_v14  ;;  %v3385_v6 = vmul.f32 %v2959_v1, %v7905_v28  ;;  %v2961_v24 = vpop.f32.mrb[215].mxu1  ;;  %v7918_v14 = vld [vmem:[#allocation20_spill] sm:$0xff] }
 0x585   : > { %4029 = vst [vmem:[%s6852_s18 + $0x150] sm:$0xff] %v3532_v55  ;;  %v3386_v47 = vmul.f32 %v2961_v24, %v7906_v31  ;;  %v7919_v24 = vld [vmem:[#allocation21_spill] sm:$0xff] }
 0x586   : > { %v3535_v52 = vadd.f32 %v6840_v32, %v3385_v6 }
 0x587   : > { %v3536_v9 = vadd.f32 %v6843_v3, %v3386_v47  ;;  %v2965_v8 = vpop.f32.mrb[216].mxu1 }
 0x588   : > { %3630 = vst [vmem:[%s6852_s18 + $0x148] sm:$0xff] %v3535_v52  ;;  %v3389_v45 = vmul.f32 %v2965_v8, %v7907_v37  ;;  %v2967_v10 = vpop.f32.mrb[217].mxu1  ;;  %v7920_v52 = vld [vmem:[#allocation18_spill] sm:$0xff] }
 0x589   : > { %4030 = vst [vmem:[%s6852_s18 + $0x158] sm:$0xff] %v3536_v9  ;;  %v3390_v34 = vmul.f32 %v2967_v10, %v7908_v15  ;;  %v7921_v10 = vld [vmem:[#allocation24_spill] sm:$0xff] }
 0x58a   : > { %v3539_v7 = vadd.f32 %v6840_v32, %v3389_v45 }
 0x58b   : > { %v3540_v23 = vadd.f32 %v6843_v3, %v3390_v34  ;;  %v2971_v50 = vpop.f32.mrb[218].mxu1 }
 0x58c   : > { %3631 = vst [vmem:[%s6852_s18 + $0x180] sm:$0xff] %v3539_v7  ;;  %v3393_v33 = vmul.f32 %v2971_v50, %v7909_v39  ;;  %v2973_v21 = vpop.f32.mrb[219].mxu1  ;;  %v7922_v7 = vld [vmem:[#allocation27_spill] sm:$0xff] }
 0x58d   : > { %4031 = vst [vmem:[%s6852_s18 + $0x190] sm:$0xff] %v3540_v23  ;;  %v3394_v42 = vmul.f32 %v2973_v21, %v7910_v30  ;;  %v7923_v21 = vld [vmem:[#allocation22_spill] sm:$0xff] }
 0x58e   : > { %v3543_v27 = vadd.f32 %v6840_v32, %v3393_v33 }
 0x58f   : > { %v3544_v60 = vadd.f32 %v6843_v3, %v3394_v42  ;;  %v2977_v2 = vpop.f32.mrb[220].mxu1 }
 0x590   : > { %3632 = vst [vmem:[%s6852_s18 + $0x188] sm:$0xff] %v3543_v27  ;;  %v3397_v4 = vmul.f32 %v2977_v2, %v7911_v25  ;;  %v2979_v29 = vpop.f32.mrb[221].mxu1  ;;  %v7924_v27 = vld [vmem:[#allocation28_spill] sm:$0xff] }
 0x591   : > { %4032 = vst [vmem:[%s6852_s18 + $0x198] sm:$0xff] %v3544_v60  ;;  %v3398_v61 = vmul.f32 %v2979_v29, %v7912_v5  ;;  %v7925_v29 = vld [vmem:[#allocation29_spill] sm:$0xff] }
 0x592   : > { %v3547_v43 = vadd.f32 %v6840_v32, %v3397_v4 }
 0x593   : > { %v3548_v22 = vadd.f32 %v6843_v3, %v3398_v61  ;;  %v2983_v16 = vpop.f32.mrb[222].mxu1 }
 0x594   : > { %3633 = vst [vmem:[%s6852_s18 + $0x1c0] sm:$0xff] %v3547_v43  ;;  %v3401_v48 = vmul.f32 %v2983_v16, %v7913_v20  ;;  %v2985_v0 = vpop.f32.mrb[223].mxu1  ;;  %v7926_v43 = vld [vmem:[#allocation25_spill] sm:$0xff] }
 0x595   : > { %4033 = vst [vmem:[%s6852_s18 + $0x1d0] sm:$0xff] %v3548_v22  ;;  %v3402_v18 = vmul.f32 %v2985_v0, %v7914_v57  ;;  %v7927_v0 = vld [vmem:[#allocation32_spill] sm:$0xff] }
 0x596   : > { %v3551_v54 = vadd.f32 %v6840_v32, %v3401_v48 }
 0x597   : > { %v3552_v62 = vadd.f32 %v6843_v3, %v3402_v18  ;;  %v2989_v40 = vpop.f32.mrb[224].mxu1 }
 0x598   : > { %3634 = vst [vmem:[%s6852_s18 + $0x1c8] sm:$0xff] %v3551_v54  ;;  %v3405_v49 = vmul.f32 %v2989_v40, %v7915_v11  ;;  %v2991_v17 = vpop.f32.mrb[225].mxu1  ;;  %v7928_v54 = vld [vmem:[#allocation34_spill] sm:$0xff] }
 0x599   : > { %4034 = vst [vmem:[%s6852_s18 + $0x1d8] sm:$0xff] %v3552_v62  ;;  %v3406_v19 = vmul.f32 %v2991_v17, %v7916_v58  ;;  %v7929_v17 = vld [vmem:[#allocation30_spill] sm:$0xff] }
 0x59a   : > { %v3555_v44 = vadd.f32 %v6840_v32, %v3405_v49 }
 0x59b   : > { %v3556_v26 = vadd.f32 %v6843_v3, %v3406_v19  ;;  %v2995_v46 = vpop.f32.mrb[226].mxu1 }
 0x59c   : > { %3635 = vst [vmem:[%s6852_s18 + $0x200] sm:$0xff] %v3555_v44  ;;  %v3409_v59 = vmul.f32 %v2995_v46, %v7917_v36  ;;  %v2997_v51 = vpop.f32.mrb[227].mxu1  ;;  %v7930_v44 = vld [vmem:[#allocation35_spill] sm:$0xff] }
 0x59d   : > { %4035 = vst [vmem:[%s6852_s18 + $0x210] sm:$0xff] %v3556_v26  ;;  %v3410_v55 = vmul.f32 %v2997_v51, %v7918_v14  ;;  %v7931_v51 = vld [vmem:[#allocation36_spill] sm:$0xff] }
 0x59e   : > { %v3559_v1 = vadd.f32 %v6840_v32, %v3409_v59 }
 0x59f   : > { %v3560_v28 = vadd.f32 %v6843_v3, %v3410_v55  ;;  %v3001_v6 = vpop.f32.mrb[228].mxu1 }
 0x5a0   : > { %3636 = vst [vmem:[%s6852_s18 + $0x208] sm:$0xff] %v3559_v1  ;;  %v3413_v31 = vmul.f32 %v3001_v6, %v7919_v24  ;;  %v3003_v47 = vpop.f32.mrb[229].mxu1  ;;  %v7932_v1 = vld [vmem:[#allocation33_spill] sm:$0xff] }
 0x5a1   : > { %4036 = vst [vmem:[%s6852_s18 + $0x218] sm:$0xff] %v3560_v28  ;;  %v3414_v9 = vmul.f32 %v3003_v47, %v7920_v52  ;;  %v7933_v47 = vld [vmem:[#allocation38_spill] sm:$0xff] }
 0x5a2   : > { %v3563_v8 = vadd.f32 %v6840_v32, %v3413_v31 }
 0x5a3   : > { %v3564_v37 = vadd.f32 %v6843_v3, %v3414_v9  ;;  %v3007_v45 = vpop.f32.mrb[230].mxu1 }
 0x5a4   : > { %3637 = vst [vmem:[%s6852_s18 + $0x240] sm:$0xff] %v3563_v8  ;;  %v3417_v15 = vmul.f32 %v3007_v45, %v7921_v10  ;;  %v3009_v34 = vpop.f32.mrb[231].mxu1  ;;  %v7934_v8 = vld [vmem:[#allocation40_spill] sm:$0xff] }
 0x5a5   : > { %4037 = vst [vmem:[%s6852_s18 + $0x250] sm:$0xff] %v3564_v37  ;;  %v3418_v23 = vmul.f32 %v3009_v34, %v7922_v7  ;;  %v7935_v34 = vld [vmem:[#allocation37_spill] sm:$0xff] }
 0x5a6   : > { %v3567_v50 = vadd.f32 %v6840_v32, %v3417_v15 }
 0x5a7   : > { %v3568_v39 = vadd.f32 %v6843_v3, %v3418_v23  ;;  %v3013_v33 = vpop.f32.mrb[232].mxu1 }
 0x5a8   : > { %3638 = vst [vmem:[%s6852_s18 + $0x248] sm:$0xff] %v3567_v50  ;;  %v3421_v30 = vmul.f32 %v3013_v33, %v7923_v21  ;;  %v3015_v42 = vpop.f32.mrb[233].mxu1  ;;  %v7936_v50 = vld [vmem:[#allocation41_spill] sm:$0xff] }
 0x5a9   : > { %4038 = vst [vmem:[%s6852_s18 + $0x258] sm:$0xff] %v3568_v39  ;;  %v3422_v60 = vmul.f32 %v3015_v42, %v7924_v27  ;;  %v7937_v42 = vld [vmem:[#allocation42_spill] sm:$0xff] }
 0x5aa   : > { %v3571_v2 = vadd.f32 %v6840_v32, %v3421_v30 }
 0x5ab   : > { %v3572_v25 = vadd.f32 %v6843_v3, %v3422_v60  ;;  %v3019_v4 = vpop.f32.mrb[234].mxu1 }
 0x5ac   : > { %3639 = vst [vmem:[%s6852_s18 + $0x280] sm:$0xff] %v3571_v2  ;;  %v3425_v5 = vmul.f32 %v3019_v4, %v7925_v29  ;;  %v3021_v61 = vpop.f32.mrb[235].mxu1  ;;  %v7938_v2 = vld [vmem:[#allocation39_spill] sm:$0xff] }
 0x5ad   : > { %4039 = vst [vmem:[%s6852_s18 + $0x290] sm:$0xff] %v3572_v25  ;;  %v3426_v22 = vmul.f32 %v3021_v61, %v7926_v43 }
 0x5ae   : > { %v3575_v16 = vadd.f32 %v6840_v32, %v3425_v5 }
 0x5af   : > { %v3576_v20 = vadd.f32 %v6843_v3, %v3426_v22  ;;  %v3025_v48 = vpop.f32.mrb[236].mxu1  ;;  %v7939_v22 = vld [vmem:[#allocation44_spill] sm:$0xff] }
 0x5b0   : > { %3640 = vst [vmem:[%s6852_s18 + $0x288] sm:$0xff] %v3575_v16  ;;  %v3429_v57 = vmul.f32 %v3025_v48, %v7927_v0  ;;  %v3027_v18 = vpop.f32.mrb[237].mxu1 }
 0x5b1   : > { %4040 = vst [vmem:[%s6852_s18 + $0x298] sm:$0xff] %v3576_v20  ;;  %v3430_v62 = vmul.f32 %v3027_v18, %v7928_v54 }
 0x5b2   : > { %v3579_v40 = vadd.f32 %v6840_v32, %v3429_v57  ;;  %v7940_v57 = vld [vmem:[#allocation46_spill] sm:$0xff] }
 0x5b3   : > { %v3580_v11 = vadd.f32 %v6843_v3, %v3430_v62  ;;  %v3031_v49 = vpop.f32.mrb[238].mxu1  ;;  %v7941_v62 = vld [vmem:[#allocation43_spill] sm:$0xff] }
 0x5b4   : > { %3641 = vst [vmem:[%s6852_s18 + $0x2c0] sm:$0xff] %v3579_v40  ;;  %v3433_v58 = vmul.f32 %v3031_v49, %v7929_v17  ;;  %v3033_v19 = vpop.f32.mrb[239].mxu1 }
 0x5b5   : > { %4041 = vst [vmem:[%s6852_s18 + $0x2d0] sm:$0xff] %v3580_v11  ;;  %v3434_v26 = vmul.f32 %v3033_v19, %v7930_v44  ;;  %v7942_v19 = vld [vmem:[#allocation47_spill] sm:$0xff] }
 0x5b6   : > { %v3583_v46 = vadd.f32 %v6840_v32, %v3433_v58 }
 0x5b7   : > { %v3584_v36 = vadd.f32 %v6843_v3, %v3434_v26  ;;  %v3037_v59 = vpop.f32.mrb[240].mxu1 }
 0x5b8   : > { %3642 = vst [vmem:[%s6852_s18 + $0x2c8] sm:$0xff] %v3583_v46  ;;  %v3437_v14 = vmul.f32 %v3037_v59, %v7931_v51  ;;  %v3039_v55 = vpop.f32.mrb[241].mxu1  ;;  %v3481_v46 = vsub.s32 2, %v6821_v12  ;;  %v3485_v51 = vsub.s32 3, %v6821_v12 }
 0x5b9   : > { %4042 = vst [vmem:[%s6852_s18 + $0x2d8] sm:$0xff] %v3584_v36  ;;  %v3438_v28 = vmul.f32 %v3039_v55, %v7932_v1 }
 0x5ba   : > { %v3587_v6 = vadd.f32 %v6840_v32, %v3437_v14 }
 0x5bb   : > { %v3588_v24 = vadd.f32 %v6843_v3, %v3438_v28  ;;  %v3043_v31 = vpop.f32.mrb[242].mxu1 }
 0x5bc   : > { %3643 = vst [vmem:[%s6852_s18 + $0x300] sm:$0xff] %v3587_v6  ;;  %v3441_v52 = vmul.f32 %v3043_v31, %v7933_v47  ;;  %v3045_v9 = vpop.f32.mrb[243].mxu1  ;;  %v7071_v6 = vrot.slane %v6831_v53, %v3481_v46  ;;  %v7075_v47 = vrot.slane %v6831_v53, %v3485_v51 }
 0x5bd   : > { %4043 = vst [vmem:[%s6852_s18 + $0x310] sm:$0xff] %v3588_v24  ;;  %v3442_v37 = vmul.f32 %v3045_v9, %v7934_v8 }
 0x5be   : > { %v3591_v45 = vadd.f32 %v6840_v32, %v3441_v52  ;;  %v7944_v52 = vld [vmem:[#allocation45_spill] sm:$0xff] }
 0x5bf   : > { %v3592_v10 = vadd.f32 %v6843_v3, %v3442_v37  ;;  %v3049_v15 = vpop.f32.mrb[244].mxu1 }
 0x5c0   : > { %3644 = vst [vmem:[%s6852_s18 + $0x308] sm:$0xff] %v3591_v45  ;;  %v3445_v7 = vmul.f32 %v3049_v15, %v7935_v34  ;;  %v3051_v23 = vpop.f32.mrb[245].mxu1  ;;  %v7945_v34 = vld [vmem:[#allocation50_spill] sm:$0xff] }
 0x5c1   : > { %4044 = vst [vmem:[%s6852_s18 + $0x318] sm:$0xff] %v3592_v10  ;;  %v3446_v39 = vmul.f32 %v3051_v23, %v7936_v50  ;;  %v7946_v50 = vld [vmem:[#allocation52_spill] sm:$0xff] }
 0x5c2   : > { %v3595_v33 = vadd.f32 %v6840_v32, %v3445_v7 }
 0x5c3   : > { %v3596_v21 = vadd.f32 %v6843_v3, %v3446_v39  ;;  %v3055_v30 = vpop.f32.mrb[246].mxu1 }
 0x5c4   : > { %3645 = vst [vmem:[%s6852_s18 + $0x340] sm:$0xff] %v3595_v33  ;;  %v3449_v27 = vmul.f32 %v3055_v30, %v7937_v42  ;;  %v3057_v60 = vpop.f32.mrb[247].mxu1 }
 0x5c5   : > { %4045 = vst [vmem:[%s6852_s18 + $0x350] sm:$0xff] %v3596_v21  ;;  %v3450_v25 = vmul.f32 %v3057_v60, %v7938_v2 }
 0x5c6   : > { %v3599_v4 = vadd.f32 %v6840_v32, %v3449_v27  ;;  %v7948_v27 = vld [vmem:[#allocation53_spill] sm:$0xff] }
 0x5c7   : > { %v3600_v29 = vadd.f32 %v6843_v3, %v3450_v25  ;;  %v3061_v5 = vpop.f32.mrb[248].mxu1 }
 0x5c8   : > { %3646 = vst [vmem:[%s6852_s18 + $0x348] sm:$0xff] %v3599_v4  ;;  %v3453_v61 = vmul.f32 %v3061_v5, %v6233_v35  ;;  %v3063_v43 = vpop.f32.mrb[249].mxu1 }
 0x5c9   : > { %4046 = vst [vmem:[%s6852_s18 + $0x358] sm:$0xff] %v3600_v29  ;;  %v3454_v16 = vmul.f32 %v3063_v43, %v7939_v22  ;;  %v7949_v29 = vld [vmem:[#allocation54_spill] sm:$0xff]  ;;  %v7950_v43 = vld [vmem:[#allocation51_spill] sm:$0xff] }
 0x5ca   : > { %v3603_v20 = vadd.f32 %v6840_v32, %v3453_v61 }
 0x5cb   : > { %v3604_v48 = vadd.f32 %v6843_v3, %v3454_v16  ;;  %v3067_v0 = vpop.f32.mrb[250].mxu1 }
 0x5cc   : > { %3647 = vst [vmem:[%s6852_s18 + $0x380] sm:$0xff] %v3603_v20  ;;  %v3457_v18 = vmul.f32 %v3067_v0, %v7940_v57  ;;  %v3069_v54 = vpop.f32.mrb[251].mxu1  ;;  %v7951_v0 = vld [vmem:[#allocation56_spill] sm:$0xff] }
 0x5cd   : > { %4047 = vst [vmem:[%s6852_s18 + $0x390] sm:$0xff] %v3604_v48  ;;  %v3458_v40 = vmul.f32 %v3069_v54, %v7941_v62  ;;  %v7952_v54 = vld [vmem:[#allocation57_spill] sm:$0xff] }
 0x5ce   : > { %v3607_v35 = vadd.f32 %v6840_v32, %v3457_v18 }
 0x5cf   : > { %v3608_v11 = vadd.f32 %v6843_v3, %v3458_v40  ;;  %v3073_v49 = vpop.f32.mrb[252].mxu1 }
 0x5d0   : > { %3648 = vst [vmem:[%s6852_s18 + $0x388] sm:$0xff] %v3607_v35  ;;  %v3461_v17 = vmul.f32 %v3073_v49, %v6253_v41  ;;  %v3075_v58 = vpop.f32.mrb[253].mxu1  ;;  %v7943_v41 = vld [vmem:[#allocation48_spill] sm:$0xff]  ;;  %v7953_v49 = vld [vmem:[#allocation55_spill] sm:$0xff] }
 0x5d1   : > { %4048 = vst [vmem:[%s6852_s18 + $0x398] sm:$0xff] %v3608_v11  ;;  %v3462_v44 = vmul.f32 %v3075_v58, %v7942_v19  ;;  %v7954_v19 = vld [vmem:[#allocation58_spill] sm:$0xff] }
 0x5d2   : > { %v3611_v26 = vadd.f32 %v6840_v32, %v3461_v17 }
 0x5d3   : > { %v3612_v36 = vadd.f32 %v6843_v3, %v3462_v44  ;;  %v3079_v59 = vpop.f32.mrb[254].mxu1 }
 0x5d4   : > { %3649 = vst [vmem:[%s6852_s18 + $0x3c0] sm:$0xff] %v3611_v26  ;;  %v3465_v14 = vmul.f32 %v3079_v59, %v6263_v38  ;;  %v3081_v55 = vpop.f32.mrb[255].mxu1  ;;  %v7955_v59 = vld [vmem:[#allocation59_spill] sm:$0xff] }
 0x5d5   : > { %4049 = vst [vmem:[%s6852_s18 + $0x3d0] sm:$0xff] %v3612_v36  ;;  %v3466_v1 = vmul.f32 %v3081_v55, %v7943_v41  ;;  %v7956_v55 = vld [vmem:[#allocation60_spill] sm:$0xff] }
 0x5d6   : > { %v3615_v28 = vadd.f32 %v6840_v32, %v3465_v14 }
 0x5d7   : > { %v3616_v24 = vadd.f32 %v6843_v3, %v3466_v1  ;;  %v3150_v31 = vpop.f32.mrb[0].mxu1 }
 0x5d8   : > { %3650 = vst [vmem:[%s6852_s18 + $0x3c8] sm:$0xff] %v3615_v28  ;;  %v3343_v38 = vmul.f32 %v3150_v31, %v6273_v63  ;;  %v3152_v12 = vpop.f32.mrb[1].mxu1  ;;  %v7957_v31 = vld [vmem:[#allocation61_spill] sm:$0xff] }
 0x5d9   : > { %4050 = vst [vmem:[%s6852_s18 + $0x3d8] sm:$0xff] %v3616_v24  ;;  %v3344_v9 = vmul.f32 %v3152_v12, %v7944_v52  ;;  %v7958_v52 = vld [vmem:[#allocation62_spill] sm:$0xff] }
 0x5da   : > { %v3493_v32 = vadd.f32 %v7071_v6, %v3343_v38 }
 0x5db   : > { %v3494_v8 = vadd.f32 %v7075_v47, %v3344_v9  ;;  %v3156_v37 = vpop.f32.mrb[2].mxu1 }
 0x5dc   : > { %4051 = vst [vmem:[%s6852_s18 + $0x20] sm:$0xff] %v3493_v32  ;;  %v3347_v3 = vmul.f32 %v3156_v37, %v6283_v13  ;;  %v3158_v53 = vpop.f32.mrb[3].mxu1 }
 0x5dd   : > { %4083 = vst [vmem:[%s6852_s18 + $0x30] sm:$0xff] %v3494_v8  ;;  %v3348_v45 = vmul.f32 %v3158_v53, %v6286_v56  ;;  %v7947_v56 = vld [vmem:[#allocation49_spill] sm:$0xff] }
 0x5de   : > { %v3497_v63 = vadd.f32 %v7071_v6, %v3347_v3  ;;  %v7959_v3 = vld [vmem:[#allocation63_spill] sm:$0xff] }
 0x5df   : > { %v3498_v10 = vadd.f32 %v7075_v47, %v3348_v45  ;;  %v3162_v15 = vpop.f32.mrb[4].mxu1 }
 0x5e0   : > { %4052 = vst [vmem:[%s6852_s18 + $0x28] sm:$0xff] %v3497_v63  ;;  %v3351_v7 = vmul.f32 %v3162_v15, %v7945_v34  ;;  %v3164_v23 = vpop.f32.mrb[5].mxu1  ;;  %v7960_v63 = vld [vmem:[#allocation66_spill] sm:$0xff] }
 0x5e1   : > { %4084 = vst [vmem:[%s6852_s18 + $0x38] sm:$0xff] %v3498_v10  ;;  %v3352_v39 = vmul.f32 %v3164_v23, %v7946_v50  ;;  %v7961_v23 = vld [vmem:[#allocation68_spill] sm:$0xff] }
 0x5e2   : > { %v3501_v13 = vadd.f32 %v7071_v6, %v3351_v7 }
 0x5e3   : > { %v3502_v33 = vadd.f32 %v7075_v47, %v3352_v39  ;;  %v3168_v21 = vpop.f32.mrb[6].mxu1 }
 0x5e4   : > { %4053 = vst [vmem:[%s6852_s18 + $0x60] sm:$0xff] %v3501_v13  ;;  %v3355_v30 = vmul.f32 %v3168_v21, %v7947_v56  ;;  %v3170_v42 = vpop.f32.mrb[7].mxu1  ;;  %v7962_v13 = vld [vmem:[#allocation69_spill] sm:$0xff] }
 0x5e5   : > { %4085 = vst [vmem:[%s6852_s18 + $0x70] sm:$0xff] %v3502_v33  ;;  %v3356_v60 = vmul.f32 %v3170_v42, %v7948_v27  ;;  %v7963_v42 = vld [vmem:[#allocation70_spill] sm:$0xff] }
 0x5e6   : > { %v3505_v2 = vadd.f32 %v7071_v6, %v3355_v30 }
 0x5e7   : > { %v3506_v25 = vadd.f32 %v7075_v47, %v3356_v60  ;;  %v3174_v4 = vpop.f32.mrb[8].mxu1 }
 0x5e8   : > { %4054 = vst [vmem:[%s6852_s18 + $0x68] sm:$0xff] %v3505_v2  ;;  %v3359_v5 = vmul.f32 %v3174_v4, %v7949_v29  ;;  %v3176_v61 = vpop.f32.mrb[9].mxu1  ;;  %v7964_v2 = vld [vmem:[#allocation74_spill] sm:$0xff] }
 0x5e9   : > { %4086 = vst [vmem:[%s6852_s18 + $0x78] sm:$0xff] %v3506_v25  ;;  %v3360_v22 = vmul.f32 %v3176_v61, %v7950_v43  ;;  %v7965_v61 = vld [vmem:[#allocation76_spill] sm:$0xff] }
 0x5ea   : > { %v3509_v16 = vadd.f32 %v7071_v6, %v3359_v5 }
 0x5eb   : > { %v3510_v20 = vadd.f32 %v7075_v47, %v3360_v22  ;;  %v3180_v48 = vpop.f32.mrb[10].mxu1 }
 0x5ec   : > { %4055 = vst [vmem:[%s6852_s18 + $0xa0] sm:$0xff] %v3509_v16  ;;  %v3363_v57 = vmul.f32 %v3180_v48, %v7951_v0  ;;  %v3182_v18 = vpop.f32.mrb[11].mxu1  ;;  %v7966_v16 = vld [vmem:[#allocation77_spill] sm:$0xff] }
 0x5ed   : > { %4087 = vst [vmem:[%s6852_s18 + $0xb0] sm:$0xff] %v3510_v20  ;;  %v3364_v62 = vmul.f32 %v3182_v18, %v7952_v54  ;;  %v7967_v18 = vld [vmem:[#allocation78_spill] sm:$0xff] }
 0x5ee   : > { %v3513_v40 = vadd.f32 %v7071_v6, %v3363_v57 }
 0x5ef   : > { %v3514_v35 = vadd.f32 %v7075_v47, %v3364_v62  ;;  %v3186_v11 = vpop.f32.mrb[12].mxu1 }
 0x5f0   : > { %4056 = vst [vmem:[%s6852_s18 + $0xa8] sm:$0xff] %v3513_v40  ;;  %v3367_v17 = vmul.f32 %v3186_v11, %v7953_v49  ;;  %v3188_v58 = vpop.f32.mrb[13].mxu1  ;;  %v7968_v40 = vld [vmem:[#allocation82_spill] sm:$0xff] }
 0x5f1   : > { %4088 = vst [vmem:[%s6852_s18 + $0xb8] sm:$0xff] %v3514_v35  ;;  %v3368_v44 = vmul.f32 %v3188_v58, %v7954_v19  ;;  %v7969_v58 = vld [vmem:[#allocation84_spill] sm:$0xff] }
 0x5f2   : > { %v3517_v26 = vadd.f32 %v7071_v6, %v3367_v17 }
 0x5f3   : > { %v3518_v46 = vadd.f32 %v7075_v47, %v3368_v44  ;;  %v3192_v36 = vpop.f32.mrb[14].mxu1 }
 0x5f4   : > { %4057 = vst [vmem:[%s6852_s18 + $0xe0] sm:$0xff] %v3517_v26  ;;  %v3371_v51 = vmul.f32 %v3192_v36, %v7955_v59  ;;  %v3194_v14 = vpop.f32.mrb[15].mxu1  ;;  %v7970_v26 = vld [vmem:[#allocation85_spill] sm:$0xff] }
 0x5f5   : > { %4089 = vst [vmem:[%s6852_s18 + $0xf0] sm:$0xff] %v3518_v46  ;;  %v3372_v41 = vmul.f32 %v3194_v14, %v7956_v55  ;;  %v7971_v14 = vld [vmem:[#allocation86_spill] sm:$0xff] }
 0x5f6   : > { %v3521_v1 = vadd.f32 %v7071_v6, %v3371_v51 }
 0x5f7   : > { %v3522_v28 = vadd.f32 %v7075_v47, %v3372_v41  ;;  %v3198_v24 = vpop.f32.mrb[16].mxu1 }
 0x5f8   : > { %4058 = vst [vmem:[%s6852_s18 + $0xe8] sm:$0xff] %v3521_v1  ;;  %v3375_v38 = vmul.f32 %v3198_v24, %v7957_v31  ;;  %v3200_v12 = vpop.f32.mrb[17].mxu1  ;;  %v7972_v1 = vld [vmem:[#allocation90_spill] sm:$0xff] }
 0x5f9   : > { %4090 = vst [vmem:[%s6852_s18 + $0xf8] sm:$0xff] %v3522_v28  ;;  %v3376_v9 = vmul.f32 %v3200_v12, %v7958_v52  ;;  %v7973_v12 = vld [vmem:[#allocation92_spill] sm:$0xff] }
 0x5fa   : > { %v3525_v32 = vadd.f32 %v7071_v6, %v3375_v38 }
 0x5fb   : > { %v3526_v8 = vadd.f32 %v7075_v47, %v3376_v9  ;;  %v3204_v37 = vpop.f32.mrb[18].mxu1 }
 0x5fc   : > { %4059 = vst [vmem:[%s6852_s18 + $0x120] sm:$0xff] %v3525_v32  ;;  %v3379_v53 = vmul.f32 %v3204_v37, %v7959_v3  ;;  %v3206_v45 = vpop.f32.mrb[19].mxu1  ;;  %v7974_v32 = vld [vmem:[#allocation93_spill] sm:$0xff] }
 0x5fd   : > { %4091 = vst [vmem:[%s6852_s18 + $0x130] sm:$0xff] %v3526_v8  ;;  %v3380_v10 = vmul.f32 %v3206_v45, %v7960_v63  ;;  %v7975_v45 = vld [vmem:[#allocation94_spill] sm:$0xff] }
 0x5fe   : > { %v3529_v15 = vadd.f32 %v7071_v6, %v3379_v53 }
 0x5ff   : > { %v3530_v34 = vadd.f32 %v7075_v47, %v3380_v10  ;;  %v3210_v7 = vpop.f32.mrb[20].mxu1 }
 0x600   : > { %4060 = vst [vmem:[%s6852_s18 + $0x128] sm:$0xff] %v3529_v15  ;;  %v3383_v50 = vmul.f32 %v3210_v7, %v7961_v23  ;;  %v3212_v39 = vpop.f32.mrb[21].mxu1  ;;  %v7976_v15 = vld [vmem:[#allocation98_spill] sm:$0xff] }
 0x601   : > { %4092 = vst [vmem:[%s6852_s18 + $0x138] sm:$0xff] %v3530_v34  ;;  %v3384_v33 = vmul.f32 %v3212_v39, %v7962_v13  ;;  %v7977_v39 = vld [vmem:[#allocation100_spill] sm:$0xff] }
 0x602   : > { %v3533_v21 = vadd.f32 %v7071_v6, %v3383_v50 }
 0x603   : > { %v3534_v56 = vadd.f32 %v7075_v47, %v3384_v33  ;;  %v3216_v30 = vpop.f32.mrb[22].mxu1 }
 0x604   : > { %4061 = vst [vmem:[%s6852_s18 + $0x160] sm:$0xff] %v3533_v21  ;;  %v3387_v27 = vmul.f32 %v3216_v30, %v7963_v42  ;;  %v3218_v60 = vpop.f32.mrb[23].mxu1  ;;  %v7978_v21 = vld [vmem:[#allocation101_spill] sm:$0xff] }
 0x605   : > { %4093 = vst [vmem:[%s6852_s18 + $0x170] sm:$0xff] %v3534_v56  ;;  %v3388_v25 = vmul.f32 %v3218_v60, %v7964_v2  ;;  %v7979_v60 = vld [vmem:[#allocation102_spill] sm:$0xff] }
 0x606   : > { %v3537_v4 = vadd.f32 %v7071_v6, %v3387_v27 }
 0x607   : > { %v3538_v29 = vadd.f32 %v7075_v47, %v3388_v25  ;;  %v3222_v5 = vpop.f32.mrb[24].mxu1 }
 0x608   : > { %4062 = vst [vmem:[%s6852_s18 + $0x168] sm:$0xff] %v3537_v4  ;;  %v3391_v43 = vmul.f32 %v3222_v5, %v7965_v61  ;;  %v3224_v22 = vpop.f32.mrb[25].mxu1  ;;  %v7980_v4 = vld [vmem:[#allocation107_spill] sm:$0xff] }
 0x609   : > { %4094 = vst [vmem:[%s6852_s18 + $0x178] sm:$0xff] %v3538_v29  ;;  %v3392_v20 = vmul.f32 %v3224_v22, %v7966_v16  ;;  %v7981_v22 = vld [vmem:[#allocation108_spill] sm:$0xff] }
 0x60a   : > { %v3541_v48 = vadd.f32 %v7071_v6, %v3391_v43 }
 0x60b   : > { %v3542_v0 = vadd.f32 %v7075_v47, %v3392_v20  ;;  %v3228_v57 = vpop.f32.mrb[26].mxu1 }
 0x60c   : > { %4063 = vst [vmem:[%s6852_s18 + $0x1a0] sm:$0xff] %v3541_v48  ;;  %v3395_v54 = vmul.f32 %v3228_v57, %v7967_v18  ;;  %v3230_v62 = vpop.f32.mrb[27].mxu1  ;;  %v7982_v48 = vld [vmem:[#allocation109_spill] sm:$0xff] }
 0x60d   : > { %4095 = vst [vmem:[%s6852_s18 + $0x1b0] sm:$0xff] %v3542_v0  ;;  %v3396_v35 = vmul.f32 %v3230_v62, %v7968_v40  ;;  %v7983_v62 = vld [vmem:[#allocation23_spill] sm:$0xff] }
 0x60e   : > { %v3545_v11 = vadd.f32 %v7071_v6, %v3395_v54 }
 0x60f   : > { %v3546_v49 = vadd.f32 %v7075_v47, %v3396_v35  ;;  %v3234_v17 = vpop.f32.mrb[28].mxu1 }
 0x610   : > { %4064 = vst [vmem:[%s6852_s18 + $0x1a8] sm:$0xff] %v3545_v11  ;;  %v3399_v19 = vmul.f32 %v3234_v17, %v7969_v58  ;;  %v3236_v44 = vpop.f32.mrb[29].mxu1  ;;  %v7984_v11 = vld [vmem:[#allocation26_spill] sm:$0xff] }
 0x611   : > { %4096 = vst [vmem:[%s6852_s18 + $0x1b8] sm:$0xff] %v3546_v49  ;;  %v3400_v46 = vmul.f32 %v3236_v44, %v7970_v26  ;;  %v7985_v44 = vld [vmem:[#allocation31_spill] sm:$0xff] }
 0x612   : > { %v3549_v36 = vadd.f32 %v7071_v6, %v3399_v19 }
 0x613   : > { %v3550_v59 = vadd.f32 %v7075_v47, %v3400_v46  ;;  %v3240_v51 = vpop.f32.mrb[30].mxu1 }
 0x614   : > { %4065 = vst [vmem:[%s6852_s18 + $0x1e0] sm:$0xff] %v3549_v36  ;;  %v3403_v55 = vmul.f32 %v3240_v51, %v7971_v14  ;;  %v3242_v41 = vpop.f32.mrb[31].mxu1  ;;  %v7986_v36 = vld [vmem:[#allocation64_spill] sm:$0xff] }
 0x615   : > { %4097 = vst [vmem:[%s6852_s18 + $0x1f0] sm:$0xff] %v3550_v59  ;;  %v3404_v28 = vmul.f32 %v3242_v41, %v7972_v1  ;;  %v7987_v41 = vld [vmem:[#allocation65_spill] sm:$0xff] }
 0x616   : > { %v3553_v24 = vadd.f32 %v7071_v6, %v3403_v55 }
 0x617   : > { %v3554_v31 = vadd.f32 %v7075_v47, %v3404_v28  ;;  %v3246_v38 = vpop.f32.mrb[32].mxu1 }
 0x618   : > { %4066 = vst [vmem:[%s6852_s18 + $0x1e8] sm:$0xff] %v3553_v24  ;;  %v3407_v52 = vmul.f32 %v3246_v38, %v7973_v12  ;;  %v3248_v9 = vpop.f32.mrb[33].mxu1  ;;  %v7988_v24 = vld [vmem:[#allocation67_spill] sm:$0xff] }
 0x619   : > { %4098 = vst [vmem:[%s6852_s18 + $0x1f8] sm:$0xff] %v3554_v31  ;;  %v3408_v8 = vmul.f32 %v3248_v9, %v7974_v32  ;;  %v7989_v9 = vld [vmem:[#allocation71_spill] sm:$0xff] }
 0x61a   : > { %v3557_v37 = vadd.f32 %v7071_v6, %v3407_v52 }
 0x61b   : > { %v3558_v3 = vadd.f32 %v7075_v47, %v3408_v8  ;;  %v3252_v53 = vpop.f32.mrb[34].mxu1 }
 0x61c   : > { %4067 = vst [vmem:[%s6852_s18 + $0x220] sm:$0xff] %v3557_v37  ;;  %v3411_v63 = vmul.f32 %v3252_v53, %v7975_v45  ;;  %v3254_v10 = vpop.f32.mrb[35].mxu1  ;;  %v7990_v37 = vld [vmem:[#allocation72_spill] sm:$0xff] }
 0x61d   : > { %4099 = vst [vmem:[%s6852_s18 + $0x230] sm:$0xff] %v3558_v3  ;;  %v3412_v34 = vmul.f32 %v3254_v10, %v7976_v15  ;;  %v7991_v10 = vld [vmem:[#allocation73_spill] sm:$0xff] }
 0x61e   : > { %v3561_v7 = vadd.f32 %v7071_v6, %v3411_v63 }
 0x61f   : > { %v3562_v23 = vadd.f32 %v7075_v47, %v3412_v34  ;;  %v3258_v50 = vpop.f32.mrb[36].mxu1 }
 0x620   : > { %4068 = vst [vmem:[%s6852_s18 + $0x228] sm:$0xff] %v3561_v7  ;;  %v3415_v13 = vmul.f32 %v3258_v50, %v7977_v39  ;;  %v3260_v33 = vpop.f32.mrb[37].mxu1  ;;  %v7992_v7 = vld [vmem:[#allocation75_spill] sm:$0xff] }
 0x621   : > { %4100 = vst [vmem:[%s6852_s18 + $0x238] sm:$0xff] %v3562_v23  ;;  %v3416_v56 = vmul.f32 %v3260_v33, %v7978_v21  ;;  %v7993_v33 = vld [vmem:[#allocation79_spill] sm:$0xff] }
 0x622   : > { %v3565_v30 = vadd.f32 %v7071_v6, %v3415_v13 }
 0x623   : > { %v3566_v42 = vadd.f32 %v7075_v47, %v3416_v56  ;;  %v3264_v27 = vpop.f32.mrb[38].mxu1 }
 0x624   : > { %4069 = vst [vmem:[%s6852_s18 + $0x260] sm:$0xff] %v3565_v30  ;;  %v3419_v2 = vmul.f32 %v3264_v27, %v7979_v60  ;;  %v3266_v25 = vpop.f32.mrb[39].mxu1  ;;  %v7994_v30 = vld [vmem:[#allocation80_spill] sm:$0xff] }
 0x625   : > { %4101 = vst [vmem:[%s6852_s18 + $0x270] sm:$0xff] %v3566_v42  ;;  %v3420_v29 = vmul.f32 %v3266_v25, %v7980_v4  ;;  %v7995_v25 = vld [vmem:[#allocation81_spill] sm:$0xff] }
 0x626   : > { %v3569_v5 = vadd.f32 %v7071_v6, %v3419_v2 }
 0x627   : > { %v3570_v61 = vadd.f32 %v7075_v47, %v3420_v29  ;;  %v3270_v43 = vpop.f32.mrb[40].mxu1 }
 0x628   : > { %4070 = vst [vmem:[%s6852_s18 + $0x268] sm:$0xff] %v3569_v5  ;;  %v3423_v16 = vmul.f32 %v3270_v43, %v7981_v22  ;;  %v3272_v20 = vpop.f32.mrb[41].mxu1  ;;  %v7996_v5 = vld [vmem:[#allocation83_spill] sm:$0xff] }
 0x629   : > { %4102 = vst [vmem:[%s6852_s18 + $0x278] sm:$0xff] %v3570_v61  ;;  %v3424_v0 = vmul.f32 %v3272_v20, %v7982_v48  ;;  %v7997_v20 = vld [vmem:[#allocation87_spill] sm:$0xff] }
 0x62a   : > { %v3573_v57 = vadd.f32 %v7071_v6, %v3423_v16 }
 0x62b   : > { %v3574_v18 = vadd.f32 %v7075_v47, %v3424_v0  ;;  %v3276_v54 = vpop.f32.mrb[42].mxu1 }
 0x62c   : > { %4071 = vst [vmem:[%s6852_s18 + $0x2a0] sm:$0xff] %v3573_v57  ;;  %v3427_v40 = vmul.f32 %v3276_v54, %v7983_v62  ;;  %v3278_v35 = vpop.f32.mrb[43].mxu1  ;;  %v7998_v57 = vld [vmem:[#allocation88_spill] sm:$0xff] }
 0x62d   : > { %4103 = vst [vmem:[%s6852_s18 + $0x2b0] sm:$0xff] %v3574_v18  ;;  %v3428_v49 = vmul.f32 %v3278_v35, %v7984_v11  ;;  %v7999_v35 = vld [vmem:[#allocation89_spill] sm:$0xff] }
 0x62e   : > { %v3577_v17 = vadd.f32 %v7071_v6, %v3427_v40 }
 0x62f   : > { %v3578_v58 = vadd.f32 %v7075_v47, %v3428_v49  ;;  %v3282_v19 = vpop.f32.mrb[44].mxu1 }
 0x630   : > { %4072 = vst [vmem:[%s6852_s18 + $0x2a8] sm:$0xff] %v3577_v17  ;;  %v3431_v26 = vmul.f32 %v3282_v19, %v7985_v44  ;;  %v3284_v46 = vpop.f32.mrb[45].mxu1  ;;  %v8000_v17 = vld [vmem:[#allocation91_spill] sm:$0xff] }
 0x631   : > { %4104 = vst [vmem:[%s6852_s18 + $0x2b8] sm:$0xff] %v3578_v58  ;;  %v3432_v59 = vmul.f32 %v3284_v46, %v7986_v36  ;;  %v8001_v46 = vld [vmem:[#allocation95_spill] sm:$0xff] }
 0x632   : > { %v3581_v51 = vadd.f32 %v7071_v6, %v3431_v26 }
 0x633   : > { %v3582_v14 = vadd.f32 %v7075_v47, %v3432_v59  ;;  %v3288_v55 = vpop.f32.mrb[46].mxu1 }
 0x634   : > { %4073 = vst [vmem:[%s6852_s18 + $0x2e0] sm:$0xff] %v3581_v51  ;;  %v3435_v1 = vmul.f32 %v3288_v55, %v7987_v41  ;;  %v3290_v28 = vpop.f32.mrb[47].mxu1  ;;  %v8002_v51 = vld [vmem:[#allocation96_spill] sm:$0xff] }
 0x635   : > { %4105 = vst [vmem:[%s6852_s18 + $0x2f0] sm:$0xff] %v3582_v14  ;;  %v3436_v31 = vmul.f32 %v3290_v28, %v7988_v24  ;;  %v8003_v28 = vld [vmem:[#allocation97_spill] sm:$0xff] }
 0x636   : > { %v3585_v38 = vadd.f32 %v7071_v6, %v3435_v1 }
 0x637   : > { %v3586_v12 = vadd.f32 %v7075_v47, %v3436_v31  ;;  %v3294_v52 = vpop.f32.mrb[48].mxu1 }
 0x638   : > { %4074 = vst [vmem:[%s6852_s18 + $0x2e8] sm:$0xff] %v3585_v38  ;;  %v3439_v32 = vmul.f32 %v3294_v52, %v7989_v9  ;;  %v3296_v8 = vpop.f32.mrb[49].mxu1  ;;  %v8004_v38 = vld [vmem:[#allocation99_spill] sm:$0xff] }
 0x639   : > { %4106 = vst [vmem:[%s6852_s18 + $0x2f8] sm:$0xff] %v3586_v12  ;;  %v3440_v3 = vmul.f32 %v3296_v8, %v7990_v37 }
 0x63a   : > { %v3589_v53 = vadd.f32 %v7071_v6, %v3439_v32 }
 0x63b   : > { %v3590_v45 = vadd.f32 %v7075_v47, %v3440_v3  ;;  %v3300_v63 = vpop.f32.mrb[50].mxu1 }
 0x63c   : > { %4075 = vst [vmem:[%s6852_s18 + $0x320] sm:$0xff] %v3589_v53  ;;  %v3443_v15 = vmul.f32 %v3300_v63, %v7991_v10  ;;  %v3302_v34 = vpop.f32.mrb[51].mxu1 }
 0x63d   : > { %4107 = vst [vmem:[%s6852_s18 + $0x330] sm:$0xff] %v3590_v45  ;;  %v3444_v23 = vmul.f32 %v3302_v34, %v7992_v7 }
 0x63e   : > { %v3593_v50 = vadd.f32 %v7071_v6, %v3443_v15 }
 0x63f   : > { %v3594_v39 = vadd.f32 %v7075_v47, %v3444_v23  ;;  %v3306_v13 = vpop.f32.mrb[52].mxu1 }
 0x640   : > { %4076 = vst [vmem:[%s6852_s18 + $0x328] sm:$0xff] %v3593_v50  ;;  %v3447_v21 = vmul.f32 %v3306_v13, %v7993_v33  ;;  %v3308_v56 = vpop.f32.mrb[53].mxu1 }
 0x641   : > { %4108 = vst [vmem:[%s6852_s18 + $0x338] sm:$0xff] %v3594_v39  ;;  %v3448_v42 = vmul.f32 %v3308_v56, %v7994_v30 }
 0x642   : > { %v3597_v27 = vadd.f32 %v7071_v6, %v3447_v21 }
 0x643   : > { %v3598_v60 = vadd.f32 %v7075_v47, %v3448_v42  ;;  %v3312_v2 = vpop.f32.mrb[54].mxu1 }
 0x644   : > { %4077 = vst [vmem:[%s6852_s18 + $0x360] sm:$0xff] %v3597_v27  ;;  %v3451_v4 = vmul.f32 %v3312_v2, %v7995_v25  ;;  %v3314_v29 = vpop.f32.mrb[55].mxu1 }
 0x645   : > { %4109 = vst [vmem:[%s6852_s18 + $0x370] sm:$0xff] %v3598_v60  ;;  %v3452_v61 = vmul.f32 %v3314_v29, %v7996_v5 }
 0x646   : > { %v3601_v43 = vadd.f32 %v7071_v6, %v3451_v4 }
 0x647   : > { %v3602_v22 = vadd.f32 %v7075_v47, %v3452_v61  ;;  %v3318_v16 = vpop.f32.mrb[56].mxu1 }
 0x648   : > { %4078 = vst [vmem:[%s6852_s18 + $0x368] sm:$0xff] %v3601_v43  ;;  %v3455_v48 = vmul.f32 %v3318_v16, %v7997_v20  ;;  %v3320_v0 = vpop.f32.mrb[57].mxu1 }
 0x649   : > { %4110 = vst [vmem:[%s6852_s18 + $0x378] sm:$0xff] %v3602_v22  ;;  %v3456_v18 = vmul.f32 %v3320_v0, %v7998_v57 }
 0x64a   : > { %v3605_v54 = vadd.f32 %v7071_v6, %v3455_v48 }
 0x64b   : > { %v3606_v62 = vadd.f32 %v7075_v47, %v3456_v18  ;;  %v3324_v40 = vpop.f32.mrb[58].mxu1 }
 0x64c   : > { %4079 = vst [vmem:[%s6852_s18 + $0x3a0] sm:$0xff] %v3605_v54  ;;  %v3459_v11 = vmul.f32 %v3324_v40, %v7999_v35  ;;  %v3326_v49 = vpop.f32.mrb[59].mxu1 }
 0x64d   : > { %4111 = vst [vmem:[%s6852_s18 + $0x3b0] sm:$0xff] %v3606_v62  ;;  %v3460_v58 = vmul.f32 %v3326_v49, %v8000_v17 }
 0x64e   : > { %v3609_v19 = vadd.f32 %v7071_v6, %v3459_v11 }
 0x64f   : > { %v3610_v44 = vadd.f32 %v7075_v47, %v3460_v58  ;;  %v3330_v26 = vpop.f32.mrb[60].mxu1 }
 0x650   : > { %4080 = vst [vmem:[%s6852_s18 + $0x3a8] sm:$0xff] %v3609_v19  ;;  %v3463_v36 = vmul.f32 %v3330_v26, %v8001_v46  ;;  %v3332_v59 = vpop.f32.mrb[61].mxu1 }
 0x651   : > { %4112 = vst [vmem:[%s6852_s18 + $0x3b8] sm:$0xff] %v3610_v44  ;;  %v3464_v14 = vmul.f32 %v3332_v59, %v8002_v51 }
 0x652   : > { %v3613_v55 = vadd.f32 %v7071_v6, %v3463_v36 }
 0x653   : > { %v3614_v41 = vadd.f32 %v7075_v47, %v3464_v14  ;;  %v3336_v1 = vpop.f32.mrb[62].mxu1 }
 0x654   : > { %4081 = vst [vmem:[%s6852_s18 + $0x3e0] sm:$0xff] %v3613_v55  ;;  %v3467_v24 = vmul.f32 %v3336_v1, %v8003_v28  ;;  %v3338_v31 = vpop.f32.mrb[63].mxu1 }
 0x655   : > { %4113 = vst [vmem:[%s6852_s18 + $0x3f0] sm:$0xff] %v3614_v41  ;;  %v3468_v12 = vmul.f32 %v3338_v31, %v8004_v38 }
 0x656   : > { %v3617_v52 = vadd.f32 %v7071_v6, %v3467_v24 }
 0x657   : > { %v3618_v9 = vadd.f32 %v7075_v47, %v3468_v12 }
 0x658   : > { %4082 = vst [vmem:[%s6852_s18 + $0x3e8] sm:$0xff] %v3617_v52 }
 0x659   : > { %4114 = vst [vmem:[%s6852_s18 + $0x3f8] sm:$0xff] %v3618_v9 }
 0x65a   : > { %4641 = shalt.err (!%p4638_p3)
}
 0x65b   : > { %s4642_s14 = scalar_lea.hbm %s7273_s29, 16384  ;;  %s4646_s17 = scalar_lea.hbm %s7329_s6, 32768 }
 0x65c   : > { %p4643_p4 = scmp.ne.s32.totalorder %s7273_s29, %s4642_s14  ;;  %p4647_p9 = scmp.lt.u32.totalorder %s7273_s29, %s7329_s6 }
 0x65d   : > { %p4648_p10 = scmp.lt.u32.totalorder %s4646_s17, %s4642_s14  ;;  %p4650_p12 = scmp.lt.u32.totalorder %s4642_s14, %s7273_s29 }
 0x65e   : > { %p4644_p7 = pnand %p4643_p4, %p4771_p5 }
 0x65f   : > { %p4649_p11 = por %p4648_p10, %p4647_p9 }
 0x660   : > { %p4645_p8 = pneg %p4644_p7 }
 0x661   : > { %p4651_p13 = por %p4650_p12, %p4649_p11 }
 0x663   : > { %p4652_p0 = pnand %p4651_p13, %p4645_p8 }
 0x665   : > { %4655 = shalt.err (!%p4652_p0)
}
 0x666   : > { %s4696_s19 = smov 128   ;;  %s4697_s26 = smov 8  }
 0x667   : > { %4492 = dma.vmem_to_hbm [thread:$0]  (%p4771_p5), %s7275_s20, 16384, %s7273_s29, %s7282_s25, %s4696_s19, %s4696_s19, %s4697_s26  }
 0x668 PF: > { %p4498_p1 = scmp.ge.s32.totalorder %s4690_s24, 2  ;;  %s3780_s28 = sand.u32 1, %s4678_s21  }
 0x669   : > { %s3781_s9 = scalar_lea.sflag [#allocation3], %s3780_s28 }
 0x66a   : > { %p4495_p2 = pnand %p4498_p1, %p4775_p6 }
 0x66c   : > { %4673 = dma.done.wait (!%p4495_p2), %s3781_s9, 16384  }
 0x66d   : > { %4675 = vsyncadd (!%p4495_p2), %s3781_s9, 4294950912  ;;  %p16_p3 = scmp.ge.s32.totalorder %s4758_s27, 4   ;;  %s8005_s21 = smov %s4682_s22 }
 0x66e   : > { %s8006_s22 = smov %s4686_s23  ;;  %s8007_s23 = smov %s4769_s30 }
 0x66f   : > { %s8008_s24 = smov %s4758_s27  ;;  %18 = sbr.rel (!%p16_p3) target bundleno = 3 (0x3), region = 82 }
 0x676   :  { %3786 = vsyncpa [#allocation3], 1 }
 0x677   :  { %3788 = vsyncpa [#allocation3 + $0x1], 1 }

</bundles_post_ra>
